<compile_context>
chip_gen: v7x
topology: tpu7x:2x2x1
jax: 0.10.0
libtpu: 0.0.40
codegen_flags: <defaults>
</compile_context>

<pallas_src>
import functools

import jax
import jax.numpy as jnp
from jax.experimental import pallas as pl
from jax.experimental.pallas import tpu as pltpu

HIDDEN = 256


def _gates_to_hc(gates, c):
    """gates:(B,4H) f32 in repacked order (i,f,o,g), c:(B,H) f32 -> (h,c)."""
    H = HIDDEN
    sig = jax.nn.sigmoid(gates[:, 0:3 * H])          # one EUP pass over (B,3H)
    i = sig[:, 0 * H:1 * H]
    f = sig[:, 1 * H:2 * H]
    o = sig[:, 2 * H:3 * H]
    g = jnp.tanh(gates[:, 3 * H:4 * H])              # one tanh over (B,H)
    c_new = f * c + i * g
    h_new = o * jnp.tanh(c_new)
    return h_new, c_new


def lstm_kernel(x_ref, wih0_ref, whh0_ref, b0_ref, wih1_ref, whh1_ref, b1_ref,
                out_ref, gates_ref, h0hist_ref, *, seq_len):
    """Single-invocation 2-layer LSTM (two sequential recurrence passes).

    x_ref:      (T*B, D)  bf16  time-major rows (row t*B + b)
    wih0_ref:   (D, 4H)   bf16  (gate order i,f,o,g)
    whh0_ref:   (H, 4H)   bf16
    b0_ref:     (1, 4H)   f32   (b_ih0 + b_hh0)
    wih1_ref:   (H, 4H)   bf16
    whh1_ref:   (H, 4H)   bf16
    b1_ref:     (1, 4H)   f32   (b_ih1 + b_hh1)
    out_ref:    (B, H)    f32   top-layer h at t = T-1
    gates_ref:  (T*B, 4H) f32   VMEM scratch, reused by layer 0 then layer 1
    h0hist_ref: (T*B, H)  f32   VMEM scratch, h0(t) for every step
    """
    H = HIDDEN
    B = out_ref.shape[0]
    unroll = True if seq_len <= 16 else 4
    z = jnp.zeros((B, H), jnp.float32)

    # --- Pass A -------------------------------------------------------------
    # Hoisted layer-0 input projection + bias: one MXU pass for all timesteps,
    # off the recurrent critical path.
    gates_ref[...] = (
        jnp.dot(x_ref[...], wih0_ref[...], preferred_element_type=jnp.float32)
        + b0_ref[...]
    )

    whh0 = whh0_ref[...]                              # bf16 (H, 4H)

    def step0(t, carry):
        h0, c0 = carry
        row = pl.multiple_of(t * B, B)
        g0 = gates_ref[pl.ds(row, B), :] + jnp.dot(
            h0.astype(jnp.bfloat16), whh0, preferred_element_type=jnp.float32)
        h0, c0 = _gates_to_hc(g0, c0)
        h0hist_ref[pl.ds(row, B), :] = h0             # record h0(t) for layer 1
        return (h0, c0)

    jax.lax.fori_loop(0, seq_len, step0, (z, z), unroll=unroll)

    # --- Pass B -------------------------------------------------------------
    # Hoisted layer-1 input projection over the whole h0 history: ONE matmul
    # (M = T*B) into the reused gates scratch -> only the recurrent matmul
    # remains on the layer-1 serial path.
    gates_ref[...] = (
        jnp.dot(h0hist_ref[...].astype(jnp.bfloat16), wih1_ref[...],
                preferred_element_type=jnp.float32)
        + b1_ref[...]
    )

    whh1 = whh1_ref[...]                              # bf16 (H, 4H)

    def step1(t, carry):
        h1, c1 = carry
        row = pl.multiple_of(t * B, B)
        g1 = gates_ref[pl.ds(row, B), :] + jnp.dot(
            h1.astype(jnp.bfloat16), whh1, preferred_element_type=jnp.float32)
        return _gates_to_hc(g1, c1)

    h1, _ = jax.lax.fori_loop(0, seq_len, step1, (z, z), unroll=unroll)
    out_ref[...] = h1.astype(out_ref.dtype)


def agent_encoder_forward(x_btd, params):
    """x_btd: (B, T, D) float32, batch_first like PyTorch. Returns (B, 256)."""
    B, T, D = x_btd.shape
    H = HIDDEN
    wih0, whh0, b0, wih1, whh1, b1 = params

    # Pad batch up to a full sublane multiple so tiles / the output store are
    # unmasked. Real workloads should pack many sequences so M reaches the MXU
    # height (128 on v5e, 256 on v6e/v7x).
    B_pad = max(8, -(-B // 8) * 8)
    x_tbd = jnp.transpose(x_btd, (1, 0, 2))                   # (T, B, D) time-major
    x_tbd = jnp.pad(x_tbd, ((0, 0), (0, B_pad - B), (0, 0)))
    x_flat = x_tbd.reshape(T * B_pad, D).astype(jnp.bfloat16)

    # Repack gate order from PyTorch (i,f,g,o) to (i,f,o,g) so the three
    # sigmoid gates are contiguous in the 4H axis.
    def reorder(w):
        return jnp.concatenate(
            [w[..., 0:H], w[..., H:2 * H], w[..., 3 * H:4 * H], w[..., 2 * H:3 * H]],
            axis=-1)

    wih0_r = reorder(wih0).astype(jnp.bfloat16)
    whh0_r = reorder(whh0).astype(jnp.bfloat16)
    b0_r = reorder(b0)
    wih1_r = reorder(wih1).astype(jnp.bfloat16)
    whh1_r = reorder(whh1).astype(jnp.bfloat16)
    b1_r = reorder(b1)

    vmem = lambda: pl.BlockSpec(memory_space=pltpu.MemorySpace.VMEM)
    out = pl.pallas_call(
        functools.partial(lstm_kernel, seq_len=T),
        out_shape=jax.ShapeDtypeStruct((B_pad, H), jnp.float32),
        in_specs=[vmem() for _ in range(7)],
        out_specs=vmem(),
        scratch_shapes=[
            pltpu.VMEM((T * B_pad, 4 * H), jnp.float32),  # gates (reused L0 then L1)
            pltpu.VMEM((T * B_pad, H), jnp.float32),      # h0 history
        ],
        # Explicit scoped-VMEM budget (tiny at these shapes; at production
        # packed sizes chunk the gates scratch over T to fit v7x's 64 MiB).
        compiler_params=pltpu.CompilerParams(vmem_limit_bytes=32 * 1024 * 1024),
    )(x_flat, wih0_r, whh0_r, b0_r, wih1_r, whh1_r, b1_r)
    return out[:B]


def init_params(key, agent_dim):
    """Deterministic synthetic LSTM params (2 layers, hidden=256).

    Stored transposed relative to PyTorch: W_ih as (in, 4H), W_hh as (H, 4H).
    Bias is the PyTorch b_ih + b_hh combined, shape (1, 4H). Gate order here is
    the PyTorch order (i,f,g,o); the kernel wrapper repacks it.
    """
    H = HIDDEN
    ks = jax.random.split(key, 6)
    scale = 1.0 / jnp.sqrt(jnp.float32(H))
    wih0 = jax.random.uniform(ks[0], (agent_dim, 4 * H), jnp.float32, -scale, scale)
    whh0 = jax.random.uniform(ks[1], (H, 4 * H), jnp.float32, -scale, scale)
    b0 = jax.random.uniform(ks[2], (1, 4 * H), jnp.float32, -scale, scale)
    wih1 = jax.random.uniform(ks[3], (H, 4 * H), jnp.float32, -scale, scale)
    whh1 = jax.random.uniform(ks[4], (H, 4 * H), jnp.float32, -scale, scale)
    b1 = jax.random.uniform(ks[5], (1, 4 * H), jnp.float32, -scale, scale)
    return wih0, whh0, b0, wih1, whh1, b1


def _lstm_cell_ref(x_in, h, c, w_ih, w_hh, b):
    gates = x_in @ w_ih + h @ w_hh + b
    H = HIDDEN
    i = jax.nn.sigmoid(gates[:, 0 * H:1 * H])
    f = jax.nn.sigmoid(gates[:, 1 * H:2 * H])
    g = jnp.tanh(gates[:, 2 * H:3 * H])
    o = jax.nn.sigmoid(gates[:, 3 * H:4 * H])
    c_new = f * c + i * g
    return o * jnp.tanh(c_new), c_new


def reference_forward(x_btd, params):
    """Pure-JAX f32 reference matching torch.nn.LSTM semantics (2 layers)."""
    wih0, whh0, b0, wih1, whh1, b1 = params
    B, T, D = x_btd.shape
    H = HIDDEN

    def step(carry, x_t):
        h0, c0, h1, c1 = carry
        h0, c0 = _lstm_cell_ref(x_t, h0, c0, wih0, whh0, b0)
        h1, c1 = _lstm_cell_ref(h0, h1, c1, wih1, whh1, b1)
        return (h0, c0, h1, c1), None

    z = jnp.zeros((B, H), jnp.float32)
    (_, _, h1, _), _ = jax.lax.scan(step, (z, z, z, z),
                                    jnp.transpose(x_btd, (1, 0, 2)))
    return h1


if __name__ == "__main__":
    key = jax.random.PRNGKey(0)
    k_x, k_p = jax.random.split(key)

    B, T, agent_dim = 2, 8, 8            # small shapes; hidden fixed at 256 by module
    x = jax.random.normal(k_x, (B, T, agent_dim), jnp.float32)
    params = init_params(k_p, agent_dim)

    out = agent_encoder_forward(x, params)
    out = jax.block_until_ready(out)

    ref = reference_forward(x, params)
    assert out.shape == (B, HIDDEN), out.shape
    # bf16 matmul operands (f32 accumulate / f32 gate + state math) -> looser
    # tolerance than a pure-f32 kernel; error compounds over T.
    assert jnp.allclose(out, ref, atol=5e-2, rtol=5e-2), \
        f"max err {jnp.max(jnp.abs(out - ref))}"

    print("KERNEL_OK")
</pallas_src>

<mosaic_0001>
module attributes {stable_mosaic.version = 11 : i64} {
  func.func @lstm_kernel(%arg0: memref<64x8xbf16, #tpu.memory_space<vmem>>, %arg1: memref<8x1024xbf16, #tpu.memory_space<vmem>>, %arg2: memref<256x1024xbf16, #tpu.memory_space<vmem>>, %arg3: memref<1x1024xf32, #tpu.memory_space<vmem>>, %arg4: memref<256x1024xbf16, #tpu.memory_space<vmem>>, %arg5: memref<256x1024xbf16, #tpu.memory_space<vmem>>, %arg6: memref<1x1024xf32, #tpu.memory_space<vmem>>, %arg7: memref<8x256xf32, #tpu.memory_space<vmem>>, %arg8: memref<64x1024xf32, #tpu.memory_space<vmem>>, %arg9: memref<64x256xf32, #tpu.memory_space<vmem>>) attributes {dimension_semantics = [], scalar_prefetch = 0 : i64, scratch_operands = 2 : i64, tpu.core_type = #tpu.core_type<tc>} {
    %cst = arith.constant 0.000000e+00 : f32
    %0 = vector.broadcast %cst : f32 to vector<8x256xf32>
    %c0 = arith.constant 0 : index
    %c0_0 = arith.constant 0 : index
    %1 = vector.load %arg0[%c0, %c0_0] : memref<64x8xbf16, #tpu.memory_space<vmem>>, vector<64x8xbf16>
    %c0_1 = arith.constant 0 : index
    %c0_2 = arith.constant 0 : index
    %2 = vector.load %arg1[%c0_1, %c0_2] : memref<8x1024xbf16, #tpu.memory_space<vmem>>, vector<8x1024xbf16>
    %cst_3 = arith.constant dense<0.000000e+00> : vector<64x1024xf32>
    %3 = tpu.matmul %1, %2, %cst_3 {dimension_numbers = #tpu.dot_dimension_numbers<[1], [0], [0], [1], [0, 0, 1, 1], [], []>} : vector<64x8xbf16>, vector<8x1024xbf16>, vector<64x1024xf32> -> vector<64x1024xf32>
    %c0_4 = arith.constant 0 : index
    %c0_5 = arith.constant 0 : index
    %4 = vector.load %arg3[%c0_4, %c0_5] : memref<1x1024xf32, #tpu.memory_space<vmem>>, vector<1x1024xf32>
    %5 = vector.broadcast %4 : vector<1x1024xf32> to vector<64x1024xf32>
    %6 = arith.addf %3, %5 : vector<64x1024xf32>
    %c0_6 = arith.constant 0 : index
    %c0_7 = arith.constant 0 : index
    %7 = vector.load %arg8[%c0_6, %c0_7] : memref<64x1024xf32, #tpu.memory_space<vmem>>, vector<64x1024xf32>
    tpu.vector_store %arg8[%c0_6, %c0_7], %6 {strides = array<i32>} : memref<64x1024xf32, #tpu.memory_space<vmem>>, vector<64x1024xf32>,
    %c0_8 = arith.constant 0 : index
    %c0_9 = arith.constant 0 : index
    %8 = vector.load %arg2[%c0_8, %c0_9] : memref<256x1024xbf16, #tpu.memory_space<vmem>>, vector<256x1024xbf16>
    %c0_i32 = arith.constant 0 : i32
    %c8_i32 = arith.constant 8 : i32
    %9 = arith.muli %c0_i32, %c8_i32 : i32
    %10 = tpu.assume_multiple %9, 8 : i32
    %11 = arith.index_cast %10 : i32 to index
    %c0_10 = arith.constant 0 : index
    %12 = vector.load %arg8[%11, %c0_10] : memref<64x1024xf32, #tpu.memory_space<vmem>>, vector<8x1024xf32>
    %13 = arith.truncf %0 : vector<8x256xf32> to vector<8x256xbf16>
    %cst_11 = arith.constant dense<0.000000e+00> : vector<8x1024xf32>
    %14 = tpu.matmul %13, %8, %cst_11 {dimension_numbers = #tpu.dot_dimension_numbers<[1], [0], [0], [1], [0, 0, 1, 1], [], []>} : vector<8x256xbf16>, vector<256x1024xbf16>, vector<8x1024xf32> -> vector<8x1024xf32>
    %15 = arith.addf %12, %14 : vector<8x1024xf32>
    %16 = vector.extract_strided_slice %15 {offsets = [0, 0], sizes = [8, 768], strides = [1, 1]} : vector<8x1024xf32> to vector<8x768xf32>
    %17 = arith.negf %16 : vector<8x768xf32>
    %18 = math.exp %17 : vector<8x768xf32>
    %cst_12 = arith.constant 1.000000e+00 : f32
    %19 = vector.broadcast %cst_12 : f32 to vector<8x768xf32>
    %20 = arith.addf %19, %18 : vector<8x768xf32>
    %21 = arith.divf %19, %20 : vector<8x768xf32>
    %22 = vector.extract_strided_slice %21 {offsets = [0, 0], sizes = [8, 256], strides = [1, 1]} : vector<8x768xf32> to vector<8x256xf32>
    %23 = vector.extract_strided_slice %21 {offsets = [0, 256], sizes = [8, 256], strides = [1, 1]} : vector<8x768xf32> to vector<8x256xf32>
    %24 = vector.extract_strided_slice %21 {offsets = [0, 512], sizes = [8, 256], strides = [1, 1]} : vector<8x768xf32> to vector<8x256xf32>
    %25 = vector.extract_strided_slice %15 {offsets = [0, 768], sizes = [8, 256], strides = [1, 1]} : vector<8x1024xf32> to vector<8x256xf32>
    %26 = math.tanh %25 : vector<8x256xf32>
    %27 = arith.mulf %23, %0 : vector<8x256xf32>
    %28 = arith.mulf %22, %26 : vector<8x256xf32>
    %29 = arith.addf %27, %28 : vector<8x256xf32>
    %30 = math.tanh %29 : vector<8x256xf32>
    %31 = arith.mulf %24, %30 : vector<8x256xf32>
    %32 = arith.index_cast %10 : i32 to index
    %c0_13 = arith.constant 0 : index
    %33 = vector.load %arg9[%32, %c0_13] : memref<64x256xf32, #tpu.memory_space<vmem>>, vector<8x256xf32>
    tpu.vector_store %arg9[%32, %c0_13], %31 {strides = array<i32>} : memref<64x256xf32, #tpu.memory_space<vmem>>, vector<8x256xf32>,
    %c1_i32 = arith.constant 1 : i32
    %c8_i32_14 = arith.constant 8 : i32
    %34 = arith.muli %c1_i32, %c8_i32_14 : i32
    %35 = tpu.assume_multiple %34, 8 : i32
    %36 = arith.index_cast %35 : i32 to index
    %c0_15 = arith.constant 0 : index
    %37 = vector.load %arg8[%36, %c0_15] : memref<64x1024xf32, #tpu.memory_space<vmem>>, vector<8x1024xf32>
    %38 = arith.truncf %31 : vector<8x256xf32> to vector<8x256xbf16>
    %cst_16 = arith.constant dense<0.000000e+00> : vector<8x1024xf32>
    %39 = tpu.matmul %38, %8, %cst_16 {dimension_numbers = #tpu.dot_dimension_numbers<[1], [0], [0], [1], [0, 0, 1, 1], [], []>} : vector<8x256xbf16>, vector<256x1024xbf16>, vector<8x1024xf32> -> vector<8x1024xf32>
    %40 = arith.addf %37, %39 : vector<8x1024xf32>
    %41 = vector.extract_strided_slice %40 {offsets = [0, 0], sizes = [8, 768], strides = [1, 1]} : vector<8x1024xf32> to vector<8x768xf32>
    %42 = arith.negf %41 : vector<8x768xf32>
    %43 = math.exp %42 : vector<8x768xf32>
    %cst_17 = arith.constant 1.000000e+00 : f32
    %44 = vector.broadcast %cst_17 : f32 to vector<8x768xf32>
    %45 = arith.addf %44, %43 : vector<8x768xf32>
    %46 = arith.divf %44, %45 : vector<8x768xf32>
    %47 = vector.extract_strided_slice %46 {offsets = [0, 0], sizes = [8, 256], strides = [1, 1]} : vector<8x768xf32> to vector<8x256xf32>
    %48 = vector.extract_strided_slice %46 {offsets = [0, 256], sizes = [8, 256], strides = [1, 1]} : vector<8x768xf32> to vector<8x256xf32>
    %49 = vector.extract_strided_slice %46 {offsets = [0, 512], sizes = [8, 256], strides = [1, 1]} : vector<8x768xf32> to vector<8x256xf32>
    %50 = vector.extract_strided_slice %40 {offsets = [0, 768], sizes = [8, 256], strides = [1, 1]} : vector<8x1024xf32> to vector<8x256xf32>
    %51 = math.tanh %50 : vector<8x256xf32>
    %52 = arith.mulf %48, %29 : vector<8x256xf32>
    %53 = arith.mulf %47, %51 : vector<8x256xf32>
    %54 = arith.addf %52, %53 : vector<8x256xf32>
    %55 = math.tanh %54 : vector<8x256xf32>
    %56 = arith.mulf %49, %55 : vector<8x256xf32>
    %57 = arith.index_cast %35 : i32 to index
    %c0_18 = arith.constant 0 : index
    %58 = vector.load %arg9[%57, %c0_18] : memref<64x256xf32, #tpu.memory_space<vmem>>, vector<8x256xf32>
    tpu.vector_store %arg9[%57, %c0_18], %56 {strides = array<i32>} : memref<64x256xf32, #tpu.memory_space<vmem>>, vector<8x256xf32>,
    %c2_i32 = arith.constant 2 : i32
    %c8_i32_19 = arith.constant 8 : i32
    %59 = arith.muli %c2_i32, %c8_i32_19 : i32
    %60 = tpu.assume_multiple %59, 8 : i32
    %61 = arith.index_cast %60 : i32 to index
    %c0_20 = arith.constant 0 : index
    %62 = vector.load %arg8[%61, %c0_20] : memref<64x1024xf32, #tpu.memory_space<vmem>>, vector<8x1024xf32>
    %63 = arith.truncf %56 : vector<8x256xf32> to vector<8x256xbf16>
    %cst_21 = arith.constant dense<0.000000e+00> : vector<8x1024xf32>
    %64 = tpu.matmul %63, %8, %cst_21 {dimension_numbers = #tpu.dot_dimension_numbers<[1], [0], [0], [1], [0, 0, 1, 1], [], []>} : vector<8x256xbf16>, vector<256x1024xbf16>, vector<8x1024xf32> -> vector<8x1024xf32>
    %65 = arith.addf %62, %64 : vector<8x1024xf32>
    %66 = vector.extract_strided_slice %65 {offsets = [0, 0], sizes = [8, 768], strides = [1, 1]} : vector<8x1024xf32> to vector<8x768xf32>
    %67 = arith.negf %66 : vector<8x768xf32>
    %68 = math.exp %67 : vector<8x768xf32>
    %cst_22 = arith.constant 1.000000e+00 : f32
    %69 = vector.broadcast %cst_22 : f32 to vector<8x768xf32>
    %70 = arith.addf %69, %68 : vector<8x768xf32>
    %71 = arith.divf %69, %70 : vector<8x768xf32>
    %72 = vector.extract_strided_slice %71 {offsets = [0, 0], sizes = [8, 256], strides = [1, 1]} : vector<8x768xf32> to vector<8x256xf32>
    %73 = vector.extract_strided_slice %71 {offsets = [0, 256], sizes = [8, 256], strides = [1, 1]} : vector<8x768xf32> to vector<8x256xf32>
    %74 = vector.extract_strided_slice %71 {offsets = [0, 512], sizes = [8, 256], strides = [1, 1]} : vector<8x768xf32> to vector<8x256xf32>
    %75 = vector.extract_strided_slice %65 {offsets = [0, 768], sizes = [8, 256], strides = [1, 1]} : vector<8x1024xf32> to vector<8x256xf32>
    %76 = math.tanh %75 : vector<8x256xf32>
    %77 = arith.mulf %73, %54 : vector<8x256xf32>
    %78 = arith.mulf %72, %76 : vector<8x256xf32>
    %79 = arith.addf %77, %78 : vector<8x256xf32>
    %80 = math.tanh %79 : vector<8x256xf32>
    %81 = arith.mulf %74, %80 : vector<8x256xf32>
    %82 = arith.index_cast %60 : i32 to index
    %c0_23 = arith.constant 0 : index
    %83 = vector.load %arg9[%82, %c0_23] : memref<64x256xf32, #tpu.memory_space<vmem>>, vector<8x256xf32>
    tpu.vector_store %arg9[%82, %c0_23], %81 {strides = array<i32>} : memref<64x256xf32, #tpu.memory_space<vmem>>, vector<8x256xf32>,
    %c3_i32 = arith.constant 3 : i32
    %c8_i32_24 = arith.constant 8 : i32
    %84 = arith.muli %c3_i32, %c8_i32_24 : i32
    %85 = tpu.assume_multiple %84, 8 : i32
    %86 = arith.index_cast %85 : i32 to index
    %c0_25 = arith.constant 0 : index
    %87 = vector.load %arg8[%86, %c0_25] : memref<64x1024xf32, #tpu.memory_space<vmem>>, vector<8x1024xf32>
    %88 = arith.truncf %81 : vector<8x256xf32> to vector<8x256xbf16>
    %cst_26 = arith.constant dense<0.000000e+00> : vector<8x1024xf32>
    %89 = tpu.matmul %88, %8, %cst_26 {dimension_numbers = #tpu.dot_dimension_numbers<[1], [0], [0], [1], [0, 0, 1, 1], [], []>} : vector<8x256xbf16>, vector<256x1024xbf16>, vector<8x1024xf32> -> vector<8x1024xf32>
    %90 = arith.addf %87, %89 : vector<8x1024xf32>
    %91 = vector.extract_strided_slice %90 {offsets = [0, 0], sizes = [8, 768], strides = [1, 1]} : vector<8x1024xf32> to vector<8x768xf32>
    %92 = arith.negf %91 : vector<8x768xf32>
    %93 = math.exp %92 : vector<8x768xf32>
    %cst_27 = arith.constant 1.000000e+00 : f32
    %94 = vector.broadcast %cst_27 : f32 to vector<8x768xf32>
    %95 = arith.addf %94, %93 : vector<8x768xf32>
    %96 = arith.divf %94, %95 : vector<8x768xf32>
    %97 = vector.extract_strided_slice %96 {offsets = [0, 0], sizes = [8, 256], strides = [1, 1]} : vector<8x768xf32> to vector<8x256xf32>
    %98 = vector.extract_strided_slice %96 {offsets = [0, 256], sizes = [8, 256], strides = [1, 1]} : vector<8x768xf32> to vector<8x256xf32>
    %99 = vector.extract_strided_slice %96 {offsets = [0, 512], sizes = [8, 256], strides = [1, 1]} : vector<8x768xf32> to vector<8x256xf32>
    %100 = vector.extract_strided_slice %90 {offsets = [0, 768], sizes = [8, 256], strides = [1, 1]} : vector<8x1024xf32> to vector<8x256xf32>
    %101 = math.tanh %100 : vector<8x256xf32>
    %102 = arith.mulf %98, %79 : vector<8x256xf32>
    %103 = arith.mulf %97, %101 : vector<8x256xf32>
    %104 = arith.addf %102, %103 : vector<8x256xf32>
    %105 = math.tanh %104 : vector<8x256xf32>
    %106 = arith.mulf %99, %105 : vector<8x256xf32>
    %107 = arith.index_cast %85 : i32 to index
    %c0_28 = arith.constant 0 : index
    %108 = vector.load %arg9[%107, %c0_28] : memref<64x256xf32, #tpu.memory_space<vmem>>, vector<8x256xf32>
    tpu.vector_store %arg9[%107, %c0_28], %106 {strides = array<i32>} : memref<64x256xf32, #tpu.memory_space<vmem>>, vector<8x256xf32>,
    %c4_i32 = arith.constant 4 : i32
    %c8_i32_29 = arith.constant 8 : i32
    %109 = arith.muli %c4_i32, %c8_i32_29 : i32
    %110 = tpu.assume_multiple %109, 8 : i32
    %111 = arith.index_cast %110 : i32 to index
    %c0_30 = arith.constant 0 : index
    %112 = vector.load %arg8[%111, %c0_30] : memref<64x1024xf32, #tpu.memory_space<vmem>>, vector<8x1024xf32>
    %113 = arith.truncf %106 : vector<8x256xf32> to vector<8x256xbf16>
    %cst_31 = arith.constant dense<0.000000e+00> : vector<8x1024xf32>
    %114 = tpu.matmul %113, %8, %cst_31 {dimension_numbers = #tpu.dot_dimension_numbers<[1], [0], [0], [1], [0, 0, 1, 1], [], []>} : vector<8x256xbf16>, vector<256x1024xbf16>, vector<8x1024xf32> -> vector<8x1024xf32>
    %115 = arith.addf %112, %114 : vector<8x1024xf32>
    %116 = vector.extract_strided_slice %115 {offsets = [0, 0], sizes = [8, 768], strides = [1, 1]} : vector<8x1024xf32> to vector<8x768xf32>
    %117 = arith.negf %116 : vector<8x768xf32>
    %118 = math.exp %117 : vector<8x768xf32>
    %cst_32 = arith.constant 1.000000e+00 : f32
    %119 = vector.broadcast %cst_32 : f32 to vector<8x768xf32>
    %120 = arith.addf %119, %118 : vector<8x768xf32>
    %121 = arith.divf %119, %120 : vector<8x768xf32>
    %122 = vector.extract_strided_slice %121 {offsets = [0, 0], sizes = [8, 256], strides = [1, 1]} : vector<8x768xf32> to vector<8x256xf32>
    %123 = vector.extract_strided_slice %121 {offsets = [0, 256], sizes = [8, 256], strides = [1, 1]} : vector<8x768xf32> to vector<8x256xf32>
    %124 = vector.extract_strided_slice %121 {offsets = [0, 512], sizes = [8, 256], strides = [1, 1]} : vector<8x768xf32> to vector<8x256xf32>
    %125 = vector.extract_strided_slice %115 {offsets = [0, 768], sizes = [8, 256], strides = [1, 1]} : vector<8x1024xf32> to vector<8x256xf32>
    %126 = math.tanh %125 : vector<8x256xf32>
    %127 = arith.mulf %123, %104 : vector<8x256xf32>
    %128 = arith.mulf %122, %126 : vector<8x256xf32>
    %129 = arith.addf %127, %128 : vector<8x256xf32>
    %130 = math.tanh %129 : vector<8x256xf32>
    %131 = arith.mulf %124, %130 : vector<8x256xf32>
    %132 = arith.index_cast %110 : i32 to index
    %c0_33 = arith.constant 0 : index
    %133 = vector.load %arg9[%132, %c0_33] : memref<64x256xf32, #tpu.memory_space<vmem>>, vector<8x256xf32>
    tpu.vector_store %arg9[%132, %c0_33], %131 {strides = array<i32>} : memref<64x256xf32, #tpu.memory_space<vmem>>, vector<8x256xf32>,
    %c5_i32 = arith.constant 5 : i32
    %c8_i32_34 = arith.constant 8 : i32
    %134 = arith.muli %c5_i32, %c8_i32_34 : i32
    %135 = tpu.assume_multiple %134, 8 : i32
    %136 = arith.index_cast %135 : i32 to index
    %c0_35 = arith.constant 0 : index
    %137 = vector.load %arg8[%136, %c0_35] : memref<64x1024xf32, #tpu.memory_space<vmem>>, vector<8x1024xf32>
    %138 = arith.truncf %131 : vector<8x256xf32> to vector<8x256xbf16>
    %cst_36 = arith.constant dense<0.000000e+00> : vector<8x1024xf32>
    %139 = tpu.matmul %138, %8, %cst_36 {dimension_numbers = #tpu.dot_dimension_numbers<[1], [0], [0], [1], [0, 0, 1, 1], [], []>} : vector<8x256xbf16>, vector<256x1024xbf16>, vector<8x1024xf32> -> vector<8x1024xf32>
    %140 = arith.addf %137, %139 : vector<8x1024xf32>
    %141 = vector.extract_strided_slice %140 {offsets = [0, 0], sizes = [8, 768], strides = [1, 1]} : vector<8x1024xf32> to vector<8x768xf32>
    %142 = arith.negf %141 : vector<8x768xf32>
    %143 = math.exp %142 : vector<8x768xf32>
    %cst_37 = arith.constant 1.000000e+00 : f32
    %144 = vector.broadcast %cst_37 : f32 to vector<8x768xf32>
    %145 = arith.addf %144, %143 : vector<8x768xf32>
    %146 = arith.divf %144, %145 : vector<8x768xf32>
    %147 = vector.extract_strided_slice %146 {offsets = [0, 0], sizes = [8, 256], strides = [1, 1]} : vector<8x768xf32> to vector<8x256xf32>
    %148 = vector.extract_strided_slice %146 {offsets = [0, 256], sizes = [8, 256], strides = [1, 1]} : vector<8x768xf32> to vector<8x256xf32>
    %149 = vector.extract_strided_slice %146 {offsets = [0, 512], sizes = [8, 256], strides = [1, 1]} : vector<8x768xf32> to vector<8x256xf32>
    %150 = vector.extract_strided_slice %140 {offsets = [0, 768], sizes = [8, 256], strides = [1, 1]} : vector<8x1024xf32> to vector<8x256xf32>
    %151 = math.tanh %150 : vector<8x256xf32>
    %152 = arith.mulf %148, %129 : vector<8x256xf32>
    %153 = arith.mulf %147, %151 : vector<8x256xf32>
    %154 = arith.addf %152, %153 : vector<8x256xf32>
    %155 = math.tanh %154 : vector<8x256xf32>
    %156 = arith.mulf %149, %155 : vector<8x256xf32>
    %157 = arith.index_cast %135 : i32 to index
    %c0_38 = arith.constant 0 : index
    %158 = vector.load %arg9[%157, %c0_38] : memref<64x256xf32, #tpu.memory_space<vmem>>, vector<8x256xf32>
    tpu.vector_store %arg9[%157, %c0_38], %156 {strides = array<i32>} : memref<64x256xf32, #tpu.memory_space<vmem>>, vector<8x256xf32>,
    %c6_i32 = arith.constant 6 : i32
    %c8_i32_39 = arith.constant 8 : i32
    %159 = arith.muli %c6_i32, %c8_i32_39 : i32
    %160 = tpu.assume_multiple %159, 8 : i32
    %161 = arith.index_cast %160 : i32 to index
    %c0_40 = arith.constant 0 : index
    %162 = vector.load %arg8[%161, %c0_40] : memref<64x1024xf32, #tpu.memory_space<vmem>>, vector<8x1024xf32>
    %163 = arith.truncf %156 : vector<8x256xf32> to vector<8x256xbf16>
    %cst_41 = arith.constant dense<0.000000e+00> : vector<8x1024xf32>
    %164 = tpu.matmul %163, %8, %cst_41 {dimension_numbers = #tpu.dot_dimension_numbers<[1], [0], [0], [1], [0, 0, 1, 1], [], []>} : vector<8x256xbf16>, vector<256x1024xbf16>, vector<8x1024xf32> -> vector<8x1024xf32>
    %165 = arith.addf %162, %164 : vector<8x1024xf32>
    %166 = vector.extract_strided_slice %165 {offsets = [0, 0], sizes = [8, 768], strides = [1, 1]} : vector<8x1024xf32> to vector<8x768xf32>
    %167 = arith.negf %166 : vector<8x768xf32>
    %168 = math.exp %167 : vector<8x768xf32>
    %cst_42 = arith.constant 1.000000e+00 : f32
    %169 = vector.broadcast %cst_42 : f32 to vector<8x768xf32>
    %170 = arith.addf %169, %168 : vector<8x768xf32>
    %171 = arith.divf %169, %170 : vector<8x768xf32>
    %172 = vector.extract_strided_slice %171 {offsets = [0, 0], sizes = [8, 256], strides = [1, 1]} : vector<8x768xf32> to vector<8x256xf32>
    %173 = vector.extract_strided_slice %171 {offsets = [0, 256], sizes = [8, 256], strides = [1, 1]} : vector<8x768xf32> to vector<8x256xf32>
    %174 = vector.extract_strided_slice %171 {offsets = [0, 512], sizes = [8, 256], strides = [1, 1]} : vector<8x768xf32> to vector<8x256xf32>
    %175 = vector.extract_strided_slice %165 {offsets = [0, 768], sizes = [8, 256], strides = [1, 1]} : vector<8x1024xf32> to vector<8x256xf32>
    %176 = math.tanh %175 : vector<8x256xf32>
    %177 = arith.mulf %173, %154 : vector<8x256xf32>
    %178 = arith.mulf %172, %176 : vector<8x256xf32>
    %179 = arith.addf %177, %178 : vector<8x256xf32>
    %180 = math.tanh %179 : vector<8x256xf32>
    %181 = arith.mulf %174, %180 : vector<8x256xf32>
    %182 = arith.index_cast %160 : i32 to index
    %c0_43 = arith.constant 0 : index
    %183 = vector.load %arg9[%182, %c0_43] : memref<64x256xf32, #tpu.memory_space<vmem>>, vector<8x256xf32>
    tpu.vector_store %arg9[%182, %c0_43], %181 {strides = array<i32>} : memref<64x256xf32, #tpu.memory_space<vmem>>, vector<8x256xf32>,
    %c7_i32 = arith.constant 7 : i32
    %c8_i32_44 = arith.constant 8 : i32
    %184 = arith.muli %c7_i32, %c8_i32_44 : i32
    %185 = tpu.assume_multiple %184, 8 : i32
    %186 = arith.index_cast %185 : i32 to index
    %c0_45 = arith.constant 0 : index
    %187 = vector.load %arg8[%186, %c0_45] : memref<64x1024xf32, #tpu.memory_space<vmem>>, vector<8x1024xf32>
    %188 = arith.truncf %181 : vector<8x256xf32> to vector<8x256xbf16>
    %cst_46 = arith.constant dense<0.000000e+00> : vector<8x1024xf32>
    %189 = tpu.matmul %188, %8, %cst_46 {dimension_numbers = #tpu.dot_dimension_numbers<[1], [0], [0], [1], [0, 0, 1, 1], [], []>} : vector<8x256xbf16>, vector<256x1024xbf16>, vector<8x1024xf32> -> vector<8x1024xf32>
    %190 = arith.addf %187, %189 : vector<8x1024xf32>
    %191 = vector.extract_strided_slice %190 {offsets = [0, 0], sizes = [8, 768], strides = [1, 1]} : vector<8x1024xf32> to vector<8x768xf32>
    %192 = arith.negf %191 : vector<8x768xf32>
    %193 = math.exp %192 : vector<8x768xf32>
    %cst_47 = arith.constant 1.000000e+00 : f32
    %194 = vector.broadcast %cst_47 : f32 to vector<8x768xf32>
    %195 = arith.addf %194, %193 : vector<8x768xf32>
    %196 = arith.divf %194, %195 : vector<8x768xf32>
    %197 = vector.extract_strided_slice %196 {offsets = [0, 0], sizes = [8, 256], strides = [1, 1]} : vector<8x768xf32> to vector<8x256xf32>
    %198 = vector.extract_strided_slice %196 {offsets = [0, 256], sizes = [8, 256], strides = [1, 1]} : vector<8x768xf32> to vector<8x256xf32>
    %199 = vector.extract_strided_slice %196 {offsets = [0, 512], sizes = [8, 256], strides = [1, 1]} : vector<8x768xf32> to vector<8x256xf32>
    %200 = vector.extract_strided_slice %190 {offsets = [0, 768], sizes = [8, 256], strides = [1, 1]} : vector<8x1024xf32> to vector<8x256xf32>
    %201 = math.tanh %200 : vector<8x256xf32>
    %202 = arith.mulf %198, %179 : vector<8x256xf32>
    %203 = arith.mulf %197, %201 : vector<8x256xf32>
    %204 = arith.addf %202, %203 : vector<8x256xf32>
    %205 = math.tanh %204 : vector<8x256xf32>
    %206 = arith.mulf %199, %205 : vector<8x256xf32>
    %207 = arith.index_cast %185 : i32 to index
    %c0_48 = arith.constant 0 : index
    %208 = vector.load %arg9[%207, %c0_48] : memref<64x256xf32, #tpu.memory_space<vmem>>, vector<8x256xf32>
    tpu.vector_store %arg9[%207, %c0_48], %206 {strides = array<i32>} : memref<64x256xf32, #tpu.memory_space<vmem>>, vector<8x256xf32>,
    %c8_i32_49 = arith.constant 8 : i32
    %c0_50 = arith.constant 0 : index
    %c0_51 = arith.constant 0 : index
    %209 = vector.load %arg9[%c0_50, %c0_51] : memref<64x256xf32, #tpu.memory_space<vmem>>, vector<64x256xf32>
    %210 = arith.truncf %209 : vector<64x256xf32> to vector<64x256xbf16>
    %c0_52 = arith.constant 0 : index
    %c0_53 = arith.constant 0 : index
    %211 = vector.load %arg4[%c0_52, %c0_53] : memref<256x1024xbf16, #tpu.memory_space<vmem>>, vector<256x1024xbf16>
    %cst_54 = arith.constant dense<0.000000e+00> : vector<64x1024xf32>
    %212 = tpu.matmul %210, %211, %cst_54 {dimension_numbers = #tpu.dot_dimension_numbers<[1], [0], [0], [1], [0, 0, 1, 1], [], []>} : vector<64x256xbf16>, vector<256x1024xbf16>, vector<64x1024xf32> -> vector<64x1024xf32>
    %c0_55 = arith.constant 0 : index
    %c0_56 = arith.constant 0 : index
    %213 = vector.load %arg6[%c0_55, %c0_56] : memref<1x1024xf32, #tpu.memory_space<vmem>>, vector<1x1024xf32>
    %214 = vector.broadcast %213 : vector<1x1024xf32> to vector<64x1024xf32>
    %215 = arith.addf %212, %214 : vector<64x1024xf32>
    %c0_57 = arith.constant 0 : index
    %c0_58 = arith.constant 0 : index
    %216 = vector.load %arg8[%c0_57, %c0_58] : memref<64x1024xf32, #tpu.memory_space<vmem>>, vector<64x1024xf32>
    tpu.vector_store %arg8[%c0_57, %c0_58], %215 {strides = array<i32>} : memref<64x1024xf32, #tpu.memory_space<vmem>>, vector<64x1024xf32>,
    %c0_59 = arith.constant 0 : index
    %c0_60 = arith.constant 0 : index
    %217 = vector.load %arg5[%c0_59, %c0_60] : memref<256x1024xbf16, #tpu.memory_space<vmem>>, vector<256x1024xbf16>
    %c0_i32_61 = arith.constant 0 : i32
    %c8_i32_62 = arith.constant 8 : i32
    %218 = arith.muli %c0_i32_61, %c8_i32_62 : i32
    %219 = tpu.assume_multiple %218, 8 : i32
    %220 = arith.index_cast %219 : i32 to index
    %c0_63 = arith.constant 0 : index
    %221 = vector.load %arg8[%220, %c0_63] : memref<64x1024xf32, #tpu.memory_space<vmem>>, vector<8x1024xf32>
    %222 = arith.truncf %0 : vector<8x256xf32> to vector<8x256xbf16>
    %cst_64 = arith.constant dense<0.000000e+00> : vector<8x1024xf32>
    %223 = tpu.matmul %222, %217, %cst_64 {dimension_numbers = #tpu.dot_dimension_numbers<[1], [0], [0], [1], [0, 0, 1, 1], [], []>} : vector<8x256xbf16>, vector<256x1024xbf16>, vector<8x1024xf32> -> vector<8x1024xf32>
    %224 = arith.addf %221, %223 : vector<8x1024xf32>
    %225 = vector.extract_strided_slice %224 {offsets = [0, 0], sizes = [8, 768], strides = [1, 1]} : vector<8x1024xf32> to vector<8x768xf32>
    %226 = arith.negf %225 : vector<8x768xf32>
    %227 = math.exp %226 : vector<8x768xf32>
    %cst_65 = arith.constant 1.000000e+00 : f32
    %228 = vector.broadcast %cst_65 : f32 to vector<8x768xf32>
    %229 = arith.addf %228, %227 : vector<8x768xf32>
    %230 = arith.divf %228, %229 : vector<8x768xf32>
    %231 = vector.extract_strided_slice %230 {offsets = [0, 0], sizes = [8, 256], strides = [1, 1]} : vector<8x768xf32> to vector<8x256xf32>
    %232 = vector.extract_strided_slice %230 {offsets = [0, 256], sizes = [8, 256], strides = [1, 1]} : vector<8x768xf32> to vector<8x256xf32>
    %233 = vector.extract_strided_slice %230 {offsets = [0, 512], sizes = [8, 256], strides = [1, 1]} : vector<8x768xf32> to vector<8x256xf32>
    %234 = vector.extract_strided_slice %224 {offsets = [0, 768], sizes = [8, 256], strides = [1, 1]} : vector<8x1024xf32> to vector<8x256xf32>
    %235 = math.tanh %234 : vector<8x256xf32>
    %236 = arith.mulf %232, %0 : vector<8x256xf32>
    %237 = arith.mulf %231, %235 : vector<8x256xf32>
    %238 = arith.addf %236, %237 : vector<8x256xf32>
    %239 = math.tanh %238 : vector<8x256xf32>
    %240 = arith.mulf %233, %239 : vector<8x256xf32>
    %c1_i32_66 = arith.constant 1 : i32
    %c8_i32_67 = arith.constant 8 : i32
    %241 = arith.muli %c1_i32_66, %c8_i32_67 : i32
    %242 = tpu.assume_multiple %241, 8 : i32
    %243 = arith.index_cast %242 : i32 to index
    %c0_68 = arith.constant 0 : index
    %244 = vector.load %arg8[%243, %c0_68] : memref<64x1024xf32, #tpu.memory_space<vmem>>, vector<8x1024xf32>
    %245 = arith.truncf %240 : vector<8x256xf32> to vector<8x256xbf16>
    %cst_69 = arith.constant dense<0.000000e+00> : vector<8x1024xf32>
    %246 = tpu.matmul %245, %217, %cst_69 {dimension_numbers = #tpu.dot_dimension_numbers<[1], [0], [0], [1], [0, 0, 1, 1], [], []>} : vector<8x256xbf16>, vector<256x1024xbf16>, vector<8x1024xf32> -> vector<8x1024xf32>
    %247 = arith.addf %244, %246 : vector<8x1024xf32>
    %248 = vector.extract_strided_slice %247 {offsets = [0, 0], sizes = [8, 768], strides = [1, 1]} : vector<8x1024xf32> to vector<8x768xf32>
    %249 = arith.negf %248 : vector<8x768xf32>
    %250 = math.exp %249 : vector<8x768xf32>
    %cst_70 = arith.constant 1.000000e+00 : f32
    %251 = vector.broadcast %cst_70 : f32 to vector<8x768xf32>
    %252 = arith.addf %251, %250 : vector<8x768xf32>
    %253 = arith.divf %251, %252 : vector<8x768xf32>
    %254 = vector.extract_strided_slice %253 {offsets = [0, 0], sizes = [8, 256], strides = [1, 1]} : vector<8x768xf32> to vector<8x256xf32>
    %255 = vector.extract_strided_slice %253 {offsets = [0, 256], sizes = [8, 256], strides = [1, 1]} : vector<8x768xf32> to vector<8x256xf32>
    %256 = vector.extract_strided_slice %253 {offsets = [0, 512], sizes = [8, 256], strides = [1, 1]} : vector<8x768xf32> to vector<8x256xf32>
    %257 = vector.extract_strided_slice %247 {offsets = [0, 768], sizes = [8, 256], strides = [1, 1]} : vector<8x1024xf32> to vector<8x256xf32>
    %258 = math.tanh %257 : vector<8x256xf32>
    %259 = arith.mulf %255, %238 : vector<8x256xf32>
    %260 = arith.mulf %254, %258 : vector<8x256xf32>
    %261 = arith.addf %259, %260 : vector<8x256xf32>
    %262 = math.tanh %261 : vector<8x256xf32>
    %263 = arith.mulf %256, %262 : vector<8x256xf32>
    %c2_i32_71 = arith.constant 2 : i32
    %c8_i32_72 = arith.constant 8 : i32
    %264 = arith.muli %c2_i32_71, %c8_i32_72 : i32
    %265 = tpu.assume_multiple %264, 8 : i32
    %266 = arith.index_cast %265 : i32 to index
    %c0_73 = arith.constant 0 : index
    %267 = vector.load %arg8[%266, %c0_73] : memref<64x1024xf32, #tpu.memory_space<vmem>>, vector<8x1024xf32>
    %268 = arith.truncf %263 : vector<8x256xf32> to vector<8x256xbf16>
    %cst_74 = arith.constant dense<0.000000e+00> : vector<8x1024xf32>
    %269 = tpu.matmul %268, %217, %cst_74 {dimension_numbers = #tpu.dot_dimension_numbers<[1], [0], [0], [1], [0, 0, 1, 1], [], []>} : vector<8x256xbf16>, vector<256x1024xbf16>, vector<8x1024xf32> -> vector<8x1024xf32>
    %270 = arith.addf %267, %269 : vector<8x1024xf32>
    %271 = vector.extract_strided_slice %270 {offsets = [0, 0], sizes = [8, 768], strides = [1, 1]} : vector<8x1024xf32> to vector<8x768xf32>
    %272 = arith.negf %271 : vector<8x768xf32>
    %273 = math.exp %272 : vector<8x768xf32>
    %cst_75 = arith.constant 1.000000e+00 : f32
    %274 = vector.broadcast %cst_75 : f32 to vector<8x768xf32>
    %275 = arith.addf %274, %273 : vector<8x768xf32>
    %276 = arith.divf %274, %275 : vector<8x768xf32>
    %277 = vector.extract_strided_slice %276 {offsets = [0, 0], sizes = [8, 256], strides = [1, 1]} : vector<8x768xf32> to vector<8x256xf32>
    %278 = vector.extract_strided_slice %276 {offsets = [0, 256], sizes = [8, 256], strides = [1, 1]} : vector<8x768xf32> to vector<8x256xf32>
    %279 = vector.extract_strided_slice %276 {offsets = [0, 512], sizes = [8, 256], strides = [1, 1]} : vector<8x768xf32> to vector<8x256xf32>
    %280 = vector.extract_strided_slice %270 {offsets = [0, 768], sizes = [8, 256], strides = [1, 1]} : vector<8x1024xf32> to vector<8x256xf32>
    %281 = math.tanh %280 : vector<8x256xf32>
    %282 = arith.mulf %278, %261 : vector<8x256xf32>
    %283 = arith.mulf %277, %281 : vector<8x256xf32>
    %284 = arith.addf %282, %283 : vector<8x256xf32>
    %285 = math.tanh %284 : vector<8x256xf32>
    %286 = arith.mulf %279, %285 : vector<8x256xf32>
    %c3_i32_76 = arith.constant 3 : i32
    %c8_i32_77 = arith.constant 8 : i32
    %287 = arith.muli %c3_i32_76, %c8_i32_77 : i32
    %288 = tpu.assume_multiple %287, 8 : i32
    %289 = arith.index_cast %288 : i32 to index
    %c0_78 = arith.constant 0 : index
    %290 = vector.load %arg8[%289, %c0_78] : memref<64x1024xf32, #tpu.memory_space<vmem>>, vector<8x1024xf32>
    %291 = arith.truncf %286 : vector<8x256xf32> to vector<8x256xbf16>
    %cst_79 = arith.constant dense<0.000000e+00> : vector<8x1024xf32>
    %292 = tpu.matmul %291, %217, %cst_79 {dimension_numbers = #tpu.dot_dimension_numbers<[1], [0], [0], [1], [0, 0, 1, 1], [], []>} : vector<8x256xbf16>, vector<256x1024xbf16>, vector<8x1024xf32> -> vector<8x1024xf32>
    %293 = arith.addf %290, %292 : vector<8x1024xf32>
    %294 = vector.extract_strided_slice %293 {offsets = [0, 0], sizes = [8, 768], strides = [1, 1]} : vector<8x1024xf32> to vector<8x768xf32>
    %295 = arith.negf %294 : vector<8x768xf32>
    %296 = math.exp %295 : vector<8x768xf32>
    %cst_80 = arith.constant 1.000000e+00 : f32
    %297 = vector.broadcast %cst_80 : f32 to vector<8x768xf32>
    %298 = arith.addf %297, %296 : vector<8x768xf32>
    %299 = arith.divf %297, %298 : vector<8x768xf32>
    %300 = vector.extract_strided_slice %299 {offsets = [0, 0], sizes = [8, 256], strides = [1, 1]} : vector<8x768xf32> to vector<8x256xf32>
    %301 = vector.extract_strided_slice %299 {offsets = [0, 256], sizes = [8, 256], strides = [1, 1]} : vector<8x768xf32> to vector<8x256xf32>
    %302 = vector.extract_strided_slice %299 {offsets = [0, 512], sizes = [8, 256], strides = [1, 1]} : vector<8x768xf32> to vector<8x256xf32>
    %303 = vector.extract_strided_slice %293 {offsets = [0, 768], sizes = [8, 256], strides = [1, 1]} : vector<8x1024xf32> to vector<8x256xf32>
    %304 = math.tanh %303 : vector<8x256xf32>
    %305 = arith.mulf %301, %284 : vector<8x256xf32>
    %306 = arith.mulf %300, %304 : vector<8x256xf32>
    %307 = arith.addf %305, %306 : vector<8x256xf32>
    %308 = math.tanh %307 : vector<8x256xf32>
    %309 = arith.mulf %302, %308 : vector<8x256xf32>
    %c4_i32_81 = arith.constant 4 : i32
    %c8_i32_82 = arith.constant 8 : i32
    %310 = arith.muli %c4_i32_81, %c8_i32_82 : i32
    %311 = tpu.assume_multiple %310, 8 : i32
    %312 = arith.index_cast %311 : i32 to index
    %c0_83 = arith.constant 0 : index
    %313 = vector.load %arg8[%312, %c0_83] : memref<64x1024xf32, #tpu.memory_space<vmem>>, vector<8x1024xf32>
    %314 = arith.truncf %309 : vector<8x256xf32> to vector<8x256xbf16>
    %cst_84 = arith.constant dense<0.000000e+00> : vector<8x1024xf32>
    %315 = tpu.matmul %314, %217, %cst_84 {dimension_numbers = #tpu.dot_dimension_numbers<[1], [0], [0], [1], [0, 0, 1, 1], [], []>} : vector<8x256xbf16>, vector<256x1024xbf16>, vector<8x1024xf32> -> vector<8x1024xf32>
    %316 = arith.addf %313, %315 : vector<8x1024xf32>
    %317 = vector.extract_strided_slice %316 {offsets = [0, 0], sizes = [8, 768], strides = [1, 1]} : vector<8x1024xf32> to vector<8x768xf32>
    %318 = arith.negf %317 : vector<8x768xf32>
    %319 = math.exp %318 : vector<8x768xf32>
    %cst_85 = arith.constant 1.000000e+00 : f32
    %320 = vector.broadcast %cst_85 : f32 to vector<8x768xf32>
    %321 = arith.addf %320, %319 : vector<8x768xf32>
    %322 = arith.divf %320, %321 : vector<8x768xf32>
    %323 = vector.extract_strided_slice %322 {offsets = [0, 0], sizes = [8, 256], strides = [1, 1]} : vector<8x768xf32> to vector<8x256xf32>
    %324 = vector.extract_strided_slice %322 {offsets = [0, 256], sizes = [8, 256], strides = [1, 1]} : vector<8x768xf32> to vector<8x256xf32>
    %325 = vector.extract_strided_slice %322 {offsets = [0, 512], sizes = [8, 256], strides = [1, 1]} : vector<8x768xf32> to vector<8x256xf32>
    %326 = vector.extract_strided_slice %316 {offsets = [0, 768], sizes = [8, 256], strides = [1, 1]} : vector<8x1024xf32> to vector<8x256xf32>
    %327 = math.tanh %326 : vector<8x256xf32>
    %328 = arith.mulf %324, %307 : vector<8x256xf32>
    %329 = arith.mulf %323, %327 : vector<8x256xf32>
    %330 = arith.addf %328, %329 : vector<8x256xf32>
    %331 = math.tanh %330 : vector<8x256xf32>
    %332 = arith.mulf %325, %331 : vector<8x256xf32>
    %c5_i32_86 = arith.constant 5 : i32
    %c8_i32_87 = arith.constant 8 : i32
    %333 = arith.muli %c5_i32_86, %c8_i32_87 : i32
    %334 = tpu.assume_multiple %333, 8 : i32
    %335 = arith.index_cast %334 : i32 to index
    %c0_88 = arith.constant 0 : index
    %336 = vector.load %arg8[%335, %c0_88] : memref<64x1024xf32, #tpu.memory_space<vmem>>, vector<8x1024xf32>
    %337 = arith.truncf %332 : vector<8x256xf32> to vector<8x256xbf16>
    %cst_89 = arith.constant dense<0.000000e+00> : vector<8x1024xf32>
    %338 = tpu.matmul %337, %217, %cst_89 {dimension_numbers = #tpu.dot_dimension_numbers<[1], [0], [0], [1], [0, 0, 1, 1], [], []>} : vector<8x256xbf16>, vector<256x1024xbf16>, vector<8x1024xf32> -> vector<8x1024xf32>
    %339 = arith.addf %336, %338 : vector<8x1024xf32>
    %340 = vector.extract_strided_slice %339 {offsets = [0, 0], sizes = [8, 768], strides = [1, 1]} : vector<8x1024xf32> to vector<8x768xf32>
    %341 = arith.negf %340 : vector<8x768xf32>
    %342 = math.exp %341 : vector<8x768xf32>
    %cst_90 = arith.constant 1.000000e+00 : f32
    %343 = vector.broadcast %cst_90 : f32 to vector<8x768xf32>
    %344 = arith.addf %343, %342 : vector<8x768xf32>
    %345 = arith.divf %343, %344 : vector<8x768xf32>
    %346 = vector.extract_strided_slice %345 {offsets = [0, 0], sizes = [8, 256], strides = [1, 1]} : vector<8x768xf32> to vector<8x256xf32>
    %347 = vector.extract_strided_slice %345 {offsets = [0, 256], sizes = [8, 256], strides = [1, 1]} : vector<8x768xf32> to vector<8x256xf32>
    %348 = vector.extract_strided_slice %345 {offsets = [0, 512], sizes = [8, 256], strides = [1, 1]} : vector<8x768xf32> to vector<8x256xf32>
    %349 = vector.extract_strided_slice %339 {offsets = [0, 768], sizes = [8, 256], strides = [1, 1]} : vector<8x1024xf32> to vector<8x256xf32>
    %350 = math.tanh %349 : vector<8x256xf32>
    %351 = arith.mulf %347, %330 : vector<8x256xf32>
    %352 = arith.mulf %346, %350 : vector<8x256xf32>
    %353 = arith.addf %351, %352 : vector<8x256xf32>
    %354 = math.tanh %353 : vector<8x256xf32>
    %355 = arith.mulf %348, %354 : vector<8x256xf32>
    %c6_i32_91 = arith.constant 6 : i32
    %c8_i32_92 = arith.constant 8 : i32
    %356 = arith.muli %c6_i32_91, %c8_i32_92 : i32
    %357 = tpu.assume_multiple %356, 8 : i32
    %358 = arith.index_cast %357 : i32 to index
    %c0_93 = arith.constant 0 : index
    %359 = vector.load %arg8[%358, %c0_93] : memref<64x1024xf32, #tpu.memory_space<vmem>>, vector<8x1024xf32>
    %360 = arith.truncf %355 : vector<8x256xf32> to vector<8x256xbf16>
    %cst_94 = arith.constant dense<0.000000e+00> : vector<8x1024xf32>
    %361 = tpu.matmul %360, %217, %cst_94 {dimension_numbers = #tpu.dot_dimension_numbers<[1], [0], [0], [1], [0, 0, 1, 1], [], []>} : vector<8x256xbf16>, vector<256x1024xbf16>, vector<8x1024xf32> -> vector<8x1024xf32>
    %362 = arith.addf %359, %361 : vector<8x1024xf32>
    %363 = vector.extract_strided_slice %362 {offsets = [0, 0], sizes = [8, 768], strides = [1, 1]} : vector<8x1024xf32> to vector<8x768xf32>
    %364 = arith.negf %363 : vector<8x768xf32>
    %365 = math.exp %364 : vector<8x768xf32>
    %cst_95 = arith.constant 1.000000e+00 : f32
    %366 = vector.broadcast %cst_95 : f32 to vector<8x768xf32>
    %367 = arith.addf %366, %365 : vector<8x768xf32>
    %368 = arith.divf %366, %367 : vector<8x768xf32>
    %369 = vector.extract_strided_slice %368 {offsets = [0, 0], sizes = [8, 256], strides = [1, 1]} : vector<8x768xf32> to vector<8x256xf32>
    %370 = vector.extract_strided_slice %368 {offsets = [0, 256], sizes = [8, 256], strides = [1, 1]} : vector<8x768xf32> to vector<8x256xf32>
    %371 = vector.extract_strided_slice %368 {offsets = [0, 512], sizes = [8, 256], strides = [1, 1]} : vector<8x768xf32> to vector<8x256xf32>
    %372 = vector.extract_strided_slice %362 {offsets = [0, 768], sizes = [8, 256], strides = [1, 1]} : vector<8x1024xf32> to vector<8x256xf32>
    %373 = math.tanh %372 : vector<8x256xf32>
    %374 = arith.mulf %370, %353 : vector<8x256xf32>
    %375 = arith.mulf %369, %373 : vector<8x256xf32>
    %376 = arith.addf %374, %375 : vector<8x256xf32>
    %377 = math.tanh %376 : vector<8x256xf32>
    %378 = arith.mulf %371, %377 : vector<8x256xf32>
    %c7_i32_96 = arith.constant 7 : i32
    %c8_i32_97 = arith.constant 8 : i32
    %379 = arith.muli %c7_i32_96, %c8_i32_97 : i32
    %380 = tpu.assume_multiple %379, 8 : i32
    %381 = arith.index_cast %380 : i32 to index
    %c0_98 = arith.constant 0 : index
    %382 = vector.load %arg8[%381, %c0_98] : memref<64x1024xf32, #tpu.memory_space<vmem>>, vector<8x1024xf32>
    %383 = arith.truncf %378 : vector<8x256xf32> to vector<8x256xbf16>
    %cst_99 = arith.constant dense<0.000000e+00> : vector<8x1024xf32>
    %384 = tpu.matmul %383, %217, %cst_99 {dimension_numbers = #tpu.dot_dimension_numbers<[1], [0], [0], [1], [0, 0, 1, 1], [], []>} : vector<8x256xbf16>, vector<256x1024xbf16>, vector<8x1024xf32> -> vector<8x1024xf32>
    %385 = arith.addf %382, %384 : vector<8x1024xf32>
    %386 = vector.extract_strided_slice %385 {offsets = [0, 0], sizes = [8, 768], strides = [1, 1]} : vector<8x1024xf32> to vector<8x768xf32>
    %387 = arith.negf %386 : vector<8x768xf32>
    %388 = math.exp %387 : vector<8x768xf32>
    %cst_100 = arith.constant 1.000000e+00 : f32
    %389 = vector.broadcast %cst_100 : f32 to vector<8x768xf32>
    %390 = arith.addf %389, %388 : vector<8x768xf32>
    %391 = arith.divf %389, %390 : vector<8x768xf32>
    %392 = vector.extract_strided_slice %391 {offsets = [0, 0], sizes = [8, 256], strides = [1, 1]} : vector<8x768xf32> to vector<8x256xf32>
    %393 = vector.extract_strided_slice %391 {offsets = [0, 256], sizes = [8, 256], strides = [1, 1]} : vector<8x768xf32> to vector<8x256xf32>
    %394 = vector.extract_strided_slice %391 {offsets = [0, 512], sizes = [8, 256], strides = [1, 1]} : vector<8x768xf32> to vector<8x256xf32>
    %395 = vector.extract_strided_slice %385 {offsets = [0, 768], sizes = [8, 256], strides = [1, 1]} : vector<8x1024xf32> to vector<8x256xf32>
    %396 = math.tanh %395 : vector<8x256xf32>
    %397 = arith.mulf %393, %376 : vector<8x256xf32>
    %398 = arith.mulf %392, %396 : vector<8x256xf32>
    %399 = arith.addf %397, %398 : vector<8x256xf32>
    %400 = math.tanh %399 : vector<8x256xf32>
    %401 = arith.mulf %394, %400 : vector<8x256xf32>
    %c8_i32_101 = arith.constant 8 : i32
    %c0_102 = arith.constant 0 : index
    %c0_103 = arith.constant 0 : index
    %402 = vector.load %arg7[%c0_102, %c0_103] : memref<8x256xf32, #tpu.memory_space<vmem>>, vector<8x256xf32>
    tpu.vector_store %arg7[%c0_102, %c0_103], %401 {strides = array<i32>} : memref<8x256xf32, #tpu.memory_space<vmem>>, vector<8x256xf32>,
    return
  }
}

</mosaic_0001>

<bundles_post_ra>
// kernel: tpu_custom_call.1
= control target key start
LH: loop header
LB: loop body
LE: loop exit
PB: predicated region body
PF: predicated region fallthrough
CT: control target
= control target key end

     0   :  { %12 = vsyncpa [#allocation5], 0  ;;  %s11881_s0 = inlined_call_operand.vmem [shape: bf16[64,8], index: 0, kind: input, shape index: {}]   ;;  %s11882_s1 = inlined_call_operand.vmem [shape: bf16[8,1024], index: 1, kind: input, shape index: {}]   ;;  %s11883_s2 = inlined_call_operand.hbm [shape: bf16[256,1024], index: 2, kind: input, shape index: {}]   ;;  %s11884_s3 = inlined_call_operand.vmem [shape: f32[1,1024], index: 3, kind: input, shape index: {}]   ;;  %s11885_s4 = inlined_call_operand.hbm [shape: bf16[256,1024], index: 4, kind: input, shape index: {}]   ;;  %s11886_s5 = inlined_call_operand.hbm [shape: bf16[256,1024], index: 5, kind: input, shape index: {}]   ;;  %s11887_s6 = inlined_call_operand.vmem [shape: f32[1,1024], index: 6, kind: input, shape index: {}]   ;;  %s11888_s7 = inlined_call_operand.hbm [shape: f32[8,256], index: 7, kind: output, shape index: {}]  }
   0x1   :  { %13 = vsyncpa [#allocation8], 0 }
   0x2   :  { %14 = vsyncpa [#allocation6], 0  ;;  %s8192_s24 = smov [#allocation7]   ;;  %s8193_s26 = smov [#allocation4]  }
   0x3   :  { %s38_s25 = sshll.u32 %s8192_s24, 4  ;;  %s24_s27 = sshll.u32 %s8193_s26, 4  ;;  %s39_s25 = int_to_ptr.vmem [resolvable:$true] %s38_s25  ;;  %s8239_s27 = int_to_ptr.vmem [resolvable:$true] %s24_s27 }
   0x4   :  { %s8098_s30 = scalar_lea.hbm %s11885_s4, 16384 }
   0x5   :  { %p8099_p0 = scmp.ne.s32.totalorder %s11885_s4, %s8098_s30  ;;  %p8102_p1 = scmp.lt.u32.totalorder %s8098_s30, %s11885_s4 }
   0x7   :  { %p8104_p2 = pnand %p8102_p1, %p8099_p0 }
   0x9   :  { %8107 = shalt.err (!%p8104_p2)
}
   0xa   :  { %s8108_s12 = scalar_lea.vmem %s39_s25, 16384  ;;  %p8113_p4 = scmp.lt.s32.totalorder %s39_s25, %s39_s25 }
   0xb   :  { %p8109_p3 = scmp.ne.s32.totalorder %s39_s25, %s8108_s12  ;;  %p8114_p5 = scmp.lt.s32.totalorder %s8108_s12, %s8108_s12 }
   0xd   :  { %p8115_p6 = por %p8114_p5, %p8113_p4 }
   0xf   :  { %p8116_p7 = pnand %p8115_p6, %p8109_p3 }
  0x11   :  { %8119 = shalt.err (!%p8116_p7)
}
  0x12   :  { %s8194_s13 = smov 512   ;;  %s8195_s14 = smov 32  }
  0x13   :  { %44 = dma.hbm_to_vmem [thread:$0]  %s11885_s4, 16384, %s39_s25, [#allocation8], %s8194_s13, %s8194_s13, %s8195_s14  }
  0x14   :  { %s8120_s19 = scalar_lea.hbm %s11883_s2, 16384 }
  0x15   :  { %p8121_p8 = scmp.ne.s32.totalorder %s11883_s2, %s8120_s19  ;;  %p8124_p9 = scmp.lt.u32.totalorder %s8120_s19, %s11883_s2 }
  0x17   :  { %p8126_p10 = pnand %p8124_p9, %p8121_p8 }
  0x19   :  { %8129 = shalt.err (!%p8126_p10)
}
  0x1a   :  { %s8130_s24 = scalar_lea.vmem %s8239_s27, 16384  ;;  %p8135_p12 = scmp.lt.s32.totalorder %s8239_s27, %s8239_s27 }
  0x1b   :  { %p8131_p11 = scmp.ne.s32.totalorder %s8239_s27, %s8130_s24  ;;  %p8136_p13 = scmp.lt.s32.totalorder %s8130_s24, %s8130_s24 }
  0x1d   :  { %p8137_p0 = por %p8136_p13, %p8135_p12 }
  0x1f   :  { %p8138_p1 = pnand %p8137_p0, %p8131_p11 }
  0x21   :  { %8141 = shalt.err (!%p8138_p1)
}
  0x22   :  { %30 = dma.hbm_to_vmem [thread:$0]  %s11883_s2, 16384, %s8239_s27, [#allocation5], %s8194_s13, %s8194_s13, %s8195_s14  }
  0x23   :  { %s8196_s26 = smov [#allocation9]   ;;  %s8142_s8 = scalar_lea.hbm %s11886_s5, 16384 }
  0x24   :  { %s50_s28 = sshll.u32 %s8196_s26, 4  ;;  %p8143_p2 = scmp.ne.s32.totalorder %s11886_s5, %s8142_s8  ;;  %s51_s28 = int_to_ptr.vmem [resolvable:$true] %s50_s28 }
  0x25   :  { %p8146_p3 = scmp.lt.u32.totalorder %s8142_s8, %s11886_s5 }
  0x27   :  { %p8148_p4 = pnand %p8146_p3, %p8143_p2 }
  0x29   :  { %8151 = shalt.err (!%p8148_p4)
}
  0x2a   :  { %s8152_s15 = scalar_lea.vmem %s51_s28, 16384  ;;  %p8157_p6 = scmp.lt.s32.totalorder %s51_s28, %s51_s28 }
  0x2b   :  { %p8153_p5 = scmp.ne.s32.totalorder %s51_s28, %s8152_s15  ;;  %p8158_p7 = scmp.lt.s32.totalorder %s8152_s15, %s8152_s15 }
  0x2d   :  { %p8159_p8 = por %p8158_p7, %p8157_p6 }
  0x2f   :  { %p8160_p9 = pnand %p8159_p8, %p8153_p5 }
  0x31   :  { %8163 = shalt.err (!%p8160_p9)
}
  0x32   :  { %56 = dma.hbm_to_vmem [thread:$0]  %s11886_s5, 16384, %s51_s28, [#allocation8], %s8194_s13, %s8194_s13, %s8195_s14  }
  0x33   :  { %8186 = dma.done.wait [#allocation5], 16384  }
  0x34   :  { %8187 = vsyncadd [#allocation5], 4294950912 }
  0x35   :  { %8188 = dma.done.wait [#allocation8], 32768  }
  0x36   :  { %8189 = vsyncadd [#allocation8], 4294934528  ;;  %v11889_v0 = vmov 0   ;;  %v77_v1 = vld [vmem:[%s11882_s1] sm:$0xff]  ;;  %vm176_vm0 = vcmask 1043456   ;;  %v78_v2 = vld [vmem:[%s11882_s1 + $0x8] sm:$0xff] }
  0x37   :  { %233 = vmatprep.mubr.bf16.mxu0 %v11889_v0  ;;  %306 = vmatprep.mubr.bf16.mxu1 %v11889_v0  ;;  %v7060_v3 = vcombine.high %v77_v1, %v77_v1  ;;  %v7062_v4 = vcombine.high %v78_v2, %v78_v2  ;;  %v7059_v5 = vcombine.low %v77_v1, %v77_v1  ;;  %v79_v7 = vld [vmem:[%s11882_s1 + $0x10] sm:$0xff]  ;;  %v80_v9 = vld [vmem:[%s11882_s1 + $0x18] sm:$0xff]  ;;  %v7578_v13 = vld [vmem:[%s11881_s0] sm:$0xff]   ;;  %vm163_vm1 = vcmask 64512  }
  0x38   :  { %v7061_v6 = vcombine.low %v78_v2, %v78_v2  ;;  %v7064_v8 = vcombine.high %v79_v7, %v79_v7  ;;  %v7063_v10 = vcombine.low %v79_v7, %v79_v7  ;;  %v7066_v14 = vcombine.high %v80_v9, %v80_v9  ;;  %v557_v18 = vld [vmem:[#allocation4] sm:$0xff]  ;;  %v558_v21 = vld [vmem:[#allocation4 + $0x8] sm:$0xff]  ;;  %v7583_v24 = vld [vmem:[%s11881_s0 + $0x8] sm:$0xff]  }
  0x39   :  { %7067 = vmatprep.subr.msk.bf16.mxu0 %vm176_vm0, %v7060_v3  ;;  %7072 = vmatprep.subr.msk.bf16.mxu1 %vm176_vm0, %v7062_v4  ;;  %v178_v11 = vsel %vm176_vm0, %v7059_v5, 0  ;;  %v7065_v15 = vcombine.low %v80_v9, %v80_v9  ;;  %v561_v19 = vld [vmem:[#allocation4 + $0x20] sm:$0xff]  ;;  %v562_v22 = vld [vmem:[#allocation4 + $0x28] sm:$0xff] }
  0x3a   :  { %v184_v12 = vsel %vm176_vm0, %v7061_v6, 0  ;;  %202 = vmatpush1.bf16.msra.mxu0 %v178_v11  ;;  %v190_v16 = vsel %vm176_vm0, %v7063_v10, 0  ;;  %v8316_v20 = vcombine.high %v557_v18, %v561_v19  ;;  %v8320_v23 = vcombine.high %v558_v21, %v562_v22  ;;  %v8336_v25 = vld [vmem:[%s11881_s0 + $0x10] sm:$0xff]   ;;  %v8347_v26 = vld [vmem:[%s11881_s0 + $0x18] sm:$0xff]  }
  0x3b   :  { %275 = vmatpush1.bf16.msra.mxu1 %v184_v12  ;;  %7077 = vmatprep.subr.msk.bf16.mxu0 %vm176_vm0, %v7064_v8  ;;  %v196_v17 = vsel %vm176_vm0, %v7065_v15, 0  ;;  %v565_v27 = vld [vmem:[#allocation4 + $0x40] sm:$0xff]  ;;  %v566_v29 = vld [vmem:[#allocation4 + $0x48] sm:$0xff]  ;;  %v8355_v31 = vcombine.low %v557_v18, %v561_v19  ;;  %v8357_v32 = vcombine.low %v558_v21, %v562_v22 }
  0x3c   :  { %7082 = vmatprep.subr.msk.bf16.mxu1 %vm176_vm0, %v7066_v14  ;;  %12444 = vst [vmem:[#allocation14_spill] sm:$0xff] %v8316_v20  ;;  %12445 = vst [vmem:[#allocation15_spill] sm:$0xff] %v8320_v23  ;;  %v569_v28 = vld [vmem:[#allocation4 + $0x60] sm:$0xff]  ;;  %v570_v30 = vld [vmem:[#allocation4 + $0x68] sm:$0xff] }
  0x3d   :  { %7068 = vmatmul.mubr.msk.bf16.vlgmr.msra.gmra.mrb[0].mxu0 %vm163_vm1, %v7578_v13  ;;  %12446 = vst [vmem:[#allocation16_spill] sm:$0xff] %v8355_v31  ;;  %12447 = vst [vmem:[#allocation17_spill] sm:$0xff] %v8357_v32  ;;  %v8359_v33 = vcombine.high %v565_v27, %v569_v28  ;;  %v8361_v34 = vcombine.high %v566_v29, %v570_v30  ;;  %v573_v35 = vld [vmem:[#allocation4 + $0x80] sm:$0xff]  ;;  %v574_v37 = vld [vmem:[#allocation4 + $0x88] sm:$0xff]  ;;  %v8367_v39 = vcombine.low %v565_v27, %v569_v28 }
  0x3e   :  { %7073 = vmatmul.mubr.msk.bf16.vlgmr.msra.gmra.mrb[0].mxu1 %vm163_vm1, %v7578_v13  ;;  %348 = vmatpush1.bf16.msra.mxu0 %v190_v16  ;;  %v577_v36 = vld [vmem:[#allocation4 + $0xa0] sm:$0xff]  ;;  %v578_v38 = vld [vmem:[#allocation4 + $0xa8] sm:$0xff]  ;;  %v8369_v40 = vcombine.low %v566_v29, %v570_v30 }
  0x3f   :  { %421 = vmatpush1.bf16.msra.mxu1 %v196_v17  ;;  %243 = vmatprep.mubr.bf16.mxu0 %v11889_v0  ;;  %12448 = vst [vmem:[#allocation18_spill] sm:$0xff] %v8359_v33  ;;  %12449 = vst [vmem:[#allocation19_spill] sm:$0xff] %v8361_v34  ;;  %v8373_v41 = vcombine.high %v573_v35, %v577_v36  ;;  %v8375_v42 = vcombine.high %v574_v37, %v578_v38  ;;  %v581_v43 = vld [vmem:[#allocation4 + $0xc0] sm:$0xff]  ;;  %v582_v45 = vld [vmem:[#allocation4 + $0xc8] sm:$0xff] }
  0x40   :  { %316 = vmatprep.mubr.bf16.mxu1 %v11889_v0  ;;  %1336 = vmatprep.subr.bf16.mxu0 %v8316_v20  ;;  %12450 = vst [vmem:[#allocation20_spill] sm:$0xff] %v8367_v39  ;;  %12451 = vst [vmem:[#allocation21_spill] sm:$0xff] %v8369_v40  ;;  %v585_v44 = vld [vmem:[#allocation4 + $0xe0] sm:$0xff]  ;;  %v586_v46 = vld [vmem:[#allocation4 + $0xe8] sm:$0xff]  ;;  %v8381_v47 = vcombine.low %v573_v35, %v577_v36  ;;  %v8383_v48 = vcombine.low %v574_v37, %v578_v38 }
  0x41   :  { %1377 = vmatprep.subr.bf16.mxu1 %v8320_v23  ;;  %12452 = vst [vmem:[#allocation22_spill] sm:$0xff] %v8373_v41  ;;  %12453 = vst [vmem:[#allocation23_spill] sm:$0xff] %v8375_v42  ;;  %v8387_v49 = vcombine.high %v581_v43, %v585_v44  ;;  %v8389_v50 = vcombine.high %v582_v45, %v586_v46  ;;  %v589_v51 = vld [vmem:[#allocation4 + $0x100] sm:$0xff]  ;;  %v590_v53 = vld [vmem:[#allocation4 + $0x108] sm:$0xff]  ;;  %v8395_v55 = vcombine.low %v581_v43, %v585_v44 }
  0x42   :  { %12454 = vst [vmem:[#allocation24_spill] sm:$0xff] %v8381_v47  ;;  %12455 = vst [vmem:[#allocation25_spill] sm:$0xff] %v8383_v48  ;;  %v593_v52 = vld [vmem:[#allocation4 + $0x120] sm:$0xff]  ;;  %v594_v54 = vld [vmem:[#allocation4 + $0x128] sm:$0xff]  ;;  %v8397_v56 = vcombine.low %v582_v45, %v586_v46 }
  0x43   :  { %12456 = vst [vmem:[#allocation26_spill] sm:$0xff] %v8387_v49  ;;  %12457 = vst [vmem:[#allocation27_spill] sm:$0xff] %v8389_v50  ;;  %v8401_v57 = vcombine.high %v589_v51, %v593_v52  ;;  %v8403_v58 = vcombine.high %v590_v53, %v594_v54  ;;  %v597_v59 = vld [vmem:[#allocation4 + $0x140] sm:$0xff]  ;;  %v598_v61 = vld [vmem:[#allocation4 + $0x148] sm:$0xff]  ;;  %v8409_v63 = vcombine.low %v589_v51, %v593_v52 }
  0x44   :  { %12458 = vst [vmem:[#allocation28_spill] sm:$0xff] %v8395_v55  ;;  %12459 = vst [vmem:[#allocation29_spill] sm:$0xff] %v8397_v56  ;;  %v601_v60 = vld [vmem:[#allocation4 + $0x160] sm:$0xff]  ;;  %v602_v62 = vld [vmem:[#allocation4 + $0x168] sm:$0xff]  ;;  %v8411_v1 = vcombine.low %v590_v53, %v594_v54 }
  0x45   :  { %7069 = vmatmul.mubr.msk.bf16.gmra.mrb[4].mxu0 %vm163_vm1, %v7583_v24  ;;  %12460 = vst [vmem:[#allocation30_spill] sm:$0xff] %v8401_v57  ;;  %12461 = vst [vmem:[#allocation31_spill] sm:$0xff] %v8403_v58  ;;  %v8415_v2 = vcombine.high %v597_v59, %v601_v60  ;;  %v8417_v3 = vcombine.high %v598_v61, %v602_v62  ;;  %v605_v4 = vld [vmem:[#allocation4 + $0x180] sm:$0xff]  ;;  %v606_v6 = vld [vmem:[#allocation4 + $0x188] sm:$0xff]  ;;  %v8425_v8 = vcombine.low %v597_v59, %v601_v60 }
  0x46   :  { %7074 = vmatmul.mubr.msk.bf16.gmra.mrb[4].mxu1 %vm163_vm1, %v7583_v24  ;;  %253 = vmatprep.mubr.bf16.mxu0 %v11889_v0  ;;  %12462 = vst [vmem:[#allocation32_spill] sm:$0xff] %v8409_v63  ;;  %12463 = vst [vmem:[#allocation33_spill] sm:$0xff] %v8411_v1  ;;  %v609_v5 = vld [vmem:[#allocation4 + $0x1a0] sm:$0xff]  ;;  %v610_v7 = vld [vmem:[#allocation4 + $0x1a8] sm:$0xff]  ;;  %v8427_v9 = vcombine.low %v598_v61, %v602_v62 }
  0x47   :  { %326 = vmatprep.mubr.bf16.mxu1 %v11889_v0  ;;  %12464 = vst [vmem:[#allocation34_spill] sm:$0xff] %v8415_v2  ;;  %12465 = vst [vmem:[#allocation35_spill] sm:$0xff] %v8417_v3  ;;  %v8431_v10 = vcombine.high %v605_v4, %v609_v5  ;;  %v8433_v11 = vcombine.high %v606_v6, %v610_v7  ;;  %v613_v12 = vld [vmem:[#allocation4 + $0x1c0] sm:$0xff]  ;;  %v614_v14 = vld [vmem:[#allocation4 + $0x1c8] sm:$0xff]  ;;  %v8439_v16 = vcombine.low %v605_v4, %v609_v5 }
  0x48   :  { %12466 = vst [vmem:[#allocation36_spill] sm:$0xff] %v8425_v8  ;;  %12467 = vst [vmem:[#allocation37_spill] sm:$0xff] %v8427_v9  ;;  %v618_v15 = vld [vmem:[#allocation4 + $0x1e8] sm:$0xff]  ;;  %v8441_v17 = vcombine.low %v606_v6, %v610_v7  ;;  %v621_v21 = vld [vmem:[#allocation4 + $0x200] sm:$0xff] }
  0x49   :  { %12468 = vst [vmem:[#allocation38_spill] sm:$0xff] %v8431_v10  ;;  %12469 = vst [vmem:[#allocation39_spill] sm:$0xff] %v8433_v11  ;;  %v8447_v19 = vcombine.high %v614_v14, %v618_v15  ;;  %v625_v22 = vld [vmem:[#allocation4 + $0x220] sm:$0xff]  ;;  %v8457_v28 = vcombine.low %v614_v14, %v618_v15  ;;  %v630_v37 = vld [vmem:[#allocation4 + $0x248] sm:$0xff] }
  0x4a   :  { %12470 = vst [vmem:[#allocation40_spill] sm:$0xff] %v8439_v16  ;;  %12471 = vst [vmem:[#allocation41_spill] sm:$0xff] %v8441_v17  ;;  %v8461_v29 = vcombine.high %v621_v21, %v625_v22  ;;  %v629_v35 = vld [vmem:[#allocation4 + $0x240] sm:$0xff]  ;;  %v8469_v38 = vcombine.low %v621_v21, %v625_v22  ;;  %v638_v52 = vld [vmem:[#allocation4 + $0x288] sm:$0xff] }
  0x4b   :  { %12473 = vst [vmem:[#allocation43_spill] sm:$0xff] %v8447_v19  ;;  %12475 = vst [vmem:[#allocation45_spill] sm:$0xff] %v8457_v28  ;;  %v633_v36 = vld [vmem:[#allocation4 + $0x260] sm:$0xff]  ;;  %v642_v53 = vld [vmem:[#allocation4 + $0x2a8] sm:$0xff] }
  0x4c   :  { %12476 = vst [vmem:[#allocation46_spill] sm:$0xff] %v8461_v29  ;;  %12478 = vst [vmem:[#allocation48_spill] sm:$0xff] %v8469_v38  ;;  %v8475_v44 = vcombine.high %v629_v35, %v633_v36  ;;  %v637_v46 = vld [vmem:[#allocation4 + $0x280] sm:$0xff]  ;;  %v8481_v54 = vcombine.low %v629_v35, %v633_v36  ;;  %v8489_v61 = vcombine.high %v638_v52, %v642_v53  ;;  %v646_v5 = vld [vmem:[#allocation4 + $0x2c8] sm:$0xff] }
  0x4d   :  { %7070 = vmatmul.mubr.msk.bf16.gmra.mrb[8].mxu0 %vm163_vm1, %v8336_v25  ;;  %v641_v51 = vld [vmem:[#allocation4 + $0x2a0] sm:$0xff]  ;;  %v650_v6 = vld [vmem:[#allocation4 + $0x2e8] sm:$0xff] }
  0x4e   :  { %7075 = vmatmul.mubr.msk.bf16.gmra.mrb[8].mxu1 %vm163_vm1, %v8336_v25  ;;  %263 = vmatprep.mubr.bf16.mxu0 %v11889_v0  ;;  %12480 = vst [vmem:[#allocation50_spill] sm:$0xff] %v8475_v44  ;;  %12482 = vst [vmem:[#allocation52_spill] sm:$0xff] %v8481_v54  ;;  %v8487_v60 = vcombine.high %v637_v46, %v641_v51  ;;  %v645_v62 = vld [vmem:[#allocation4 + $0x2c0] sm:$0xff]  ;;  %v8493_v7 = vcombine.low %v637_v46, %v641_v51  ;;  %v654_v22 = vld [vmem:[#allocation4 + $0x308] sm:$0xff] }
  0x4f   :  { %336 = vmatprep.mubr.bf16.mxu1 %v11889_v0  ;;  %12485 = vst [vmem:[#allocation55_spill] sm:$0xff] %v8489_v61  ;;  %v649_v4 = vld [vmem:[#allocation4 + $0x2e0] sm:$0xff]  ;;  %v8501_v14 = vcombine.high %v646_v5, %v650_v6  ;;  %v8507_v35 = vcombine.low %v646_v5, %v650_v6  ;;  %v662_v51 = vld [vmem:[#allocation4 + $0x348] sm:$0xff] }
  0x50   :  { %12484 = vst [vmem:[#allocation54_spill] sm:$0xff] %v8487_v60  ;;  %12486 = vst [vmem:[#allocation56_spill] sm:$0xff] %v8493_v7  ;;  %v653_v15 = vld [vmem:[#allocation4 + $0x300] sm:$0xff] }
  0x51   :  { %12489 = vst [vmem:[#allocation59_spill] sm:$0xff] %v8501_v14  ;;  %v657_v21 = vld [vmem:[#allocation4 + $0x320] sm:$0xff]  ;;  %12491 = vst [vmem:[#allocation61_spill] sm:$0xff] %v8507_v35 }
  0x52   :  { %v8511_v36 = vcombine.high %v653_v15, %v657_v21  ;;  %v665_v46 = vld [vmem:[#allocation4 + $0x360] sm:$0xff] }
  0x53   :  { %v669_v6 = vld [vmem:[#allocation4 + $0x380] sm:$0xff] }
  0x54   :  { %12492 = vst [vmem:[#allocation62_spill] sm:$0xff] %v8511_v36 }
  0x55   :  { %7071 = vmatmul.mubr.msk.bf16.gmra.mrb[12].mxu0 %vm163_vm1, %v8347_v26 }
  0x56   :  { %7076 = vmatmul.mubr.msk.bf16.gmra.mrb[12].mxu1 %vm163_vm1, %v8347_v26  ;;  %379 = vmatprep.mubr.bf16.mxu0 %v11889_v0 }
  0x57   :  { %452 = vmatprep.mubr.bf16.mxu1 %v11889_v0 }
  0x5d   :  { %7078 = vmatmul.mubr.msk.bf16.vlgmr.msra.gmra.mrb[16].mxu0 %vm163_vm1, %v7578_v13 }
  0x5e   :  { %7083 = vmatmul.mubr.msk.bf16.vlgmr.msra.gmra.mrb[16].mxu1 %vm163_vm1, %v7578_v13  ;;  %1337 = vmatpush1.bf16.msra.mxu0 %v8355_v31  ;;  %v617_v13 = vld [vmem:[#allocation4 + $0x1e0] sm:$0xff] }
  0x5f   :  { %1378 = vmatpush1.bf16.msra.mxu1 %v8357_v32  ;;  %1338 = vmatprep.subr.bf16.mxu0 %v8359_v33  ;;  %v8445_v18 = vcombine.high %v613_v12, %v617_v13  ;;  %v8455_v27 = vcombine.low %v613_v12, %v617_v13  ;;  %v8495_v12 = vcombine.low %v638_v52, %v642_v53  ;;  %v666_v52 = vld [vmem:[#allocation4 + $0x368] sm:$0xff] }
  0x60   :  { %1379 = vmatprep.subr.bf16.mxu1 %v8361_v34  ;;  %389 = vmatprep.mubr.bf16.mxu0 %v11889_v0  ;;  %v8499_v13 = vcombine.high %v645_v62, %v649_v4  ;;  %v8517_v53 = vcombine.low %v653_v15, %v657_v21  ;;  %v8525_v5 = vcombine.high %v662_v51, %v666_v52 }
  0x61   :  { %462 = vmatprep.mubr.bf16.mxu1 %v11889_v0  ;;  %12472 = vst [vmem:[#allocation42_spill] sm:$0xff] %v8445_v18  ;;  %12474 = vst [vmem:[#allocation44_spill] sm:$0xff] %v8455_v27  ;;  %v8531_v21 = vcombine.low %v662_v51, %v666_v52 }
  0x62   :  { %1339 = vmatpush1.bf16.msra.mxu0 %v8367_v39  ;;  %12487 = vst [vmem:[#allocation57_spill] sm:$0xff] %v8495_v12  ;;  %12488 = vst [vmem:[#allocation58_spill] sm:$0xff] %v8499_v13 }
  0x63   :  { %1380 = vmatpush1.bf16.msra.mxu1 %v8369_v40  ;;  %1340 = vmatprep.subr.bf16.mxu0 %v8373_v41  ;;  %12494 = vst [vmem:[#allocation64_spill] sm:$0xff] %v8517_v53  ;;  %12497 = vst [vmem:[#allocation67_spill] sm:$0xff] %v8525_v5 }
  0x64   :  { %1381 = vmatprep.subr.bf16.mxu1 %v8375_v42  ;;  %12499 = vst [vmem:[#allocation69_spill] sm:$0xff] %v8531_v21 }
  0x65   :  { %7079 = vmatmul.mubr.msk.bf16.gmra.mrb[20].mxu0 %vm163_vm1, %v7583_v24 }
  0x66   :  { %7084 = vmatmul.mubr.msk.bf16.gmra.mrb[20].mxu1 %vm163_vm1, %v7583_v24  ;;  %1341 = vmatpush1.bf16.msra.mxu0 %v8381_v47  ;;  %v622_v24 = vld [vmem:[#allocation4 + $0x208] sm:$0xff] }
  0x67   :  { %1382 = vmatpush1.bf16.msra.mxu1 %v8383_v48  ;;  %1342 = vmatprep.subr.bf16.mxu0 %v8387_v49 }
  0x68   :  { %1383 = vmatprep.subr.bf16.mxu1 %v8389_v50  ;;  %399 = vmatprep.mubr.bf16.mxu0 %v11889_v0 }
  0x69   :  { %472 = vmatprep.mubr.bf16.mxu1 %v11889_v0 }
  0x6a   :  { %1343 = vmatpush1.bf16.msra.mxu0 %v8395_v55 }
  0x6b   :  { %1384 = vmatpush1.bf16.msra.mxu1 %v8397_v56  ;;  %1344 = vmatprep.subr.bf16.mxu0 %v8401_v57 }
  0x6c   :  { %1385 = vmatprep.subr.bf16.mxu1 %v8403_v58 }
  0x6d   :  { %7080 = vmatmul.mubr.msk.bf16.gmra.mrb[24].mxu0 %vm163_vm1, %v8336_v25 }
  0x6e   :  { %7085 = vmatmul.mubr.msk.bf16.gmra.mrb[24].mxu1 %vm163_vm1, %v8336_v25  ;;  %1345 = vmatpush1.bf16.msra.mxu0 %v8409_v63  ;;  %v626_v25 = vld [vmem:[#allocation4 + $0x228] sm:$0xff] }
  0x6f   :  { %1386 = vmatpush1.bf16.msra.mxu1 %v8411_v1  ;;  %1346 = vmatprep.subr.bf16.mxu0 %v8415_v2  ;;  %v8463_v30 = vcombine.high %v622_v24, %v626_v25  ;;  %v8471_v43 = vcombine.low %v622_v24, %v626_v25  ;;  %v658_v24 = vld [vmem:[#allocation4 + $0x328] sm:$0xff]  ;;  %v8505_v25 = vcombine.low %v645_v62, %v649_v4 }
  0x70   :  { %1387 = vmatprep.subr.bf16.mxu1 %v8417_v3  ;;  %409 = vmatprep.mubr.bf16.mxu0 %v11889_v0  ;;  %v8519_v62 = vcombine.low %v654_v22, %v658_v24 }
  0x71   :  { %482 = vmatprep.mubr.bf16.mxu1 %v11889_v0  ;;  %12477 = vst [vmem:[#allocation47_spill] sm:$0xff] %v8463_v30  ;;  %12479 = vst [vmem:[#allocation49_spill] sm:$0xff] %v8471_v43 }
  0x72   :  { %1347 = vmatpush1.bf16.msra.mxu0 %v8425_v8  ;;  %12490 = vst [vmem:[#allocation60_spill] sm:$0xff] %v8505_v25  ;;  %12495 = vst [vmem:[#allocation65_spill] sm:$0xff] %v8519_v62 }
  0x73   :  { %1388 = vmatpush1.bf16.msra.mxu1 %v8427_v9  ;;  %1348 = vmatprep.subr.bf16.mxu0 %v8431_v10 }
  0x74   :  { %1389 = vmatprep.subr.bf16.mxu1 %v8433_v11 }
  0x75   :  { %7081 = vmatmul.mubr.msk.bf16.gmra.mrb[28].mxu0 %vm163_vm1, %v8347_v26 }
  0x76   :  { %7086 = vmatmul.mubr.msk.bf16.gmra.mrb[28].mxu1 %vm163_vm1, %v8347_v26  ;;  %1349 = vmatpush1.bf16.msra.mxu0 %v8439_v16  ;;  %v634_v26 = vld [vmem:[#allocation4 + $0x268] sm:$0xff] }
  0x77   :  { %1390 = vmatpush1.bf16.msra.mxu1 %v8441_v17  ;;  %1350 = vmatprep.subr.bf16.mxu0 %v8445_v18  ;;  %v8477_v45 = vcombine.high %v630_v37, %v634_v26  ;;  %v8483_v59 = vcombine.low %v630_v37, %v634_v26  ;;  %v8513_v37 = vcombine.high %v654_v22, %v658_v24  ;;  %v661_v26 = vld [vmem:[#allocation4 + $0x340] sm:$0xff] }
  0x78   :  { %1391 = vmatprep.subr.bf16.mxu1 %v8447_v19  ;;  %1368 = vmatprep.mubr.bf16.mxu0 %v11889_v0  ;;  %v8523_v4 = vcombine.high %v661_v26, %v665_v46  ;;  %v8529_v15 = vcombine.low %v661_v26, %v665_v46 }
  0x79   :  { %1409 = vmatprep.mubr.bf16.mxu1 %v11889_v0  ;;  %12481 = vst [vmem:[#allocation51_spill] sm:$0xff] %v8477_v45  ;;  %12483 = vst [vmem:[#allocation53_spill] sm:$0xff] %v8483_v59  ;;  %v673_v0 = vld [vmem:[#allocation4 + $0x3a0] sm:$0xff] }
  0x7a   :  { %1351 = vmatpush1.bf16.msra.mxu0 %v8455_v27  ;;  %12493 = vst [vmem:[#allocation63_spill] sm:$0xff] %v8513_v37  ;;  %12496 = vst [vmem:[#allocation66_spill] sm:$0xff] %v8523_v4  ;;  %v8535_v22 = vcombine.high %v669_v6, %v673_v0  ;;  %v8541_v26 = vcombine.low %v669_v6, %v673_v0 }
  0x7b   :  { %1392 = vmatpush1.bf16.msra.mxu1 %v8457_v28  ;;  %1352 = vmatprep.subr.bf16.mxu0 %v8461_v29  ;;  %12498 = vst [vmem:[#allocation68_spill] sm:$0xff] %v8529_v15 }
  0x7c   :  { %1393 = vmatprep.subr.bf16.mxu1 %v8463_v30  ;;  %12500 = vst [vmem:[#allocation70_spill] sm:$0xff] %v8535_v22  ;;  %12502 = vst [vmem:[#allocation72_spill] sm:$0xff] %v8541_v26 }
  0x7e   :  { %1353 = vmatpush1.bf16.msra.mxu0 %v8469_v38 }
  0x7f   :  { %1394 = vmatpush1.bf16.msra.mxu1 %v8471_v43  ;;  %1354 = vmatprep.subr.bf16.mxu0 %v8475_v44 }
  0x80   :  { %1395 = vmatprep.subr.bf16.mxu1 %v8477_v45 }
  0x82   :  { %1355 = vmatpush1.bf16.msra.mxu0 %v8481_v54 }
  0x83   :  { %1396 = vmatpush1.bf16.msra.mxu1 %v8483_v59  ;;  %1356 = vmatprep.subr.bf16.mxu0 %v8487_v60 }
  0x84   :  { %1397 = vmatprep.subr.bf16.mxu1 %v8489_v61 }
  0x86   :  { %1357 = vmatpush1.bf16.msra.mxu0 %v8493_v7 }
  0x87   :  { %1398 = vmatpush1.bf16.msra.mxu1 %v8495_v12  ;;  %1358 = vmatprep.subr.bf16.mxu0 %v8499_v13  ;;  %v674_v13 = vld [vmem:[#allocation4 + $0x3a8] sm:$0xff]  ;;  %v12514_v12 = vmov 0  }
  0x88   :  { %1399 = vmatprep.subr.bf16.mxu1 %v8501_v14  ;;  %v670_v14 = vld [vmem:[#allocation4 + $0x388] sm:$0xff] }
  0x89   :  { %v8537_v24 = vcombine.high %v670_v14, %v674_v13  ;;  %v8543_v46 = vcombine.low %v670_v14, %v674_v13 }
  0x8a   :  { %1359 = vmatpush1.bf16.msra.mxu0 %v8505_v25  ;;  %v682_v25 = vld [vmem:[#allocation4 + $0x3e8] sm:$0xff] }
  0x8b   :  { %1400 = vmatpush1.bf16.msra.mxu1 %v8507_v35  ;;  %1360 = vmatprep.subr.bf16.mxu0 %v8511_v36  ;;  %12501 = vst [vmem:[#allocation71_spill] sm:$0xff] %v8537_v24  ;;  %v681_v36 = vld [vmem:[#allocation4 + $0x3e0] sm:$0xff]  ;;  %v678_v35 = vld [vmem:[#allocation4 + $0x3c8] sm:$0xff]  ;;  %12503 = vst [vmem:[#allocation73_spill] sm:$0xff] %v8543_v46 }
  0x8c   :  { %1401 = vmatprep.subr.bf16.mxu1 %v8513_v37  ;;  %v677_v37 = vld [vmem:[#allocation4 + $0x3c0] sm:$0xff]  ;;  %v8549_v52 = vcombine.high %v678_v35, %v682_v25  ;;  %v8555_v13 = vcombine.low %v678_v35, %v682_v25 }
  0x8d   :  { %v8547_v51 = vcombine.high %v677_v37, %v681_v36  ;;  %v8553_v0 = vcombine.low %v677_v37, %v681_v36 }
  0x8e   :  { %1361 = vmatpush1.bf16.msra.mxu0 %v8517_v53  ;;  %12505 = vst [vmem:[#allocation75_spill] sm:$0xff] %v8549_v52  ;;  %v564_v53 = vld [vmem:[#allocation4 + $0x38] sm:$0xff]  ;;  %12507 = vst [vmem:[#allocation77_spill] sm:$0xff] %v8555_v13 }
  0x8f   :  { %1402 = vmatpush1.bf16.msra.mxu1 %v8519_v62  ;;  %1362 = vmatprep.subr.bf16.mxu0 %v8523_v4  ;;  %12504 = vst [vmem:[#allocation74_spill] sm:$0xff] %v8547_v51  ;;  %v563_v4 = vld [vmem:[#allocation4 + $0x30] sm:$0xff]  ;;  %v560_v62 = vld [vmem:[#allocation4 + $0x18] sm:$0xff]  ;;  %12506 = vst [vmem:[#allocation76_spill] sm:$0xff] %v8553_v0 }
  0x90   :  { %1403 = vmatprep.subr.bf16.mxu1 %v8525_v5  ;;  %v559_v5 = vld [vmem:[#allocation4 + $0x10] sm:$0xff]  ;;  %v8561_v6 = vcombine.high %v560_v62, %v564_v53  ;;  %v8567_v25 = vcombine.low %v560_v62, %v564_v53 }
  0x91   :  { %v8559_v14 = vcombine.high %v559_v5, %v563_v4  ;;  %v8565_v36 = vcombine.low %v559_v5, %v563_v4 }
  0x92   :  { %1363 = vmatpush1.bf16.msra.mxu0 %v8529_v15  ;;  %12509 = vst [vmem:[#allocation79_spill] sm:$0xff] %v8561_v6  ;;  %v572_v15 = vld [vmem:[#allocation4 + $0x78] sm:$0xff]  ;;  %12511 = vst [vmem:[#allocation81_spill] sm:$0xff] %v8567_v25 }
  0x93   :  { %1404 = vmatpush1.bf16.msra.mxu1 %v8531_v21  ;;  %1364 = vmatprep.subr.bf16.mxu0 %v8535_v22  ;;  %12508 = vst [vmem:[#allocation78_spill] sm:$0xff] %v8559_v14  ;;  %v571_v22 = vld [vmem:[#allocation4 + $0x70] sm:$0xff]  ;;  %v568_v21 = vld [vmem:[#allocation4 + $0x58] sm:$0xff]  ;;  %12510 = vst [vmem:[#allocation80_spill] sm:$0xff] %v8565_v36 }
  0x94   :  { %1405 = vmatprep.subr.bf16.mxu1 %v8537_v24  ;;  %v567_v24 = vld [vmem:[#allocation4 + $0x50] sm:$0xff]  ;;  %v8573_v37 = vcombine.high %v568_v21, %v572_v15  ;;  %v8581_v62 = vcombine.low %v568_v21, %v572_v15 }
  0x95   :  { %v8571_v35 = vcombine.high %v567_v24, %v571_v22  ;;  %v8579_v53 = vcombine.low %v567_v24, %v571_v22 }
  0x96   :  { %1365 = vmatpush1.bf16.msra.mxu0 %v8541_v26  ;;  %12513 = vst [vmem:[#allocation83_spill] sm:$0xff] %v8573_v37  ;;  %v580_v26 = vld [vmem:[#allocation4 + $0xb8] sm:$0xff]  ;;  %12516 = vst [vmem:[#allocation85_spill] sm:$0xff] %v8581_v62 }
  0x97   :  { %1406 = vmatpush1.bf16.msra.mxu1 %v8543_v46  ;;  %1366 = vmatprep.subr.bf16.mxu0 %v8547_v51  ;;  %12512 = vst [vmem:[#allocation82_spill] sm:$0xff] %v8571_v35  ;;  %v579_v51 = vld [vmem:[#allocation4 + $0xb0] sm:$0xff]  ;;  %v576_v46 = vld [vmem:[#allocation4 + $0x98] sm:$0xff]  ;;  %12515 = vst [vmem:[#allocation84_spill] sm:$0xff] %v8579_v53 }
  0x98   :  { %1407 = vmatprep.subr.bf16.mxu1 %v8549_v52  ;;  %v575_v52 = vld [vmem:[#allocation4 + $0x90] sm:$0xff]  ;;  %v8587_v5 = vcombine.high %v576_v46, %v580_v26  ;;  %v8595_v21 = vcombine.low %v576_v46, %v580_v26 }
  0x99   :  { %v8585_v4 = vcombine.high %v575_v52, %v579_v51  ;;  %v8593_v15 = vcombine.low %v575_v52, %v579_v51 }
  0x9a   :  { %1367 = vmatpush1.bf16.msra.mxu0 %v8553_v0  ;;  %12518 = vst [vmem:[#allocation87_spill] sm:$0xff] %v8587_v5  ;;  %v588_v0 = vld [vmem:[#allocation4 + $0xf8] sm:$0xff]  ;;  %12520 = vst [vmem:[#allocation89_spill] sm:$0xff] %v8595_v21 }
  0x9b   :  { %1408 = vmatpush1.bf16.msra.mxu1 %v8555_v13  ;;  %1418 = vmatprep.subr.bf16.mxu0 %v8559_v14  ;;  %12517 = vst [vmem:[#allocation86_spill] sm:$0xff] %v8585_v4  ;;  %v587_v14 = vld [vmem:[#allocation4 + $0xf0] sm:$0xff]  ;;  %v584_v13 = vld [vmem:[#allocation4 + $0xd8] sm:$0xff]  ;;  %12519 = vst [vmem:[#allocation88_spill] sm:$0xff] %v8593_v15 }
  0x9c   :  { %1459 = vmatprep.subr.bf16.mxu1 %v8561_v6  ;;  %v583_v6 = vld [vmem:[#allocation4 + $0xd0] sm:$0xff]  ;;  %v8601_v24 = vcombine.high %v584_v13, %v588_v0  ;;  %v8607_v26 = vcombine.low %v584_v13, %v588_v0 }
  0x9d   :  { %1369 = vmatmul.mubr.bf16.vlgmr.msra.gmra.mrb[32].mxu0 %v12514_v12  ;;  %v8599_v22 = vcombine.high %v583_v6, %v587_v14  ;;  %v8605_v51 = vcombine.low %v583_v6, %v587_v14 }
  0x9e   :  { %1410 = vmatmul.mubr.bf16.vlgmr.msra.gmra.mrb[32].mxu1 %v12514_v12  ;;  %1419 = vmatpush1.bf16.msra.mxu0 %v8565_v36  ;;  %12522 = vst [vmem:[#allocation91_spill] sm:$0xff] %v8601_v24  ;;  %v596_v36 = vld [vmem:[#allocation4 + $0x138] sm:$0xff]  ;;  %12524 = vst [vmem:[#allocation93_spill] sm:$0xff] %v8607_v26 }
  0x9f   :  { %1460 = vmatpush1.bf16.msra.mxu1 %v8567_v25  ;;  %1420 = vmatprep.subr.bf16.mxu0 %v8571_v35  ;;  %12521 = vst [vmem:[#allocation90_spill] sm:$0xff] %v8599_v22  ;;  %v595_v35 = vld [vmem:[#allocation4 + $0x130] sm:$0xff]  ;;  %v592_v25 = vld [vmem:[#allocation4 + $0x118] sm:$0xff]  ;;  %12523 = vst [vmem:[#allocation92_spill] sm:$0xff] %v8605_v51 }
  0xa0   :  { %1461 = vmatprep.subr.bf16.mxu1 %v8573_v37  ;;  %1450 = vmatprep.mubr.bf16.mxu0 %v12514_v12  ;;  %v591_v37 = vld [vmem:[#allocation4 + $0x110] sm:$0xff]  ;;  %v8613_v52 = vcombine.high %v592_v25, %v596_v36  ;;  %v8619_v0 = vcombine.low %v592_v25, %v596_v36 }
  0xa1   :  { %1491 = vmatprep.mubr.bf16.mxu1 %v12514_v12  ;;  %v8611_v46 = vcombine.high %v591_v37, %v595_v35  ;;  %v8617_v14 = vcombine.low %v591_v37, %v595_v35 }
  0xa2   :  { %1421 = vmatpush1.bf16.msra.mxu0 %v8579_v53  ;;  %12526 = vst [vmem:[#allocation95_spill] sm:$0xff] %v8613_v52  ;;  %v604_v53 = vld [vmem:[#allocation4 + $0x178] sm:$0xff]  ;;  %12528 = vst [vmem:[#allocation97_spill] sm:$0xff] %v8619_v0 }
  0xa3   :  { %1462 = vmatpush1.bf16.msra.mxu1 %v8581_v62  ;;  %1422 = vmatprep.subr.bf16.mxu0 %v8585_v4  ;;  %12525 = vst [vmem:[#allocation94_spill] sm:$0xff] %v8611_v46  ;;  %v603_v4 = vld [vmem:[#allocation4 + $0x170] sm:$0xff]  ;;  %v600_v62 = vld [vmem:[#allocation4 + $0x158] sm:$0xff]  ;;  %12527 = vst [vmem:[#allocation96_spill] sm:$0xff] %v8617_v14 }
  0xa4   :  { %1463 = vmatprep.subr.bf16.mxu1 %v8587_v5  ;;  %v599_v5 = vld [vmem:[#allocation4 + $0x150] sm:$0xff]  ;;  %v8625_v6 = vcombine.high %v600_v62, %v604_v53  ;;  %v8631_v36 = vcombine.low %v600_v62, %v604_v53 }
  0xa5   :  { %v8623_v13 = vcombine.high %v599_v5, %v603_v4  ;;  %v8629_v35 = vcombine.low %v599_v5, %v603_v4 }
  0xa6   :  { %1423 = vmatpush1.bf16.msra.mxu0 %v8593_v15  ;;  %12530 = vst [vmem:[#allocation99_spill] sm:$0xff] %v8625_v6  ;;  %v612_v15 = vld [vmem:[#allocation4 + $0x1b8] sm:$0xff]  ;;  %12532 = vst [vmem:[#allocation101_spill] sm:$0xff] %v8631_v36 }
  0xa7   :  { %1464 = vmatpush1.bf16.msra.mxu1 %v8595_v21  ;;  %1424 = vmatprep.subr.bf16.mxu0 %v8599_v22  ;;  %12529 = vst [vmem:[#allocation98_spill] sm:$0xff] %v8623_v13  ;;  %v611_v22 = vld [vmem:[#allocation4 + $0x1b0] sm:$0xff]  ;;  %v608_v21 = vld [vmem:[#allocation4 + $0x198] sm:$0xff]  ;;  %12531 = vst [vmem:[#allocation100_spill] sm:$0xff] %v8629_v35 }
  0xa8   :  { %1465 = vmatprep.subr.bf16.mxu1 %v8601_v24  ;;  %v607_v24 = vld [vmem:[#allocation4 + $0x190] sm:$0xff]  ;;  %v8637_v37 = vcombine.high %v608_v21, %v612_v15  ;;  %v8643_v53 = vcombine.low %v608_v21, %v612_v15 }
  0xa9   :  { %v8635_v25 = vcombine.high %v607_v24, %v611_v22  ;;  %v8641_v4 = vcombine.low %v607_v24, %v611_v22 }
  0xaa   :  { %1425 = vmatpush1.bf16.msra.mxu0 %v8605_v51  ;;  %12534 = vst [vmem:[#allocation103_spill] sm:$0xff] %v8637_v37  ;;  %v620_v51 = vld [vmem:[#allocation4 + $0x1f8] sm:$0xff]  ;;  %12536 = vst [vmem:[#allocation105_spill] sm:$0xff] %v8643_v53 }
  0xab   :  { %1466 = vmatpush1.bf16.msra.mxu1 %v8607_v26  ;;  %1426 = vmatprep.subr.bf16.mxu0 %v8611_v46  ;;  %12533 = vst [vmem:[#allocation102_spill] sm:$0xff] %v8635_v25  ;;  %v619_v46 = vld [vmem:[#allocation4 + $0x1f0] sm:$0xff]  ;;  %v616_v26 = vld [vmem:[#allocation4 + $0x1d8] sm:$0xff]  ;;  %12535 = vst [vmem:[#allocation104_spill] sm:$0xff] %v8641_v4 }
  0xac   :  { %1467 = vmatprep.subr.bf16.mxu1 %v8613_v52  ;;  %v615_v52 = vld [vmem:[#allocation4 + $0x1d0] sm:$0xff]  ;;  %v8649_v5 = vcombine.high %v616_v26, %v620_v51  ;;  %v8655_v15 = vcombine.low %v616_v26, %v620_v51 }
  0xad   :  { %v8647_v62 = vcombine.high %v615_v52, %v619_v46  ;;  %v8653_v22 = vcombine.low %v615_v52, %v619_v46 }
  0xae   :  { %1427 = vmatpush1.bf16.msra.mxu0 %v8617_v14  ;;  %12538 = vst [vmem:[#allocation107_spill] sm:$0xff] %v8649_v5  ;;  %v628_v14 = vld [vmem:[#allocation4 + $0x238] sm:$0xff]  ;;  %12540 = vst [vmem:[#allocation109_spill] sm:$0xff] %v8655_v15 }
  0xaf   :  { %1468 = vmatpush1.bf16.msra.mxu1 %v8619_v0  ;;  %1428 = vmatprep.subr.bf16.mxu0 %v8623_v13  ;;  %12537 = vst [vmem:[#allocation106_spill] sm:$0xff] %v8647_v62  ;;  %v627_v13 = vld [vmem:[#allocation4 + $0x230] sm:$0xff]  ;;  %v624_v0 = vld [vmem:[#allocation4 + $0x218] sm:$0xff]  ;;  %12539 = vst [vmem:[#allocation108_spill] sm:$0xff] %v8653_v22 }
  0xb0   :  { %1469 = vmatprep.subr.bf16.mxu1 %v8625_v6  ;;  %v623_v6 = vld [vmem:[#allocation4 + $0x210] sm:$0xff]  ;;  %v8661_v24 = vcombine.high %v624_v0, %v628_v14  ;;  %v8667_v51 = vcombine.low %v624_v0, %v628_v14 }
  0xb1   :  { %v8659_v21 = vcombine.high %v623_v6, %v627_v13  ;;  %v8665_v46 = vcombine.low %v623_v6, %v627_v13 }
  0xb2   :  { %1429 = vmatpush1.bf16.msra.mxu0 %v8629_v35  ;;  %12542 = vst [vmem:[#allocation111_spill] sm:$0xff] %v8661_v24  ;;  %v636_v35 = vld [vmem:[#allocation4 + $0x278] sm:$0xff]  ;;  %12544 = vst [vmem:[#allocation113_spill] sm:$0xff] %v8667_v51 }
  0xb3   :  { %1470 = vmatpush1.bf16.msra.mxu1 %v8631_v36  ;;  %1430 = vmatprep.subr.bf16.mxu0 %v8635_v25  ;;  %12541 = vst [vmem:[#allocation110_spill] sm:$0xff] %v8659_v21  ;;  %v635_v25 = vld [vmem:[#allocation4 + $0x270] sm:$0xff]  ;;  %v632_v36 = vld [vmem:[#allocation4 + $0x258] sm:$0xff]  ;;  %12543 = vst [vmem:[#allocation112_spill] sm:$0xff] %v8665_v46 }
  0xb4   :  { %1471 = vmatprep.subr.bf16.mxu1 %v8637_v37  ;;  %v631_v37 = vld [vmem:[#allocation4 + $0x250] sm:$0xff]  ;;  %v8673_v52 = vcombine.high %v632_v36, %v636_v35  ;;  %v8679_v14 = vcombine.low %v632_v36, %v636_v35 }
  0xb5   :  { %v8671_v26 = vcombine.high %v631_v37, %v635_v25  ;;  %v8677_v13 = vcombine.low %v631_v37, %v635_v25 }
  0xb6   :  { %1431 = vmatpush1.bf16.msra.mxu0 %v8641_v4  ;;  %12546 = vst [vmem:[#allocation115_spill] sm:$0xff] %v8673_v52  ;;  %v644_v4 = vld [vmem:[#allocation4 + $0x2b8] sm:$0xff]  ;;  %12548 = vst [vmem:[#allocation117_spill] sm:$0xff] %v8679_v14 }
  0xb7   :  { %1472 = vmatpush1.bf16.msra.mxu1 %v8643_v53  ;;  %1432 = vmatprep.subr.bf16.mxu0 %v8647_v62  ;;  %12545 = vst [vmem:[#allocation114_spill] sm:$0xff] %v8671_v26  ;;  %v643_v62 = vld [vmem:[#allocation4 + $0x2b0] sm:$0xff]  ;;  %v640_v53 = vld [vmem:[#allocation4 + $0x298] sm:$0xff]  ;;  %12547 = vst [vmem:[#allocation116_spill] sm:$0xff] %v8677_v13 }
  0xb8   :  { %1473 = vmatprep.subr.bf16.mxu1 %v8649_v5  ;;  %v639_v5 = vld [vmem:[#allocation4 + $0x290] sm:$0xff]  ;;  %v8685_v6 = vcombine.high %v640_v53, %v644_v4  ;;  %v8691_v35 = vcombine.low %v640_v53, %v644_v4 }
  0xb9   :  { %v8683_v0 = vcombine.high %v639_v5, %v643_v62  ;;  %v8689_v25 = vcombine.low %v639_v5, %v643_v62 }
  0xba   :  { %1433 = vmatpush1.bf16.msra.mxu0 %v8653_v22  ;;  %12550 = vst [vmem:[#allocation119_spill] sm:$0xff] %v8685_v6  ;;  %v652_v22 = vld [vmem:[#allocation4 + $0x2f8] sm:$0xff]  ;;  %12552 = vst [vmem:[#allocation121_spill] sm:$0xff] %v8691_v35 }
  0xbb   :  { %1474 = vmatpush1.bf16.msra.mxu1 %v8655_v15  ;;  %1434 = vmatprep.subr.bf16.mxu0 %v8659_v21  ;;  %12549 = vst [vmem:[#allocation118_spill] sm:$0xff] %v8683_v0  ;;  %v651_v21 = vld [vmem:[#allocation4 + $0x2f0] sm:$0xff]  ;;  %v648_v15 = vld [vmem:[#allocation4 + $0x2d8] sm:$0xff]  ;;  %12551 = vst [vmem:[#allocation120_spill] sm:$0xff] %v8689_v25 }
  0xbc   :  { %1475 = vmatprep.subr.bf16.mxu1 %v8661_v24  ;;  %v647_v24 = vld [vmem:[#allocation4 + $0x2d0] sm:$0xff]  ;;  %v8697_v37 = vcombine.high %v648_v15, %v652_v22  ;;  %v8703_v4 = vcombine.low %v648_v15, %v652_v22 }
  0xbd   :  { %v8695_v36 = vcombine.high %v647_v24, %v651_v21  ;;  %v8701_v62 = vcombine.low %v647_v24, %v651_v21 }
  0xbe   :  { %1435 = vmatpush1.bf16.msra.mxu0 %v8665_v46  ;;  %12554 = vst [vmem:[#allocation123_spill] sm:$0xff] %v8697_v37  ;;  %v660_v46 = vld [vmem:[#allocation4 + $0x338] sm:$0xff]  ;;  %12556 = vst [vmem:[#allocation125_spill] sm:$0xff] %v8703_v4 }
  0xbf   :  { %1476 = vmatpush1.bf16.msra.mxu1 %v8667_v51  ;;  %1436 = vmatprep.subr.bf16.mxu0 %v8671_v26  ;;  %12553 = vst [vmem:[#allocation122_spill] sm:$0xff] %v8695_v36  ;;  %v659_v26 = vld [vmem:[#allocation4 + $0x330] sm:$0xff]  ;;  %v656_v51 = vld [vmem:[#allocation4 + $0x318] sm:$0xff]  ;;  %12555 = vst [vmem:[#allocation124_spill] sm:$0xff] %v8701_v62 }
  0xc0   :  { %1477 = vmatprep.subr.bf16.mxu1 %v8673_v52  ;;  %v655_v52 = vld [vmem:[#allocation4 + $0x310] sm:$0xff]  ;;  %v8709_v5 = vcombine.high %v656_v51, %v660_v46  ;;  %v8715_v22 = vcombine.low %v656_v51, %v660_v46 }
  0xc1   :  { %v8707_v53 = vcombine.high %v655_v52, %v659_v26  ;;  %v8713_v21 = vcombine.low %v655_v52, %v659_v26 }
  0xc2   :  { %1437 = vmatpush1.bf16.msra.mxu0 %v8677_v13  ;;  %12558 = vst [vmem:[#allocation127_spill] sm:$0xff] %v8709_v5  ;;  %v668_v13 = vld [vmem:[#allocation4 + $0x378] sm:$0xff]  ;;  %12560 = vst [vmem:[#allocation129_spill] sm:$0xff] %v8715_v22 }
  0xc3   :  { %1478 = vmatpush1.bf16.msra.mxu1 %v8679_v14  ;;  %1438 = vmatprep.subr.bf16.mxu0 %v8683_v0  ;;  %12557 = vst [vmem:[#allocation126_spill] sm:$0xff] %v8707_v53  ;;  %v667_v0 = vld [vmem:[#allocation4 + $0x370] sm:$0xff]  ;;  %v664_v14 = vld [vmem:[#allocation4 + $0x358] sm:$0xff]  ;;  %12559 = vst [vmem:[#allocation128_spill] sm:$0xff] %v8713_v21 }
  0xc4   :  { %1479 = vmatprep.subr.bf16.mxu1 %v8685_v6  ;;  %v663_v6 = vld [vmem:[#allocation4 + $0x350] sm:$0xff]  ;;  %v8721_v24 = vcombine.high %v664_v14, %v668_v13  ;;  %v8727_v46 = vcombine.low %v664_v14, %v668_v13 }
  0xc5   :  { %v8719_v15 = vcombine.high %v663_v6, %v667_v0  ;;  %v8725_v26 = vcombine.low %v663_v6, %v667_v0 }
  0xc6   :  { %1439 = vmatpush1.bf16.msra.mxu0 %v8689_v25  ;;  %12562 = vst [vmem:[#allocation131_spill] sm:$0xff] %v8721_v24  ;;  %v676_v25 = vld [vmem:[#allocation4 + $0x3b8] sm:$0xff]  ;;  %12564 = vst [vmem:[#allocation133_spill] sm:$0xff] %v8727_v46 }
  0xc7   :  { %1480 = vmatpush1.bf16.msra.mxu1 %v8691_v35  ;;  %1440 = vmatprep.subr.bf16.mxu0 %v8695_v36  ;;  %12561 = vst [vmem:[#allocation130_spill] sm:$0xff] %v8719_v15  ;;  %v675_v36 = vld [vmem:[#allocation4 + $0x3b0] sm:$0xff]  ;;  %v672_v35 = vld [vmem:[#allocation4 + $0x398] sm:$0xff]  ;;  %12563 = vst [vmem:[#allocation132_spill] sm:$0xff] %v8725_v26 }
  0xc8   :  { %1481 = vmatprep.subr.bf16.mxu1 %v8697_v37  ;;  %v671_v37 = vld [vmem:[#allocation4 + $0x390] sm:$0xff]  ;;  %v8733_v52 = vcombine.high %v672_v35, %v676_v25  ;;  %v8739_v13 = vcombine.low %v672_v35, %v676_v25  ;;  %v83_v25 = vlaneseq  ;;  %v12573_v35 = vld [vmem:[#allocation57_spill] sm:$0xff] }
  0xc9   :  { %v8731_v51 = vcombine.high %v671_v37, %v675_v36  ;;  %v8737_v0 = vcombine.low %v671_v37, %v675_v36  ;;  %v12574_v36 = vld [vmem:[#allocation58_spill] sm:$0xff]  ;;  %v12575_v37 = vld [vmem:[#allocation59_spill] sm:$0xff] }
  0xca   :  { %1441 = vmatpush1.bf16.msra.mxu0 %v8701_v62  ;;  %12566 = vst [vmem:[#allocation135_spill] sm:$0xff] %v8733_v52  ;;  %v684_v62 = vld [vmem:[#allocation4 + $0x3f8] sm:$0xff]  ;;  %12568 = vst [vmem:[#allocation137_spill] sm:$0xff] %v8739_v13 }
  0xcb   :  { %1482 = vmatpush1.bf16.msra.mxu1 %v8703_v4  ;;  %1442 = vmatprep.subr.bf16.mxu0 %v8707_v53  ;;  %12565 = vst [vmem:[#allocation134_spill] sm:$0xff] %v8731_v51  ;;  %v683_v53 = vld [vmem:[#allocation4 + $0x3f0] sm:$0xff]  ;;  %v680_v4 = vld [vmem:[#allocation4 + $0x3d8] sm:$0xff]  ;;  %12567 = vst [vmem:[#allocation136_spill] sm:$0xff] %v8737_v0 }
  0xcc   :  { %1483 = vmatprep.subr.bf16.mxu1 %v8709_v5  ;;  %v679_v5 = vld [vmem:[#allocation4 + $0x3d0] sm:$0xff]  ;;  %v8745_v6 = vcombine.high %v680_v4, %v684_v62 }
  0xcd   :  { %v8743_v14 = vcombine.high %v679_v5, %v683_v53 }
  0xce   :  { %1443 = vmatpush1.bf16.msra.mxu0 %v8713_v21  ;;  %12570 = vst [vmem:[#allocation139_spill] sm:$0xff] %v8745_v6 }
  0xcf   :  { %1484 = vmatpush1.bf16.msra.mxu1 %v8715_v22  ;;  %1444 = vmatprep.subr.bf16.mxu0 %v8719_v15  ;;  %12569 = vst [vmem:[#allocation138_spill] sm:$0xff] %v8743_v14 }
  0xd0   :  { %1485 = vmatprep.subr.bf16.mxu1 %v8721_v24  ;;  %v8749_v24 = vcombine.low %v679_v5, %v683_v53  ;;  %v12578_v53 = vld [vmem:[#allocation61_spill] sm:$0xff]  ;;  %v12579_v5 = vld [vmem:[#allocation62_spill] sm:$0xff] }
  0xd2   :  { %1445 = vmatpush1.bf16.msra.mxu0 %v8725_v26  ;;  %12571 = vst [vmem:[#allocation140_spill] sm:$0xff] %v8749_v24  ;;  %v8751_v26 = vcombine.low %v680_v4, %v684_v62  ;;  %v8805_v62 = vshrl.u32 %v83_v25, 7  ;;  %v12577_v4 = vld [vmem:[#allocation60_spill] sm:$0xff] }
  0xd3   :  { %1486 = vmatpush1.bf16.msra.mxu1 %v8727_v46  ;;  %1446 = vmatprep.subr.bf16.mxu0 %v8731_v51 }
  0xd4   :  { %1487 = vmatprep.subr.bf16.mxu1 %v8733_v52  ;;  %12572 = vst [vmem:[#allocation141_spill] sm:$0xff] %v8751_v26  ;;  %12576 = vst [vmem:[#allocation142_spill] sm:$0xff] %v8805_v62  ;;  %v12586_v25 = vsub.s32 2, %v8805_v62 }
  0xd6   :  { %1447 = vmatpush1.bf16.msra.mxu0 %v8737_v0 }
  0xd7   :  { %1488 = vmatpush1.bf16.msra.mxu1 %v8739_v13  ;;  %1448 = vmatprep.subr.bf16.mxu0 %v8743_v14 }
  0xd8   :  { %1489 = vmatprep.subr.bf16.mxu1 %v8745_v6 }
  0xda   :  { %1449 = vmatpush1.bf16.msra.mxu0 %v8749_v24 }
  0xdb   :  { %1490 = vmatpush1.bf16.msra.mxu1 %v8751_v26  ;;  %1574 = vmatprep.subr.bf16.mxu0 %v8316_v20 }
  0xdc   :  { %1615 = vmatprep.subr.bf16.mxu1 %v8320_v23 }
  0xdd   :  { %1451 = vmatmul.mubr.bf16.vlgmr.msra.gmra.mrb[36].mxu0 %v12514_v12 }
  0xde   :  { %1492 = vmatmul.mubr.bf16.vlgmr.msra.gmra.mrb[36].mxu1 %v12514_v12  ;;  %1575 = vmatpush1.bf16.msra.mxu0 %v8355_v31  ;;  %v12580_v12 = vld [vmem:[#allocation63_spill] sm:$0xff] }
  0xdf   :  { %1616 = vmatpush1.bf16.msra.mxu1 %v8357_v32  ;;  %1576 = vmatprep.subr.bf16.mxu0 %v8359_v33 }
  0xe0   :  { %1617 = vmatprep.subr.bf16.mxu1 %v8361_v34 }
  0xe2   :  { %1577 = vmatpush1.bf16.msra.mxu0 %v8367_v39 }
  0xe3   :  { %1618 = vmatpush1.bf16.msra.mxu1 %v8369_v40  ;;  %1578 = vmatprep.subr.bf16.mxu0 %v8373_v41 }
  0xe4   :  { %1619 = vmatprep.subr.bf16.mxu1 %v8375_v42 }
  0xe6   :  { %1579 = vmatpush1.bf16.msra.mxu0 %v8381_v47 }
  0xe7   :  { %1620 = vmatpush1.bf16.msra.mxu1 %v8383_v48  ;;  %1580 = vmatprep.subr.bf16.mxu0 %v8387_v49 }
  0xe8   :  { %1621 = vmatprep.subr.bf16.mxu1 %v8389_v50 }
  0xea   :  { %1581 = vmatpush1.bf16.msra.mxu0 %v8395_v55 }
  0xeb   :  { %1622 = vmatpush1.bf16.msra.mxu1 %v8397_v56  ;;  %1582 = vmatprep.subr.bf16.mxu0 %v8401_v57 }
  0xec   :  { %1623 = vmatprep.subr.bf16.mxu1 %v8403_v58 }
  0xee   :  { %1583 = vmatpush1.bf16.msra.mxu0 %v8409_v63 }
  0xef   :  { %1624 = vmatpush1.bf16.msra.mxu1 %v8411_v1  ;;  %1584 = vmatprep.subr.bf16.mxu0 %v8415_v2 }
  0xf0   :  { %1625 = vmatprep.subr.bf16.mxu1 %v8417_v3 }
  0xf2   :  { %1585 = vmatpush1.bf16.msra.mxu0 %v8425_v8 }
  0xf3   :  { %1626 = vmatpush1.bf16.msra.mxu1 %v8427_v9  ;;  %1586 = vmatprep.subr.bf16.mxu0 %v8431_v10 }
  0xf4   :  { %1627 = vmatprep.subr.bf16.mxu1 %v8433_v11 }
  0xf6   :  { %1587 = vmatpush1.bf16.msra.mxu0 %v8439_v16 }
  0xf7   :  { %1628 = vmatpush1.bf16.msra.mxu1 %v8441_v17  ;;  %1588 = vmatprep.subr.bf16.mxu0 %v8445_v18 }
  0xf8   :  { %1629 = vmatprep.subr.bf16.mxu1 %v8447_v19  ;;  %v12609_v19 = vld [vmem:[#allocation78_spill] sm:$0xff] }
  0xfa   :  { %1589 = vmatpush1.bf16.msra.mxu0 %v8455_v27 }
  0xfb   :  { %1630 = vmatpush1.bf16.msra.mxu1 %v8457_v28  ;;  %1590 = vmatprep.subr.bf16.mxu0 %v8461_v29  ;;  %v12593_v29 = vld [vmem:[#allocation70_spill] sm:$0xff]  ;;  %v12594_v28 = vld [vmem:[#allocation71_spill] sm:$0xff] }
  0xfc   :  { %1631 = vmatprep.subr.bf16.mxu1 %v8463_v30 }
  0xfe   :  { %1591 = vmatpush1.bf16.msra.mxu0 %v8469_v38 }
  0xff   :  { %1632 = vmatpush1.bf16.msra.mxu1 %v8471_v43  ;;  %1592 = vmatprep.subr.bf16.mxu0 %v8475_v44  ;;  %v12589_v44 = vld [vmem:[#allocation68_spill] sm:$0xff] }
 0x100   :  { %1633 = vmatprep.subr.bf16.mxu1 %v8477_v45 }
 0x102   :  { %1593 = vmatpush1.bf16.msra.mxu0 %v8481_v54 }
 0x103   :  { %1634 = vmatpush1.bf16.msra.mxu1 %v8483_v59  ;;  %1594 = vmatprep.subr.bf16.mxu0 %v8487_v60  ;;  %v12588_v59 = vsub.s32 3, %v8805_v62 }
 0x104   :  { %1635 = vmatprep.subr.bf16.mxu1 %v8489_v61 }
 0x106   :  { %1595 = vmatpush1.bf16.msra.mxu0 %v8493_v7 }
 0x107   :  { %1636 = vmatpush1.bf16.msra.mxu1 %v12573_v35  ;;  %1596 = vmatprep.subr.bf16.mxu0 %v12574_v36  ;;  %v8816_v36 = vld [vmem:[%s11884_s3] sm:$0xff]  ;;  %v12585_v35 = vsub.s32 0, %v8805_v62 }
 0x108   :  { %1637 = vmatprep.subr.bf16.mxu1 %v12575_v37  ;;  %v8836_v37 = vrot.slane %v8816_v36, %v12586_v25  ;;  %v8850_v54 = vrot.slane %v8816_v36, %v12588_v59  ;;  %v12590_v25 = vld [vmem:[#allocation69_spill] sm:$0xff] }
 0x109   :  { %v8831_v60 = vrot.slane %v8816_v36, %v12585_v35 }
 0x10a   :  { %1597 = vmatpush1.bf16.msra.mxu0 %v12577_v4  ;;  %v12581_v4 = vld [vmem:[#allocation64_spill] sm:$0xff] }
 0x10b   :  { %1638 = vmatpush1.bf16.msra.mxu1 %v12578_v53  ;;  %1598 = vmatprep.subr.bf16.mxu0 %v12579_v5  ;;  %v12582_v53 = vld [vmem:[#allocation65_spill] sm:$0xff]  ;;  %v12583_v5 = vld [vmem:[#allocation66_spill] sm:$0xff] }
 0x10c   :  { %1639 = vmatprep.subr.bf16.mxu1 %v12580_v12  ;;  %v12584_v12 = vld [vmem:[#allocation67_spill] sm:$0xff] }
 0x10e   :  { %1599 = vmatpush1.bf16.msra.mxu0 %v12581_v4 }
 0x10f   :  { %1640 = vmatpush1.bf16.msra.mxu1 %v12582_v53  ;;  %1600 = vmatprep.subr.bf16.mxu0 %v12583_v5 }
 0x110   :  { %1641 = vmatprep.subr.bf16.mxu1 %v12584_v12  ;;  %v8824_v61 = vpop.f32.mrb[0].mxu0  ;;  %v12587_v12 = vsub.s32 1, %v8805_v62 }
 0x111   :  { %v8826_v7 = vpop.f32.mrb[0].mxu1  ;;  %v8838_v4 = vpop.f32.mrb[1].mxu0 }
 0x112   :  { %v8840_v53 = vpop.f32.mrb[1].mxu1  ;;  %v8845_v5 = vrot.slane %v8816_v36, %v12587_v12  ;;  %v239_v35 = vpop.f32.mrb[2].mxu0  ;;  %1601 = vmatpush1.bf16.msra.mxu0 %v12589_v44  ;;  %v12597_v44 = vld [vmem:[#allocation72_spill] sm:$0xff] }
 0x113   :  { %v312_v45 = vpop.f32.mrb[2].mxu1  ;;  %1642 = vmatpush1.bf16.msra.mxu1 %v12590_v25  ;;  %v8855_v43 = vadd.f32 %v239_v35, %v8831_v60  ;;  %v241_v30 = vpop.f32.mrb[3].mxu0  ;;  %1602 = vmatprep.subr.bf16.mxu0 %v12593_v29  ;;  %v12598_v25 = vld [vmem:[#allocation73_spill] sm:$0xff]  ;;  %v12599_v35 = vld [vmem:[#allocation74_spill] sm:$0xff] }
 0x114   :  { %v8858_v38 = vadd.f32 %v312_v45, %v8836_v37  ;;  %v314_v12 = vpop.f32.mrb[3].mxu1  ;;  %1643 = vmatprep.subr.bf16.mxu1 %v12594_v28  ;;  %v8863_v59 = vadd.f32 %v241_v30, %v8845_v5  ;;  %v12600_v45 = vld [vmem:[#allocation75_spill] sm:$0xff] }
 0x115   :  { %12591 = vst [vmem:[#allocation143_spill] sm:$0xff] %v8855_v43  ;;  %v8866_v27 = vadd.f32 %v314_v12, %v8850_v54 }
 0x116   :  { %12592 = vst [vmem:[#allocation144_spill] sm:$0xff] %v8858_v38  ;;  %12595 = vst [vmem:[#allocation145_spill] sm:$0xff] %v8863_v59  ;;  %1603 = vmatpush1.bf16.msra.mxu0 %v12597_v44  ;;  %v12605_v44 = vld [vmem:[#allocation76_spill] sm:$0xff] }
 0x117   :  { %12596 = vst [vmem:[#allocation146_spill] sm:$0xff] %v8866_v27  ;;  %1644 = vmatpush1.bf16.msra.mxu1 %v12598_v25  ;;  %1604 = vmatprep.subr.bf16.mxu0 %v12599_v35 }
 0x118   :  { %1645 = vmatprep.subr.bf16.mxu1 %v12600_v45  ;;  %v245_v38 = vpop.f32.mrb[4].mxu0  ;;  %v12606_v45 = vld [vmem:[#allocation77_spill] sm:$0xff] }
 0x119   :  { %v318_v43 = vpop.f32.mrb[4].mxu1  ;;  %v8873_v29 = vadd.f32 %v245_v38, %v8831_v60  ;;  %v247_v30 = vpop.f32.mrb[5].mxu0 }
 0x11a   :  { %v8876_v28 = vadd.f32 %v318_v43, %v8836_v37  ;;  %v320_v59 = vpop.f32.mrb[5].mxu1  ;;  %v8879_v12 = vadd.f32 %v247_v30, %v8845_v5  ;;  %v249_v25 = vpop.f32.mrb[6].mxu0  ;;  %1605 = vmatpush1.bf16.msra.mxu0 %v12605_v44  ;;  %v12610_v30 = vld [vmem:[#allocation79_spill] sm:$0xff] }
 0x11b   :  { %12601 = vst [vmem:[#allocation147_spill] sm:$0xff] %v8873_v29  ;;  %v8882_v27 = vadd.f32 %v320_v59, %v8850_v54  ;;  %v322_v35 = vpop.f32.mrb[6].mxu1  ;;  %1646 = vmatpush1.bf16.msra.mxu1 %v12606_v45  ;;  %v8887_v38 = vadd.f32 %v249_v25, %v8831_v60  ;;  %1656 = vmatprep.subr.bf16.mxu0 %v12609_v19 }
 0x11c   :  { %12602 = vst [vmem:[#allocation148_spill] sm:$0xff] %v8876_v28  ;;  %12603 = vst [vmem:[#allocation149_spill] sm:$0xff] %v8879_v12  ;;  %v8890_v43 = vadd.f32 %v322_v35, %v8836_v37  ;;  %v251_v28 = vpop.f32.mrb[7].mxu0  ;;  %v324_v29 = vpop.f32.mrb[7].mxu1  ;;  %1697 = vmatprep.subr.bf16.mxu1 %v12610_v30 }
 0x11d   :  { %12604 = vst [vmem:[#allocation150_spill] sm:$0xff] %v8882_v27  ;;  %12607 = vst [vmem:[#allocation151_spill] sm:$0xff] %v8887_v38  ;;  %v8895_v59 = vadd.f32 %v251_v28, %v8845_v5  ;;  %v8898_v27 = vadd.f32 %v324_v29, %v8850_v54 }
 0x11e   :  { %12608 = vst [vmem:[#allocation152_spill] sm:$0xff] %v8890_v43 }
 0x11f   :  { %12611 = vst [vmem:[#allocation153_spill] sm:$0xff] %v8895_v59  ;;  %12612 = vst [vmem:[#allocation154_spill] sm:$0xff] %v8898_v27 }
 0x120   :  { %v255_v12 = vpop.f32.mrb[8].mxu0 }
 0x121   :  { %v328_v45 = vpop.f32.mrb[8].mxu1  ;;  %v8901_v25 = vadd.f32 %v255_v12, %v8831_v60  ;;  %v257_v43 = vpop.f32.mrb[9].mxu0 }
 0x122   :  { %v8904_v35 = vadd.f32 %v328_v45, %v8836_v37  ;;  %v330_v38 = vpop.f32.mrb[9].mxu1  ;;  %v8907_v19 = vadd.f32 %v257_v43, %v8845_v5  ;;  %v259_v28 = vpop.f32.mrb[10].mxu0 }
 0x123   :  { %12613 = vst [vmem:[#allocation155_spill] sm:$0xff] %v8901_v25  ;;  %v8910_v30 = vadd.f32 %v330_v38, %v8850_v54  ;;  %v332_v59 = vpop.f32.mrb[10].mxu1  ;;  %v8913_v29 = vadd.f32 %v259_v28, %v8831_v60  ;;  %v261_v12 = vpop.f32.mrb[11].mxu0 }
 0x124   :  { %12614 = vst [vmem:[#allocation156_spill] sm:$0xff] %v8904_v35  ;;  %12615 = vst [vmem:[#allocation157_spill] sm:$0xff] %v8907_v19  ;;  %v8916_v27 = vadd.f32 %v332_v59, %v8836_v37  ;;  %v334_v25 = vpop.f32.mrb[11].mxu1  ;;  %v8919_v45 = vadd.f32 %v261_v12, %v8845_v5 }
 0x125   :  { %12616 = vst [vmem:[#allocation158_spill] sm:$0xff] %v8910_v30  ;;  %12617 = vst [vmem:[#allocation159_spill] sm:$0xff] %v8913_v29  ;;  %v8922_v35 = vadd.f32 %v334_v25, %v8850_v54 }
 0x126   :  { %12618 = vst [vmem:[#allocation160_spill] sm:$0xff] %v8916_v27  ;;  %12619 = vst [vmem:[#allocation161_spill] sm:$0xff] %v8919_v45 }
 0x127   :  { %12620 = vst [vmem:[#allocation162_spill] sm:$0xff] %v8922_v35 }
 0x128   :  { %v265_v43 = vpop.f32.mrb[12].mxu0 }
 0x129   :  { %v338_v19 = vpop.f32.mrb[12].mxu1  ;;  %v8925_v38 = vadd.f32 %v265_v43, %v8831_v60  ;;  %v267_v28 = vpop.f32.mrb[13].mxu0 }
 0x12a   :  { %v8928_v30 = vadd.f32 %v338_v19, %v8836_v37  ;;  %v340_v29 = vpop.f32.mrb[13].mxu1  ;;  %v8931_v59 = vadd.f32 %v267_v28, %v8845_v5  ;;  %v269_v12 = vpop.f32.mrb[14].mxu0  ;;  %v12066_v28 = vsub.s32 4, %v8805_v62 }
 0x12b   :  { %12621 = vst [vmem:[#allocation163_spill] sm:$0xff] %v8925_v38  ;;  %v8934_v27 = vadd.f32 %v340_v29, %v8850_v54  ;;  %v342_v45 = vpop.f32.mrb[14].mxu1  ;;  %v8937_v25 = vadd.f32 %v269_v12, %v8831_v60  ;;  %v271_v43 = vpop.f32.mrb[15].mxu0  ;;  %v12069_v29 = vsub.s32 6, %v8805_v62 }
 0x12c   :  { %12622 = vst [vmem:[#allocation164_spill] sm:$0xff] %v8928_v30  ;;  %12623 = vst [vmem:[#allocation165_spill] sm:$0xff] %v8931_v59  ;;  %v8940_v35 = vadd.f32 %v342_v45, %v8836_v37  ;;  %v344_v38 = vpop.f32.mrb[15].mxu1  ;;  %v8943_v19 = vadd.f32 %v271_v43, %v8845_v5  ;;  %v8959_v43 = vrot.slane %v8816_v36, %v12066_v28 }
 0x12d   :  { %12624 = vst [vmem:[#allocation166_spill] sm:$0xff] %v8934_v27  ;;  %12625 = vst [vmem:[#allocation167_spill] sm:$0xff] %v8937_v25  ;;  %v8946_v30 = vadd.f32 %v344_v38, %v8850_v54  ;;  %v12076_v27 = vsub.s32 5, %v8805_v62  ;;  %v8964_v38 = vrot.slane %v8816_v36, %v12069_v29 }
 0x12e   :  { %12626 = vst [vmem:[#allocation168_spill] sm:$0xff] %v8940_v35  ;;  %12627 = vst [vmem:[#allocation169_spill] sm:$0xff] %v8943_v19  ;;  %v12629_v35 = vsub.s32 7, %v8805_v62 }
 0x12f   :  { %12628 = vst [vmem:[#allocation170_spill] sm:$0xff] %v8946_v30  ;;  %v8973_v12 = vrot.slane %v8816_v36, %v12076_v27 }
 0x130   :  { %v8952_v25 = vpop.f32.mrb[16].mxu0  ;;  %v8978_v59 = vrot.slane %v8816_v36, %v12629_v35 }
 0x131   :  { %v8954_v45 = vpop.f32.mrb[16].mxu1  ;;  %v8966_v30 = vpop.f32.mrb[17].mxu0 }
 0x132   :  { %v8968_v19 = vpop.f32.mrb[17].mxu1  ;;  %v385_v28 = vpop.f32.mrb[18].mxu0 }
 0x133   :  { %v458_v44 = vpop.f32.mrb[18].mxu1  ;;  %v8981_v18 = vadd.f32 %v385_v28, %v8959_v43  ;;  %v387_v17 = vpop.f32.mrb[19].mxu0 }
 0x134   :  { %v8984_v29 = vadd.f32 %v458_v44, %v8964_v38  ;;  %v460_v16 = vpop.f32.mrb[19].mxu1  ;;  %v8987_v11 = vadd.f32 %v387_v17, %v8973_v12 }
 0x135   :  { %12630 = vst [vmem:[#allocation171_spill] sm:$0xff] %v8981_v18  ;;  %v8990_v27 = vadd.f32 %v460_v16, %v8978_v59 }
 0x136   :  { %12631 = vst [vmem:[#allocation172_spill] sm:$0xff] %v8984_v29  ;;  %12632 = vst [vmem:[#allocation173_spill] sm:$0xff] %v8987_v11 }
 0x137   :  { %12633 = vst [vmem:[#allocation174_spill] sm:$0xff] %v8990_v27 }
 0x138   :  { %v391_v62 = vpop.f32.mrb[20].mxu0 }
 0x139   :  { %v464_v10 = vpop.f32.mrb[20].mxu1  ;;  %v8993_v36 = vadd.f32 %v391_v62, %v8959_v43  ;;  %v393_v28 = vpop.f32.mrb[21].mxu0 }
 0x13a   :  { %v8996_v35 = vadd.f32 %v464_v10, %v8964_v38  ;;  %v466_v18 = vpop.f32.mrb[21].mxu1  ;;  %v8999_v44 = vadd.f32 %v393_v28, %v8973_v12  ;;  %v395_v17 = vpop.f32.mrb[22].mxu0 }
 0x13b   :  { %12634 = vst [vmem:[#allocation175_spill] sm:$0xff] %v8993_v36  ;;  %v9002_v29 = vadd.f32 %v466_v18, %v8978_v59  ;;  %v468_v11 = vpop.f32.mrb[22].mxu1  ;;  %v9005_v16 = vadd.f32 %v395_v17, %v8959_v43  ;;  %v397_v62 = vpop.f32.mrb[23].mxu0 }
 0x13c   :  { %12635 = vst [vmem:[#allocation176_spill] sm:$0xff] %v8996_v35  ;;  %12636 = vst [vmem:[#allocation177_spill] sm:$0xff] %v8999_v44  ;;  %v9008_v27 = vadd.f32 %v468_v11, %v8964_v38  ;;  %v470_v36 = vpop.f32.mrb[23].mxu1  ;;  %v9011_v10 = vadd.f32 %v397_v62, %v8973_v12 }
 0x13d   :  { %12637 = vst [vmem:[#allocation178_spill] sm:$0xff] %v9002_v29  ;;  %12638 = vst [vmem:[#allocation179_spill] sm:$0xff] %v9005_v16  ;;  %v9014_v35 = vadd.f32 %v470_v36, %v8978_v59 }
 0x13e   :  { %12639 = vst [vmem:[#allocation180_spill] sm:$0xff] %v9008_v27  ;;  %12640 = vst [vmem:[#allocation181_spill] sm:$0xff] %v9011_v10 }
 0x13f   :  { %12641 = vst [vmem:[#allocation182_spill] sm:$0xff] %v9014_v35 }
 0x140   :  { %v401_v28 = vpop.f32.mrb[24].mxu0 }
 0x141   :  { %v474_v44 = vpop.f32.mrb[24].mxu1  ;;  %v9017_v18 = vadd.f32 %v401_v28, %v8959_v43  ;;  %v403_v17 = vpop.f32.mrb[25].mxu0 }
 0x142   :  { %v9020_v29 = vadd.f32 %v474_v44, %v8964_v38  ;;  %v476_v16 = vpop.f32.mrb[25].mxu1  ;;  %v9023_v11 = vadd.f32 %v403_v17, %v8973_v12  ;;  %v405_v62 = vpop.f32.mrb[26].mxu0 }
 0x143   :  { %12642 = vst [vmem:[#allocation183_spill] sm:$0xff] %v9017_v18  ;;  %v9026_v27 = vadd.f32 %v476_v16, %v8978_v59  ;;  %v478_v10 = vpop.f32.mrb[26].mxu1  ;;  %v9029_v36 = vadd.f32 %v405_v62, %v8959_v43  ;;  %v407_v28 = vpop.f32.mrb[27].mxu0 }
 0x144   :  { %12643 = vst [vmem:[#allocation184_spill] sm:$0xff] %v9020_v29  ;;  %12644 = vst [vmem:[#allocation185_spill] sm:$0xff] %v9023_v11  ;;  %v9032_v35 = vadd.f32 %v478_v10, %v8964_v38  ;;  %v480_v18 = vpop.f32.mrb[27].mxu1  ;;  %v9035_v44 = vadd.f32 %v407_v28, %v8973_v12 }
 0x145   :  { %12645 = vst [vmem:[#allocation186_spill] sm:$0xff] %v9026_v27  ;;  %12646 = vst [vmem:[#allocation187_spill] sm:$0xff] %v9029_v36  ;;  %v9038_v29 = vadd.f32 %v480_v18, %v8978_v59 }
 0x146   :  { %12647 = vst [vmem:[#allocation188_spill] sm:$0xff] %v9032_v35  ;;  %12648 = vst [vmem:[#allocation189_spill] sm:$0xff] %v9035_v44 }
 0x147   :  { %12649 = vst [vmem:[#allocation190_spill] sm:$0xff] %v9038_v29 }
 0x148   :  { %v411_v17 = vpop.f32.mrb[28].mxu0 }
 0x149   :  { %v484_v11 = vpop.f32.mrb[28].mxu1  ;;  %v9041_v16 = vadd.f32 %v411_v17, %v8959_v43  ;;  %v413_v62 = vpop.f32.mrb[29].mxu0 }
 0x14a   :  { %v9044_v27 = vadd.f32 %v484_v11, %v8964_v38  ;;  %v486_v36 = vpop.f32.mrb[29].mxu1  ;;  %v9047_v10 = vadd.f32 %v413_v62, %v8973_v12  ;;  %v415_v28 = vpop.f32.mrb[30].mxu0  ;;  %v309_v62 = vadd.f32 %v8826_v7, %v8836_v37 }
 0x14b   :  { %12650 = vst [vmem:[#allocation191_spill] sm:$0xff] %v9041_v16  ;;  %v9050_v35 = vadd.f32 %v486_v36, %v8978_v59  ;;  %v488_v44 = vpop.f32.mrb[30].mxu1  ;;  %v9053_v18 = vadd.f32 %v415_v28, %v8959_v43  ;;  %v417_v17 = vpop.f32.mrb[31].mxu0  ;;  %v236_v36 = vadd.f32 %v8824_v61, %v8831_v60  ;;  %v238_v28 = vadd.f32 %v8838_v4, %v8845_v5 }
 0x14c   :  { %12651 = vst [vmem:[#allocation192_spill] sm:$0xff] %v9044_v27  ;;  %12652 = vst [vmem:[#allocation193_spill] sm:$0xff] %v9047_v10  ;;  %v9056_v29 = vadd.f32 %v488_v44, %v8964_v38  ;;  %v490_v16 = vpop.f32.mrb[31].mxu1  ;;  %v9059_v11 = vadd.f32 %v417_v17, %v8973_v12  ;;  %v311_v44 = vadd.f32 %v8840_v53, %v8850_v54 }
 0x14d   :  { %12653 = vst [vmem:[#allocation194_spill] sm:$0xff] %v9050_v35  ;;  %12654 = vst [vmem:[#allocation195_spill] sm:$0xff] %v9053_v18  ;;  %v9062_v27 = vadd.f32 %v490_v16, %v8978_v59 }
 0x14e   :  { %12655 = vst [vmem:[#allocation196_spill] sm:$0xff] %v9056_v29  ;;  %12656 = vst [vmem:[#allocation197_spill] sm:$0xff] %v9059_v11 }
 0x14f   :  { %12657 = vst [vmem:[#allocation198_spill] sm:$0xff] %v9062_v27 }
 0x170   :  { %v1370_v29 = vpop.f32.mrb[32].mxu0 }
 0x171   :  { %v1411_v18 = vpop.f32.mrb[32].mxu1  ;;  %v1500_v35 = vadd.f32 %v1370_v29, %v236_v36  ;;  %v1372_v11 = vpop.f32.mrb[33].mxu0 }
 0x172   :  { %v1502_v17 = vadd.f32 %v1411_v18, %v309_v62  ;;  %v1413_v10 = vpop.f32.mrb[33].mxu1  ;;  %v1501_v16 = vadd.f32 %v1372_v11, %v238_v28  ;;  %v1374_v9 = vpop.f32.mrb[34].mxu0 }
 0x173   :  { %v1503_v27 = vadd.f32 %v1413_v10, %v311_v44  ;;  %v1415_v8 = vpop.f32.mrb[34].mxu1  ;;  %v1375_v60 = vpop.f32.mrb[35].mxu0  ;;  %v7215_v3 = vmul.f32 -1.442695, %v1500_v35  ;;  %v455_v9 = vadd.f32 %v8954_v45, %v8964_v38 }
 0x174   :  { %v1416_v61 = vpop.f32.mrb[35].mxu1  ;;  %v7217_v7 = vmul.f32 -1.442695, %v1502_v17  ;;  %v7216_v37 = vmul.f32 -1.442695, %v1501_v16  ;;  %v382_v8 = vadd.f32 %v8952_v25, %v8959_v43 }
 0x175   :  { %v7218_v2 = vmul.f32 -1.442695, %v1503_v27  ;;  %7586 = vpow2.f32 %v7215_v3  ;;  %v384_v3 = vadd.f32 %v8966_v30, %v8973_v12 }
 0x176   :  { %7588 = vpow2.f32 %v7217_v7 }
 0x177   :  { %7590 = vpow2.f32 %v7216_v37 }
 0x178   :  { %7592 = vpow2.f32 %v7218_v2  ;;  %v457_v2 = vadd.f32 %v8968_v19, %v8978_v59 }
 0x17f   :  { %v7587_v54 = vpop.eup %7586 }
 0x180   :  { %v7589_v4 = vpop.eup %7588  ;;  %v1526_v29 = vadd.f32 1.0, %v7587_v54 }
 0x181   :  { %v7591_v53 = vpop.eup %7590  ;;  %v1528_v18 = vadd.f32 1.0, %v7589_v4 }
 0x182   :  { %v7593_v5 = vpop.eup %7592  ;;  %v1527_v11 = vadd.f32 1.0, %v7591_v53  ;;  %7594 = vrcp.f32 %v1526_v29 }
 0x183   :  { %v1529_v10 = vadd.f32 1.0, %v7593_v5  ;;  %7596 = vrcp.f32 %v1528_v18 }
 0x184   :  { %7598 = vrcp.f32 %v1527_v11 }
 0x185   :  { %7600 = vrcp.f32 %v1529_v10 }
 0x18c   :  { %v7595_v59 = vpop.eup %7594 }
 0x18d   :  { %v7597_v19 = vpop.eup %7596 }
 0x18e   :  { %v7599_v60 = vpop.eup %7598  ;;  %v1546_v54 = vmul.f32 0.0, %v7597_v19  ;;  %v12669_v19 = vld [vmem:[#allocation89_spill] sm:$0xff] }
 0x18f   :  { %v7601_v61 = vpop.eup %7600 }
 0x190   :  { %v1547_v5 = vmul.f32 0.0, %v7601_v61  ;;  %v12671_v61 = vld [vmem:[#allocation91_spill] sm:$0xff] }
 0x1b0   :  { %v1452_v27 = vpop.f32.mrb[36].mxu0 }
 0x1b1   :  { %v1493_v35 = vpop.f32.mrb[36].mxu1  ;;  %v1504_v36 = vadd.f32 %v1452_v27, %v382_v8  ;;  %v1454_v28 = vpop.f32.mrb[37].mxu0 }
 0x1b2   :  { %v1506_v62 = vadd.f32 %v1493_v35, %v455_v9  ;;  %v1495_v44 = vpop.f32.mrb[37].mxu1  ;;  %v1505_v25 = vadd.f32 %v1454_v28, %v384_v3  ;;  %v1456_v17 = vpop.f32.mrb[38].mxu0 }
 0x1b3   :  { %v1507_v43 = vadd.f32 %v1495_v44, %v457_v2  ;;  %v1497_v45 = vpop.f32.mrb[38].mxu1  ;;  %v7219_v38 = vmul.f32 -1.442695, %v1504_v36  ;;  %v1457_v16 = vpop.f32.mrb[39].mxu0  ;;  %v12662_v17 = vld [vmem:[#allocation82_spill] sm:$0xff] }
 0x1b4   :  { %7602 = vtanh.f32 %v1506_v62  ;;  %v1498_v30 = vpop.f32.mrb[39].mxu1  ;;  %v7220_v12 = vmul.f32 -1.442695, %v1505_v25  ;;  %v12660_v25 = vld [vmem:[#allocation80_spill] sm:$0xff]  ;;  %v12663_v45 = vld [vmem:[#allocation83_spill] sm:$0xff]  ;;  %v12665_v16 = vld [vmem:[#allocation85_spill] sm:$0xff] }
 0x1b5   :  { %7604 = vtanh.f32 %v1507_v43  ;;  %v12661_v43 = vld [vmem:[#allocation81_spill] sm:$0xff]  ;;  %v12666_v30 = vld [vmem:[#allocation86_spill] sm:$0xff] }
 0x1b6   :  { %7606 = vpow2.f32 %v7219_v38  ;;  %v12664_v38 = vld [vmem:[#allocation84_spill] sm:$0xff] }
 0x1b7   :  { %7608 = vpow2.f32 %v7220_v12  ;;  %v12667_v12 = vld [vmem:[#allocation87_spill] sm:$0xff] }
 0x1be   :  { %v7603_v7 = vpop.eup %7602 }
 0x1bf   :  { %v7605_v37 = vpop.eup %7604  ;;  %v1548_v4 = vmul.f32 %v7603_v7, %v7595_v59  ;;  %v12668_v59 = vld [vmem:[#allocation88_spill] sm:$0xff] }
 0x1c0   :  { %v7607_v53 = vpop.eup %7606  ;;  %v1549_v29 = vmul.f32 %v7605_v37, %v7599_v60  ;;  %v12670_v60 = vld [vmem:[#allocation90_spill] sm:$0xff]  ;;  %v12672_v7 = vld [vmem:[#allocation92_spill] sm:$0xff]  ;;  %v12673_v37 = vld [vmem:[#allocation93_spill] sm:$0xff] }
 0x1c1   :  { %v7609_v18 = vpop.eup %7608  ;;  %v1530_v11 = vadd.f32 1.0, %v7607_v53  ;;  %v9080_v10 = vadd.f32 %v1548_v4, %v1546_v54  ;;  %v12674_v54 = vld [vmem:[#allocation94_spill] sm:$0xff]  ;;  %v12675_v4 = vld [vmem:[#allocation95_spill] sm:$0xff]  ;;  %v12676_v53 = vld [vmem:[#allocation96_spill] sm:$0xff] }
 0x1c2   :  { %v1531_v8 = vadd.f32 1.0, %v7609_v18  ;;  %v9082_v9 = vadd.f32 %v1549_v29, %v1547_v5  ;;  %v12677_v5 = vld [vmem:[#allocation97_spill] sm:$0xff]  ;;  %v12678_v29 = vld [vmem:[#allocation98_spill] sm:$0xff]  ;;  %v12679_v18 = vld [vmem:[#allocation99_spill] sm:$0xff] }
 0x1c3   :  { %7610 = vrcp.f32 %v1530_v11  ;;  %v12680_v11 = vld [vmem:[#allocation100_spill] sm:$0xff] }
 0x1c4   :  { %7612 = vtanh.f32 %v9080_v10 }
 0x1c5   :  { %7614 = vrcp.f32 %v1531_v8  ;;  %v12681_v8 = vld [vmem:[#allocation101_spill] sm:$0xff] }
 0x1c6   :  { %7616 = vtanh.f32 %v9082_v9 }
 0x1cd   :  { %v7611_v3 = vpop.eup %7610 }
 0x1ce   :  { %v7613_v2 = vpop.eup %7612 }
 0x1cf   :  { %v7615_v27 = vpop.eup %7614  ;;  %v9086_v36 = vmul.f32 %v7613_v2, %v7611_v3  ;;  %v12682_v3 = vld [vmem:[#allocation102_spill] sm:$0xff]  ;;  %v12683_v2 = vld [vmem:[#allocation103_spill] sm:$0xff] }
 0x1d0   :  { %v7617_v35 = vpop.eup %7616 }
 0x1d1   :  { %12658 = vst [vmem:[#allocation199_spill] sm:$0xff] %v9086_v36  ;;  %v9088_v62 = vmul.f32 %v7617_v35, %v7615_v27  ;;  %v9094_v44 = vpack.c.bf16 %v9086_v36, %v9086_v36  ;;  %v12684_v27 = vld [vmem:[#allocation104_spill] sm:$0xff]  ;;  %v12685_v35 = vld [vmem:[#allocation105_spill] sm:$0xff]  ;;  %v12687_v36 = vld [vmem:[#allocation107_spill] sm:$0xff] }
 0x1d3   :  { %12659 = vst [vmem:[#allocation200_spill] sm:$0xff] %v9088_v62  ;;  %v1573_v28 = vpack.c.bf16 %v9088_v62, %v9088_v62  ;;  %v12688_v62 = vld [vmem:[#allocation108_spill] sm:$0xff] }
 0x1d5   :  { %1606 = vmatprep.mubr.bf16.mxu0 %v1573_v28  ;;  %1647 = vmatprep.mubr.bf16.mxu1 %v1573_v28 }
 0x1d6   :  { %1607 = vmatmul.mubr.bf16.vlgmr.msra.gmra.mrb[40].mxu0 %v9094_v44  ;;  %1648 = vmatmul.mubr.bf16.vlgmr.msra.gmra.mrb[40].mxu1 %v9094_v44 }
 0x1d7   :  { %1657 = vmatpush1.bf16.msra.mxu0 %v12660_v25  ;;  %1698 = vmatpush1.bf16.msra.mxu1 %v12661_v43 }
 0x1d8   :  { %1688 = vmatprep.mubr.bf16.mxu0 %v1573_v28  ;;  %1729 = vmatprep.mubr.bf16.mxu1 %v1573_v28  ;;  %v12686_v28 = vld [vmem:[#allocation106_spill] sm:$0xff] }
 0x1d9   :  { %1658 = vmatprep.subr.bf16.mxu0 %v12662_v17  ;;  %1699 = vmatprep.subr.bf16.mxu1 %v12663_v45 }
 0x1db   :  { %1659 = vmatpush1.bf16.msra.mxu0 %v12664_v38  ;;  %1700 = vmatpush1.bf16.msra.mxu1 %v12665_v16 }
 0x1dc   :  { %1660 = vmatprep.subr.bf16.mxu0 %v12666_v30  ;;  %1701 = vmatprep.subr.bf16.mxu1 %v12667_v12 }
 0x1df   :  { %1661 = vmatpush1.bf16.msra.mxu0 %v12668_v59  ;;  %1702 = vmatpush1.bf16.msra.mxu1 %v12669_v19 }
 0x1e0   :  { %1662 = vmatprep.subr.bf16.mxu0 %v12670_v60  ;;  %1703 = vmatprep.subr.bf16.mxu1 %v12671_v61 }
 0x1e3   :  { %1663 = vmatpush1.bf16.msra.mxu0 %v12672_v7  ;;  %1704 = vmatpush1.bf16.msra.mxu1 %v12673_v37 }
 0x1e4   :  { %1664 = vmatprep.subr.bf16.mxu0 %v12674_v54  ;;  %1705 = vmatprep.subr.bf16.mxu1 %v12675_v4 }
 0x1e7   :  { %1665 = vmatpush1.bf16.msra.mxu0 %v12676_v53  ;;  %1706 = vmatpush1.bf16.msra.mxu1 %v12677_v5 }
 0x1e8   :  { %1666 = vmatprep.subr.bf16.mxu0 %v12678_v29  ;;  %1707 = vmatprep.subr.bf16.mxu1 %v12679_v18  ;;  %v12689_v29 = vld [vmem:[#allocation109_spill] sm:$0xff]  ;;  %v12690_v18 = vld [vmem:[#allocation110_spill] sm:$0xff] }
 0x1eb   :  { %1667 = vmatpush1.bf16.msra.mxu0 %v12680_v11  ;;  %1708 = vmatpush1.bf16.msra.mxu1 %v12681_v8  ;;  %v12691_v11 = vld [vmem:[#allocation111_spill] sm:$0xff]  ;;  %v12692_v8 = vld [vmem:[#allocation112_spill] sm:$0xff] }
 0x1ec   :  { %1668 = vmatprep.subr.bf16.mxu0 %v12682_v3  ;;  %1709 = vmatprep.subr.bf16.mxu1 %v12683_v2  ;;  %v12693_v3 = vld [vmem:[#allocation113_spill] sm:$0xff]  ;;  %v12694_v2 = vld [vmem:[#allocation114_spill] sm:$0xff] }
 0x1ef   :  { %1669 = vmatpush1.bf16.msra.mxu0 %v12684_v27  ;;  %1710 = vmatpush1.bf16.msra.mxu1 %v12685_v35  ;;  %v12695_v27 = vld [vmem:[#allocation115_spill] sm:$0xff]  ;;  %v12696_v35 = vld [vmem:[#allocation116_spill] sm:$0xff] }
 0x1f0   :  { %1670 = vmatprep.subr.bf16.mxu0 %v12686_v28  ;;  %1711 = vmatprep.subr.bf16.mxu1 %v12687_v36  ;;  %v12697_v28 = vld [vmem:[#allocation117_spill] sm:$0xff]  ;;  %v12698_v36 = vld [vmem:[#allocation118_spill] sm:$0xff] }
 0x1f3   :  { %1671 = vmatpush1.bf16.msra.mxu0 %v12688_v62  ;;  %1712 = vmatpush1.bf16.msra.mxu1 %v12689_v29  ;;  %v12699_v62 = vld [vmem:[#allocation119_spill] sm:$0xff]  ;;  %v12700_v29 = vld [vmem:[#allocation120_spill] sm:$0xff] }
 0x1f4   :  { %1672 = vmatprep.subr.bf16.mxu0 %v12690_v18  ;;  %1713 = vmatprep.subr.bf16.mxu1 %v12691_v11  ;;  %v12701_v18 = vld [vmem:[#allocation121_spill] sm:$0xff]  ;;  %v12702_v11 = vld [vmem:[#allocation122_spill] sm:$0xff] }
 0x1f7   :  { %1673 = vmatpush1.bf16.msra.mxu0 %v12692_v8  ;;  %1714 = vmatpush1.bf16.msra.mxu1 %v12693_v3  ;;  %v12703_v8 = vld [vmem:[#allocation123_spill] sm:$0xff]  ;;  %v12704_v3 = vld [vmem:[#allocation124_spill] sm:$0xff] }
 0x1f8   :  { %1674 = vmatprep.subr.bf16.mxu0 %v12694_v2  ;;  %1715 = vmatprep.subr.bf16.mxu1 %v12695_v27  ;;  %v12705_v2 = vld [vmem:[#allocation125_spill] sm:$0xff]  ;;  %v12706_v27 = vld [vmem:[#allocation126_spill] sm:$0xff] }
 0x1fb   :  { %1675 = vmatpush1.bf16.msra.mxu0 %v12696_v35  ;;  %1716 = vmatpush1.bf16.msra.mxu1 %v12697_v28  ;;  %v12707_v35 = vld [vmem:[#allocation127_spill] sm:$0xff] }
 0x1fc   :  { %1676 = vmatprep.subr.bf16.mxu0 %v12698_v36  ;;  %1717 = vmatprep.subr.bf16.mxu1 %v12699_v62 }
 0x1ff   :  { %1677 = vmatpush1.bf16.msra.mxu0 %v12700_v29  ;;  %1718 = vmatpush1.bf16.msra.mxu1 %v12701_v18  ;;  %v12708_v29 = vld [vmem:[#allocation131_spill] sm:$0xff]  ;;  %v12709_v18 = vld [vmem:[#allocation132_spill] sm:$0xff] }
 0x200   :  { %1678 = vmatprep.subr.bf16.mxu0 %v12702_v11  ;;  %1719 = vmatprep.subr.bf16.mxu1 %v12703_v8 }
 0x203   :  { %1679 = vmatpush1.bf16.msra.mxu0 %v12704_v3  ;;  %1720 = vmatpush1.bf16.msra.mxu1 %v12705_v2 }
 0x204   :  { %1680 = vmatprep.subr.bf16.mxu0 %v12706_v27  ;;  %1721 = vmatprep.subr.bf16.mxu1 %v12707_v35 }
 0x207   :  { %1681 = vmatpush1.bf16.msra.mxu0 %v8713_v21  ;;  %1722 = vmatpush1.bf16.msra.mxu1 %v8715_v22 }
 0x208   :  { %1682 = vmatprep.subr.bf16.mxu0 %v8719_v15  ;;  %1723 = vmatprep.subr.bf16.mxu1 %v12708_v29 }
 0x20b   :  { %1683 = vmatpush1.bf16.msra.mxu0 %v12709_v18  ;;  %1724 = vmatpush1.bf16.msra.mxu1 %v8727_v46 }
 0x20c   :  { %1684 = vmatprep.subr.bf16.mxu0 %v8731_v51  ;;  %1725 = vmatprep.subr.bf16.mxu1 %v8733_v52 }
 0x20f   :  { %1685 = vmatpush1.bf16.msra.mxu0 %v8737_v0  ;;  %1726 = vmatpush1.bf16.msra.mxu1 %v8739_v13 }
 0x210   :  { %1686 = vmatprep.subr.bf16.mxu0 %v8743_v14  ;;  %1727 = vmatprep.subr.bf16.mxu1 %v8745_v6 }
 0x213   :  { %1687 = vmatpush1.bf16.msra.mxu0 %v8749_v24  ;;  %1728 = vmatpush1.bf16.msra.mxu1 %v8751_v26 }
 0x214   :  { %1812 = vmatprep.subr.bf16.mxu0 %v8316_v20  ;;  %1853 = vmatprep.subr.bf16.mxu1 %v8320_v23 }
 0x216   :  { %1689 = vmatmul.mubr.bf16.vlgmr.msra.gmra.mrb[44].mxu0 %v9094_v44  ;;  %1730 = vmatmul.mubr.bf16.vlgmr.msra.gmra.mrb[44].mxu1 %v9094_v44  ;;  %v12710_v44 = vld [vmem:[#allocation34_spill] sm:$0xff] }
 0x217   :  { %1813 = vmatpush1.bf16.msra.mxu0 %v8355_v31  ;;  %1854 = vmatpush1.bf16.msra.mxu1 %v8357_v32 }
 0x218   :  { %1814 = vmatprep.subr.bf16.mxu0 %v8359_v33  ;;  %1855 = vmatprep.subr.bf16.mxu1 %v8361_v34  ;;  %v12759_v34 = vld [vmem:[#allocation146_spill] sm:$0xff] }
 0x21b   :  { %1815 = vmatpush1.bf16.msra.mxu0 %v8367_v39  ;;  %1856 = vmatpush1.bf16.msra.mxu1 %v8369_v40  ;;  %v12758_v39 = vld [vmem:[#allocation145_spill] sm:$0xff] }
 0x21c   :  { %1816 = vmatprep.subr.bf16.mxu0 %v8373_v41  ;;  %1857 = vmatprep.subr.bf16.mxu1 %v8375_v42  ;;  %v12756_v42 = vld [vmem:[#allocation143_spill] sm:$0xff]  ;;  %v12757_v41 = vld [vmem:[#allocation144_spill] sm:$0xff] }
 0x21f   :  { %1817 = vmatpush1.bf16.msra.mxu0 %v8381_v47  ;;  %1858 = vmatpush1.bf16.msra.mxu1 %v8383_v48  ;;  %v12711_v47 = vld [vmem:[#allocation35_spill] sm:$0xff]  ;;  %v12712_v48 = vld [vmem:[#allocation36_spill] sm:$0xff] }
 0x220   :  { %1818 = vmatprep.subr.bf16.mxu0 %v8387_v49  ;;  %1859 = vmatprep.subr.bf16.mxu1 %v8389_v50  ;;  %v12713_v49 = vld [vmem:[#allocation37_spill] sm:$0xff]  ;;  %v12714_v50 = vld [vmem:[#allocation38_spill] sm:$0xff] }
 0x223   :  { %1819 = vmatpush1.bf16.msra.mxu0 %v8395_v55  ;;  %1860 = vmatpush1.bf16.msra.mxu1 %v8397_v56  ;;  %v12715_v55 = vld [vmem:[#allocation39_spill] sm:$0xff]  ;;  %v12716_v56 = vld [vmem:[#allocation40_spill] sm:$0xff] }
 0x224   :  { %1820 = vmatprep.subr.bf16.mxu0 %v8401_v57  ;;  %1861 = vmatprep.subr.bf16.mxu1 %v8403_v58  ;;  %v12717_v57 = vld [vmem:[#allocation41_spill] sm:$0xff]  ;;  %v12718_v58 = vld [vmem:[#allocation42_spill] sm:$0xff] }
 0x227   :  { %1821 = vmatpush1.bf16.msra.mxu0 %v8409_v63  ;;  %1862 = vmatpush1.bf16.msra.mxu1 %v8411_v1  ;;  %v12719_v63 = vld [vmem:[#allocation43_spill] sm:$0xff]  ;;  %v12720_v1 = vld [vmem:[#allocation44_spill] sm:$0xff] }
 0x228   :  { %1822 = vmatprep.subr.bf16.mxu0 %v12710_v44  ;;  %1863 = vmatprep.subr.bf16.mxu1 %v12711_v47  ;;  %v12721_v44 = vld [vmem:[#allocation45_spill] sm:$0xff]  ;;  %v12722_v47 = vld [vmem:[#allocation46_spill] sm:$0xff] }
 0x22b   :  { %1823 = vmatpush1.bf16.msra.mxu0 %v12712_v48  ;;  %1864 = vmatpush1.bf16.msra.mxu1 %v12713_v49  ;;  %v12723_v48 = vld [vmem:[#allocation47_spill] sm:$0xff]  ;;  %v12724_v49 = vld [vmem:[#allocation48_spill] sm:$0xff] }
 0x22c   :  { %1824 = vmatprep.subr.bf16.mxu0 %v12714_v50  ;;  %1865 = vmatprep.subr.bf16.mxu1 %v12715_v55  ;;  %v12725_v50 = vld [vmem:[#allocation49_spill] sm:$0xff]  ;;  %v12726_v55 = vld [vmem:[#allocation50_spill] sm:$0xff] }
 0x22f   :  { %1825 = vmatpush1.bf16.msra.mxu0 %v12716_v56  ;;  %1866 = vmatpush1.bf16.msra.mxu1 %v12717_v57  ;;  %v12727_v56 = vld [vmem:[#allocation51_spill] sm:$0xff]  ;;  %v12728_v57 = vld [vmem:[#allocation52_spill] sm:$0xff] }
 0x230   :  { %1826 = vmatprep.subr.bf16.mxu0 %v12718_v58  ;;  %1867 = vmatprep.subr.bf16.mxu1 %v12719_v63  ;;  %v12729_v58 = vld [vmem:[#allocation53_spill] sm:$0xff]  ;;  %v12730_v63 = vld [vmem:[#allocation54_spill] sm:$0xff] }
 0x233   :  { %1827 = vmatpush1.bf16.msra.mxu0 %v12720_v1  ;;  %1868 = vmatpush1.bf16.msra.mxu1 %v12721_v44  ;;  %v12731_v1 = vld [vmem:[#allocation55_spill] sm:$0xff]  ;;  %v12732_v44 = vld [vmem:[#allocation56_spill] sm:$0xff] }
 0x234   :  { %1828 = vmatprep.subr.bf16.mxu0 %v12722_v47  ;;  %1869 = vmatprep.subr.bf16.mxu1 %v12723_v48  ;;  %v12733_v47 = vld [vmem:[#allocation57_spill] sm:$0xff]  ;;  %v12734_v48 = vld [vmem:[#allocation58_spill] sm:$0xff] }
 0x237   :  { %1829 = vmatpush1.bf16.msra.mxu0 %v12724_v49  ;;  %1870 = vmatpush1.bf16.msra.mxu1 %v12725_v50  ;;  %v12735_v49 = vld [vmem:[#allocation59_spill] sm:$0xff]  ;;  %v12736_v50 = vld [vmem:[#allocation60_spill] sm:$0xff] }
 0x238   :  { %1830 = vmatprep.subr.bf16.mxu0 %v12726_v55  ;;  %1871 = vmatprep.subr.bf16.mxu1 %v12727_v56  ;;  %v12737_v55 = vld [vmem:[#allocation61_spill] sm:$0xff]  ;;  %v12738_v56 = vld [vmem:[#allocation62_spill] sm:$0xff] }
 0x23b   :  { %1831 = vmatpush1.bf16.msra.mxu0 %v12728_v57  ;;  %1872 = vmatpush1.bf16.msra.mxu1 %v12729_v58  ;;  %v12739_v57 = vld [vmem:[#allocation63_spill] sm:$0xff]  ;;  %v12740_v58 = vld [vmem:[#allocation64_spill] sm:$0xff] }
 0x23c   :  { %1832 = vmatprep.subr.bf16.mxu0 %v12730_v63  ;;  %1873 = vmatprep.subr.bf16.mxu1 %v12731_v1  ;;  %v12741_v63 = vld [vmem:[#allocation65_spill] sm:$0xff]  ;;  %v12742_v1 = vld [vmem:[#allocation66_spill] sm:$0xff] }
 0x23f   :  { %1833 = vmatpush1.bf16.msra.mxu0 %v12732_v44  ;;  %1874 = vmatpush1.bf16.msra.mxu1 %v12733_v47  ;;  %v12743_v44 = vld [vmem:[#allocation67_spill] sm:$0xff]  ;;  %v12744_v47 = vld [vmem:[#allocation68_spill] sm:$0xff] }
 0x240   :  { %1834 = vmatprep.subr.bf16.mxu0 %v12734_v48  ;;  %1875 = vmatprep.subr.bf16.mxu1 %v12735_v49  ;;  %v12745_v48 = vld [vmem:[#allocation69_spill] sm:$0xff]  ;;  %v12746_v49 = vld [vmem:[#allocation70_spill] sm:$0xff] }
 0x243   :  { %1835 = vmatpush1.bf16.msra.mxu0 %v12736_v50  ;;  %1876 = vmatpush1.bf16.msra.mxu1 %v12737_v55  ;;  %v12747_v50 = vld [vmem:[#allocation71_spill] sm:$0xff]  ;;  %v12748_v55 = vld [vmem:[#allocation72_spill] sm:$0xff] }
 0x244   :  { %1836 = vmatprep.subr.bf16.mxu0 %v12738_v56  ;;  %1877 = vmatprep.subr.bf16.mxu1 %v12739_v57  ;;  %v12749_v56 = vld [vmem:[#allocation73_spill] sm:$0xff]  ;;  %v12750_v57 = vld [vmem:[#allocation74_spill] sm:$0xff] }
 0x247   :  { %1837 = vmatpush1.bf16.msra.mxu0 %v12740_v58  ;;  %1878 = vmatpush1.bf16.msra.mxu1 %v12741_v63  ;;  %v12751_v58 = vld [vmem:[#allocation75_spill] sm:$0xff]  ;;  %v12752_v63 = vld [vmem:[#allocation76_spill] sm:$0xff] }
 0x248   :  { %1838 = vmatprep.subr.bf16.mxu0 %v12742_v1  ;;  %1879 = vmatprep.subr.bf16.mxu1 %v12743_v44  ;;  %v12753_v1 = vld [vmem:[#allocation77_spill] sm:$0xff]  ;;  %v12754_v44 = vld [vmem:[#allocation78_spill] sm:$0xff] }
 0x24b   :  { %1839 = vmatpush1.bf16.msra.mxu0 %v12744_v47  ;;  %1880 = vmatpush1.bf16.msra.mxu1 %v12745_v48  ;;  %v12755_v47 = vld [vmem:[#allocation79_spill] sm:$0xff] }
 0x24c   :  { %1840 = vmatprep.subr.bf16.mxu0 %v12746_v49  ;;  %1881 = vmatprep.subr.bf16.mxu1 %v12747_v50 }
 0x24f   :  { %1841 = vmatpush1.bf16.msra.mxu0 %v12748_v55  ;;  %1882 = vmatpush1.bf16.msra.mxu1 %v12749_v56 }
 0x250   :  { %1842 = vmatprep.subr.bf16.mxu0 %v12750_v57  ;;  %1883 = vmatprep.subr.bf16.mxu1 %v12751_v58 }
 0x253   :  { %1843 = vmatpush1.bf16.msra.mxu0 %v12752_v63  ;;  %1884 = vmatpush1.bf16.msra.mxu1 %v12753_v1 }
 0x254   :  { %1894 = vmatprep.subr.bf16.mxu0 %v12754_v44  ;;  %1935 = vmatprep.subr.bf16.mxu1 %v12755_v47 }
 0x2a9   :  { %v1608_v48 = vpop.f32.mrb[40].mxu0  ;;  %v1649_v49 = vpop.f32.mrb[40].mxu1 }
 0x2aa   :  { %v1738_v50 = vadd.f32 %v1608_v48, %v12756_v42  ;;  %v1740_v55 = vadd.f32 %v1649_v49, %v12757_v41  ;;  %v1610_v40 = vpop.f32.mrb[41].mxu0  ;;  %v1651_v56 = vpop.f32.mrb[41].mxu1 }
 0x2ab   :  { %v1739_v57 = vadd.f32 %v1610_v40, %v12758_v39  ;;  %v1741_v58 = vadd.f32 %v1651_v56, %v12759_v34  ;;  %v1612_v33 = vpop.f32.mrb[42].mxu0  ;;  %v1653_v63 = vpop.f32.mrb[42].mxu1  ;;  %v12761_v56 = vld [vmem:[#allocation172_spill] sm:$0xff] }
 0x2ac   :  { %v1613_v32 = vpop.f32.mrb[43].mxu0  ;;  %v1654_v1 = vpop.f32.mrb[43].mxu1  ;;  %v7221_v31 = vmul.f32 -1.442695, %v1738_v50  ;;  %v7223_v44 = vmul.f32 -1.442695, %v1740_v55 }
 0x2ad   :  { %v7222_v23 = vmul.f32 -1.442695, %v1739_v57  ;;  %v7224_v47 = vmul.f32 -1.442695, %v1741_v58  ;;  %v12760_v50 = vld [vmem:[#allocation171_spill] sm:$0xff]  ;;  %v12763_v63 = vld [vmem:[#allocation174_spill] sm:$0xff] }
 0x2ae   :  { %7618 = vpow2.f32 %v7221_v31 }
 0x2af   :  { %7620 = vpow2.f32 %v7223_v44 }
 0x2b0   :  { %7622 = vpow2.f32 %v7222_v23 }
 0x2b1   :  { %7624 = vpow2.f32 %v7224_v47  ;;  %v12762_v47 = vld [vmem:[#allocation173_spill] sm:$0xff] }
 0x2b8   :  { %v7619_v42 = vpop.eup %7618 }
 0x2b9   :  { %v7621_v41 = vpop.eup %7620  ;;  %v1764_v20 = vadd.f32 1.0, %v7619_v42 }
 0x2ba   :  { %v7623_v48 = vpop.eup %7622  ;;  %v1766_v39 = vadd.f32 1.0, %v7621_v41 }
 0x2bb   :  { %v7625_v49 = vpop.eup %7624  ;;  %v1765_v40 = vadd.f32 1.0, %v7623_v48  ;;  %7626 = vrcp.f32 %v1764_v20 }
 0x2bc   :  { %v1767_v34 = vadd.f32 1.0, %v7625_v49  ;;  %7628 = vrcp.f32 %v1766_v39 }
 0x2bd   :  { %7630 = vrcp.f32 %v1765_v40 }
 0x2be   :  { %7632 = vrcp.f32 %v1767_v34 }
 0x2c5   :  { %v7627_v39 = vpop.eup %7626 }
 0x2c6   :  { %v7629_v40 = vpop.eup %7628 }
 0x2e9   :  { %v1690_v32 = vpop.f32.mrb[44].mxu0  ;;  %v1731_v33 = vpop.f32.mrb[44].mxu1 }
 0x2ea   :  { %v1742_v55 = vadd.f32 %v1690_v32, %v12760_v50  ;;  %v1744_v31 = vadd.f32 %v1731_v33, %v12761_v56  ;;  %v1692_v57 = vpop.f32.mrb[45].mxu0  ;;  %v1733_v23 = vpop.f32.mrb[45].mxu1  ;;  %v1784_v56 = vmul.f32 %v7629_v40, %v9080_v10  ;;  %v12766_v40 = vld [vmem:[#allocation98_spill] sm:$0xff] }
 0x2eb   :  { %v1743_v58 = vadd.f32 %v1692_v57, %v12762_v47  ;;  %v1745_v1 = vadd.f32 %v1733_v23, %v12763_v63  ;;  %v1694_v44 = vpop.f32.mrb[46].mxu0  ;;  %v1735_v42 = vpop.f32.mrb[46].mxu1 }
 0x2ec   :  { %v7225_v41 = vmul.f32 -1.442695, %v1742_v55  ;;  %7634 = vtanh.f32 %v1744_v31  ;;  %v1695_v20 = vpop.f32.mrb[47].mxu0  ;;  %v1736_v48 = vpop.f32.mrb[47].mxu1 }
 0x2ed   :  { %v7226_v49 = vmul.f32 -1.442695, %v1743_v58  ;;  %7636 = vtanh.f32 %v1745_v1  ;;  %v7631_v32 = vpop.eup %7630 }
 0x2ee   :  { %7638 = vpow2.f32 %v7225_v41  ;;  %v7633_v33 = vpop.eup %7632 }
 0x2ef   :  { %7640 = vpow2.f32 %v7226_v49  ;;  %v1785_v47 = vmul.f32 %v7633_v33, %v9082_v9  ;;  %v12768_v33 = vld [vmem:[#allocation100_spill] sm:$0xff] }
 0x2f6   :  { %v7635_v50 = vpop.eup %7634 }
 0x2f7   :  { %v7637_v34 = vpop.eup %7636  ;;  %v1786_v57 = vmul.f32 %v7635_v50, %v7627_v39  ;;  %v12769_v50 = vld [vmem:[#allocation101_spill] sm:$0xff] }
 0x2f8   :  { %v7639_v23 = vpop.eup %7638  ;;  %v1787_v55 = vmul.f32 %v7637_v34, %v7631_v32  ;;  %v12767_v32 = vld [vmem:[#allocation99_spill] sm:$0xff]  ;;  %v12770_v34 = vld [vmem:[#allocation102_spill] sm:$0xff] }
 0x2f9   :  { %v7641_v31 = vpop.eup %7640  ;;  %v1768_v63 = vadd.f32 1.0, %v7639_v23  ;;  %v9238_v44 = vadd.f32 %v1786_v57, %v1784_v56  ;;  %v12771_v56 = vld [vmem:[#allocation103_spill] sm:$0xff]  ;;  %v12772_v57 = vld [vmem:[#allocation104_spill] sm:$0xff]  ;;  %v12773_v23 = vld [vmem:[#allocation105_spill] sm:$0xff] }
 0x2fa   :  { %v1769_v58 = vadd.f32 1.0, %v7641_v31  ;;  %v9240_v1 = vadd.f32 %v1787_v55, %v1785_v47  ;;  %v12774_v47 = vld [vmem:[#allocation106_spill] sm:$0xff]  ;;  %v12775_v55 = vld [vmem:[#allocation107_spill] sm:$0xff]  ;;  %v12776_v31 = vld [vmem:[#allocation108_spill] sm:$0xff] }
 0x2fb   :  { %7642 = vrcp.f32 %v1768_v63  ;;  %v12777_v63 = vld [vmem:[#allocation109_spill] sm:$0xff] }
 0x2fc   :  { %7644 = vtanh.f32 %v9238_v44 }
 0x2fd   :  { %7646 = vrcp.f32 %v1769_v58  ;;  %v12778_v58 = vld [vmem:[#allocation110_spill] sm:$0xff] }
 0x2fe   :  { %7648 = vtanh.f32 %v9240_v1 }
 0x305   :  { %v7643_v42 = vpop.eup %7642 }
 0x306   :  { %v7645_v10 = vpop.eup %7644 }
 0x307   :  { %v7647_v41 = vpop.eup %7646  ;;  %v9244_v48 = vmul.f32 %v7645_v10, %v7643_v42  ;;  %v12779_v42 = vld [vmem:[#allocation111_spill] sm:$0xff]  ;;  %v12780_v10 = vld [vmem:[#allocation112_spill] sm:$0xff] }
 0x308   :  { %v7649_v20 = vpop.eup %7648 }
 0x309   :  { %12764 = vst [vmem:[#allocation80_spill] sm:$0xff] %v9244_v48  ;;  %v9246_v9 = vmul.f32 %v7649_v20, %v7647_v41  ;;  %v9252_v39 = vpack.c.bf16 %v9244_v48, %v9244_v48  ;;  %v12781_v41 = vld [vmem:[#allocation113_spill] sm:$0xff]  ;;  %v12782_v20 = vld [vmem:[#allocation114_spill] sm:$0xff]  ;;  %v12784_v48 = vld [vmem:[#allocation116_spill] sm:$0xff] }
 0x30b   :  { %12765 = vst [vmem:[#allocation81_spill] sm:$0xff] %v9246_v9  ;;  %v1811_v49 = vpack.c.bf16 %v9246_v9, %v9246_v9  ;;  %v12785_v9 = vld [vmem:[#allocation120_spill] sm:$0xff] }
 0x30d   :  { %1844 = vmatprep.mubr.bf16.mxu0 %v1811_v49  ;;  %1885 = vmatprep.mubr.bf16.mxu1 %v1811_v49 }
 0x30e   :  { %1845 = vmatmul.mubr.bf16.vlgmr.msra.gmra.mrb[48].mxu0 %v9252_v39  ;;  %1886 = vmatmul.mubr.bf16.vlgmr.msra.gmra.mrb[48].mxu1 %v9252_v39 }
 0x30f   :  { %1895 = vmatpush1.bf16.msra.mxu0 %v12660_v25  ;;  %1936 = vmatpush1.bf16.msra.mxu1 %v12661_v43 }
 0x310   :  { %1926 = vmatprep.mubr.bf16.mxu0 %v1811_v49  ;;  %1967 = vmatprep.mubr.bf16.mxu1 %v1811_v49  ;;  %v12783_v49 = vld [vmem:[#allocation115_spill] sm:$0xff] }
 0x311   :  { %1896 = vmatprep.subr.bf16.mxu0 %v12662_v17  ;;  %1937 = vmatprep.subr.bf16.mxu1 %v12663_v45 }
 0x313   :  { %1897 = vmatpush1.bf16.msra.mxu0 %v12664_v38  ;;  %1938 = vmatpush1.bf16.msra.mxu1 %v12665_v16 }
 0x314   :  { %1898 = vmatprep.subr.bf16.mxu0 %v12666_v30  ;;  %1939 = vmatprep.subr.bf16.mxu1 %v12667_v12 }
 0x317   :  { %1899 = vmatpush1.bf16.msra.mxu0 %v12668_v59  ;;  %1940 = vmatpush1.bf16.msra.mxu1 %v12669_v19 }
 0x318   :  { %1900 = vmatprep.subr.bf16.mxu0 %v12670_v60  ;;  %1941 = vmatprep.subr.bf16.mxu1 %v12671_v61 }
 0x31b   :  { %1901 = vmatpush1.bf16.msra.mxu0 %v12672_v7  ;;  %1942 = vmatpush1.bf16.msra.mxu1 %v12673_v37 }
 0x31c   :  { %1902 = vmatprep.subr.bf16.mxu0 %v12674_v54  ;;  %1943 = vmatprep.subr.bf16.mxu1 %v12675_v4 }
 0x31f   :  { %1903 = vmatpush1.bf16.msra.mxu0 %v12676_v53  ;;  %1944 = vmatpush1.bf16.msra.mxu1 %v12677_v5 }
 0x320   :  { %1904 = vmatprep.subr.bf16.mxu0 %v12766_v40  ;;  %1945 = vmatprep.subr.bf16.mxu1 %v12767_v32 }
 0x323   :  { %1905 = vmatpush1.bf16.msra.mxu0 %v12768_v33  ;;  %1946 = vmatpush1.bf16.msra.mxu1 %v12769_v50 }
 0x324   :  { %1906 = vmatprep.subr.bf16.mxu0 %v12770_v34  ;;  %1947 = vmatprep.subr.bf16.mxu1 %v12771_v56 }
 0x327   :  { %1907 = vmatpush1.bf16.msra.mxu0 %v12772_v57  ;;  %1948 = vmatpush1.bf16.msra.mxu1 %v12773_v23 }
 0x328   :  { %1908 = vmatprep.subr.bf16.mxu0 %v12774_v47  ;;  %1949 = vmatprep.subr.bf16.mxu1 %v12775_v55 }
 0x32b   :  { %1909 = vmatpush1.bf16.msra.mxu0 %v12776_v31  ;;  %1950 = vmatpush1.bf16.msra.mxu1 %v12777_v63 }
 0x32c   :  { %1910 = vmatprep.subr.bf16.mxu0 %v12778_v58  ;;  %1951 = vmatprep.subr.bf16.mxu1 %v12779_v42  ;;  %v12786_v58 = vld [vmem:[#allocation121_spill] sm:$0xff] }
 0x32f   :  { %1911 = vmatpush1.bf16.msra.mxu0 %v12780_v10  ;;  %1952 = vmatpush1.bf16.msra.mxu1 %v12781_v41 }
 0x330   :  { %1912 = vmatprep.subr.bf16.mxu0 %v12782_v20  ;;  %1953 = vmatprep.subr.bf16.mxu1 %v12783_v49 }
 0x333   :  { %1913 = vmatpush1.bf16.msra.mxu0 %v12784_v48  ;;  %1954 = vmatpush1.bf16.msra.mxu1 %v12697_v28 }
 0x334   :  { %1914 = vmatprep.subr.bf16.mxu0 %v12698_v36  ;;  %1955 = vmatprep.subr.bf16.mxu1 %v12699_v62 }
 0x337   :  { %1915 = vmatpush1.bf16.msra.mxu0 %v12785_v9  ;;  %1956 = vmatpush1.bf16.msra.mxu1 %v12786_v58 }
 0x338   :  { %1916 = vmatprep.subr.bf16.mxu0 %v12702_v11  ;;  %1957 = vmatprep.subr.bf16.mxu1 %v12703_v8 }
 0x33b   :  { %1917 = vmatpush1.bf16.msra.mxu0 %v12704_v3  ;;  %1958 = vmatpush1.bf16.msra.mxu1 %v12705_v2 }
 0x33c   :  { %1918 = vmatprep.subr.bf16.mxu0 %v12706_v27  ;;  %1959 = vmatprep.subr.bf16.mxu1 %v12707_v35  ;;  %v12856_v35 = vld [vmem:[#allocation150_spill] sm:$0xff] }
 0x33f   :  { %1919 = vmatpush1.bf16.msra.mxu0 %v8713_v21  ;;  %1960 = vmatpush1.bf16.msra.mxu1 %v8715_v22  ;;  %v12855_v21 = vld [vmem:[#allocation149_spill] sm:$0xff] }
 0x340   :  { %1920 = vmatprep.subr.bf16.mxu0 %v8719_v15  ;;  %1961 = vmatprep.subr.bf16.mxu1 %v12708_v29  ;;  %v12787_v29 = vld [vmem:[#allocation14_spill] sm:$0xff]  ;;  %v12854_v15 = vld [vmem:[#allocation148_spill] sm:$0xff] }
 0x343   :  { %1921 = vmatpush1.bf16.msra.mxu0 %v12709_v18  ;;  %1962 = vmatpush1.bf16.msra.mxu1 %v8727_v46  ;;  %v12788_v18 = vld [vmem:[#allocation15_spill] sm:$0xff] }
 0x344   :  { %1922 = vmatprep.subr.bf16.mxu0 %v8731_v51  ;;  %1963 = vmatprep.subr.bf16.mxu1 %v8733_v52  ;;  %v12789_v52 = vld [vmem:[#allocation16_spill] sm:$0xff]  ;;  %v12798_v51 = vld [vmem:[#allocation25_spill] sm:$0xff]  ;;  %v12853_v46 = vld [vmem:[#allocation147_spill] sm:$0xff] }
 0x347   :  { %1923 = vmatpush1.bf16.msra.mxu0 %v8737_v0  ;;  %1964 = vmatpush1.bf16.msra.mxu1 %v8739_v13  ;;  %v12790_v0 = vld [vmem:[#allocation17_spill] sm:$0xff]  ;;  %v12791_v13 = vld [vmem:[#allocation18_spill] sm:$0xff] }
 0x348   :  { %1924 = vmatprep.subr.bf16.mxu0 %v8743_v14  ;;  %1965 = vmatprep.subr.bf16.mxu1 %v8745_v6  ;;  %v12792_v14 = vld [vmem:[#allocation19_spill] sm:$0xff]  ;;  %v12793_v6 = vld [vmem:[#allocation20_spill] sm:$0xff] }
 0x34b   :  { %1925 = vmatpush1.bf16.msra.mxu0 %v8749_v24  ;;  %1966 = vmatpush1.bf16.msra.mxu1 %v8751_v26  ;;  %v12794_v24 = vld [vmem:[#allocation21_spill] sm:$0xff]  ;;  %v12795_v26 = vld [vmem:[#allocation22_spill] sm:$0xff] }
 0x34c   :  { %2050 = vmatprep.subr.bf16.mxu0 %v12787_v29  ;;  %2091 = vmatprep.subr.bf16.mxu1 %v12788_v18  ;;  %v12796_v29 = vld [vmem:[#allocation23_spill] sm:$0xff]  ;;  %v12797_v18 = vld [vmem:[#allocation24_spill] sm:$0xff] }
 0x34e   :  { %1927 = vmatmul.mubr.bf16.vlgmr.msra.gmra.mrb[52].mxu0 %v9252_v39  ;;  %1968 = vmatmul.mubr.bf16.vlgmr.msra.gmra.mrb[52].mxu1 %v9252_v39  ;;  %v12799_v39 = vld [vmem:[#allocation26_spill] sm:$0xff] }
 0x34f   :  { %2051 = vmatpush1.bf16.msra.mxu0 %v12789_v52  ;;  %2092 = vmatpush1.bf16.msra.mxu1 %v12790_v0  ;;  %v12800_v52 = vld [vmem:[#allocation27_spill] sm:$0xff]  ;;  %v12801_v0 = vld [vmem:[#allocation28_spill] sm:$0xff] }
 0x350   :  { %2052 = vmatprep.subr.bf16.mxu0 %v12791_v13  ;;  %2093 = vmatprep.subr.bf16.mxu1 %v12792_v14  ;;  %v12802_v13 = vld [vmem:[#allocation29_spill] sm:$0xff]  ;;  %v12803_v14 = vld [vmem:[#allocation30_spill] sm:$0xff] }
 0x353   :  { %2053 = vmatpush1.bf16.msra.mxu0 %v12793_v6  ;;  %2094 = vmatpush1.bf16.msra.mxu1 %v12794_v24  ;;  %v12804_v6 = vld [vmem:[#allocation31_spill] sm:$0xff]  ;;  %v12805_v24 = vld [vmem:[#allocation32_spill] sm:$0xff] }
 0x354   :  { %2054 = vmatprep.subr.bf16.mxu0 %v12795_v26  ;;  %2095 = vmatprep.subr.bf16.mxu1 %v12796_v29  ;;  %v12806_v26 = vld [vmem:[#allocation33_spill] sm:$0xff]  ;;  %v12807_v29 = vld [vmem:[#allocation34_spill] sm:$0xff] }
 0x357   :  { %2055 = vmatpush1.bf16.msra.mxu0 %v12797_v18  ;;  %2096 = vmatpush1.bf16.msra.mxu1 %v12798_v51  ;;  %v12808_v18 = vld [vmem:[#allocation35_spill] sm:$0xff]  ;;  %v12809_v51 = vld [vmem:[#allocation36_spill] sm:$0xff] }
 0x358   :  { %2056 = vmatprep.subr.bf16.mxu0 %v12799_v39  ;;  %2097 = vmatprep.subr.bf16.mxu1 %v12800_v52  ;;  %v12810_v39 = vld [vmem:[#allocation37_spill] sm:$0xff]  ;;  %v12811_v52 = vld [vmem:[#allocation38_spill] sm:$0xff] }
 0x35b   :  { %2057 = vmatpush1.bf16.msra.mxu0 %v12801_v0  ;;  %2098 = vmatpush1.bf16.msra.mxu1 %v12802_v13  ;;  %v12812_v0 = vld [vmem:[#allocation39_spill] sm:$0xff]  ;;  %v12813_v13 = vld [vmem:[#allocation40_spill] sm:$0xff] }
 0x35c   :  { %2058 = vmatprep.subr.bf16.mxu0 %v12803_v14  ;;  %2099 = vmatprep.subr.bf16.mxu1 %v12804_v6  ;;  %v12814_v14 = vld [vmem:[#allocation41_spill] sm:$0xff]  ;;  %v12815_v6 = vld [vmem:[#allocation42_spill] sm:$0xff] }
 0x35f   :  { %2059 = vmatpush1.bf16.msra.mxu0 %v12805_v24  ;;  %2100 = vmatpush1.bf16.msra.mxu1 %v12806_v26  ;;  %v12816_v24 = vld [vmem:[#allocation43_spill] sm:$0xff]  ;;  %v12817_v26 = vld [vmem:[#allocation44_spill] sm:$0xff] }
 0x360   :  { %2060 = vmatprep.subr.bf16.mxu0 %v12807_v29  ;;  %2101 = vmatprep.subr.bf16.mxu1 %v12808_v18  ;;  %v12818_v29 = vld [vmem:[#allocation45_spill] sm:$0xff]  ;;  %v12819_v18 = vld [vmem:[#allocation46_spill] sm:$0xff] }
 0x363   :  { %2061 = vmatpush1.bf16.msra.mxu0 %v12809_v51  ;;  %2102 = vmatpush1.bf16.msra.mxu1 %v12810_v39  ;;  %v12820_v51 = vld [vmem:[#allocation47_spill] sm:$0xff]  ;;  %v12821_v39 = vld [vmem:[#allocation48_spill] sm:$0xff] }
 0x364   :  { %2062 = vmatprep.subr.bf16.mxu0 %v12811_v52  ;;  %2103 = vmatprep.subr.bf16.mxu1 %v12812_v0  ;;  %v12822_v52 = vld [vmem:[#allocation49_spill] sm:$0xff]  ;;  %v12823_v0 = vld [vmem:[#allocation50_spill] sm:$0xff] }
 0x367   :  { %2063 = vmatpush1.bf16.msra.mxu0 %v12813_v13  ;;  %2104 = vmatpush1.bf16.msra.mxu1 %v12814_v14  ;;  %v12824_v13 = vld [vmem:[#allocation51_spill] sm:$0xff]  ;;  %v12825_v14 = vld [vmem:[#allocation52_spill] sm:$0xff] }
 0x368   :  { %2064 = vmatprep.subr.bf16.mxu0 %v12815_v6  ;;  %2105 = vmatprep.subr.bf16.mxu1 %v12816_v24  ;;  %v12826_v6 = vld [vmem:[#allocation53_spill] sm:$0xff]  ;;  %v12827_v24 = vld [vmem:[#allocation54_spill] sm:$0xff] }
 0x36b   :  { %2065 = vmatpush1.bf16.msra.mxu0 %v12817_v26  ;;  %2106 = vmatpush1.bf16.msra.mxu1 %v12818_v29  ;;  %v12828_v26 = vld [vmem:[#allocation55_spill] sm:$0xff]  ;;  %v12829_v29 = vld [vmem:[#allocation56_spill] sm:$0xff] }
 0x36c   :  { %2066 = vmatprep.subr.bf16.mxu0 %v12819_v18  ;;  %2107 = vmatprep.subr.bf16.mxu1 %v12820_v51  ;;  %v12830_v18 = vld [vmem:[#allocation57_spill] sm:$0xff]  ;;  %v12831_v51 = vld [vmem:[#allocation58_spill] sm:$0xff] }
 0x36f   :  { %2067 = vmatpush1.bf16.msra.mxu0 %v12821_v39  ;;  %2108 = vmatpush1.bf16.msra.mxu1 %v12822_v52  ;;  %v12832_v39 = vld [vmem:[#allocation59_spill] sm:$0xff]  ;;  %v12833_v52 = vld [vmem:[#allocation60_spill] sm:$0xff] }
 0x370   :  { %2068 = vmatprep.subr.bf16.mxu0 %v12823_v0  ;;  %2109 = vmatprep.subr.bf16.mxu1 %v12824_v13  ;;  %v12834_v0 = vld [vmem:[#allocation61_spill] sm:$0xff]  ;;  %v12835_v13 = vld [vmem:[#allocation62_spill] sm:$0xff] }
 0x373   :  { %2069 = vmatpush1.bf16.msra.mxu0 %v12825_v14  ;;  %2110 = vmatpush1.bf16.msra.mxu1 %v12826_v6  ;;  %v12836_v14 = vld [vmem:[#allocation63_spill] sm:$0xff]  ;;  %v12837_v6 = vld [vmem:[#allocation64_spill] sm:$0xff] }
 0x374   :  { %2070 = vmatprep.subr.bf16.mxu0 %v12827_v24  ;;  %2111 = vmatprep.subr.bf16.mxu1 %v12828_v26  ;;  %v12838_v24 = vld [vmem:[#allocation65_spill] sm:$0xff]  ;;  %v12839_v26 = vld [vmem:[#allocation66_spill] sm:$0xff] }
 0x377   :  { %2071 = vmatpush1.bf16.msra.mxu0 %v12829_v29  ;;  %2112 = vmatpush1.bf16.msra.mxu1 %v12830_v18  ;;  %v12840_v29 = vld [vmem:[#allocation67_spill] sm:$0xff]  ;;  %v12841_v18 = vld [vmem:[#allocation68_spill] sm:$0xff] }
 0x378   :  { %2072 = vmatprep.subr.bf16.mxu0 %v12831_v51  ;;  %2113 = vmatprep.subr.bf16.mxu1 %v12832_v39  ;;  %v12842_v51 = vld [vmem:[#allocation69_spill] sm:$0xff]  ;;  %v12843_v39 = vld [vmem:[#allocation70_spill] sm:$0xff] }
 0x37b   :  { %2073 = vmatpush1.bf16.msra.mxu0 %v12833_v52  ;;  %2114 = vmatpush1.bf16.msra.mxu1 %v12834_v0  ;;  %v12844_v52 = vld [vmem:[#allocation71_spill] sm:$0xff]  ;;  %v12845_v0 = vld [vmem:[#allocation72_spill] sm:$0xff] }
 0x37c   :  { %2074 = vmatprep.subr.bf16.mxu0 %v12835_v13  ;;  %2115 = vmatprep.subr.bf16.mxu1 %v12836_v14  ;;  %v12846_v13 = vld [vmem:[#allocation73_spill] sm:$0xff]  ;;  %v12847_v14 = vld [vmem:[#allocation74_spill] sm:$0xff] }
 0x37f   :  { %2075 = vmatpush1.bf16.msra.mxu0 %v12837_v6  ;;  %2116 = vmatpush1.bf16.msra.mxu1 %v12838_v24  ;;  %v12848_v6 = vld [vmem:[#allocation75_spill] sm:$0xff]  ;;  %v12849_v24 = vld [vmem:[#allocation76_spill] sm:$0xff] }
 0x380   :  { %2076 = vmatprep.subr.bf16.mxu0 %v12839_v26  ;;  %2117 = vmatprep.subr.bf16.mxu1 %v12840_v29  ;;  %v12850_v26 = vld [vmem:[#allocation77_spill] sm:$0xff]  ;;  %v12851_v29 = vld [vmem:[#allocation78_spill] sm:$0xff] }
 0x383   :  { %2077 = vmatpush1.bf16.msra.mxu0 %v12841_v18  ;;  %2118 = vmatpush1.bf16.msra.mxu1 %v12842_v51  ;;  %v12852_v18 = vld [vmem:[#allocation79_spill] sm:$0xff] }
 0x384   :  { %2078 = vmatprep.subr.bf16.mxu0 %v12843_v39  ;;  %2119 = vmatprep.subr.bf16.mxu1 %v12844_v52 }
 0x387   :  { %2079 = vmatpush1.bf16.msra.mxu0 %v12845_v0  ;;  %2120 = vmatpush1.bf16.msra.mxu1 %v12846_v13 }
 0x388   :  { %2080 = vmatprep.subr.bf16.mxu0 %v12847_v14  ;;  %2121 = vmatprep.subr.bf16.mxu1 %v12848_v6 }
 0x38b   :  { %2081 = vmatpush1.bf16.msra.mxu0 %v12849_v24  ;;  %2122 = vmatpush1.bf16.msra.mxu1 %v12850_v26 }
 0x38c   :  { %2132 = vmatprep.subr.bf16.mxu0 %v12851_v29  ;;  %2173 = vmatprep.subr.bf16.mxu1 %v12852_v18 }
 0x3e1   :  { %v1846_v51 = vpop.f32.mrb[48].mxu0  ;;  %v1887_v39 = vpop.f32.mrb[48].mxu1 }
 0x3e2   :  { %v1976_v52 = vadd.f32 %v1846_v51, %v12853_v46  ;;  %v1978_v0 = vadd.f32 %v1887_v39, %v12854_v15  ;;  %v1848_v22 = vpop.f32.mrb[49].mxu0  ;;  %v1889_v13 = vpop.f32.mrb[49].mxu1 }
 0x3e3   :  { %v1977_v14 = vadd.f32 %v1848_v22, %v12855_v21  ;;  %v1979_v6 = vadd.f32 %v1889_v13, %v12856_v35  ;;  %v1850_v27 = vpop.f32.mrb[50].mxu0  ;;  %v1891_v24 = vpop.f32.mrb[50].mxu1 }
 0x3e4   :  { %v1851_v2 = vpop.f32.mrb[51].mxu0  ;;  %v1892_v26 = vpop.f32.mrb[51].mxu1  ;;  %v7227_v3 = vmul.f32 -1.442695, %v1976_v52  ;;  %v7229_v29 = vmul.f32 -1.442695, %v1978_v0 }
 0x3e5   :  { %v7228_v8 = vmul.f32 -1.442695, %v1977_v14  ;;  %v7230_v18 = vmul.f32 -1.442695, %v1979_v6  ;;  %v12857_v52 = vld [vmem:[#allocation175_spill] sm:$0xff]  ;;  %v12858_v14 = vld [vmem:[#allocation176_spill] sm:$0xff] }
 0x3e6   :  { %7650 = vpow2.f32 %v7227_v3  ;;  %v12860_v2 = vld [vmem:[#allocation178_spill] sm:$0xff] }
 0x3e7   :  { %7652 = vpow2.f32 %v7229_v29 }
 0x3e8   :  { %7654 = vpow2.f32 %v7228_v8 }
 0x3e9   :  { %7656 = vpow2.f32 %v7230_v18  ;;  %v12859_v18 = vld [vmem:[#allocation177_spill] sm:$0xff] }
 0x3f0   :  { %v7651_v46 = vpop.eup %7650 }
 0x3f1   :  { %v7653_v15 = vpop.eup %7652  ;;  %v2002_v11 = vadd.f32 1.0, %v7651_v46 }
 0x3f2   :  { %v7655_v51 = vpop.eup %7654  ;;  %v2004_v21 = vadd.f32 1.0, %v7653_v15 }
 0x3f3   :  { %v7657_v39 = vpop.eup %7656  ;;  %v2003_v22 = vadd.f32 1.0, %v7655_v51  ;;  %7658 = vrcp.f32 %v2002_v11 }
 0x3f4   :  { %v2005_v13 = vadd.f32 1.0, %v7657_v39  ;;  %7660 = vrcp.f32 %v2004_v21 }
 0x3f5   :  { %7662 = vrcp.f32 %v2003_v22 }
 0x3f6   :  { %7664 = vrcp.f32 %v2005_v13 }
 0x3fd   :  { %v7659_v21 = vpop.eup %7658 }
 0x3fe   :  { %v7661_v22 = vpop.eup %7660 }
 0x421   :  { %v1928_v24 = vpop.f32.mrb[52].mxu0  ;;  %v1969_v26 = vpop.f32.mrb[52].mxu1 }
 0x422   :  { %v1980_v0 = vadd.f32 %v1928_v24, %v12857_v52  ;;  %v1982_v6 = vadd.f32 %v1969_v26, %v12858_v14  ;;  %v1930_v29 = vpop.f32.mrb[53].mxu0  ;;  %v1971_v8 = vpop.f32.mrb[53].mxu1  ;;  %v2022_v14 = vmul.f32 %v7661_v22, %v9238_v44  ;;  %v12863_v22 = vld [vmem:[#allocation110_spill] sm:$0xff] }
 0x423   :  { %v1981_v3 = vadd.f32 %v1930_v29, %v12859_v18  ;;  %v1983_v27 = vadd.f32 %v1971_v8, %v12860_v2  ;;  %v1932_v35 = vpop.f32.mrb[54].mxu0  ;;  %v1973_v46 = vpop.f32.mrb[54].mxu1 }
 0x424   :  { %v7231_v15 = vmul.f32 -1.442695, %v1980_v0  ;;  %7666 = vtanh.f32 %v1982_v6  ;;  %v1933_v11 = vpop.f32.mrb[55].mxu0  ;;  %v1974_v51 = vpop.f32.mrb[55].mxu1 }
 0x425   :  { %v7232_v39 = vmul.f32 -1.442695, %v1981_v3  ;;  %7668 = vtanh.f32 %v1983_v27  ;;  %v7663_v24 = vpop.eup %7662 }
 0x426   :  { %7670 = vpow2.f32 %v7231_v15  ;;  %v7665_v26 = vpop.eup %7664 }
 0x427   :  { %7672 = vpow2.f32 %v7232_v39  ;;  %v2023_v18 = vmul.f32 %v7665_v26, %v9240_v1  ;;  %v12865_v26 = vld [vmem:[#allocation123_spill] sm:$0xff] }
 0x42e   :  { %v7667_v52 = vpop.eup %7666 }
 0x42f   :  { %v7669_v13 = vpop.eup %7668  ;;  %v2024_v29 = vmul.f32 %v7667_v52, %v7659_v21  ;;  %v12866_v52 = vld [vmem:[#allocation124_spill] sm:$0xff] }
 0x430   :  { %v7671_v8 = vpop.eup %7670  ;;  %v2025_v0 = vmul.f32 %v7669_v13, %v7663_v24  ;;  %v12864_v24 = vld [vmem:[#allocation122_spill] sm:$0xff]  ;;  %v12867_v13 = vld [vmem:[#allocation125_spill] sm:$0xff] }
 0x431   :  { %v7673_v6 = vpop.eup %7672  ;;  %v2006_v2 = vadd.f32 1.0, %v7671_v8  ;;  %v9396_v35 = vadd.f32 %v2024_v29, %v2022_v14  ;;  %v12868_v14 = vld [vmem:[#allocation126_spill] sm:$0xff]  ;;  %v12869_v29 = vld [vmem:[#allocation127_spill] sm:$0xff]  ;;  %v12870_v8 = vld [vmem:[#allocation128_spill] sm:$0xff] }
 0x432   :  { %v2007_v3 = vadd.f32 1.0, %v7673_v6  ;;  %v9398_v27 = vadd.f32 %v2025_v0, %v2023_v18  ;;  %v12871_v18 = vld [vmem:[#allocation129_spill] sm:$0xff]  ;;  %v12872_v0 = vld [vmem:[#allocation130_spill] sm:$0xff]  ;;  %v12873_v6 = vld [vmem:[#allocation131_spill] sm:$0xff] }
 0x433   :  { %7674 = vrcp.f32 %v2006_v2  ;;  %v12874_v2 = vld [vmem:[#allocation132_spill] sm:$0xff] }
 0x434   :  { %7676 = vtanh.f32 %v9396_v35 }
 0x435   :  { %7678 = vrcp.f32 %v2007_v3  ;;  %v12875_v3 = vld [vmem:[#allocation133_spill] sm:$0xff] }
 0x436   :  { %7680 = vtanh.f32 %v9398_v27 }
 0x43d   :  { %v7675_v46 = vpop.eup %7674 }
 0x43e   :  { %v7677_v44 = vpop.eup %7676 }
 0x43f   :  { %v7679_v15 = vpop.eup %7678  ;;  %v9402_v51 = vmul.f32 %v7677_v44, %v7675_v46  ;;  %v12876_v46 = vld [vmem:[#allocation134_spill] sm:$0xff]  ;;  %v12877_v44 = vld [vmem:[#allocation135_spill] sm:$0xff] }
 0x440   :  { %v7681_v11 = vpop.eup %7680 }
 0x441   :  { %12861 = vst [vmem:[#allocation82_spill] sm:$0xff] %v9402_v51  ;;  %v9404_v1 = vmul.f32 %v7681_v11, %v7679_v15  ;;  %v9410_v21 = vpack.c.bf16 %v9402_v51, %v9402_v51  ;;  %v12878_v15 = vld [vmem:[#allocation136_spill] sm:$0xff]  ;;  %v12879_v11 = vld [vmem:[#allocation137_spill] sm:$0xff]  ;;  %v12881_v51 = vld [vmem:[#allocation139_spill] sm:$0xff] }
 0x443   :  { %12862 = vst [vmem:[#allocation83_spill] sm:$0xff] %v9404_v1  ;;  %v2049_v39 = vpack.c.bf16 %v9404_v1, %v9404_v1  ;;  %v12882_v1 = vld [vmem:[#allocation140_spill] sm:$0xff] }
 0x445   :  { %2082 = vmatprep.mubr.bf16.mxu0 %v2049_v39  ;;  %2123 = vmatprep.mubr.bf16.mxu1 %v2049_v39 }
 0x446   :  { %2083 = vmatmul.mubr.bf16.vlgmr.msra.gmra.mrb[56].mxu0 %v9410_v21  ;;  %2124 = vmatmul.mubr.bf16.vlgmr.msra.gmra.mrb[56].mxu1 %v9410_v21 }
 0x447   :  { %2133 = vmatpush1.bf16.msra.mxu0 %v12660_v25  ;;  %2174 = vmatpush1.bf16.msra.mxu1 %v12661_v43 }
 0x448   :  { %2164 = vmatprep.mubr.bf16.mxu0 %v2049_v39  ;;  %2205 = vmatprep.mubr.bf16.mxu1 %v2049_v39  ;;  %v12880_v39 = vld [vmem:[#allocation138_spill] sm:$0xff] }
 0x449   :  { %2134 = vmatprep.subr.bf16.mxu0 %v12662_v17  ;;  %2175 = vmatprep.subr.bf16.mxu1 %v12663_v45 }
 0x44b   :  { %2135 = vmatpush1.bf16.msra.mxu0 %v12664_v38  ;;  %2176 = vmatpush1.bf16.msra.mxu1 %v12665_v16 }
 0x44c   :  { %2136 = vmatprep.subr.bf16.mxu0 %v12666_v30  ;;  %2177 = vmatprep.subr.bf16.mxu1 %v12667_v12 }
 0x44f   :  { %2137 = vmatpush1.bf16.msra.mxu0 %v12668_v59  ;;  %2178 = vmatpush1.bf16.msra.mxu1 %v12669_v19 }
 0x450   :  { %2138 = vmatprep.subr.bf16.mxu0 %v12670_v60  ;;  %2179 = vmatprep.subr.bf16.mxu1 %v12671_v61 }
 0x453   :  { %2139 = vmatpush1.bf16.msra.mxu0 %v12672_v7  ;;  %2180 = vmatpush1.bf16.msra.mxu1 %v12673_v37 }
 0x454   :  { %2140 = vmatprep.subr.bf16.mxu0 %v12674_v54  ;;  %2181 = vmatprep.subr.bf16.mxu1 %v12675_v4 }
 0x457   :  { %2141 = vmatpush1.bf16.msra.mxu0 %v12676_v53  ;;  %2182 = vmatpush1.bf16.msra.mxu1 %v12677_v5 }
 0x458   :  { %2142 = vmatprep.subr.bf16.mxu0 %v12766_v40  ;;  %2183 = vmatprep.subr.bf16.mxu1 %v12767_v32 }
 0x45b   :  { %2143 = vmatpush1.bf16.msra.mxu0 %v12768_v33  ;;  %2184 = vmatpush1.bf16.msra.mxu1 %v12769_v50 }
 0x45c   :  { %2144 = vmatprep.subr.bf16.mxu0 %v12770_v34  ;;  %2185 = vmatprep.subr.bf16.mxu1 %v12771_v56 }
 0x45f   :  { %2145 = vmatpush1.bf16.msra.mxu0 %v12772_v57  ;;  %2186 = vmatpush1.bf16.msra.mxu1 %v12773_v23 }
 0x460   :  { %2146 = vmatprep.subr.bf16.mxu0 %v12774_v47  ;;  %2187 = vmatprep.subr.bf16.mxu1 %v12775_v55 }
 0x463   :  { %2147 = vmatpush1.bf16.msra.mxu0 %v12776_v31  ;;  %2188 = vmatpush1.bf16.msra.mxu1 %v12777_v63 }
 0x464   :  { %2148 = vmatprep.subr.bf16.mxu0 %v12863_v22  ;;  %2189 = vmatprep.subr.bf16.mxu1 %v12779_v42 }
 0x467   :  { %2149 = vmatpush1.bf16.msra.mxu0 %v12780_v10  ;;  %2190 = vmatpush1.bf16.msra.mxu1 %v12781_v41 }
 0x468   :  { %2150 = vmatprep.subr.bf16.mxu0 %v12782_v20  ;;  %2191 = vmatprep.subr.bf16.mxu1 %v12783_v49 }
 0x46b   :  { %2151 = vmatpush1.bf16.msra.mxu0 %v12784_v48  ;;  %2192 = vmatpush1.bf16.msra.mxu1 %v12697_v28 }
 0x46c   :  { %2152 = vmatprep.subr.bf16.mxu0 %v12698_v36  ;;  %2193 = vmatprep.subr.bf16.mxu1 %v12699_v62 }
 0x46f   :  { %2153 = vmatpush1.bf16.msra.mxu0 %v12785_v9  ;;  %2194 = vmatpush1.bf16.msra.mxu1 %v12786_v58 }
 0x470   :  { %2154 = vmatprep.subr.bf16.mxu0 %v12864_v24  ;;  %2195 = vmatprep.subr.bf16.mxu1 %v12865_v26 }
 0x473   :  { %2155 = vmatpush1.bf16.msra.mxu0 %v12866_v52  ;;  %2196 = vmatpush1.bf16.msra.mxu1 %v12867_v13 }
 0x474   :  { %2156 = vmatprep.subr.bf16.mxu0 %v12868_v14  ;;  %2197 = vmatprep.subr.bf16.mxu1 %v12869_v29  ;;  %v12952_v29 = vld [vmem:[#allocation153_spill] sm:$0xff]  ;;  %v12953_v14 = vld [vmem:[#allocation154_spill] sm:$0xff] }
 0x477   :  { %2157 = vmatpush1.bf16.msra.mxu0 %v12870_v8  ;;  %2198 = vmatpush1.bf16.msra.mxu1 %v12871_v18  ;;  %v12951_v18 = vld [vmem:[#allocation152_spill] sm:$0xff] }
 0x478   :  { %2158 = vmatprep.subr.bf16.mxu0 %v12872_v0  ;;  %2199 = vmatprep.subr.bf16.mxu1 %v12873_v6  ;;  %v12883_v0 = vld [vmem:[#allocation141_spill] sm:$0xff]  ;;  %v12884_v6 = vld [vmem:[#allocation14_spill] sm:$0xff] }
 0x47b   :  { %2159 = vmatpush1.bf16.msra.mxu0 %v12874_v2  ;;  %2200 = vmatpush1.bf16.msra.mxu1 %v12875_v3  ;;  %v12885_v2 = vld [vmem:[#allocation15_spill] sm:$0xff] }
 0x47c   :  { %2160 = vmatprep.subr.bf16.mxu0 %v12876_v46  ;;  %2201 = vmatprep.subr.bf16.mxu1 %v12877_v44  ;;  %v12886_v44 = vld [vmem:[#allocation16_spill] sm:$0xff]  ;;  %v12895_v46 = vld [vmem:[#allocation25_spill] sm:$0xff]  ;;  %v12950_v3 = vld [vmem:[#allocation151_spill] sm:$0xff] }
 0x47f   :  { %2161 = vmatpush1.bf16.msra.mxu0 %v12878_v15  ;;  %2202 = vmatpush1.bf16.msra.mxu1 %v12879_v11  ;;  %v12887_v15 = vld [vmem:[#allocation17_spill] sm:$0xff]  ;;  %v12888_v11 = vld [vmem:[#allocation18_spill] sm:$0xff] }
 0x480   :  { %2162 = vmatprep.subr.bf16.mxu0 %v12880_v39  ;;  %2203 = vmatprep.subr.bf16.mxu1 %v12881_v51  ;;  %v12889_v39 = vld [vmem:[#allocation19_spill] sm:$0xff]  ;;  %v12890_v51 = vld [vmem:[#allocation20_spill] sm:$0xff] }
 0x483   :  { %2163 = vmatpush1.bf16.msra.mxu0 %v12882_v1  ;;  %2204 = vmatpush1.bf16.msra.mxu1 %v12883_v0  ;;  %v12891_v1 = vld [vmem:[#allocation21_spill] sm:$0xff]  ;;  %v12892_v0 = vld [vmem:[#allocation22_spill] sm:$0xff] }
 0x484   :  { %2288 = vmatprep.subr.bf16.mxu0 %v12884_v6  ;;  %2329 = vmatprep.subr.bf16.mxu1 %v12885_v2  ;;  %v12893_v6 = vld [vmem:[#allocation23_spill] sm:$0xff]  ;;  %v12894_v2 = vld [vmem:[#allocation24_spill] sm:$0xff] }
 0x486   :  { %2165 = vmatmul.mubr.bf16.vlgmr.msra.gmra.mrb[60].mxu0 %v9410_v21  ;;  %2206 = vmatmul.mubr.bf16.vlgmr.msra.gmra.mrb[60].mxu1 %v9410_v21  ;;  %v12896_v21 = vld [vmem:[#allocation26_spill] sm:$0xff] }
 0x487   :  { %2289 = vmatpush1.bf16.msra.mxu0 %v12886_v44  ;;  %2330 = vmatpush1.bf16.msra.mxu1 %v12887_v15  ;;  %v12897_v44 = vld [vmem:[#allocation27_spill] sm:$0xff]  ;;  %v12898_v15 = vld [vmem:[#allocation28_spill] sm:$0xff] }
 0x488   :  { %2290 = vmatprep.subr.bf16.mxu0 %v12888_v11  ;;  %2331 = vmatprep.subr.bf16.mxu1 %v12889_v39  ;;  %v12899_v11 = vld [vmem:[#allocation29_spill] sm:$0xff]  ;;  %v12900_v39 = vld [vmem:[#allocation30_spill] sm:$0xff] }
 0x48b   :  { %2291 = vmatpush1.bf16.msra.mxu0 %v12890_v51  ;;  %2332 = vmatpush1.bf16.msra.mxu1 %v12891_v1  ;;  %v12901_v51 = vld [vmem:[#allocation31_spill] sm:$0xff]  ;;  %v12902_v1 = vld [vmem:[#allocation32_spill] sm:$0xff] }
 0x48c   :  { %2292 = vmatprep.subr.bf16.mxu0 %v12892_v0  ;;  %2333 = vmatprep.subr.bf16.mxu1 %v12893_v6  ;;  %v12903_v0 = vld [vmem:[#allocation33_spill] sm:$0xff]  ;;  %v12904_v6 = vld [vmem:[#allocation34_spill] sm:$0xff] }
 0x48f   :  { %2293 = vmatpush1.bf16.msra.mxu0 %v12894_v2  ;;  %2334 = vmatpush1.bf16.msra.mxu1 %v12895_v46  ;;  %v12905_v2 = vld [vmem:[#allocation35_spill] sm:$0xff]  ;;  %v12906_v46 = vld [vmem:[#allocation36_spill] sm:$0xff] }
 0x490   :  { %2294 = vmatprep.subr.bf16.mxu0 %v12896_v21  ;;  %2335 = vmatprep.subr.bf16.mxu1 %v12897_v44  ;;  %v12907_v21 = vld [vmem:[#allocation37_spill] sm:$0xff]  ;;  %v12908_v44 = vld [vmem:[#allocation38_spill] sm:$0xff] }
 0x493   :  { %2295 = vmatpush1.bf16.msra.mxu0 %v12898_v15  ;;  %2336 = vmatpush1.bf16.msra.mxu1 %v12899_v11  ;;  %v12909_v15 = vld [vmem:[#allocation39_spill] sm:$0xff]  ;;  %v12910_v11 = vld [vmem:[#allocation40_spill] sm:$0xff] }
 0x494   :  { %2296 = vmatprep.subr.bf16.mxu0 %v12900_v39  ;;  %2337 = vmatprep.subr.bf16.mxu1 %v12901_v51  ;;  %v12911_v39 = vld [vmem:[#allocation41_spill] sm:$0xff]  ;;  %v12912_v51 = vld [vmem:[#allocation42_spill] sm:$0xff] }
 0x497   :  { %2297 = vmatpush1.bf16.msra.mxu0 %v12902_v1  ;;  %2338 = vmatpush1.bf16.msra.mxu1 %v12903_v0  ;;  %v12913_v1 = vld [vmem:[#allocation43_spill] sm:$0xff]  ;;  %v12914_v0 = vld [vmem:[#allocation44_spill] sm:$0xff] }
 0x498   :  { %2298 = vmatprep.subr.bf16.mxu0 %v12904_v6  ;;  %2339 = vmatprep.subr.bf16.mxu1 %v12905_v2  ;;  %v12915_v6 = vld [vmem:[#allocation45_spill] sm:$0xff]  ;;  %v12916_v2 = vld [vmem:[#allocation46_spill] sm:$0xff] }
 0x49b   :  { %2299 = vmatpush1.bf16.msra.mxu0 %v12906_v46  ;;  %2340 = vmatpush1.bf16.msra.mxu1 %v12907_v21  ;;  %v12917_v46 = vld [vmem:[#allocation47_spill] sm:$0xff]  ;;  %v12918_v21 = vld [vmem:[#allocation48_spill] sm:$0xff] }
 0x49c   :  { %2300 = vmatprep.subr.bf16.mxu0 %v12908_v44  ;;  %2341 = vmatprep.subr.bf16.mxu1 %v12909_v15  ;;  %v12919_v44 = vld [vmem:[#allocation49_spill] sm:$0xff]  ;;  %v12920_v15 = vld [vmem:[#allocation50_spill] sm:$0xff] }
 0x49f   :  { %2301 = vmatpush1.bf16.msra.mxu0 %v12910_v11  ;;  %2342 = vmatpush1.bf16.msra.mxu1 %v12911_v39  ;;  %v12921_v11 = vld [vmem:[#allocation51_spill] sm:$0xff]  ;;  %v12922_v39 = vld [vmem:[#allocation52_spill] sm:$0xff] }
 0x4a0   :  { %2302 = vmatprep.subr.bf16.mxu0 %v12912_v51  ;;  %2343 = vmatprep.subr.bf16.mxu1 %v12913_v1  ;;  %v12923_v51 = vld [vmem:[#allocation53_spill] sm:$0xff]  ;;  %v12924_v1 = vld [vmem:[#allocation54_spill] sm:$0xff] }
 0x4a3   :  { %2303 = vmatpush1.bf16.msra.mxu0 %v12914_v0  ;;  %2344 = vmatpush1.bf16.msra.mxu1 %v12915_v6  ;;  %v12925_v0 = vld [vmem:[#allocation55_spill] sm:$0xff]  ;;  %v12926_v6 = vld [vmem:[#allocation56_spill] sm:$0xff] }
 0x4a4   :  { %2304 = vmatprep.subr.bf16.mxu0 %v12916_v2  ;;  %2345 = vmatprep.subr.bf16.mxu1 %v12917_v46  ;;  %v12927_v2 = vld [vmem:[#allocation57_spill] sm:$0xff]  ;;  %v12928_v46 = vld [vmem:[#allocation58_spill] sm:$0xff] }
 0x4a7   :  { %2305 = vmatpush1.bf16.msra.mxu0 %v12918_v21  ;;  %2346 = vmatpush1.bf16.msra.mxu1 %v12919_v44  ;;  %v12929_v21 = vld [vmem:[#allocation59_spill] sm:$0xff]  ;;  %v12930_v44 = vld [vmem:[#allocation60_spill] sm:$0xff] }
 0x4a8   :  { %2306 = vmatprep.subr.bf16.mxu0 %v12920_v15  ;;  %2347 = vmatprep.subr.bf16.mxu1 %v12921_v11  ;;  %v12931_v15 = vld [vmem:[#allocation61_spill] sm:$0xff]  ;;  %v12932_v11 = vld [vmem:[#allocation62_spill] sm:$0xff] }
 0x4ab   :  { %2307 = vmatpush1.bf16.msra.mxu0 %v12922_v39  ;;  %2348 = vmatpush1.bf16.msra.mxu1 %v12923_v51  ;;  %v12933_v39 = vld [vmem:[#allocation63_spill] sm:$0xff]  ;;  %v12934_v51 = vld [vmem:[#allocation64_spill] sm:$0xff] }
 0x4ac   :  { %2308 = vmatprep.subr.bf16.mxu0 %v12924_v1  ;;  %2349 = vmatprep.subr.bf16.mxu1 %v12925_v0  ;;  %v12935_v1 = vld [vmem:[#allocation65_spill] sm:$0xff]  ;;  %v12936_v0 = vld [vmem:[#allocation66_spill] sm:$0xff] }
 0x4af   :  { %2309 = vmatpush1.bf16.msra.mxu0 %v12926_v6  ;;  %2350 = vmatpush1.bf16.msra.mxu1 %v12927_v2  ;;  %v12937_v6 = vld [vmem:[#allocation67_spill] sm:$0xff]  ;;  %v12938_v2 = vld [vmem:[#allocation68_spill] sm:$0xff] }
 0x4b0   :  { %2310 = vmatprep.subr.bf16.mxu0 %v12928_v46  ;;  %2351 = vmatprep.subr.bf16.mxu1 %v12929_v21  ;;  %v12939_v46 = vld [vmem:[#allocation69_spill] sm:$0xff]  ;;  %v12940_v21 = vld [vmem:[#allocation70_spill] sm:$0xff] }
 0x4b3   :  { %2311 = vmatpush1.bf16.msra.mxu0 %v12930_v44  ;;  %2352 = vmatpush1.bf16.msra.mxu1 %v12931_v15  ;;  %v12941_v44 = vld [vmem:[#allocation71_spill] sm:$0xff]  ;;  %v12942_v15 = vld [vmem:[#allocation72_spill] sm:$0xff] }
 0x4b4   :  { %2312 = vmatprep.subr.bf16.mxu0 %v12932_v11  ;;  %2353 = vmatprep.subr.bf16.mxu1 %v12933_v39  ;;  %v12943_v11 = vld [vmem:[#allocation73_spill] sm:$0xff]  ;;  %v12944_v39 = vld [vmem:[#allocation74_spill] sm:$0xff] }
 0x4b7   :  { %2313 = vmatpush1.bf16.msra.mxu0 %v12934_v51  ;;  %2354 = vmatpush1.bf16.msra.mxu1 %v12935_v1  ;;  %v12945_v51 = vld [vmem:[#allocation75_spill] sm:$0xff]  ;;  %v12946_v1 = vld [vmem:[#allocation76_spill] sm:$0xff] }
 0x4b8   :  { %2314 = vmatprep.subr.bf16.mxu0 %v12936_v0  ;;  %2355 = vmatprep.subr.bf16.mxu1 %v12937_v6  ;;  %v12947_v0 = vld [vmem:[#allocation77_spill] sm:$0xff]  ;;  %v12948_v6 = vld [vmem:[#allocation78_spill] sm:$0xff] }
 0x4bb   :  { %2315 = vmatpush1.bf16.msra.mxu0 %v12938_v2  ;;  %2356 = vmatpush1.bf16.msra.mxu1 %v12939_v46  ;;  %v12949_v2 = vld [vmem:[#allocation79_spill] sm:$0xff] }
 0x4bc   :  { %2316 = vmatprep.subr.bf16.mxu0 %v12940_v21  ;;  %2357 = vmatprep.subr.bf16.mxu1 %v12941_v44 }
 0x4bf   :  { %2317 = vmatpush1.bf16.msra.mxu0 %v12942_v15  ;;  %2358 = vmatpush1.bf16.msra.mxu1 %v12943_v11 }
 0x4c0   :  { %2318 = vmatprep.subr.bf16.mxu0 %v12944_v39  ;;  %2359 = vmatprep.subr.bf16.mxu1 %v12945_v51 }
 0x4c3   :  { %2319 = vmatpush1.bf16.msra.mxu0 %v12946_v1  ;;  %2360 = vmatpush1.bf16.msra.mxu1 %v12947_v0 }
 0x4c4   :  { %2370 = vmatprep.subr.bf16.mxu0 %v12948_v6  ;;  %2411 = vmatprep.subr.bf16.mxu1 %v12949_v2 }
 0x519   :  { %v2084_v46 = vpop.f32.mrb[56].mxu0  ;;  %v2125_v21 = vpop.f32.mrb[56].mxu1 }
 0x51a   :  { %v2214_v44 = vadd.f32 %v2084_v46, %v12950_v3  ;;  %v2216_v15 = vadd.f32 %v2125_v21, %v12951_v18  ;;  %v2086_v8 = vpop.f32.mrb[57].mxu0  ;;  %v2127_v11 = vpop.f32.mrb[57].mxu1 }
 0x51b   :  { %v2215_v39 = vadd.f32 %v2086_v8, %v12952_v29  ;;  %v2217_v51 = vadd.f32 %v2127_v11, %v12953_v14  ;;  %v2088_v13 = vpop.f32.mrb[58].mxu0  ;;  %v2129_v1 = vpop.f32.mrb[58].mxu1 }
 0x51c   :  { %v2089_v52 = vpop.f32.mrb[59].mxu0  ;;  %v2130_v0 = vpop.f32.mrb[59].mxu1  ;;  %v7233_v26 = vmul.f32 -1.442695, %v2214_v44  ;;  %v7235_v6 = vmul.f32 -1.442695, %v2216_v15 }
 0x51d   :  { %v7234_v24 = vmul.f32 -1.442695, %v2215_v39  ;;  %v7236_v2 = vmul.f32 -1.442695, %v2217_v51  ;;  %v12954_v13 = vld [vmem:[#allocation179_spill] sm:$0xff]  ;;  %v12955_v51 = vld [vmem:[#allocation180_spill] sm:$0xff] }
 0x51e   :  { %7682 = vpow2.f32 %v7233_v26  ;;  %v12957_v15 = vld [vmem:[#allocation182_spill] sm:$0xff] }
 0x51f   :  { %7684 = vpow2.f32 %v7235_v6 }
 0x520   :  { %7686 = vpow2.f32 %v7234_v24 }
 0x521   :  { %7688 = vpow2.f32 %v7236_v2  ;;  %v12956_v2 = vld [vmem:[#allocation181_spill] sm:$0xff] }
 0x528   :  { %v7683_v3 = vpop.eup %7682 }
 0x529   :  { %v7685_v18 = vpop.eup %7684  ;;  %v2240_v58 = vadd.f32 1.0, %v7683_v3 }
 0x52a   :  { %v7687_v46 = vpop.eup %7686  ;;  %v2242_v29 = vadd.f32 1.0, %v7685_v18 }
 0x52b   :  { %v7689_v21 = vpop.eup %7688  ;;  %v2241_v8 = vadd.f32 1.0, %v7687_v46  ;;  %7690 = vrcp.f32 %v2240_v58 }
 0x52c   :  { %v2243_v14 = vadd.f32 1.0, %v7689_v21  ;;  %7692 = vrcp.f32 %v2242_v29 }
 0x52d   :  { %7694 = vrcp.f32 %v2241_v8 }
 0x52e   :  { %7696 = vrcp.f32 %v2243_v14 }
 0x535   :  { %v7691_v29 = vpop.eup %7690 }
 0x536   :  { %v7693_v8 = vpop.eup %7692 }
 0x559   :  { %v2166_v1 = vpop.f32.mrb[60].mxu0  ;;  %v2207_v52 = vpop.f32.mrb[60].mxu1 }
 0x55a   :  { %v2218_v0 = vadd.f32 %v2166_v1, %v12954_v13  ;;  %v2220_v26 = vadd.f32 %v2207_v52, %v12955_v51  ;;  %v2168_v6 = vpop.f32.mrb[61].mxu0  ;;  %v2209_v24 = vpop.f32.mrb[61].mxu1  ;;  %v2260_v51 = vmul.f32 %v7693_v8, %v9396_v35  ;;  %v12960_v8 = vld [vmem:[#allocation121_spill] sm:$0xff] }
 0x55b   :  { %v2219_v44 = vadd.f32 %v2168_v6, %v12956_v2  ;;  %v2221_v11 = vadd.f32 %v2209_v24, %v12957_v15  ;;  %v2170_v39 = vpop.f32.mrb[62].mxu0  ;;  %v2211_v3 = vpop.f32.mrb[62].mxu1 }
 0x55c   :  { %v7237_v18 = vmul.f32 -1.442695, %v2218_v0  ;;  %7698 = vtanh.f32 %v2220_v26  ;;  %v2171_v58 = vpop.f32.mrb[63].mxu0  ;;  %v2212_v46 = vpop.f32.mrb[63].mxu1 }
 0x55d   :  { %v7238_v21 = vmul.f32 -1.442695, %v2219_v44  ;;  %7700 = vtanh.f32 %v2221_v11  ;;  %v7695_v1 = vpop.eup %7694 }
 0x55e   :  { %7702 = vpow2.f32 %v7237_v18  ;;  %v7697_v52 = vpop.eup %7696 }
 0x55f   :  { %7704 = vpow2.f32 %v7238_v21  ;;  %v2261_v2 = vmul.f32 %v7697_v52, %v9398_v27  ;;  %v12962_v52 = vld [vmem:[#allocation123_spill] sm:$0xff] }
 0x566   :  { %v7699_v13 = vpop.eup %7698 }
 0x567   :  { %v7701_v14 = vpop.eup %7700  ;;  %v2262_v6 = vmul.f32 %v7699_v13, %v7691_v29  ;;  %v12963_v13 = vld [vmem:[#allocation124_spill] sm:$0xff] }
 0x568   :  { %v7703_v24 = vpop.eup %7702  ;;  %v2263_v0 = vmul.f32 %v7701_v14, %v7695_v1  ;;  %v12961_v1 = vld [vmem:[#allocation122_spill] sm:$0xff]  ;;  %v12964_v14 = vld [vmem:[#allocation125_spill] sm:$0xff] }
 0x569   :  { %v7705_v26 = vpop.eup %7704  ;;  %v2244_v15 = vadd.f32 1.0, %v7703_v24  ;;  %v9554_v39 = vadd.f32 %v2262_v6, %v2260_v51  ;;  %v12965_v51 = vld [vmem:[#allocation126_spill] sm:$0xff]  ;;  %v12966_v6 = vld [vmem:[#allocation127_spill] sm:$0xff]  ;;  %v12967_v24 = vld [vmem:[#allocation128_spill] sm:$0xff] }
 0x56a   :  { %v2245_v44 = vadd.f32 1.0, %v7705_v26  ;;  %v9556_v11 = vadd.f32 %v2263_v0, %v2261_v2  ;;  %v12968_v2 = vld [vmem:[#allocation129_spill] sm:$0xff]  ;;  %v12969_v0 = vld [vmem:[#allocation130_spill] sm:$0xff]  ;;  %v12970_v26 = vld [vmem:[#allocation131_spill] sm:$0xff] }
 0x56b   :  { %7706 = vrcp.f32 %v2244_v15  ;;  %v12971_v15 = vld [vmem:[#allocation132_spill] sm:$0xff] }
 0x56c   :  { %7708 = vtanh.f32 %v9554_v39 }
 0x56d   :  { %7710 = vrcp.f32 %v2245_v44  ;;  %v12972_v44 = vld [vmem:[#allocation133_spill] sm:$0xff] }
 0x56e   :  { %7712 = vtanh.f32 %v9556_v11 }
 0x575   :  { %v7707_v3 = vpop.eup %7706 }
 0x576   :  { %v7709_v35 = vpop.eup %7708 }
 0x577   :  { %v7711_v18 = vpop.eup %7710  ;;  %v9560_v46 = vmul.f32 %v7709_v35, %v7707_v3  ;;  %v12973_v3 = vld [vmem:[#allocation134_spill] sm:$0xff]  ;;  %v12974_v35 = vld [vmem:[#allocation135_spill] sm:$0xff] }
 0x578   :  { %v7713_v58 = vpop.eup %7712 }
 0x579   :  { %12958 = vst [vmem:[#allocation84_spill] sm:$0xff] %v9560_v46  ;;  %v9562_v27 = vmul.f32 %v7713_v58, %v7711_v18  ;;  %v9568_v29 = vpack.c.bf16 %v9560_v46, %v9560_v46  ;;  %v12975_v18 = vld [vmem:[#allocation136_spill] sm:$0xff]  ;;  %v12976_v58 = vld [vmem:[#allocation137_spill] sm:$0xff]  ;;  %v12978_v46 = vld [vmem:[#allocation139_spill] sm:$0xff] }
 0x57b   :  { %12959 = vst [vmem:[#allocation85_spill] sm:$0xff] %v9562_v27  ;;  %v2287_v21 = vpack.c.bf16 %v9562_v27, %v9562_v27  ;;  %v12979_v27 = vld [vmem:[#allocation140_spill] sm:$0xff] }
 0x57d   :  { %2320 = vmatprep.mubr.bf16.mxu0 %v2287_v21  ;;  %2361 = vmatprep.mubr.bf16.mxu1 %v2287_v21 }
 0x57e   :  { %2321 = vmatmul.mubr.bf16.vlgmr.msra.gmra.mrb[64].mxu0 %v9568_v29  ;;  %2362 = vmatmul.mubr.bf16.vlgmr.msra.gmra.mrb[64].mxu1 %v9568_v29 }
 0x57f   :  { %2371 = vmatpush1.bf16.msra.mxu0 %v12660_v25  ;;  %2412 = vmatpush1.bf16.msra.mxu1 %v12661_v43 }
 0x580   :  { %2402 = vmatprep.mubr.bf16.mxu0 %v2287_v21  ;;  %2443 = vmatprep.mubr.bf16.mxu1 %v2287_v21  ;;  %v12977_v21 = vld [vmem:[#allocation138_spill] sm:$0xff] }
 0x581   :  { %2372 = vmatprep.subr.bf16.mxu0 %v12662_v17  ;;  %2413 = vmatprep.subr.bf16.mxu1 %v12663_v45 }
 0x583   :  { %2373 = vmatpush1.bf16.msra.mxu0 %v12664_v38  ;;  %2414 = vmatpush1.bf16.msra.mxu1 %v12665_v16 }
 0x584   :  { %2374 = vmatprep.subr.bf16.mxu0 %v12666_v30  ;;  %2415 = vmatprep.subr.bf16.mxu1 %v12667_v12 }
 0x587   :  { %2375 = vmatpush1.bf16.msra.mxu0 %v12668_v59  ;;  %2416 = vmatpush1.bf16.msra.mxu1 %v12669_v19 }
 0x588   :  { %2376 = vmatprep.subr.bf16.mxu0 %v12670_v60  ;;  %2417 = vmatprep.subr.bf16.mxu1 %v12671_v61 }
 0x58b   :  { %2377 = vmatpush1.bf16.msra.mxu0 %v12672_v7  ;;  %2418 = vmatpush1.bf16.msra.mxu1 %v12673_v37 }
 0x58c   :  { %2378 = vmatprep.subr.bf16.mxu0 %v12674_v54  ;;  %2419 = vmatprep.subr.bf16.mxu1 %v12675_v4 }
 0x58f   :  { %2379 = vmatpush1.bf16.msra.mxu0 %v12676_v53  ;;  %2420 = vmatpush1.bf16.msra.mxu1 %v12677_v5 }
 0x590   :  { %2380 = vmatprep.subr.bf16.mxu0 %v12766_v40  ;;  %2421 = vmatprep.subr.bf16.mxu1 %v12767_v32 }
 0x593   :  { %2381 = vmatpush1.bf16.msra.mxu0 %v12768_v33  ;;  %2422 = vmatpush1.bf16.msra.mxu1 %v12769_v50 }
 0x594   :  { %2382 = vmatprep.subr.bf16.mxu0 %v12770_v34  ;;  %2423 = vmatprep.subr.bf16.mxu1 %v12771_v56 }
 0x597   :  { %2383 = vmatpush1.bf16.msra.mxu0 %v12772_v57  ;;  %2424 = vmatpush1.bf16.msra.mxu1 %v12773_v23 }
 0x598   :  { %2384 = vmatprep.subr.bf16.mxu0 %v12774_v47  ;;  %2425 = vmatprep.subr.bf16.mxu1 %v12775_v55 }
 0x59b   :  { %2385 = vmatpush1.bf16.msra.mxu0 %v12776_v31  ;;  %2426 = vmatpush1.bf16.msra.mxu1 %v12777_v63 }
 0x59c   :  { %2386 = vmatprep.subr.bf16.mxu0 %v12863_v22  ;;  %2427 = vmatprep.subr.bf16.mxu1 %v12779_v42 }
 0x59f   :  { %2387 = vmatpush1.bf16.msra.mxu0 %v12780_v10  ;;  %2428 = vmatpush1.bf16.msra.mxu1 %v12781_v41 }
 0x5a0   :  { %2388 = vmatprep.subr.bf16.mxu0 %v12782_v20  ;;  %2429 = vmatprep.subr.bf16.mxu1 %v12783_v49 }
 0x5a3   :  { %2389 = vmatpush1.bf16.msra.mxu0 %v12784_v48  ;;  %2430 = vmatpush1.bf16.msra.mxu1 %v12697_v28 }
 0x5a4   :  { %2390 = vmatprep.subr.bf16.mxu0 %v12698_v36  ;;  %2431 = vmatprep.subr.bf16.mxu1 %v12699_v62 }
 0x5a7   :  { %2391 = vmatpush1.bf16.msra.mxu0 %v12785_v9  ;;  %2432 = vmatpush1.bf16.msra.mxu1 %v12960_v8 }
 0x5a8   :  { %2392 = vmatprep.subr.bf16.mxu0 %v12961_v1  ;;  %2433 = vmatprep.subr.bf16.mxu1 %v12962_v52 }
 0x5ab   :  { %2393 = vmatpush1.bf16.msra.mxu0 %v12963_v13  ;;  %2434 = vmatpush1.bf16.msra.mxu1 %v12964_v14 }
 0x5ac   :  { %2394 = vmatprep.subr.bf16.mxu0 %v12965_v51  ;;  %2435 = vmatprep.subr.bf16.mxu1 %v12966_v6  ;;  %v13049_v6 = vld [vmem:[#allocation157_spill] sm:$0xff]  ;;  %v13050_v51 = vld [vmem:[#allocation158_spill] sm:$0xff] }
 0x5af   :  { %2395 = vmatpush1.bf16.msra.mxu0 %v12967_v24  ;;  %2436 = vmatpush1.bf16.msra.mxu1 %v12968_v2  ;;  %v13048_v2 = vld [vmem:[#allocation156_spill] sm:$0xff] }
 0x5b0   :  { %2396 = vmatprep.subr.bf16.mxu0 %v12969_v0  ;;  %2437 = vmatprep.subr.bf16.mxu1 %v12970_v26  ;;  %v12980_v0 = vld [vmem:[#allocation141_spill] sm:$0xff]  ;;  %v12981_v26 = vld [vmem:[#allocation14_spill] sm:$0xff] }
 0x5b3   :  { %2397 = vmatpush1.bf16.msra.mxu0 %v12971_v15  ;;  %2438 = vmatpush1.bf16.msra.mxu1 %v12972_v44  ;;  %v12982_v15 = vld [vmem:[#allocation15_spill] sm:$0xff] }
 0x5b4   :  { %2398 = vmatprep.subr.bf16.mxu0 %v12973_v3  ;;  %2439 = vmatprep.subr.bf16.mxu1 %v12974_v35  ;;  %v12983_v35 = vld [vmem:[#allocation16_spill] sm:$0xff]  ;;  %v12992_v3 = vld [vmem:[#allocation25_spill] sm:$0xff]  ;;  %v13047_v44 = vld [vmem:[#allocation155_spill] sm:$0xff] }
 0x5b7   :  { %2399 = vmatpush1.bf16.msra.mxu0 %v12975_v18  ;;  %2440 = vmatpush1.bf16.msra.mxu1 %v12976_v58  ;;  %v12984_v18 = vld [vmem:[#allocation17_spill] sm:$0xff]  ;;  %v12985_v58 = vld [vmem:[#allocation18_spill] sm:$0xff] }
 0x5b8   :  { %2400 = vmatprep.subr.bf16.mxu0 %v12977_v21  ;;  %2441 = vmatprep.subr.bf16.mxu1 %v12978_v46  ;;  %v12986_v21 = vld [vmem:[#allocation19_spill] sm:$0xff]  ;;  %v12987_v46 = vld [vmem:[#allocation20_spill] sm:$0xff] }
 0x5bb   :  { %2401 = vmatpush1.bf16.msra.mxu0 %v12979_v27  ;;  %2442 = vmatpush1.bf16.msra.mxu1 %v12980_v0  ;;  %v12988_v27 = vld [vmem:[#allocation21_spill] sm:$0xff]  ;;  %v12989_v0 = vld [vmem:[#allocation22_spill] sm:$0xff] }
 0x5bc   :  { %2526 = vmatprep.subr.bf16.mxu0 %v12981_v26  ;;  %2567 = vmatprep.subr.bf16.mxu1 %v12982_v15  ;;  %v12990_v26 = vld [vmem:[#allocation23_spill] sm:$0xff]  ;;  %v12991_v15 = vld [vmem:[#allocation24_spill] sm:$0xff] }
 0x5be   :  { %2403 = vmatmul.mubr.bf16.vlgmr.msra.gmra.mrb[68].mxu0 %v9568_v29  ;;  %2444 = vmatmul.mubr.bf16.vlgmr.msra.gmra.mrb[68].mxu1 %v9568_v29  ;;  %v12993_v29 = vld [vmem:[#allocation26_spill] sm:$0xff] }
 0x5bf   :  { %2527 = vmatpush1.bf16.msra.mxu0 %v12983_v35  ;;  %2568 = vmatpush1.bf16.msra.mxu1 %v12984_v18  ;;  %v12994_v35 = vld [vmem:[#allocation27_spill] sm:$0xff]  ;;  %v12995_v18 = vld [vmem:[#allocation28_spill] sm:$0xff] }
 0x5c0   :  { %2528 = vmatprep.subr.bf16.mxu0 %v12985_v58  ;;  %2569 = vmatprep.subr.bf16.mxu1 %v12986_v21  ;;  %v12996_v58 = vld [vmem:[#allocation29_spill] sm:$0xff]  ;;  %v12997_v21 = vld [vmem:[#allocation30_spill] sm:$0xff] }
 0x5c3   :  { %2529 = vmatpush1.bf16.msra.mxu0 %v12987_v46  ;;  %2570 = vmatpush1.bf16.msra.mxu1 %v12988_v27  ;;  %v12998_v46 = vld [vmem:[#allocation31_spill] sm:$0xff]  ;;  %v12999_v27 = vld [vmem:[#allocation32_spill] sm:$0xff] }
 0x5c4   :  { %2530 = vmatprep.subr.bf16.mxu0 %v12989_v0  ;;  %2571 = vmatprep.subr.bf16.mxu1 %v12990_v26  ;;  %v13000_v0 = vld [vmem:[#allocation33_spill] sm:$0xff]  ;;  %v13001_v26 = vld [vmem:[#allocation34_spill] sm:$0xff] }
 0x5c7   :  { %2531 = vmatpush1.bf16.msra.mxu0 %v12991_v15  ;;  %2572 = vmatpush1.bf16.msra.mxu1 %v12992_v3  ;;  %v13002_v15 = vld [vmem:[#allocation35_spill] sm:$0xff]  ;;  %v13003_v3 = vld [vmem:[#allocation36_spill] sm:$0xff] }
 0x5c8   :  { %2532 = vmatprep.subr.bf16.mxu0 %v12993_v29  ;;  %2573 = vmatprep.subr.bf16.mxu1 %v12994_v35  ;;  %v13004_v29 = vld [vmem:[#allocation37_spill] sm:$0xff]  ;;  %v13005_v35 = vld [vmem:[#allocation38_spill] sm:$0xff] }
 0x5cb   :  { %2533 = vmatpush1.bf16.msra.mxu0 %v12995_v18  ;;  %2574 = vmatpush1.bf16.msra.mxu1 %v12996_v58  ;;  %v13006_v18 = vld [vmem:[#allocation39_spill] sm:$0xff]  ;;  %v13007_v58 = vld [vmem:[#allocation40_spill] sm:$0xff] }
 0x5cc   :  { %2534 = vmatprep.subr.bf16.mxu0 %v12997_v21  ;;  %2575 = vmatprep.subr.bf16.mxu1 %v12998_v46  ;;  %v13008_v21 = vld [vmem:[#allocation41_spill] sm:$0xff]  ;;  %v13009_v46 = vld [vmem:[#allocation42_spill] sm:$0xff] }
 0x5cf   :  { %2535 = vmatpush1.bf16.msra.mxu0 %v12999_v27  ;;  %2576 = vmatpush1.bf16.msra.mxu1 %v13000_v0  ;;  %v13010_v27 = vld [vmem:[#allocation43_spill] sm:$0xff]  ;;  %v13011_v0 = vld [vmem:[#allocation44_spill] sm:$0xff] }
 0x5d0   :  { %2536 = vmatprep.subr.bf16.mxu0 %v13001_v26  ;;  %2577 = vmatprep.subr.bf16.mxu1 %v13002_v15  ;;  %v13012_v26 = vld [vmem:[#allocation45_spill] sm:$0xff]  ;;  %v13013_v15 = vld [vmem:[#allocation46_spill] sm:$0xff] }
 0x5d3   :  { %2537 = vmatpush1.bf16.msra.mxu0 %v13003_v3  ;;  %2578 = vmatpush1.bf16.msra.mxu1 %v13004_v29  ;;  %v13014_v3 = vld [vmem:[#allocation47_spill] sm:$0xff]  ;;  %v13015_v29 = vld [vmem:[#allocation48_spill] sm:$0xff] }
 0x5d4   :  { %2538 = vmatprep.subr.bf16.mxu0 %v13005_v35  ;;  %2579 = vmatprep.subr.bf16.mxu1 %v13006_v18  ;;  %v13016_v35 = vld [vmem:[#allocation49_spill] sm:$0xff]  ;;  %v13017_v18 = vld [vmem:[#allocation50_spill] sm:$0xff] }
 0x5d7   :  { %2539 = vmatpush1.bf16.msra.mxu0 %v13007_v58  ;;  %2580 = vmatpush1.bf16.msra.mxu1 %v13008_v21  ;;  %v13018_v58 = vld [vmem:[#allocation51_spill] sm:$0xff]  ;;  %v13019_v21 = vld [vmem:[#allocation52_spill] sm:$0xff] }
 0x5d8   :  { %2540 = vmatprep.subr.bf16.mxu0 %v13009_v46  ;;  %2581 = vmatprep.subr.bf16.mxu1 %v13010_v27  ;;  %v13020_v46 = vld [vmem:[#allocation53_spill] sm:$0xff]  ;;  %v13021_v27 = vld [vmem:[#allocation54_spill] sm:$0xff] }
 0x5db   :  { %2541 = vmatpush1.bf16.msra.mxu0 %v13011_v0  ;;  %2582 = vmatpush1.bf16.msra.mxu1 %v13012_v26  ;;  %v13022_v0 = vld [vmem:[#allocation55_spill] sm:$0xff]  ;;  %v13023_v26 = vld [vmem:[#allocation56_spill] sm:$0xff] }
 0x5dc   :  { %2542 = vmatprep.subr.bf16.mxu0 %v13013_v15  ;;  %2583 = vmatprep.subr.bf16.mxu1 %v13014_v3  ;;  %v13024_v15 = vld [vmem:[#allocation57_spill] sm:$0xff]  ;;  %v13025_v3 = vld [vmem:[#allocation58_spill] sm:$0xff] }
 0x5df   :  { %2543 = vmatpush1.bf16.msra.mxu0 %v13015_v29  ;;  %2584 = vmatpush1.bf16.msra.mxu1 %v13016_v35  ;;  %v13026_v29 = vld [vmem:[#allocation59_spill] sm:$0xff]  ;;  %v13027_v35 = vld [vmem:[#allocation60_spill] sm:$0xff] }
 0x5e0   :  { %2544 = vmatprep.subr.bf16.mxu0 %v13017_v18  ;;  %2585 = vmatprep.subr.bf16.mxu1 %v13018_v58  ;;  %v13028_v18 = vld [vmem:[#allocation61_spill] sm:$0xff]  ;;  %v13029_v58 = vld [vmem:[#allocation62_spill] sm:$0xff] }
 0x5e3   :  { %2545 = vmatpush1.bf16.msra.mxu0 %v13019_v21  ;;  %2586 = vmatpush1.bf16.msra.mxu1 %v13020_v46  ;;  %v13030_v21 = vld [vmem:[#allocation63_spill] sm:$0xff]  ;;  %v13031_v46 = vld [vmem:[#allocation64_spill] sm:$0xff] }
 0x5e4   :  { %2546 = vmatprep.subr.bf16.mxu0 %v13021_v27  ;;  %2587 = vmatprep.subr.bf16.mxu1 %v13022_v0  ;;  %v13032_v27 = vld [vmem:[#allocation65_spill] sm:$0xff]  ;;  %v13033_v0 = vld [vmem:[#allocation66_spill] sm:$0xff] }
 0x5e7   :  { %2547 = vmatpush1.bf16.msra.mxu0 %v13023_v26  ;;  %2588 = vmatpush1.bf16.msra.mxu1 %v13024_v15  ;;  %v13034_v26 = vld [vmem:[#allocation67_spill] sm:$0xff]  ;;  %v13035_v15 = vld [vmem:[#allocation68_spill] sm:$0xff] }
 0x5e8   :  { %2548 = vmatprep.subr.bf16.mxu0 %v13025_v3  ;;  %2589 = vmatprep.subr.bf16.mxu1 %v13026_v29  ;;  %v13036_v3 = vld [vmem:[#allocation69_spill] sm:$0xff]  ;;  %v13037_v29 = vld [vmem:[#allocation70_spill] sm:$0xff] }
 0x5eb   :  { %2549 = vmatpush1.bf16.msra.mxu0 %v13027_v35  ;;  %2590 = vmatpush1.bf16.msra.mxu1 %v13028_v18  ;;  %v13038_v35 = vld [vmem:[#allocation71_spill] sm:$0xff]  ;;  %v13039_v18 = vld [vmem:[#allocation72_spill] sm:$0xff] }
 0x5ec   :  { %2550 = vmatprep.subr.bf16.mxu0 %v13029_v58  ;;  %2591 = vmatprep.subr.bf16.mxu1 %v13030_v21  ;;  %v13040_v58 = vld [vmem:[#allocation73_spill] sm:$0xff]  ;;  %v13041_v21 = vld [vmem:[#allocation74_spill] sm:$0xff] }
 0x5ef   :  { %2551 = vmatpush1.bf16.msra.mxu0 %v13031_v46  ;;  %2592 = vmatpush1.bf16.msra.mxu1 %v13032_v27  ;;  %v13042_v46 = vld [vmem:[#allocation75_spill] sm:$0xff]  ;;  %v13043_v27 = vld [vmem:[#allocation76_spill] sm:$0xff] }
 0x5f0   :  { %2552 = vmatprep.subr.bf16.mxu0 %v13033_v0  ;;  %2593 = vmatprep.subr.bf16.mxu1 %v13034_v26  ;;  %v13044_v0 = vld [vmem:[#allocation77_spill] sm:$0xff]  ;;  %v13045_v26 = vld [vmem:[#allocation78_spill] sm:$0xff] }
 0x5f3   :  { %2553 = vmatpush1.bf16.msra.mxu0 %v13035_v15  ;;  %2594 = vmatpush1.bf16.msra.mxu1 %v13036_v3  ;;  %v13046_v15 = vld [vmem:[#allocation79_spill] sm:$0xff] }
 0x5f4   :  { %2554 = vmatprep.subr.bf16.mxu0 %v13037_v29  ;;  %2595 = vmatprep.subr.bf16.mxu1 %v13038_v35 }
 0x5f7   :  { %2555 = vmatpush1.bf16.msra.mxu0 %v13039_v18  ;;  %2596 = vmatpush1.bf16.msra.mxu1 %v13040_v58 }
 0x5f8   :  { %2556 = vmatprep.subr.bf16.mxu0 %v13041_v21  ;;  %2597 = vmatprep.subr.bf16.mxu1 %v13042_v46 }
 0x5fb   :  { %2557 = vmatpush1.bf16.msra.mxu0 %v13043_v27  ;;  %2598 = vmatpush1.bf16.msra.mxu1 %v13044_v0 }
 0x5fc   :  { %2608 = vmatprep.subr.bf16.mxu0 %v13045_v26  ;;  %2649 = vmatprep.subr.bf16.mxu1 %v13046_v15 }
 0x651   :  { %v2322_v3 = vpop.f32.mrb[64].mxu0  ;;  %v2363_v29 = vpop.f32.mrb[64].mxu1 }
 0x652   :  { %v2452_v35 = vadd.f32 %v2322_v3, %v13047_v44  ;;  %v2454_v18 = vadd.f32 %v2363_v29, %v13048_v2  ;;  %v2324_v24 = vpop.f32.mrb[65].mxu0  ;;  %v2365_v58 = vpop.f32.mrb[65].mxu1 }
 0x653   :  { %v2453_v21 = vadd.f32 %v2324_v24, %v13049_v6  ;;  %v2455_v46 = vadd.f32 %v2365_v58, %v13050_v51  ;;  %v2326_v14 = vpop.f32.mrb[66].mxu0  ;;  %v2367_v27 = vpop.f32.mrb[66].mxu1 }
 0x654   :  { %v2327_v13 = vpop.f32.mrb[67].mxu0  ;;  %v2368_v0 = vpop.f32.mrb[67].mxu1  ;;  %v7239_v52 = vmul.f32 -1.442695, %v2452_v35  ;;  %v7241_v26 = vmul.f32 -1.442695, %v2454_v18 }
 0x655   :  { %v7240_v1 = vmul.f32 -1.442695, %v2453_v21  ;;  %v7242_v15 = vmul.f32 -1.442695, %v2455_v46  ;;  %v13051_v14 = vld [vmem:[#allocation183_spill] sm:$0xff]  ;;  %v13052_v46 = vld [vmem:[#allocation184_spill] sm:$0xff] }
 0x656   :  { %7714 = vpow2.f32 %v7239_v52  ;;  %v13054_v18 = vld [vmem:[#allocation186_spill] sm:$0xff] }
 0x657   :  { %7716 = vpow2.f32 %v7241_v26 }
 0x658   :  { %7718 = vpow2.f32 %v7240_v1 }
 0x659   :  { %7720 = vpow2.f32 %v7242_v15  ;;  %v13053_v15 = vld [vmem:[#allocation185_spill] sm:$0xff] }
 0x660   :  { %v7715_v44 = vpop.eup %7714 }
 0x661   :  { %v7717_v2 = vpop.eup %7716  ;;  %v2478_v8 = vadd.f32 1.0, %v7715_v44 }
 0x662   :  { %v7719_v3 = vpop.eup %7718  ;;  %v2480_v6 = vadd.f32 1.0, %v7717_v2 }
 0x663   :  { %v7721_v29 = vpop.eup %7720  ;;  %v2479_v24 = vadd.f32 1.0, %v7719_v3  ;;  %7722 = vrcp.f32 %v2478_v8 }
 0x664   :  { %v2481_v51 = vadd.f32 1.0, %v7721_v29  ;;  %7724 = vrcp.f32 %v2480_v6 }
 0x665   :  { %7726 = vrcp.f32 %v2479_v24 }
 0x666   :  { %7728 = vrcp.f32 %v2481_v51 }
 0x66d   :  { %v7723_v6 = vpop.eup %7722 }
 0x66e   :  { %v7725_v24 = vpop.eup %7724 }
 0x691   :  { %v2404_v27 = vpop.f32.mrb[68].mxu0  ;;  %v2445_v13 = vpop.f32.mrb[68].mxu1 }
 0x692   :  { %v2456_v0 = vadd.f32 %v2404_v27, %v13051_v14  ;;  %v2458_v52 = vadd.f32 %v2445_v13, %v13052_v46  ;;  %v2406_v26 = vpop.f32.mrb[69].mxu0  ;;  %v2447_v1 = vpop.f32.mrb[69].mxu1  ;;  %v2498_v46 = vmul.f32 %v7725_v24, %v9554_v39  ;;  %v13057_v24 = vld [vmem:[#allocation121_spill] sm:$0xff] }
 0x693   :  { %v2457_v35 = vadd.f32 %v2406_v26, %v13053_v15  ;;  %v2459_v58 = vadd.f32 %v2447_v1, %v13054_v18  ;;  %v2408_v21 = vpop.f32.mrb[70].mxu0  ;;  %v2449_v44 = vpop.f32.mrb[70].mxu1 }
 0x694   :  { %v7243_v2 = vmul.f32 -1.442695, %v2456_v0  ;;  %7730 = vtanh.f32 %v2458_v52  ;;  %v2409_v8 = vpop.f32.mrb[71].mxu0  ;;  %v2450_v3 = vpop.f32.mrb[71].mxu1 }
 0x695   :  { %v7244_v29 = vmul.f32 -1.442695, %v2457_v35  ;;  %7732 = vtanh.f32 %v2459_v58  ;;  %v7727_v27 = vpop.eup %7726 }
 0x696   :  { %7734 = vpow2.f32 %v7243_v2  ;;  %v7729_v13 = vpop.eup %7728 }
 0x697   :  { %7736 = vpow2.f32 %v7244_v29  ;;  %v2499_v15 = vmul.f32 %v7729_v13, %v9556_v11  ;;  %v13059_v13 = vld [vmem:[#allocation123_spill] sm:$0xff] }
 0x69e   :  { %v7731_v14 = vpop.eup %7730 }
 0x69f   :  { %v7733_v51 = vpop.eup %7732  ;;  %v2500_v26 = vmul.f32 %v7731_v14, %v7723_v6  ;;  %v13060_v14 = vld [vmem:[#allocation124_spill] sm:$0xff] }
 0x6a0   :  { %v7735_v1 = vpop.eup %7734  ;;  %v2501_v0 = vmul.f32 %v7733_v51, %v7727_v27  ;;  %v13058_v27 = vld [vmem:[#allocation122_spill] sm:$0xff]  ;;  %v13061_v51 = vld [vmem:[#allocation125_spill] sm:$0xff] }
 0x6a1   :  { %v7737_v52 = vpop.eup %7736  ;;  %v2482_v18 = vadd.f32 1.0, %v7735_v1  ;;  %v9712_v21 = vadd.f32 %v2500_v26, %v2498_v46  ;;  %v13062_v46 = vld [vmem:[#allocation126_spill] sm:$0xff]  ;;  %v13063_v26 = vld [vmem:[#allocation127_spill] sm:$0xff]  ;;  %v13064_v1 = vld [vmem:[#allocation128_spill] sm:$0xff] }
 0x6a2   :  { %v2483_v35 = vadd.f32 1.0, %v7737_v52  ;;  %v9714_v58 = vadd.f32 %v2501_v0, %v2499_v15  ;;  %v13065_v15 = vld [vmem:[#allocation129_spill] sm:$0xff]  ;;  %v13066_v0 = vld [vmem:[#allocation130_spill] sm:$0xff]  ;;  %v13067_v52 = vld [vmem:[#allocation131_spill] sm:$0xff] }
 0x6a3   :  { %7738 = vrcp.f32 %v2482_v18  ;;  %v13068_v18 = vld [vmem:[#allocation132_spill] sm:$0xff] }
 0x6a4   :  { %7740 = vtanh.f32 %v9712_v21 }
 0x6a5   :  { %7742 = vrcp.f32 %v2483_v35  ;;  %v13069_v35 = vld [vmem:[#allocation133_spill] sm:$0xff] }
 0x6a6   :  { %7744 = vtanh.f32 %v9714_v58 }
 0x6ad   :  { %v7739_v44 = vpop.eup %7738 }
 0x6ae   :  { %v7741_v39 = vpop.eup %7740 }
 0x6af   :  { %v7743_v2 = vpop.eup %7742  ;;  %v9718_v3 = vmul.f32 %v7741_v39, %v7739_v44  ;;  %v13070_v44 = vld [vmem:[#allocation134_spill] sm:$0xff]  ;;  %v13071_v39 = vld [vmem:[#allocation135_spill] sm:$0xff] }
 0x6b0   :  { %v7745_v8 = vpop.eup %7744 }
 0x6b1   :  { %13055 = vst [vmem:[#allocation86_spill] sm:$0xff] %v9718_v3  ;;  %v9720_v11 = vmul.f32 %v7745_v8, %v7743_v2  ;;  %v9726_v6 = vpack.c.bf16 %v9718_v3, %v9718_v3  ;;  %v13072_v2 = vld [vmem:[#allocation136_spill] sm:$0xff]  ;;  %v13073_v8 = vld [vmem:[#allocation137_spill] sm:$0xff]  ;;  %v13075_v3 = vld [vmem:[#allocation139_spill] sm:$0xff] }
 0x6b3   :  { %13056 = vst [vmem:[#allocation87_spill] sm:$0xff] %v9720_v11  ;;  %v2525_v29 = vpack.c.bf16 %v9720_v11, %v9720_v11  ;;  %v13076_v11 = vld [vmem:[#allocation140_spill] sm:$0xff] }
 0x6b5   :  { %2558 = vmatprep.mubr.bf16.mxu0 %v2525_v29  ;;  %2599 = vmatprep.mubr.bf16.mxu1 %v2525_v29 }
 0x6b6   :  { %2559 = vmatmul.mubr.bf16.vlgmr.msra.gmra.mrb[72].mxu0 %v9726_v6  ;;  %2600 = vmatmul.mubr.bf16.vlgmr.msra.gmra.mrb[72].mxu1 %v9726_v6 }
 0x6b7   :  { %2609 = vmatpush1.bf16.msra.mxu0 %v12660_v25  ;;  %2650 = vmatpush1.bf16.msra.mxu1 %v12661_v43 }
 0x6b8   :  { %2640 = vmatprep.mubr.bf16.mxu0 %v2525_v29  ;;  %2681 = vmatprep.mubr.bf16.mxu1 %v2525_v29  ;;  %v13074_v29 = vld [vmem:[#allocation138_spill] sm:$0xff] }
 0x6b9   :  { %2610 = vmatprep.subr.bf16.mxu0 %v12662_v17  ;;  %2651 = vmatprep.subr.bf16.mxu1 %v12663_v45 }
 0x6bb   :  { %2611 = vmatpush1.bf16.msra.mxu0 %v12664_v38  ;;  %2652 = vmatpush1.bf16.msra.mxu1 %v12665_v16 }
 0x6bc   :  { %2612 = vmatprep.subr.bf16.mxu0 %v12666_v30  ;;  %2653 = vmatprep.subr.bf16.mxu1 %v12667_v12 }
 0x6bf   :  { %2613 = vmatpush1.bf16.msra.mxu0 %v12668_v59  ;;  %2654 = vmatpush1.bf16.msra.mxu1 %v12669_v19 }
 0x6c0   :  { %2614 = vmatprep.subr.bf16.mxu0 %v12670_v60  ;;  %2655 = vmatprep.subr.bf16.mxu1 %v12671_v61 }
 0x6c3   :  { %2615 = vmatpush1.bf16.msra.mxu0 %v12672_v7  ;;  %2656 = vmatpush1.bf16.msra.mxu1 %v12673_v37 }
 0x6c4   :  { %2616 = vmatprep.subr.bf16.mxu0 %v12674_v54  ;;  %2657 = vmatprep.subr.bf16.mxu1 %v12675_v4 }
 0x6c7   :  { %2617 = vmatpush1.bf16.msra.mxu0 %v12676_v53  ;;  %2658 = vmatpush1.bf16.msra.mxu1 %v12677_v5 }
 0x6c8   :  { %2618 = vmatprep.subr.bf16.mxu0 %v12766_v40  ;;  %2659 = vmatprep.subr.bf16.mxu1 %v12767_v32 }
 0x6cb   :  { %2619 = vmatpush1.bf16.msra.mxu0 %v12768_v33  ;;  %2660 = vmatpush1.bf16.msra.mxu1 %v12769_v50 }
 0x6cc   :  { %2620 = vmatprep.subr.bf16.mxu0 %v12770_v34  ;;  %2661 = vmatprep.subr.bf16.mxu1 %v12771_v56 }
 0x6cf   :  { %2621 = vmatpush1.bf16.msra.mxu0 %v12772_v57  ;;  %2662 = vmatpush1.bf16.msra.mxu1 %v12773_v23 }
 0x6d0   :  { %2622 = vmatprep.subr.bf16.mxu0 %v12774_v47  ;;  %2663 = vmatprep.subr.bf16.mxu1 %v12775_v55 }
 0x6d3   :  { %2623 = vmatpush1.bf16.msra.mxu0 %v12776_v31  ;;  %2664 = vmatpush1.bf16.msra.mxu1 %v12777_v63 }
 0x6d4   :  { %2624 = vmatprep.subr.bf16.mxu0 %v12863_v22  ;;  %2665 = vmatprep.subr.bf16.mxu1 %v12779_v42 }
 0x6d7   :  { %2625 = vmatpush1.bf16.msra.mxu0 %v12780_v10  ;;  %2666 = vmatpush1.bf16.msra.mxu1 %v12781_v41 }
 0x6d8   :  { %2626 = vmatprep.subr.bf16.mxu0 %v12782_v20  ;;  %2667 = vmatprep.subr.bf16.mxu1 %v12783_v49 }
 0x6db   :  { %2627 = vmatpush1.bf16.msra.mxu0 %v12784_v48  ;;  %2668 = vmatpush1.bf16.msra.mxu1 %v12697_v28 }
 0x6dc   :  { %2628 = vmatprep.subr.bf16.mxu0 %v12698_v36  ;;  %2669 = vmatprep.subr.bf16.mxu1 %v12699_v62 }
 0x6df   :  { %2629 = vmatpush1.bf16.msra.mxu0 %v12785_v9  ;;  %2670 = vmatpush1.bf16.msra.mxu1 %v13057_v24 }
 0x6e0   :  { %2630 = vmatprep.subr.bf16.mxu0 %v13058_v27  ;;  %2671 = vmatprep.subr.bf16.mxu1 %v13059_v13 }
 0x6e3   :  { %2631 = vmatpush1.bf16.msra.mxu0 %v13060_v14  ;;  %2672 = vmatpush1.bf16.msra.mxu1 %v13061_v51 }
 0x6e4   :  { %2632 = vmatprep.subr.bf16.mxu0 %v13062_v46  ;;  %2673 = vmatprep.subr.bf16.mxu1 %v13063_v26  ;;  %v13146_v26 = vld [vmem:[#allocation161_spill] sm:$0xff]  ;;  %v13147_v46 = vld [vmem:[#allocation162_spill] sm:$0xff] }
 0x6e7   :  { %2633 = vmatpush1.bf16.msra.mxu0 %v13064_v1  ;;  %2674 = vmatpush1.bf16.msra.mxu1 %v13065_v15  ;;  %v13145_v15 = vld [vmem:[#allocation160_spill] sm:$0xff] }
 0x6e8   :  { %2634 = vmatprep.subr.bf16.mxu0 %v13066_v0  ;;  %2675 = vmatprep.subr.bf16.mxu1 %v13067_v52  ;;  %v13077_v0 = vld [vmem:[#allocation141_spill] sm:$0xff]  ;;  %v13078_v52 = vld [vmem:[#allocation14_spill] sm:$0xff] }
 0x6eb   :  { %2635 = vmatpush1.bf16.msra.mxu0 %v13068_v18  ;;  %2676 = vmatpush1.bf16.msra.mxu1 %v13069_v35  ;;  %v13079_v18 = vld [vmem:[#allocation15_spill] sm:$0xff] }
 0x6ec   :  { %2636 = vmatprep.subr.bf16.mxu0 %v13070_v44  ;;  %2677 = vmatprep.subr.bf16.mxu1 %v13071_v39  ;;  %v13080_v39 = vld [vmem:[#allocation16_spill] sm:$0xff]  ;;  %v13089_v44 = vld [vmem:[#allocation25_spill] sm:$0xff]  ;;  %v13144_v35 = vld [vmem:[#allocation159_spill] sm:$0xff] }
 0x6ef   :  { %2637 = vmatpush1.bf16.msra.mxu0 %v13072_v2  ;;  %2678 = vmatpush1.bf16.msra.mxu1 %v13073_v8  ;;  %v13081_v2 = vld [vmem:[#allocation17_spill] sm:$0xff]  ;;  %v13082_v8 = vld [vmem:[#allocation18_spill] sm:$0xff] }
 0x6f0   :  { %2638 = vmatprep.subr.bf16.mxu0 %v13074_v29  ;;  %2679 = vmatprep.subr.bf16.mxu1 %v13075_v3  ;;  %v13083_v29 = vld [vmem:[#allocation19_spill] sm:$0xff]  ;;  %v13084_v3 = vld [vmem:[#allocation20_spill] sm:$0xff] }
 0x6f3   :  { %2639 = vmatpush1.bf16.msra.mxu0 %v13076_v11  ;;  %2680 = vmatpush1.bf16.msra.mxu1 %v13077_v0  ;;  %v13085_v11 = vld [vmem:[#allocation21_spill] sm:$0xff]  ;;  %v13086_v0 = vld [vmem:[#allocation22_spill] sm:$0xff] }
 0x6f4   :  { %2764 = vmatprep.subr.bf16.mxu0 %v13078_v52  ;;  %2805 = vmatprep.subr.bf16.mxu1 %v13079_v18  ;;  %v13087_v52 = vld [vmem:[#allocation23_spill] sm:$0xff]  ;;  %v13088_v18 = vld [vmem:[#allocation24_spill] sm:$0xff] }
 0x6f6   :  { %2641 = vmatmul.mubr.bf16.vlgmr.msra.gmra.mrb[76].mxu0 %v9726_v6  ;;  %2682 = vmatmul.mubr.bf16.vlgmr.msra.gmra.mrb[76].mxu1 %v9726_v6  ;;  %v13090_v6 = vld [vmem:[#allocation26_spill] sm:$0xff] }
 0x6f7   :  { %2765 = vmatpush1.bf16.msra.mxu0 %v13080_v39  ;;  %2806 = vmatpush1.bf16.msra.mxu1 %v13081_v2  ;;  %v13091_v39 = vld [vmem:[#allocation27_spill] sm:$0xff]  ;;  %v13092_v2 = vld [vmem:[#allocation28_spill] sm:$0xff] }
 0x6f8   :  { %2766 = vmatprep.subr.bf16.mxu0 %v13082_v8  ;;  %2807 = vmatprep.subr.bf16.mxu1 %v13083_v29  ;;  %v13093_v8 = vld [vmem:[#allocation29_spill] sm:$0xff]  ;;  %v13094_v29 = vld [vmem:[#allocation30_spill] sm:$0xff] }
 0x6fb   :  { %2767 = vmatpush1.bf16.msra.mxu0 %v13084_v3  ;;  %2808 = vmatpush1.bf16.msra.mxu1 %v13085_v11  ;;  %v13095_v3 = vld [vmem:[#allocation31_spill] sm:$0xff]  ;;  %v13096_v11 = vld [vmem:[#allocation32_spill] sm:$0xff] }
 0x6fc   :  { %2768 = vmatprep.subr.bf16.mxu0 %v13086_v0  ;;  %2809 = vmatprep.subr.bf16.mxu1 %v13087_v52  ;;  %v13097_v0 = vld [vmem:[#allocation33_spill] sm:$0xff]  ;;  %v13098_v52 = vld [vmem:[#allocation34_spill] sm:$0xff] }
 0x6ff   :  { %2769 = vmatpush1.bf16.msra.mxu0 %v13088_v18  ;;  %2810 = vmatpush1.bf16.msra.mxu1 %v13089_v44  ;;  %v13099_v18 = vld [vmem:[#allocation35_spill] sm:$0xff]  ;;  %v13100_v44 = vld [vmem:[#allocation36_spill] sm:$0xff] }
 0x700   :  { %2770 = vmatprep.subr.bf16.mxu0 %v13090_v6  ;;  %2811 = vmatprep.subr.bf16.mxu1 %v13091_v39  ;;  %v13101_v6 = vld [vmem:[#allocation37_spill] sm:$0xff]  ;;  %v13102_v39 = vld [vmem:[#allocation38_spill] sm:$0xff] }
 0x703   :  { %2771 = vmatpush1.bf16.msra.mxu0 %v13092_v2  ;;  %2812 = vmatpush1.bf16.msra.mxu1 %v13093_v8  ;;  %v13103_v2 = vld [vmem:[#allocation39_spill] sm:$0xff]  ;;  %v13104_v8 = vld [vmem:[#allocation40_spill] sm:$0xff] }
 0x704   :  { %2772 = vmatprep.subr.bf16.mxu0 %v13094_v29  ;;  %2813 = vmatprep.subr.bf16.mxu1 %v13095_v3  ;;  %v13105_v29 = vld [vmem:[#allocation41_spill] sm:$0xff]  ;;  %v13106_v3 = vld [vmem:[#allocation42_spill] sm:$0xff] }
 0x707   :  { %2773 = vmatpush1.bf16.msra.mxu0 %v13096_v11  ;;  %2814 = vmatpush1.bf16.msra.mxu1 %v13097_v0  ;;  %v13107_v11 = vld [vmem:[#allocation43_spill] sm:$0xff]  ;;  %v13108_v0 = vld [vmem:[#allocation44_spill] sm:$0xff] }
 0x708   :  { %2774 = vmatprep.subr.bf16.mxu0 %v13098_v52  ;;  %2815 = vmatprep.subr.bf16.mxu1 %v13099_v18  ;;  %v13109_v52 = vld [vmem:[#allocation45_spill] sm:$0xff]  ;;  %v13110_v18 = vld [vmem:[#allocation46_spill] sm:$0xff] }
 0x70b   :  { %2775 = vmatpush1.bf16.msra.mxu0 %v13100_v44  ;;  %2816 = vmatpush1.bf16.msra.mxu1 %v13101_v6  ;;  %v13111_v44 = vld [vmem:[#allocation47_spill] sm:$0xff]  ;;  %v13112_v6 = vld [vmem:[#allocation48_spill] sm:$0xff] }
 0x70c   :  { %2776 = vmatprep.subr.bf16.mxu0 %v13102_v39  ;;  %2817 = vmatprep.subr.bf16.mxu1 %v13103_v2  ;;  %v13113_v39 = vld [vmem:[#allocation49_spill] sm:$0xff]  ;;  %v13114_v2 = vld [vmem:[#allocation50_spill] sm:$0xff] }
 0x70f   :  { %2777 = vmatpush1.bf16.msra.mxu0 %v13104_v8  ;;  %2818 = vmatpush1.bf16.msra.mxu1 %v13105_v29  ;;  %v13115_v8 = vld [vmem:[#allocation51_spill] sm:$0xff]  ;;  %v13116_v29 = vld [vmem:[#allocation52_spill] sm:$0xff] }
 0x710   :  { %2778 = vmatprep.subr.bf16.mxu0 %v13106_v3  ;;  %2819 = vmatprep.subr.bf16.mxu1 %v13107_v11  ;;  %v13117_v3 = vld [vmem:[#allocation53_spill] sm:$0xff]  ;;  %v13118_v11 = vld [vmem:[#allocation54_spill] sm:$0xff] }
 0x713   :  { %2779 = vmatpush1.bf16.msra.mxu0 %v13108_v0  ;;  %2820 = vmatpush1.bf16.msra.mxu1 %v13109_v52  ;;  %v13119_v0 = vld [vmem:[#allocation55_spill] sm:$0xff]  ;;  %v13120_v52 = vld [vmem:[#allocation56_spill] sm:$0xff] }
 0x714   :  { %2780 = vmatprep.subr.bf16.mxu0 %v13110_v18  ;;  %2821 = vmatprep.subr.bf16.mxu1 %v13111_v44  ;;  %v13121_v18 = vld [vmem:[#allocation57_spill] sm:$0xff]  ;;  %v13122_v44 = vld [vmem:[#allocation58_spill] sm:$0xff] }
 0x717   :  { %2781 = vmatpush1.bf16.msra.mxu0 %v13112_v6  ;;  %2822 = vmatpush1.bf16.msra.mxu1 %v13113_v39  ;;  %v13123_v6 = vld [vmem:[#allocation59_spill] sm:$0xff]  ;;  %v13124_v39 = vld [vmem:[#allocation60_spill] sm:$0xff] }
 0x718   :  { %2782 = vmatprep.subr.bf16.mxu0 %v13114_v2  ;;  %2823 = vmatprep.subr.bf16.mxu1 %v13115_v8  ;;  %v13125_v2 = vld [vmem:[#allocation61_spill] sm:$0xff]  ;;  %v13126_v8 = vld [vmem:[#allocation62_spill] sm:$0xff] }
 0x71b   :  { %2783 = vmatpush1.bf16.msra.mxu0 %v13116_v29  ;;  %2824 = vmatpush1.bf16.msra.mxu1 %v13117_v3  ;;  %v13127_v29 = vld [vmem:[#allocation63_spill] sm:$0xff]  ;;  %v13128_v3 = vld [vmem:[#allocation64_spill] sm:$0xff] }
 0x71c   :  { %2784 = vmatprep.subr.bf16.mxu0 %v13118_v11  ;;  %2825 = vmatprep.subr.bf16.mxu1 %v13119_v0  ;;  %v13129_v11 = vld [vmem:[#allocation65_spill] sm:$0xff]  ;;  %v13130_v0 = vld [vmem:[#allocation66_spill] sm:$0xff] }
 0x71f   :  { %2785 = vmatpush1.bf16.msra.mxu0 %v13120_v52  ;;  %2826 = vmatpush1.bf16.msra.mxu1 %v13121_v18  ;;  %v13131_v52 = vld [vmem:[#allocation67_spill] sm:$0xff]  ;;  %v13132_v18 = vld [vmem:[#allocation68_spill] sm:$0xff] }
 0x720   :  { %2786 = vmatprep.subr.bf16.mxu0 %v13122_v44  ;;  %2827 = vmatprep.subr.bf16.mxu1 %v13123_v6  ;;  %v13133_v44 = vld [vmem:[#allocation69_spill] sm:$0xff]  ;;  %v13134_v6 = vld [vmem:[#allocation70_spill] sm:$0xff] }
 0x723   :  { %2787 = vmatpush1.bf16.msra.mxu0 %v13124_v39  ;;  %2828 = vmatpush1.bf16.msra.mxu1 %v13125_v2  ;;  %v13135_v39 = vld [vmem:[#allocation71_spill] sm:$0xff]  ;;  %v13136_v2 = vld [vmem:[#allocation72_spill] sm:$0xff] }
 0x724   :  { %2788 = vmatprep.subr.bf16.mxu0 %v13126_v8  ;;  %2829 = vmatprep.subr.bf16.mxu1 %v13127_v29  ;;  %v13137_v8 = vld [vmem:[#allocation73_spill] sm:$0xff]  ;;  %v13138_v29 = vld [vmem:[#allocation74_spill] sm:$0xff] }
 0x727   :  { %2789 = vmatpush1.bf16.msra.mxu0 %v13128_v3  ;;  %2830 = vmatpush1.bf16.msra.mxu1 %v13129_v11  ;;  %v13139_v3 = vld [vmem:[#allocation75_spill] sm:$0xff]  ;;  %v13140_v11 = vld [vmem:[#allocation76_spill] sm:$0xff] }
 0x728   :  { %2790 = vmatprep.subr.bf16.mxu0 %v13130_v0  ;;  %2831 = vmatprep.subr.bf16.mxu1 %v13131_v52  ;;  %v13141_v0 = vld [vmem:[#allocation77_spill] sm:$0xff]  ;;  %v13142_v52 = vld [vmem:[#allocation78_spill] sm:$0xff] }
 0x72b   :  { %2791 = vmatpush1.bf16.msra.mxu0 %v13132_v18  ;;  %2832 = vmatpush1.bf16.msra.mxu1 %v13133_v44  ;;  %v13143_v18 = vld [vmem:[#allocation79_spill] sm:$0xff] }
 0x72c   :  { %2792 = vmatprep.subr.bf16.mxu0 %v13134_v6  ;;  %2833 = vmatprep.subr.bf16.mxu1 %v13135_v39 }
 0x72f   :  { %2793 = vmatpush1.bf16.msra.mxu0 %v13136_v2  ;;  %2834 = vmatpush1.bf16.msra.mxu1 %v13137_v8 }
 0x730   :  { %2794 = vmatprep.subr.bf16.mxu0 %v13138_v29  ;;  %2835 = vmatprep.subr.bf16.mxu1 %v13139_v3 }
 0x733   :  { %2795 = vmatpush1.bf16.msra.mxu0 %v13140_v11  ;;  %2836 = vmatpush1.bf16.msra.mxu1 %v13141_v0 }
 0x734   :  { %2846 = vmatprep.subr.bf16.mxu0 %v13142_v52  ;;  %2887 = vmatprep.subr.bf16.mxu1 %v13143_v18 }
 0x789   :  { %v2560_v44 = vpop.f32.mrb[72].mxu0  ;;  %v2601_v6 = vpop.f32.mrb[72].mxu1 }
 0x78a   :  { %v2690_v39 = vadd.f32 %v2560_v44, %v13144_v35  ;;  %v2692_v2 = vadd.f32 %v2601_v6, %v13145_v15  ;;  %v2562_v1 = vpop.f32.mrb[73].mxu0  ;;  %v2603_v8 = vpop.f32.mrb[73].mxu1 }
 0x78b   :  { %v2691_v29 = vadd.f32 %v2562_v1, %v13146_v26  ;;  %v2693_v3 = vadd.f32 %v2603_v8, %v13147_v46  ;;  %v2564_v51 = vpop.f32.mrb[74].mxu0  ;;  %v2605_v11 = vpop.f32.mrb[74].mxu1 }
 0x78c   :  { %v2565_v14 = vpop.f32.mrb[75].mxu0  ;;  %v2606_v0 = vpop.f32.mrb[75].mxu1  ;;  %v7245_v13 = vmul.f32 -1.442695, %v2690_v39  ;;  %v7247_v52 = vmul.f32 -1.442695, %v2692_v2 }
 0x78d   :  { %v7246_v27 = vmul.f32 -1.442695, %v2691_v29  ;;  %v7248_v18 = vmul.f32 -1.442695, %v2693_v3  ;;  %v13148_v51 = vld [vmem:[#allocation187_spill] sm:$0xff]  ;;  %v13149_v3 = vld [vmem:[#allocation188_spill] sm:$0xff] }
 0x78e   :  { %7746 = vpow2.f32 %v7245_v13  ;;  %v13151_v2 = vld [vmem:[#allocation190_spill] sm:$0xff] }
 0x78f   :  { %7748 = vpow2.f32 %v7247_v52 }
 0x790   :  { %7750 = vpow2.f32 %v7246_v27 }
 0x791   :  { %7752 = vpow2.f32 %v7248_v18  ;;  %v13150_v18 = vld [vmem:[#allocation189_spill] sm:$0xff] }
 0x798   :  { %v7747_v35 = vpop.eup %7746 }
 0x799   :  { %v7749_v15 = vpop.eup %7748  ;;  %v2716_v24 = vadd.f32 1.0, %v7747_v35 }
 0x79a   :  { %v7751_v44 = vpop.eup %7750  ;;  %v2718_v26 = vadd.f32 1.0, %v7749_v15 }
 0x79b   :  { %v7753_v6 = vpop.eup %7752  ;;  %v2717_v1 = vadd.f32 1.0, %v7751_v44  ;;  %7754 = vrcp.f32 %v2716_v24 }
 0x79c   :  { %v2719_v46 = vadd.f32 1.0, %v7753_v6  ;;  %7756 = vrcp.f32 %v2718_v26 }
 0x79d   :  { %7758 = vrcp.f32 %v2717_v1 }
 0x79e   :  { %7760 = vrcp.f32 %v2719_v46 }
 0x7a5   :  { %v7755_v26 = vpop.eup %7754 }
 0x7a6   :  { %v7757_v1 = vpop.eup %7756 }
 0x7c9   :  { %v2642_v11 = vpop.f32.mrb[76].mxu0  ;;  %v2683_v14 = vpop.f32.mrb[76].mxu1 }
 0x7ca   :  { %v2694_v0 = vadd.f32 %v2642_v11, %v13148_v51  ;;  %v2696_v13 = vadd.f32 %v2683_v14, %v13149_v3  ;;  %v2644_v52 = vpop.f32.mrb[77].mxu0  ;;  %v2685_v27 = vpop.f32.mrb[77].mxu1  ;;  %v2736_v3 = vmul.f32 %v7757_v1, %v9712_v21  ;;  %v13154_v1 = vld [vmem:[#allocation121_spill] sm:$0xff] }
 0x7cb   :  { %v2695_v39 = vadd.f32 %v2644_v52, %v13150_v18  ;;  %v2697_v8 = vadd.f32 %v2685_v27, %v13151_v2  ;;  %v2646_v29 = vpop.f32.mrb[78].mxu0  ;;  %v2687_v35 = vpop.f32.mrb[78].mxu1 }
 0x7cc   :  { %v7249_v15 = vmul.f32 -1.442695, %v2694_v0  ;;  %7762 = vtanh.f32 %v2696_v13  ;;  %v2647_v24 = vpop.f32.mrb[79].mxu0  ;;  %v2688_v44 = vpop.f32.mrb[79].mxu1 }
 0x7cd   :  { %v7250_v6 = vmul.f32 -1.442695, %v2695_v39  ;;  %7764 = vtanh.f32 %v2697_v8  ;;  %v7759_v11 = vpop.eup %7758 }
 0x7ce   :  { %7766 = vpow2.f32 %v7249_v15  ;;  %v7761_v14 = vpop.eup %7760 }
 0x7cf   :  { %7768 = vpow2.f32 %v7250_v6  ;;  %v2737_v18 = vmul.f32 %v7761_v14, %v9714_v58  ;;  %v13156_v14 = vld [vmem:[#allocation123_spill] sm:$0xff] }
 0x7d6   :  { %v7763_v51 = vpop.eup %7762 }
 0x7d7   :  { %v7765_v46 = vpop.eup %7764  ;;  %v2738_v52 = vmul.f32 %v7763_v51, %v7755_v26  ;;  %v13157_v51 = vld [vmem:[#allocation124_spill] sm:$0xff] }
 0x7d8   :  { %v7767_v27 = vpop.eup %7766  ;;  %v2739_v0 = vmul.f32 %v7765_v46, %v7759_v11  ;;  %v13155_v11 = vld [vmem:[#allocation122_spill] sm:$0xff]  ;;  %v13158_v46 = vld [vmem:[#allocation125_spill] sm:$0xff] }
 0x7d9   :  { %v7769_v13 = vpop.eup %7768  ;;  %v2720_v2 = vadd.f32 1.0, %v7767_v27  ;;  %v9870_v29 = vadd.f32 %v2738_v52, %v2736_v3  ;;  %v13159_v3 = vld [vmem:[#allocation126_spill] sm:$0xff]  ;;  %v13160_v52 = vld [vmem:[#allocation127_spill] sm:$0xff]  ;;  %v13161_v27 = vld [vmem:[#allocation128_spill] sm:$0xff] }
 0x7da   :  { %v2721_v39 = vadd.f32 1.0, %v7769_v13  ;;  %v9872_v8 = vadd.f32 %v2739_v0, %v2737_v18  ;;  %v13162_v18 = vld [vmem:[#allocation129_spill] sm:$0xff]  ;;  %v13163_v0 = vld [vmem:[#allocation130_spill] sm:$0xff]  ;;  %v13164_v13 = vld [vmem:[#allocation131_spill] sm:$0xff] }
 0x7db   :  { %7770 = vrcp.f32 %v2720_v2  ;;  %v13165_v2 = vld [vmem:[#allocation132_spill] sm:$0xff] }
 0x7dc   :  { %7772 = vtanh.f32 %v9870_v29 }
 0x7dd   :  { %7774 = vrcp.f32 %v2721_v39  ;;  %v13166_v39 = vld [vmem:[#allocation133_spill] sm:$0xff] }
 0x7de   :  { %7776 = vtanh.f32 %v9872_v8 }
 0x7e5   :  { %v7771_v35 = vpop.eup %7770 }
 0x7e6   :  { %v7773_v21 = vpop.eup %7772 }
 0x7e7   :  { %v7775_v15 = vpop.eup %7774  ;;  %v9876_v44 = vmul.f32 %v7773_v21, %v7771_v35  ;;  %v13167_v35 = vld [vmem:[#allocation134_spill] sm:$0xff]  ;;  %v13168_v21 = vld [vmem:[#allocation135_spill] sm:$0xff] }
 0x7e8   :  { %v7777_v24 = vpop.eup %7776 }
 0x7e9   :  { %13152 = vst [vmem:[#allocation88_spill] sm:$0xff] %v9876_v44  ;;  %v9878_v58 = vmul.f32 %v7777_v24, %v7775_v15  ;;  %v9884_v26 = vpack.c.bf16 %v9876_v44, %v9876_v44  ;;  %v13169_v15 = vld [vmem:[#allocation136_spill] sm:$0xff]  ;;  %v13170_v24 = vld [vmem:[#allocation137_spill] sm:$0xff]  ;;  %v13172_v44 = vld [vmem:[#allocation139_spill] sm:$0xff] }
 0x7eb   :  { %13153 = vst [vmem:[#allocation89_spill] sm:$0xff] %v9878_v58  ;;  %v2763_v6 = vpack.c.bf16 %v9878_v58, %v9878_v58  ;;  %v13173_v58 = vld [vmem:[#allocation140_spill] sm:$0xff] }
 0x7ed   :  { %2796 = vmatprep.mubr.bf16.mxu0 %v2763_v6  ;;  %2837 = vmatprep.mubr.bf16.mxu1 %v2763_v6 }
 0x7ee   :  { %2797 = vmatmul.mubr.bf16.vlgmr.msra.gmra.mrb[80].mxu0 %v9884_v26  ;;  %2838 = vmatmul.mubr.bf16.vlgmr.msra.gmra.mrb[80].mxu1 %v9884_v26 }
 0x7ef   :  { %2847 = vmatpush1.bf16.msra.mxu0 %v12660_v25  ;;  %2888 = vmatpush1.bf16.msra.mxu1 %v12661_v43 }
 0x7f0   :  { %2878 = vmatprep.mubr.bf16.mxu0 %v2763_v6  ;;  %2919 = vmatprep.mubr.bf16.mxu1 %v2763_v6  ;;  %v13171_v6 = vld [vmem:[#allocation138_spill] sm:$0xff] }
 0x7f1   :  { %2848 = vmatprep.subr.bf16.mxu0 %v12662_v17  ;;  %2889 = vmatprep.subr.bf16.mxu1 %v12663_v45 }
 0x7f3   :  { %2849 = vmatpush1.bf16.msra.mxu0 %v12664_v38  ;;  %2890 = vmatpush1.bf16.msra.mxu1 %v12665_v16 }
 0x7f4   :  { %2850 = vmatprep.subr.bf16.mxu0 %v12666_v30  ;;  %2891 = vmatprep.subr.bf16.mxu1 %v12667_v12 }
 0x7f7   :  { %2851 = vmatpush1.bf16.msra.mxu0 %v12668_v59  ;;  %2892 = vmatpush1.bf16.msra.mxu1 %v12669_v19 }
 0x7f8   :  { %2852 = vmatprep.subr.bf16.mxu0 %v12670_v60  ;;  %2893 = vmatprep.subr.bf16.mxu1 %v12671_v61 }
 0x7fb   :  { %2853 = vmatpush1.bf16.msra.mxu0 %v12672_v7  ;;  %2894 = vmatpush1.bf16.msra.mxu1 %v12673_v37 }
 0x7fc   :  { %2854 = vmatprep.subr.bf16.mxu0 %v12674_v54  ;;  %2895 = vmatprep.subr.bf16.mxu1 %v12675_v4 }
 0x7ff   :  { %2855 = vmatpush1.bf16.msra.mxu0 %v12676_v53  ;;  %2896 = vmatpush1.bf16.msra.mxu1 %v12677_v5 }
 0x800   :  { %2856 = vmatprep.subr.bf16.mxu0 %v12766_v40  ;;  %2897 = vmatprep.subr.bf16.mxu1 %v12767_v32 }
 0x803   :  { %2857 = vmatpush1.bf16.msra.mxu0 %v12768_v33  ;;  %2898 = vmatpush1.bf16.msra.mxu1 %v12769_v50 }
 0x804   :  { %2858 = vmatprep.subr.bf16.mxu0 %v12770_v34  ;;  %2899 = vmatprep.subr.bf16.mxu1 %v12771_v56 }
 0x807   :  { %2859 = vmatpush1.bf16.msra.mxu0 %v12772_v57  ;;  %2900 = vmatpush1.bf16.msra.mxu1 %v12773_v23 }
 0x808   :  { %2860 = vmatprep.subr.bf16.mxu0 %v12774_v47  ;;  %2901 = vmatprep.subr.bf16.mxu1 %v12775_v55 }
 0x80b   :  { %2861 = vmatpush1.bf16.msra.mxu0 %v12776_v31  ;;  %2902 = vmatpush1.bf16.msra.mxu1 %v12777_v63 }
 0x80c   :  { %2862 = vmatprep.subr.bf16.mxu0 %v12863_v22  ;;  %2903 = vmatprep.subr.bf16.mxu1 %v12779_v42 }
 0x80f   :  { %2863 = vmatpush1.bf16.msra.mxu0 %v12780_v10  ;;  %2904 = vmatpush1.bf16.msra.mxu1 %v12781_v41 }
 0x810   :  { %2864 = vmatprep.subr.bf16.mxu0 %v12782_v20  ;;  %2905 = vmatprep.subr.bf16.mxu1 %v12783_v49 }
 0x813   :  { %2865 = vmatpush1.bf16.msra.mxu0 %v12784_v48  ;;  %2906 = vmatpush1.bf16.msra.mxu1 %v12697_v28 }
 0x814   :  { %2866 = vmatprep.subr.bf16.mxu0 %v12698_v36  ;;  %2907 = vmatprep.subr.bf16.mxu1 %v12699_v62 }
 0x817   :  { %2867 = vmatpush1.bf16.msra.mxu0 %v12785_v9  ;;  %2908 = vmatpush1.bf16.msra.mxu1 %v13154_v1 }
 0x818   :  { %2868 = vmatprep.subr.bf16.mxu0 %v13155_v11  ;;  %2909 = vmatprep.subr.bf16.mxu1 %v13156_v14 }
 0x81b   :  { %2869 = vmatpush1.bf16.msra.mxu0 %v13157_v51  ;;  %2910 = vmatpush1.bf16.msra.mxu1 %v13158_v46 }
 0x81c   :  { %2870 = vmatprep.subr.bf16.mxu0 %v13159_v3  ;;  %2911 = vmatprep.subr.bf16.mxu1 %v13160_v52  ;;  %v13243_v52 = vld [vmem:[#allocation165_spill] sm:$0xff]  ;;  %v13244_v3 = vld [vmem:[#allocation166_spill] sm:$0xff] }
 0x81f   :  { %2871 = vmatpush1.bf16.msra.mxu0 %v13161_v27  ;;  %2912 = vmatpush1.bf16.msra.mxu1 %v13162_v18  ;;  %v13242_v18 = vld [vmem:[#allocation164_spill] sm:$0xff] }
 0x820   :  { %2872 = vmatprep.subr.bf16.mxu0 %v13163_v0  ;;  %2913 = vmatprep.subr.bf16.mxu1 %v13164_v13  ;;  %v13174_v0 = vld [vmem:[#allocation141_spill] sm:$0xff]  ;;  %v13175_v13 = vld [vmem:[#allocation14_spill] sm:$0xff] }
 0x823   :  { %2873 = vmatpush1.bf16.msra.mxu0 %v13165_v2  ;;  %2914 = vmatpush1.bf16.msra.mxu1 %v13166_v39  ;;  %v13176_v2 = vld [vmem:[#allocation15_spill] sm:$0xff] }
 0x824   :  { %2874 = vmatprep.subr.bf16.mxu0 %v13167_v35  ;;  %2915 = vmatprep.subr.bf16.mxu1 %v13168_v21  ;;  %v13177_v21 = vld [vmem:[#allocation16_spill] sm:$0xff]  ;;  %v13186_v35 = vld [vmem:[#allocation25_spill] sm:$0xff]  ;;  %v13241_v39 = vld [vmem:[#allocation163_spill] sm:$0xff] }
 0x827   :  { %2875 = vmatpush1.bf16.msra.mxu0 %v13169_v15  ;;  %2916 = vmatpush1.bf16.msra.mxu1 %v13170_v24  ;;  %v13178_v15 = vld [vmem:[#allocation17_spill] sm:$0xff]  ;;  %v13179_v24 = vld [vmem:[#allocation18_spill] sm:$0xff] }
 0x828   :  { %2876 = vmatprep.subr.bf16.mxu0 %v13171_v6  ;;  %2917 = vmatprep.subr.bf16.mxu1 %v13172_v44  ;;  %v13180_v6 = vld [vmem:[#allocation19_spill] sm:$0xff]  ;;  %v13181_v44 = vld [vmem:[#allocation20_spill] sm:$0xff] }
 0x82b   :  { %2877 = vmatpush1.bf16.msra.mxu0 %v13173_v58  ;;  %2918 = vmatpush1.bf16.msra.mxu1 %v13174_v0  ;;  %v13182_v58 = vld [vmem:[#allocation21_spill] sm:$0xff]  ;;  %v13183_v0 = vld [vmem:[#allocation22_spill] sm:$0xff] }
 0x82c   :  { %3002 = vmatprep.subr.bf16.mxu0 %v13175_v13  ;;  %3043 = vmatprep.subr.bf16.mxu1 %v13176_v2  ;;  %v13184_v13 = vld [vmem:[#allocation23_spill] sm:$0xff]  ;;  %v13185_v2 = vld [vmem:[#allocation24_spill] sm:$0xff] }
 0x82e   :  { %2879 = vmatmul.mubr.bf16.vlgmr.msra.gmra.mrb[84].mxu0 %v9884_v26  ;;  %2920 = vmatmul.mubr.bf16.vlgmr.msra.gmra.mrb[84].mxu1 %v9884_v26  ;;  %v13187_v26 = vld [vmem:[#allocation26_spill] sm:$0xff] }
 0x82f   :  { %3003 = vmatpush1.bf16.msra.mxu0 %v13177_v21  ;;  %3044 = vmatpush1.bf16.msra.mxu1 %v13178_v15  ;;  %v13188_v21 = vld [vmem:[#allocation27_spill] sm:$0xff]  ;;  %v13189_v15 = vld [vmem:[#allocation28_spill] sm:$0xff] }
 0x830   :  { %3004 = vmatprep.subr.bf16.mxu0 %v13179_v24  ;;  %3045 = vmatprep.subr.bf16.mxu1 %v13180_v6  ;;  %v13190_v24 = vld [vmem:[#allocation29_spill] sm:$0xff]  ;;  %v13191_v6 = vld [vmem:[#allocation30_spill] sm:$0xff] }
 0x833   :  { %3005 = vmatpush1.bf16.msra.mxu0 %v13181_v44  ;;  %3046 = vmatpush1.bf16.msra.mxu1 %v13182_v58  ;;  %v13192_v44 = vld [vmem:[#allocation31_spill] sm:$0xff]  ;;  %v13193_v58 = vld [vmem:[#allocation32_spill] sm:$0xff] }
 0x834   :  { %3006 = vmatprep.subr.bf16.mxu0 %v13183_v0  ;;  %3047 = vmatprep.subr.bf16.mxu1 %v13184_v13  ;;  %v13194_v0 = vld [vmem:[#allocation33_spill] sm:$0xff]  ;;  %v13195_v13 = vld [vmem:[#allocation34_spill] sm:$0xff] }
 0x837   :  { %3007 = vmatpush1.bf16.msra.mxu0 %v13185_v2  ;;  %3048 = vmatpush1.bf16.msra.mxu1 %v13186_v35  ;;  %v13196_v2 = vld [vmem:[#allocation35_spill] sm:$0xff]  ;;  %v13197_v35 = vld [vmem:[#allocation36_spill] sm:$0xff] }
 0x838   :  { %3008 = vmatprep.subr.bf16.mxu0 %v13187_v26  ;;  %3049 = vmatprep.subr.bf16.mxu1 %v13188_v21  ;;  %v13198_v26 = vld [vmem:[#allocation37_spill] sm:$0xff]  ;;  %v13199_v21 = vld [vmem:[#allocation38_spill] sm:$0xff] }
 0x83b   :  { %3009 = vmatpush1.bf16.msra.mxu0 %v13189_v15  ;;  %3050 = vmatpush1.bf16.msra.mxu1 %v13190_v24  ;;  %v13200_v15 = vld [vmem:[#allocation39_spill] sm:$0xff]  ;;  %v13201_v24 = vld [vmem:[#allocation40_spill] sm:$0xff] }
 0x83c   :  { %3010 = vmatprep.subr.bf16.mxu0 %v13191_v6  ;;  %3051 = vmatprep.subr.bf16.mxu1 %v13192_v44  ;;  %v13202_v6 = vld [vmem:[#allocation41_spill] sm:$0xff]  ;;  %v13203_v44 = vld [vmem:[#allocation42_spill] sm:$0xff] }
 0x83f   :  { %3011 = vmatpush1.bf16.msra.mxu0 %v13193_v58  ;;  %3052 = vmatpush1.bf16.msra.mxu1 %v13194_v0  ;;  %v13204_v58 = vld [vmem:[#allocation43_spill] sm:$0xff]  ;;  %v13205_v0 = vld [vmem:[#allocation44_spill] sm:$0xff] }
 0x840   :  { %3012 = vmatprep.subr.bf16.mxu0 %v13195_v13  ;;  %3053 = vmatprep.subr.bf16.mxu1 %v13196_v2  ;;  %v13206_v13 = vld [vmem:[#allocation45_spill] sm:$0xff]  ;;  %v13207_v2 = vld [vmem:[#allocation46_spill] sm:$0xff] }
 0x843   :  { %3013 = vmatpush1.bf16.msra.mxu0 %v13197_v35  ;;  %3054 = vmatpush1.bf16.msra.mxu1 %v13198_v26  ;;  %v13208_v35 = vld [vmem:[#allocation47_spill] sm:$0xff]  ;;  %v13209_v26 = vld [vmem:[#allocation48_spill] sm:$0xff] }
 0x844   :  { %3014 = vmatprep.subr.bf16.mxu0 %v13199_v21  ;;  %3055 = vmatprep.subr.bf16.mxu1 %v13200_v15  ;;  %v13210_v21 = vld [vmem:[#allocation49_spill] sm:$0xff]  ;;  %v13211_v15 = vld [vmem:[#allocation50_spill] sm:$0xff] }
 0x847   :  { %3015 = vmatpush1.bf16.msra.mxu0 %v13201_v24  ;;  %3056 = vmatpush1.bf16.msra.mxu1 %v13202_v6  ;;  %v13212_v24 = vld [vmem:[#allocation51_spill] sm:$0xff]  ;;  %v13213_v6 = vld [vmem:[#allocation52_spill] sm:$0xff] }
 0x848   :  { %3016 = vmatprep.subr.bf16.mxu0 %v13203_v44  ;;  %3057 = vmatprep.subr.bf16.mxu1 %v13204_v58  ;;  %v13214_v44 = vld [vmem:[#allocation53_spill] sm:$0xff]  ;;  %v13215_v58 = vld [vmem:[#allocation54_spill] sm:$0xff] }
 0x84b   :  { %3017 = vmatpush1.bf16.msra.mxu0 %v13205_v0  ;;  %3058 = vmatpush1.bf16.msra.mxu1 %v13206_v13  ;;  %v13216_v0 = vld [vmem:[#allocation55_spill] sm:$0xff]  ;;  %v13217_v13 = vld [vmem:[#allocation56_spill] sm:$0xff] }
 0x84c   :  { %3018 = vmatprep.subr.bf16.mxu0 %v13207_v2  ;;  %3059 = vmatprep.subr.bf16.mxu1 %v13208_v35  ;;  %v13218_v2 = vld [vmem:[#allocation57_spill] sm:$0xff]  ;;  %v13219_v35 = vld [vmem:[#allocation58_spill] sm:$0xff] }
 0x84f   :  { %3019 = vmatpush1.bf16.msra.mxu0 %v13209_v26  ;;  %3060 = vmatpush1.bf16.msra.mxu1 %v13210_v21  ;;  %v13220_v26 = vld [vmem:[#allocation59_spill] sm:$0xff]  ;;  %v13221_v21 = vld [vmem:[#allocation60_spill] sm:$0xff] }
 0x850   :  { %3020 = vmatprep.subr.bf16.mxu0 %v13211_v15  ;;  %3061 = vmatprep.subr.bf16.mxu1 %v13212_v24  ;;  %v13222_v15 = vld [vmem:[#allocation61_spill] sm:$0xff]  ;;  %v13223_v24 = vld [vmem:[#allocation62_spill] sm:$0xff] }
 0x853   :  { %3021 = vmatpush1.bf16.msra.mxu0 %v13213_v6  ;;  %3062 = vmatpush1.bf16.msra.mxu1 %v13214_v44  ;;  %v13224_v6 = vld [vmem:[#allocation63_spill] sm:$0xff]  ;;  %v13225_v44 = vld [vmem:[#allocation64_spill] sm:$0xff] }
 0x854   :  { %3022 = vmatprep.subr.bf16.mxu0 %v13215_v58  ;;  %3063 = vmatprep.subr.bf16.mxu1 %v13216_v0  ;;  %v13226_v58 = vld [vmem:[#allocation65_spill] sm:$0xff]  ;;  %v13227_v0 = vld [vmem:[#allocation66_spill] sm:$0xff] }
 0x857   :  { %3023 = vmatpush1.bf16.msra.mxu0 %v13217_v13  ;;  %3064 = vmatpush1.bf16.msra.mxu1 %v13218_v2  ;;  %v13228_v13 = vld [vmem:[#allocation67_spill] sm:$0xff]  ;;  %v13229_v2 = vld [vmem:[#allocation68_spill] sm:$0xff] }
 0x858   :  { %3024 = vmatprep.subr.bf16.mxu0 %v13219_v35  ;;  %3065 = vmatprep.subr.bf16.mxu1 %v13220_v26  ;;  %v13230_v35 = vld [vmem:[#allocation69_spill] sm:$0xff]  ;;  %v13231_v26 = vld [vmem:[#allocation70_spill] sm:$0xff] }
 0x85b   :  { %3025 = vmatpush1.bf16.msra.mxu0 %v13221_v21  ;;  %3066 = vmatpush1.bf16.msra.mxu1 %v13222_v15  ;;  %v13232_v21 = vld [vmem:[#allocation71_spill] sm:$0xff]  ;;  %v13233_v15 = vld [vmem:[#allocation72_spill] sm:$0xff] }
 0x85c   :  { %3026 = vmatprep.subr.bf16.mxu0 %v13223_v24  ;;  %3067 = vmatprep.subr.bf16.mxu1 %v13224_v6  ;;  %v13234_v24 = vld [vmem:[#allocation73_spill] sm:$0xff]  ;;  %v13235_v6 = vld [vmem:[#allocation74_spill] sm:$0xff] }
 0x85f   :  { %3027 = vmatpush1.bf16.msra.mxu0 %v13225_v44  ;;  %3068 = vmatpush1.bf16.msra.mxu1 %v13226_v58  ;;  %v13236_v44 = vld [vmem:[#allocation75_spill] sm:$0xff]  ;;  %v13237_v58 = vld [vmem:[#allocation76_spill] sm:$0xff] }
 0x860   :  { %3028 = vmatprep.subr.bf16.mxu0 %v13227_v0  ;;  %3069 = vmatprep.subr.bf16.mxu1 %v13228_v13  ;;  %v13238_v0 = vld [vmem:[#allocation77_spill] sm:$0xff]  ;;  %v13239_v13 = vld [vmem:[#allocation78_spill] sm:$0xff] }
 0x863   :  { %3029 = vmatpush1.bf16.msra.mxu0 %v13229_v2  ;;  %3070 = vmatpush1.bf16.msra.mxu1 %v13230_v35  ;;  %v13240_v2 = vld [vmem:[#allocation79_spill] sm:$0xff] }
 0x864   :  { %3030 = vmatprep.subr.bf16.mxu0 %v13231_v26  ;;  %3071 = vmatprep.subr.bf16.mxu1 %v13232_v21 }
 0x867   :  { %3031 = vmatpush1.bf16.msra.mxu0 %v13233_v15  ;;  %3072 = vmatpush1.bf16.msra.mxu1 %v13234_v24 }
 0x868   :  { %3032 = vmatprep.subr.bf16.mxu0 %v13235_v6  ;;  %3073 = vmatprep.subr.bf16.mxu1 %v13236_v44 }
 0x86b   :  { %3033 = vmatpush1.bf16.msra.mxu0 %v13237_v58  ;;  %3074 = vmatpush1.bf16.msra.mxu1 %v13238_v0 }
 0x86c   :  { %3084 = vmatprep.subr.bf16.mxu0 %v13239_v13  ;;  %3125 = vmatprep.subr.bf16.mxu1 %v13240_v2 }
 0x8c1   :  { %v2798_v35 = vpop.f32.mrb[80].mxu0  ;;  %v2839_v26 = vpop.f32.mrb[80].mxu1 }
 0x8c2   :  { %v2928_v21 = vadd.f32 %v2798_v35, %v13241_v39  ;;  %v2930_v15 = vadd.f32 %v2839_v26, %v13242_v18  ;;  %v2800_v27 = vpop.f32.mrb[81].mxu0  ;;  %v2841_v24 = vpop.f32.mrb[81].mxu1 }
 0x8c3   :  { %v2929_v6 = vadd.f32 %v2800_v27, %v13243_v52  ;;  %v2931_v44 = vadd.f32 %v2841_v24, %v13244_v3  ;;  %v2802_v46 = vpop.f32.mrb[82].mxu0  ;;  %v2843_v58 = vpop.f32.mrb[82].mxu1  ;;  %v13246_v24 = vld [vmem:[#allocation192_spill] sm:$0xff] }
 0x8c4   :  { %v2803_v51 = vpop.f32.mrb[83].mxu0  ;;  %v2844_v0 = vpop.f32.mrb[83].mxu1  ;;  %v7251_v14 = vmul.f32 -1.442695, %v2928_v21  ;;  %v7253_v13 = vmul.f32 -1.442695, %v2930_v15 }
 0x8c5   :  { %v7252_v11 = vmul.f32 -1.442695, %v2929_v6  ;;  %v7254_v2 = vmul.f32 -1.442695, %v2931_v44  ;;  %v13245_v21 = vld [vmem:[#allocation191_spill] sm:$0xff]  ;;  %v13247_v44 = vld [vmem:[#allocation193_spill] sm:$0xff] }
 0x8c6   :  { %7778 = vpow2.f32 %v7251_v14  ;;  %v13248_v0 = vld [vmem:[#allocation194_spill] sm:$0xff] }
 0x8c7   :  { %7780 = vpow2.f32 %v7253_v13 }
 0x8c8   :  { %7782 = vpow2.f32 %v7252_v11 }
 0x8c9   :  { %7784 = vpow2.f32 %v7254_v2 }
 0x8d0   :  { %v7779_v39 = vpop.eup %7778 }
 0x8d1   :  { %v7781_v18 = vpop.eup %7780  ;;  %v2954_v1 = vadd.f32 1.0, %v7779_v39 }
 0x8d2   :  { %v7783_v35 = vpop.eup %7782  ;;  %v2956_v52 = vadd.f32 1.0, %v7781_v18 }
 0x8d3   :  { %v7785_v26 = vpop.eup %7784  ;;  %v2955_v27 = vadd.f32 1.0, %v7783_v35  ;;  %7786 = vrcp.f32 %v2954_v1 }
 0x8d4   :  { %v2957_v3 = vadd.f32 1.0, %v7785_v26  ;;  %7788 = vrcp.f32 %v2956_v52 }
 0x8d5   :  { %7790 = vrcp.f32 %v2955_v27 }
 0x8d6   :  { %7792 = vrcp.f32 %v2957_v3 }
 0x8dd   :  { %v7787_v52 = vpop.eup %7786 }
 0x8de   :  { %v7789_v27 = vpop.eup %7788 }
 0x901   :  { %v2880_v51 = vpop.f32.mrb[84].mxu0  ;;  %v2921_v46 = vpop.f32.mrb[84].mxu1 }
 0x902   :  { %v2932_v15 = vadd.f32 %v2880_v51, %v13245_v21  ;;  %v2934_v14 = vadd.f32 %v2921_v46, %v13246_v24  ;;  %v2882_v6 = vpop.f32.mrb[85].mxu0  ;;  %v2923_v11 = vpop.f32.mrb[85].mxu1  ;;  %v2974_v24 = vmul.f32 %v7789_v27, %v9870_v29  ;;  %v3272_v27 = vld [vmem:[#allocation7 + $0xa8] sm:$0xff] }
 0x903   :  { %v2933_v58 = vadd.f32 %v2882_v6, %v13247_v44  ;;  %v2935_v13 = vadd.f32 %v2923_v11, %v13248_v0  ;;  %v2884_v2 = vpop.f32.mrb[86].mxu0  ;;  %v2925_v39 = vpop.f32.mrb[86].mxu1 }
 0x904   :  { %v7255_v18 = vmul.f32 -1.442695, %v2932_v15  ;;  %7794 = vtanh.f32 %v2934_v14  ;;  %v2885_v1 = vpop.f32.mrb[87].mxu0  ;;  %v2926_v35 = vpop.f32.mrb[87].mxu1 }
 0x905   :  { %v7256_v26 = vmul.f32 -1.442695, %v2933_v58  ;;  %7796 = vtanh.f32 %v2935_v13  ;;  %v7791_v51 = vpop.eup %7790 }
 0x906   :  { %7798 = vpow2.f32 %v7255_v18  ;;  %v7793_v46 = vpop.eup %7792 }
 0x907   :  { %7800 = vpow2.f32 %v7256_v26  ;;  %v2975_v44 = vmul.f32 %v7793_v46, %v9872_v8 }
 0x90e   :  { %v7795_v21 = vpop.eup %7794 }
 0x90f   :  { %v7797_v3 = vpop.eup %7796  ;;  %v2976_v6 = vmul.f32 %v7795_v21, %v7787_v52 }
 0x910   :  { %v7799_v11 = vpop.eup %7798  ;;  %v2977_v15 = vmul.f32 %v7797_v3, %v7791_v51 }
 0x911   :  { %v7801_v14 = vpop.eup %7800  ;;  %v2958_v0 = vadd.f32 1.0, %v7799_v11  ;;  %v10028_v2 = vadd.f32 %v2976_v6, %v2974_v24  ;;  %v3275_v24 = vld [vmem:[#allocation7 + $0xc0] sm:$0xff]  ;;  %v3276_v11 = vld [vmem:[#allocation7 + $0xc8] sm:$0xff] }
 0x912   :  { %v2959_v58 = vadd.f32 1.0, %v7801_v14  ;;  %v10030_v13 = vadd.f32 %v2977_v15, %v2975_v44  ;;  %v3279_v6 = vld [vmem:[#allocation7 + $0xe0] sm:$0xff]  ;;  %v3280_v44 = vld [vmem:[#allocation7 + $0xe8] sm:$0xff] }
 0x913   :  { %7802 = vrcp.f32 %v2958_v0  ;;  %v7288_v0 = vcombine.high %v3275_v24, %v3279_v6 }
 0x914   :  { %7804 = vtanh.f32 %v10028_v2 }
 0x915   :  { %7806 = vrcp.f32 %v2959_v58  ;;  %v7290_v58 = vcombine.high %v3276_v11, %v3280_v44 }
 0x916   :  { %7808 = vtanh.f32 %v10030_v13 }
 0x91d   :  { %v7803_v39 = vpop.eup %7802 }
 0x91e   :  { %v7805_v29 = vpop.eup %7804 }
 0x91f   :  { %v7807_v18 = vpop.eup %7806  ;;  %v10034_v35 = vmul.f32 %v7805_v29, %v7803_v39  ;;  %v3283_v39 = vld [vmem:[#allocation7 + $0x100] sm:$0xff] }
 0x920   :  { %v7809_v1 = vpop.eup %7808  ;;  %v3287_v29 = vld [vmem:[#allocation7 + $0x120] sm:$0xff] }
 0x921   :  { %v10036_v8 = vmul.f32 %v7809_v1, %v7807_v18  ;;  %v10042_v52 = vpack.c.bf16 %v10034_v35, %v10034_v35  ;;  %v3284_v18 = vld [vmem:[#allocation7 + $0x108] sm:$0xff] }
 0x922   :  { %v3288_v1 = vld [vmem:[#allocation7 + $0x128] sm:$0xff] }
 0x923   :  { %v3001_v26 = vpack.c.bf16 %v10036_v8, %v10036_v8 }
 0x925   :  { %3034 = vmatprep.mubr.bf16.mxu0 %v3001_v26  ;;  %3075 = vmatprep.mubr.bf16.mxu1 %v3001_v26 }
 0x926   :  { %3035 = vmatmul.mubr.bf16.vlgmr.msra.gmra.mrb[88].mxu0 %v10042_v52  ;;  %3076 = vmatmul.mubr.bf16.vlgmr.msra.gmra.mrb[88].mxu1 %v10042_v52 }
 0x927   :  { %3085 = vmatpush1.bf16.msra.mxu0 %v12660_v25  ;;  %3126 = vmatpush1.bf16.msra.mxu1 %v12661_v43  ;;  %v13249_v25 = vld [vmem:[#allocation121_spill] sm:$0xff]  ;;  %v13250_v43 = vld [vmem:[#allocation122_spill] sm:$0xff] }
 0x928   :  { %3116 = vmatprep.mubr.bf16.mxu0 %v3001_v26  ;;  %3157 = vmatprep.mubr.bf16.mxu1 %v3001_v26  ;;  %v7287_v26 = vcombine.low %v3275_v24, %v3279_v6  ;;  %v3336_v24 = vld [vmem:[#allocation7 + $0x2a8] sm:$0xff] }
 0x929   :  { %3086 = vmatprep.subr.bf16.mxu0 %v12662_v17  ;;  %3127 = vmatprep.subr.bf16.mxu1 %v12663_v45  ;;  %v13251_v17 = vld [vmem:[#allocation123_spill] sm:$0xff]  ;;  %v13252_v45 = vld [vmem:[#allocation124_spill] sm:$0xff] }
 0x92b   :  { %3087 = vmatpush1.bf16.msra.mxu0 %v12664_v38  ;;  %3128 = vmatpush1.bf16.msra.mxu1 %v12665_v16  ;;  %v13253_v38 = vld [vmem:[#allocation125_spill] sm:$0xff]  ;;  %v13254_v16 = vld [vmem:[#allocation126_spill] sm:$0xff] }
 0x92c   :  { %3088 = vmatprep.subr.bf16.mxu0 %v12666_v30  ;;  %3129 = vmatprep.subr.bf16.mxu1 %v12667_v12  ;;  %v13255_v30 = vld [vmem:[#allocation127_spill] sm:$0xff]  ;;  %v13256_v12 = vld [vmem:[#allocation128_spill] sm:$0xff] }
 0x92f   :  { %3089 = vmatpush1.bf16.msra.mxu0 %v12668_v59  ;;  %3130 = vmatpush1.bf16.msra.mxu1 %v12669_v19  ;;  %v13259_v59 = vld [vmem:[#allocation131_spill] sm:$0xff]  ;;  %v13260_v19 = vld [vmem:[#allocation132_spill] sm:$0xff] }
 0x930   :  { %3090 = vmatprep.subr.bf16.mxu0 %v12670_v60  ;;  %3131 = vmatprep.subr.bf16.mxu1 %v12671_v61  ;;  %v13261_v60 = vld [vmem:[#allocation133_spill] sm:$0xff]  ;;  %v13262_v61 = vld [vmem:[#allocation134_spill] sm:$0xff] }
 0x933   :  { %3091 = vmatpush1.bf16.msra.mxu0 %v12672_v7  ;;  %3132 = vmatpush1.bf16.msra.mxu1 %v12673_v37  ;;  %v13263_v7 = vld [vmem:[#allocation135_spill] sm:$0xff]  ;;  %v3251_v37 = vld [vmem:[#allocation7] sm:$0xff] }
 0x934   :  { %3092 = vmatprep.subr.bf16.mxu0 %v12674_v54  ;;  %3133 = vmatprep.subr.bf16.mxu1 %v12675_v4  ;;  %v3255_v54 = vld [vmem:[#allocation7 + $0x20] sm:$0xff]  ;;  %v3252_v4 = vld [vmem:[#allocation7 + $0x8] sm:$0xff] }
 0x937   :  { %3093 = vmatpush1.bf16.msra.mxu0 %v12676_v53  ;;  %3134 = vmatpush1.bf16.msra.mxu1 %v12677_v5  ;;  %v3256_v53 = vld [vmem:[#allocation7 + $0x28] sm:$0xff]  ;;  %v13264_v5 = vld [vmem:[#allocation136_spill] sm:$0xff] }
 0x938   :  { %3094 = vmatprep.subr.bf16.mxu0 %v12766_v40  ;;  %3135 = vmatprep.subr.bf16.mxu1 %v12767_v32  ;;  %v7264_v40 = vcombine.high %v3251_v37, %v3255_v54  ;;  %v7266_v32 = vcombine.high %v3252_v4, %v3256_v53 }
 0x93b   :  { %3095 = vmatpush1.bf16.msra.mxu0 %v12768_v33  ;;  %3136 = vmatpush1.bf16.msra.mxu1 %v12769_v50  ;;  %v3259_v33 = vld [vmem:[#allocation7 + $0x40] sm:$0xff] }
 0x93c   :  { %3096 = vmatprep.subr.bf16.mxu0 %v12770_v34  ;;  %3137 = vmatprep.subr.bf16.mxu1 %v12771_v56  ;;  %v3263_v50 = vld [vmem:[#allocation7 + $0x60] sm:$0xff]  ;;  %v3260_v34 = vld [vmem:[#allocation7 + $0x48] sm:$0xff] }
 0x93d   :  { %v3264_v56 = vld [vmem:[#allocation7 + $0x68] sm:$0xff]  ;;  %v7271_v51 = vcombine.low %v3259_v33, %v3263_v50 }
 0x93e   :  { %v7273_v46 = vcombine.low %v3260_v34, %v3264_v56 }
 0x93f   :  { %3097 = vmatpush1.bf16.msra.mxu0 %v12772_v57  ;;  %3138 = vmatpush1.bf16.msra.mxu1 %v12773_v23  ;;  %v13268_v57 = vld [vmem:[#allocation140_spill] sm:$0xff]  ;;  %v13269_v23 = vld [vmem:[#allocation141_spill] sm:$0xff] }
 0x940   :  { %3098 = vmatprep.subr.bf16.mxu0 %v12774_v47  ;;  %3139 = vmatprep.subr.bf16.mxu1 %v12775_v55  ;;  %v7263_v47 = vcombine.low %v3251_v37, %v3255_v54  ;;  %v7265_v55 = vcombine.low %v3252_v4, %v3256_v53  ;;  %v3307_v53 = vld [vmem:[#allocation7 + $0x1c0] sm:$0xff] }
 0x943   :  { %3099 = vmatpush1.bf16.msra.mxu0 %v12776_v31  ;;  %3140 = vmatpush1.bf16.msra.mxu1 %v12777_v63  ;;  %v13270_v31 = vld [vmem:[#allocation200_spill] sm:$0xff]  ;;  %v13271_v63 = vld [vmem:[#allocation81_spill] sm:$0xff] }
 0x944   :  { %3100 = vmatprep.subr.bf16.mxu0 %v12863_v22  ;;  %3141 = vmatprep.subr.bf16.mxu1 %v12779_v42  ;;  %v10110_v42 = vpack.c.bf16 %v13271_v63, %v13270_v31  ;;  %v3268_v22 = vld [vmem:[#allocation7 + $0x88] sm:$0xff]  ;;  %v3323_v63 = vld [vmem:[#allocation7 + $0x240] sm:$0xff] }
 0x945   :  { %v7282_v3 = vcombine.high %v3268_v22, %v3272_v27  ;;  %v7281_v14 = vcombine.low %v3268_v22, %v3272_v27 }
 0x947   :  { %3101 = vmatpush1.bf16.msra.mxu0 %v12780_v10  ;;  %3142 = vmatpush1.bf16.msra.mxu1 %v12781_v41  ;;  %v7272_v10 = vcombine.high %v3259_v33, %v3263_v50  ;;  %v7274_v41 = vcombine.high %v3260_v34, %v3264_v56  ;;  %v3315_v50 = vld [vmem:[#allocation7 + $0x200] sm:$0xff]  ;;  %v3316_v56 = vld [vmem:[#allocation7 + $0x208] sm:$0xff] }
 0x948   :  { %3102 = vmatprep.subr.bf16.mxu0 %v12782_v20  ;;  %3143 = vmatprep.subr.bf16.mxu1 %v12783_v49  ;;  %v3267_v20 = vld [vmem:[#allocation7 + $0x80] sm:$0xff] }
 0x949   :  { %v3271_v49 = vld [vmem:[#allocation7 + $0xa0] sm:$0xff] }
 0x94a   :  { %v7280_v21 = vcombine.high %v3267_v20, %v3271_v49  ;;  %v7279_v15 = vcombine.low %v3267_v20, %v3271_v49  ;;  %v3319_v34 = vld [vmem:[#allocation7 + $0x220] sm:$0xff]  ;;  %v3328_v20 = vld [vmem:[#allocation7 + $0x268] sm:$0xff] }
 0x94b   :  { %3103 = vmatpush1.bf16.msra.mxu0 %v12784_v48  ;;  %3144 = vmatpush1.bf16.msra.mxu1 %v12697_v28  ;;  %v13265_v28 = vld [vmem:[#allocation137_spill] sm:$0xff]  ;;  %v13266_v48 = vld [vmem:[#allocation138_spill] sm:$0xff]  ;;  %v7327_v49 = vcombine.low %v3315_v50, %v3319_v34 }
 0x94c   :  { %3104 = vmatprep.subr.bf16.mxu0 %v12698_v36  ;;  %3145 = vmatprep.subr.bf16.mxu1 %v12699_v62  ;;  %v13257_v36 = vld [vmem:[#allocation129_spill] sm:$0xff]  ;;  %v13258_v62 = vld [vmem:[#allocation130_spill] sm:$0xff] }
 0x94f   :  { %3105 = vmatpush1.bf16.msra.mxu0 %v12785_v9  ;;  %3146 = vmatpush1.bf16.msra.mxu1 %v13249_v25  ;;  %v13267_v9 = vld [vmem:[#allocation139_spill] sm:$0xff]  ;;  %v7296_v25 = vcombine.high %v3283_v39, %v3287_v29 }
 0x950   :  { %3106 = vmatprep.subr.bf16.mxu0 %v13250_v43  ;;  %3147 = vmatprep.subr.bf16.mxu1 %v13251_v17  ;;  %v7298_v43 = vcombine.high %v3284_v18, %v3288_v1  ;;  %v3291_v17 = vld [vmem:[#allocation7 + $0x140] sm:$0xff] }
 0x953   :  { %3107 = vmatpush1.bf16.msra.mxu0 %v13252_v45  ;;  %3148 = vmatpush1.bf16.msra.mxu1 %v13253_v38  ;;  %v3295_v45 = vld [vmem:[#allocation7 + $0x160] sm:$0xff]  ;;  %v3292_v38 = vld [vmem:[#allocation7 + $0x148] sm:$0xff] }
 0x954   :  { %3108 = vmatprep.subr.bf16.mxu0 %v13254_v16  ;;  %3149 = vmatprep.subr.bf16.mxu1 %v13255_v30  ;;  %v3296_v16 = vld [vmem:[#allocation7 + $0x168] sm:$0xff]  ;;  %v7295_v30 = vcombine.low %v3283_v39, %v3287_v29 }
 0x955   :  { %v7305_v37 = vcombine.low %v3292_v38, %v3296_v16  ;;  %v3344_v39 = vld [vmem:[#allocation7 + $0x2e8] sm:$0xff] }
 0x957   :  { %3109 = vmatpush1.bf16.msra.mxu0 %v13256_v12  ;;  %3150 = vmatpush1.bf16.msra.mxu1 %v13257_v36  ;;  %v7297_v12 = vcombine.low %v3284_v18, %v3288_v1  ;;  %v7304_v36 = vcombine.high %v3291_v17, %v3295_v45 }
 0x958   :  { %3110 = vmatprep.subr.bf16.mxu0 %v13258_v62  ;;  %3151 = vmatprep.subr.bf16.mxu1 %v13259_v59  ;;  %v7306_v62 = vcombine.high %v3292_v38, %v3296_v16  ;;  %v3299_v59 = vld [vmem:[#allocation7 + $0x180] sm:$0xff] }
 0x95b   :  { %3111 = vmatpush1.bf16.msra.mxu0 %v13260_v19  ;;  %3152 = vmatpush1.bf16.msra.mxu1 %v13261_v60  ;;  %v3303_v19 = vld [vmem:[#allocation7 + $0x1a0] sm:$0xff]  ;;  %v3300_v60 = vld [vmem:[#allocation7 + $0x188] sm:$0xff] }
 0x95c   :  { %3112 = vmatprep.subr.bf16.mxu0 %v13262_v61  ;;  %3153 = vmatprep.subr.bf16.mxu1 %v13263_v7  ;;  %v3304_v61 = vld [vmem:[#allocation7 + $0x1a8] sm:$0xff]  ;;  %v7303_v7 = vcombine.low %v3291_v17, %v3295_v45  ;;  %v7312_v54 = vcombine.high %v3299_v59, %v3303_v19 }
 0x95d   :  { %v7314_v4 = vcombine.high %v3300_v60, %v3304_v61  ;;  %v3352_v17 = vld [vmem:[#allocation7 + $0x328] sm:$0xff] }
 0x95f   :  { %3113 = vmatpush1.bf16.msra.mxu0 %v13264_v5  ;;  %3154 = vmatpush1.bf16.msra.mxu1 %v13265_v28  ;;  %v3311_v5 = vld [vmem:[#allocation7 + $0x1e0] sm:$0xff]  ;;  %v3308_v28 = vld [vmem:[#allocation7 + $0x1c8] sm:$0xff] }
 0x960   :  { %3114 = vmatprep.subr.bf16.mxu0 %v13266_v48  ;;  %3155 = vmatprep.subr.bf16.mxu1 %v13267_v9  ;;  %v3312_v48 = vld [vmem:[#allocation7 + $0x1e8] sm:$0xff]  ;;  %v7311_v9 = vcombine.low %v3299_v59, %v3303_v19 }
 0x961   :  { %v7322_v33 = vcombine.high %v3308_v28, %v3312_v48  ;;  %v3360_v59 = vld [vmem:[#allocation7 + $0x368] sm:$0xff] }
 0x963   :  { %3115 = vmatpush1.bf16.msra.mxu0 %v13268_v57  ;;  %3156 = vmatpush1.bf16.msra.mxu1 %v13269_v23  ;;  %v3320_v57 = vld [vmem:[#allocation7 + $0x228] sm:$0xff]  ;;  %v7319_v23 = vcombine.low %v3307_v53, %v3311_v5 }
 0x964   :  { %4061 = vmatprep.subr.bf16.mxu0 %v7264_v40  ;;  %4134 = vmatprep.subr.bf16.mxu1 %v7266_v32  ;;  %v7313_v40 = vcombine.low %v3300_v60, %v3304_v61  ;;  %v7320_v32 = vcombine.high %v3307_v53, %v3311_v5  ;;  %v7330_v31 = vcombine.high %v3316_v56, %v3320_v57  ;;  %v3368_v53 = vld [vmem:[#allocation7 + $0x3a8] sm:$0xff] }
 0x965   :  { %v7329_v22 = vcombine.low %v3316_v56, %v3320_v57 }
 0x966   :  { %3117 = vmatmul.mubr.bf16.vlgmr.msra.gmra.mrb[92].mxu0 %v10042_v52  ;;  %3158 = vmatmul.mubr.bf16.vlgmr.msra.gmra.mrb[92].mxu1 %v10042_v52  ;;  %v7289_v52 = vcombine.low %v3276_v11, %v3280_v44 }
 0x967   :  { %4062 = vmatpush1.bf16.msra.mxu0 %v7263_v47  ;;  %4093 = vmatprep.mubr.bf16.mxu0 %v10110_v42  ;;  %v7321_v47 = vcombine.low %v3308_v28, %v3312_v48 }
 0x968   :  { %4135 = vmatpush1.bf16.msra.mxu1 %v7265_v55  ;;  %4166 = vmatprep.mubr.bf16.mxu1 %v10110_v42  ;;  %v7328_v55 = vcombine.high %v3315_v50, %v3319_v34  ;;  %v3376_v50 = vld [vmem:[#allocation7 + $0x3e8] sm:$0xff] }
 0x969   :  { %4063 = vmatprep.subr.bf16.mxu0 %v7272_v10  ;;  %4136 = vmatprep.subr.bf16.mxu1 %v7274_v41  ;;  %v3327_v10 = vld [vmem:[#allocation7 + $0x260] sm:$0xff]  ;;  %v3324_v41 = vld [vmem:[#allocation7 + $0x248] sm:$0xff] }
 0x96a   :  { %v7336_v27 = vcombine.high %v3323_v63, %v3327_v10  ;;  %v7335_v6 = vcombine.low %v3323_v63, %v3327_v10  ;;  %v7337_v11 = vcombine.low %v3324_v41, %v3328_v20  ;;  %v3258_v63 = vld [vmem:[#allocation7 + $0x38] sm:$0xff] }
 0x96b   :  { %4064 = vmatpush1.bf16.msra.mxu0 %v7271_v51  ;;  %v7338_v51 = vcombine.high %v3324_v41, %v3328_v20 }
 0x96c   :  { %4137 = vmatpush1.bf16.msra.mxu1 %v7273_v46  ;;  %4065 = vmatprep.subr.bf16.mxu0 %v7280_v21  ;;  %v3331_v46 = vld [vmem:[#allocation7 + $0x280] sm:$0xff] }
 0x96d   :  { %4138 = vmatprep.subr.bf16.mxu1 %v7282_v3  ;;  %v3335_v21 = vld [vmem:[#allocation7 + $0x2a0] sm:$0xff]  ;;  %v3332_v3 = vld [vmem:[#allocation7 + $0x288] sm:$0xff] }
 0x96e   :  { %v7344_v44 = vcombine.high %v3331_v46, %v3335_v21  ;;  %v7343_v29 = vcombine.low %v3331_v46, %v3335_v21  ;;  %v7345_v18 = vcombine.low %v3332_v3, %v3336_v24  ;;  %v3266_v46 = vld [vmem:[#allocation7 + $0x78] sm:$0xff] }
 0x96f   :  { %4066 = vmatpush1.bf16.msra.mxu0 %v7279_v15  ;;  %v7346_v15 = vcombine.high %v3332_v3, %v3336_v24  ;;  %v13272_v21 = vld [vmem:[#allocation199_spill] sm:$0xff]  ;;  %v13273_v3 = vld [vmem:[#allocation80_spill] sm:$0xff] }
 0x970   :  { %4139 = vmatpush1.bf16.msra.mxu1 %v7281_v14  ;;  %4067 = vmatprep.subr.bf16.mxu0 %v7288_v0  ;;  %v3339_v14 = vld [vmem:[#allocation7 + $0x2c0] sm:$0xff]  ;;  %v10118_v24 = vpack.c.bf16 %v13273_v3, %v13272_v21 }
 0x971   :  { %4140 = vmatprep.subr.bf16.mxu1 %v7290_v58  ;;  %v3343_v0 = vld [vmem:[#allocation7 + $0x2e0] sm:$0xff]  ;;  %v3340_v58 = vld [vmem:[#allocation7 + $0x2c8] sm:$0xff] }
 0x972   :  { %v7352_v1 = vcombine.high %v3339_v14, %v3343_v0  ;;  %v7351_v45 = vcombine.low %v3339_v14, %v3343_v0  ;;  %v7353_v38 = vcombine.low %v3340_v58, %v3344_v39 }
 0x973   :  { %4068 = vmatpush1.bf16.msra.mxu0 %v7287_v26  ;;  %v7354_v26 = vcombine.high %v3340_v58, %v3344_v39  ;;  %v3269_v39 = vld [vmem:[#allocation7 + $0x90] sm:$0xff] }
 0x974   :  { %4141 = vmatpush1.bf16.msra.mxu1 %v7289_v52  ;;  %4069 = vmatprep.subr.bf16.mxu0 %v7296_v25  ;;  %v3347_v52 = vld [vmem:[#allocation7 + $0x300] sm:$0xff] }
 0x975   :  { %4142 = vmatprep.subr.bf16.mxu1 %v7298_v43  ;;  %v3351_v25 = vld [vmem:[#allocation7 + $0x320] sm:$0xff]  ;;  %v3348_v43 = vld [vmem:[#allocation7 + $0x308] sm:$0xff] }
 0x976   :  { %v7360_v16 = vcombine.high %v3347_v52, %v3351_v25  ;;  %v7359_v19 = vcombine.low %v3347_v52, %v3351_v25  ;;  %v7361_v60 = vcombine.low %v3348_v43, %v3352_v17 }
 0x977   :  { %4070 = vmatpush1.bf16.msra.mxu0 %v7295_v30  ;;  %v7362_v30 = vcombine.high %v3348_v43, %v3352_v17  ;;  %v3277_v17 = vld [vmem:[#allocation7 + $0xd0] sm:$0xff] }
 0x978   :  { %4143 = vmatpush1.bf16.msra.mxu1 %v7297_v12  ;;  %4071 = vmatprep.subr.bf16.mxu0 %v7304_v36  ;;  %v3355_v12 = vld [vmem:[#allocation7 + $0x340] sm:$0xff] }
 0x979   :  { %4144 = vmatprep.subr.bf16.mxu1 %v7306_v62  ;;  %v3359_v36 = vld [vmem:[#allocation7 + $0x360] sm:$0xff]  ;;  %v3356_v62 = vld [vmem:[#allocation7 + $0x348] sm:$0xff] }
 0x97a   :  { %v7368_v61 = vcombine.high %v3355_v12, %v3359_v36  ;;  %v7367_v5 = vcombine.low %v3355_v12, %v3359_v36  ;;  %v7369_v28 = vcombine.low %v3356_v62, %v3360_v59  ;;  %v13277_v12 = vld [vmem:[#allocation84_spill] sm:$0xff] }
 0x97b   :  { %4072 = vmatpush1.bf16.msra.mxu0 %v7303_v7  ;;  %v7370_v7 = vcombine.high %v3356_v62, %v3360_v59  ;;  %v13278_v59 = vld [vmem:[#allocation87_spill] sm:$0xff] }
 0x97c   :  { %4145 = vmatpush1.bf16.msra.mxu1 %v7305_v37  ;;  %4073 = vmatprep.subr.bf16.mxu0 %v7312_v54  ;;  %v3363_v37 = vld [vmem:[#allocation7 + $0x380] sm:$0xff] }
 0x97d   :  { %4146 = vmatprep.subr.bf16.mxu1 %v7314_v4  ;;  %v3367_v54 = vld [vmem:[#allocation7 + $0x3a0] sm:$0xff]  ;;  %v3364_v4 = vld [vmem:[#allocation7 + $0x388] sm:$0xff] }
 0x97e   :  { %v7376_v48 = vcombine.high %v3363_v37, %v3367_v54  ;;  %v7375_v34 = vcombine.low %v3363_v37, %v3367_v54  ;;  %v7377_v56 = vcombine.low %v3364_v4, %v3368_v53  ;;  %v3285_v54 = vld [vmem:[#allocation7 + $0x110] sm:$0xff] }
 0x97f   :  { %4074 = vmatpush1.bf16.msra.mxu0 %v7311_v9  ;;  %v7378_v9 = vcombine.high %v3364_v4, %v3368_v53  ;;  %v3289_v4 = vld [vmem:[#allocation7 + $0x130] sm:$0xff]  ;;  %v3286_v53 = vld [vmem:[#allocation7 + $0x118] sm:$0xff] }
 0x980   :  { %4147 = vmatpush1.bf16.msra.mxu1 %v7313_v40  ;;  %4075 = vmatprep.subr.bf16.mxu0 %v7320_v32  ;;  %v3371_v40 = vld [vmem:[#allocation7 + $0x3c0] sm:$0xff] }
 0x981   :  { %4148 = vmatprep.subr.bf16.mxu1 %v7322_v33  ;;  %v3375_v32 = vld [vmem:[#allocation7 + $0x3e0] sm:$0xff]  ;;  %v3372_v33 = vld [vmem:[#allocation7 + $0x3c8] sm:$0xff] }
 0x982   :  { %v7384_v57 = vcombine.high %v3371_v40, %v3375_v32  ;;  %v7383_v10 = vcombine.low %v3371_v40, %v3375_v32  ;;  %v7385_v41 = vcombine.low %v3372_v33, %v3376_v50  ;;  %v3293_v32 = vld [vmem:[#allocation7 + $0x150] sm:$0xff] }
 0x983   :  { %4076 = vmatpush1.bf16.msra.mxu0 %v7319_v23  ;;  %v7386_v23 = vcombine.high %v3372_v33, %v3376_v50  ;;  %v3297_v33 = vld [vmem:[#allocation7 + $0x170] sm:$0xff]  ;;  %v3294_v50 = vld [vmem:[#allocation7 + $0x158] sm:$0xff] }
 0x984   :  { %4149 = vmatpush1.bf16.msra.mxu1 %v7321_v47  ;;  %4077 = vmatprep.subr.bf16.mxu0 %v7328_v55  ;;  %v3253_v47 = vld [vmem:[#allocation7 + $0x10] sm:$0xff] }
 0x985   :  { %4150 = vmatprep.subr.bf16.mxu1 %v7330_v31  ;;  %v3257_v55 = vld [vmem:[#allocation7 + $0x30] sm:$0xff]  ;;  %v3254_v31 = vld [vmem:[#allocation7 + $0x18] sm:$0xff] }
 0x986   :  { %v7268_v20 = vcombine.high %v3253_v47, %v3257_v55  ;;  %v7269_v14 = vcombine.low %v3254_v31, %v3258_v63 }
 0x987   :  { %4078 = vmatpush1.bf16.msra.mxu0 %v7327_v49  ;;  %v7270_v49 = vcombine.high %v3254_v31, %v3258_v63  ;;  %v7308_v31 = vcombine.high %v3293_v32, %v3297_v33 }
 0x988   :  { %4151 = vmatpush1.bf16.msra.mxu1 %v7329_v22  ;;  %4079 = vmatprep.subr.bf16.mxu0 %v7336_v27  ;;  %v3261_v22 = vld [vmem:[#allocation7 + $0x50] sm:$0xff] }
 0x989   :  { %4152 = vmatprep.subr.bf16.mxu1 %v7338_v51  ;;  %v3265_v27 = vld [vmem:[#allocation7 + $0x70] sm:$0xff]  ;;  %v3262_v51 = vld [vmem:[#allocation7 + $0x58] sm:$0xff] }
 0x98a   :  { %v7276_v0 = vcombine.high %v3261_v22, %v3265_v27  ;;  %v7278_v58 = vcombine.high %v3262_v51, %v3266_v46  ;;  %v7277_v52 = vcombine.low %v3262_v51, %v3266_v46  ;;  %v3306_v51 = vld [vmem:[#allocation7 + $0x1b8] sm:$0xff] }
 0x98b   :  { %4080 = vmatpush1.bf16.msra.mxu0 %v7335_v6  ;;  %v7267_v6 = vcombine.low %v3253_v47, %v3257_v55  ;;  %v7299_v47 = vcombine.low %v3285_v54, %v3289_v4 }
 0x98c   :  { %4153 = vmatpush1.bf16.msra.mxu1 %v7337_v11  ;;  %4081 = vmatprep.subr.bf16.mxu0 %v7344_v44  ;;  %v13274_v11 = vld [vmem:[#allocation83_spill] sm:$0xff]  ;;  %v13275_v44 = vld [vmem:[#allocation85_spill] sm:$0xff] }
 0x98d   :  { %4154 = vmatprep.subr.bf16.mxu1 %v7346_v15  ;;  %v10122_v15 = vpack.c.bf16 %v13275_v44, %v13274_v11  ;;  %v3313_v11 = vld [vmem:[#allocation7 + $0x1f0] sm:$0xff]  ;;  %v3310_v44 = vld [vmem:[#allocation7 + $0x1d8] sm:$0xff] }
 0x98f   :  { %4082 = vmatpush1.bf16.msra.mxu0 %v7343_v29  ;;  %v3273_v29 = vld [vmem:[#allocation7 + $0xb0] sm:$0xff] }
 0x990   :  { %4155 = vmatpush1.bf16.msra.mxu1 %v7345_v18  ;;  %4083 = vmatprep.subr.bf16.mxu0 %v7352_v1  ;;  %v3270_v18 = vld [vmem:[#allocation7 + $0x98] sm:$0xff]  ;;  %v7284_v25 = vcombine.high %v3269_v39, %v3273_v29  ;;  %v7283_v62 = vcombine.low %v3269_v39, %v3273_v29 }
 0x991   :  { %4156 = vmatprep.subr.bf16.mxu1 %v7354_v26  ;;  %v3274_v1 = vld [vmem:[#allocation7 + $0xb8] sm:$0xff]  ;;  %v7275_v26 = vcombine.low %v3261_v22, %v3265_v27 }
 0x992   :  { %v7286_v43 = vcombine.high %v3270_v18, %v3274_v1  ;;  %v3302_v22 = vld [vmem:[#allocation7 + $0x198] sm:$0xff] }
 0x993   :  { %4084 = vmatpush1.bf16.msra.mxu0 %v7351_v45  ;;  %v3281_v45 = vld [vmem:[#allocation7 + $0xf0] sm:$0xff]  ;;  %v7318_v21 = vcombine.high %v3302_v22, %v3306_v51  ;;  %v7317_v3 = vcombine.low %v3302_v22, %v3306_v51  ;;  %v3358_v22 = vld [vmem:[#allocation7 + $0x358] sm:$0xff] }
 0x994   :  { %4157 = vmatpush1.bf16.msra.mxu1 %v7353_v38  ;;  %4085 = vmatprep.subr.bf16.mxu0 %v7360_v16  ;;  %v3278_v38 = vld [vmem:[#allocation7 + $0xd8] sm:$0xff] }
 0x995   :  { %4158 = vmatprep.subr.bf16.mxu1 %v7362_v30  ;;  %v3282_v16 = vld [vmem:[#allocation7 + $0xf8] sm:$0xff]  ;;  %v13276_v30 = vld [vmem:[#allocation82_spill] sm:$0xff] }
 0x996   :  { %v10130_v36 = vpack.c.bf16 %v13277_v12, %v13276_v30  ;;  %v7294_v37 = vcombine.high %v3278_v38, %v3282_v16  ;;  %v3326_v30 = vld [vmem:[#allocation7 + $0x258] sm:$0xff] }
 0x997   :  { %4086 = vmatpush1.bf16.msra.mxu0 %v7359_v19  ;;  %v13279_v19 = vld [vmem:[#allocation89_spill] sm:$0xff] }
 0x998   :  { %4159 = vmatpush1.bf16.msra.mxu1 %v7361_v60  ;;  %4087 = vmatprep.subr.bf16.mxu0 %v7368_v61  ;;  %v10134_v60 = vpack.c.bf16 %v13279_v19, %v13278_v59  ;;  %v7285_v61 = vcombine.low %v3270_v18, %v3274_v1  ;;  %v3317_v18 = vld [vmem:[#allocation7 + $0x210] sm:$0xff] }
 0x999   :  { %4160 = vmatprep.subr.bf16.mxu1 %v7370_v7  ;;  %v7292_v7 = vcombine.high %v3277_v17, %v3281_v45  ;;  %v3321_v1 = vld [vmem:[#allocation7 + $0x230] sm:$0xff] }
 0x99b   :  { %4088 = vmatpush1.bf16.msra.mxu0 %v7367_v5  ;;  %v3290_v5 = vld [vmem:[#allocation7 + $0x138] sm:$0xff] }
 0x99c   :  { %4161 = vmatpush1.bf16.msra.mxu1 %v7369_v28  ;;  %4089 = vmatprep.subr.bf16.mxu0 %v7376_v48  ;;  %v7291_v28 = vcombine.low %v3277_v17, %v3281_v45  ;;  %v7293_v48 = vcombine.low %v3278_v38, %v3282_v16  ;;  %v7302_v40 = vcombine.high %v3286_v53, %v3290_v5  ;;  %v3325_v38 = vld [vmem:[#allocation7 + $0x250] sm:$0xff] }
 0x99d   :  { %4162 = vmatprep.subr.bf16.mxu1 %v7378_v9  ;;  %v7300_v9 = vcombine.high %v3285_v54, %v3289_v4  ;;  %v7301_v55 = vcombine.low %v3286_v53, %v3290_v5  ;;  %v3329_v16 = vld [vmem:[#allocation7 + $0x270] sm:$0xff]  ;;  %v3334_v54 = vld [vmem:[#allocation7 + $0x298] sm:$0xff] }
 0x99e   :  { %v7340_v12 = vcombine.high %v3325_v38, %v3329_v16  ;;  %v7339_v59 = vcombine.low %v3325_v38, %v3329_v16  ;;  %v3338_v53 = vld [vmem:[#allocation7 + $0x2b8] sm:$0xff]  ;;  %v4421_v38 = vld [vmem:[#allocation9 + $0x20] sm:$0xff] }
 0x99f   :  { %4090 = vmatpush1.bf16.msra.mxu0 %v7375_v34  ;;  %v3298_v34 = vld [vmem:[#allocation7 + $0x178] sm:$0xff] }
 0x9a0   :  { %4163 = vmatpush1.bf16.msra.mxu1 %v7377_v56  ;;  %4091 = vmatprep.subr.bf16.mxu0 %v7384_v57  ;;  %v13280_v56 = vld [vmem:[#allocation86_spill] sm:$0xff]  ;;  %v13281_v57 = vld [vmem:[#allocation88_spill] sm:$0xff]  ;;  %v7310_v63 = vcombine.high %v3294_v50, %v3298_v34 }
 0x9a1   :  { %4164 = vmatprep.subr.bf16.mxu1 %v7386_v23  ;;  %v10142_v23 = vpack.c.bf16 %v13281_v57, %v13280_v56  ;;  %v3353_v56 = vld [vmem:[#allocation7 + $0x330] sm:$0xff] }
 0x9a3   :  { %4092 = vmatpush1.bf16.msra.mxu0 %v7383_v10  ;;  %v7307_v10 = vcombine.low %v3293_v32, %v3297_v33  ;;  %v3342_v32 = vld [vmem:[#allocation7 + $0x2d8] sm:$0xff] }
 0x9a4   :  { %4165 = vmatpush1.bf16.msra.mxu1 %v7385_v41  ;;  %4207 = vmatprep.subr.bf16.mxu0 %v7268_v20  ;;  %v7309_v41 = vcombine.low %v3294_v50, %v3298_v34  ;;  %v3301_v20 = vld [vmem:[#allocation7 + $0x190] sm:$0xff]  ;;  %v3346_v50 = vld [vmem:[#allocation7 + $0x2f8] sm:$0xff] }
 0x9a5   :  { %4280 = vmatprep.subr.bf16.mxu1 %v7270_v49  ;;  %v3305_v49 = vld [vmem:[#allocation7 + $0x1b0] sm:$0xff] }
 0x9a6   :  { %4094 = vmatmul.mubr.bf16.vlgmr.msra.gmra.mrb[96].mxu0 %v10118_v24  ;;  %v7316_v27 = vcombine.high %v3301_v20, %v3305_v49  ;;  %v7315_v46 = vcombine.low %v3301_v20, %v3305_v49  ;;  %v3349_v34 = vld [vmem:[#allocation7 + $0x310] sm:$0xff] }
 0x9a7   :  { %4167 = vmatmul.mubr.bf16.vlgmr.msra.gmra.mrb[96].mxu1 %v10118_v24  ;;  %4103 = vmatprep.mubr.bf16.mxu0 %v10122_v15  ;;  %v3357_v20 = vld [vmem:[#allocation7 + $0x350] sm:$0xff]  ;;  %v7363_v51 = vcombine.low %v3349_v34, %v3353_v56 }
 0x9a8   :  { %4176 = vmatprep.mubr.bf16.mxu1 %v10122_v15  ;;  %4208 = vmatpush1.bf16.msra.mxu0 %v7267_v6  ;;  %v3309_v6 = vld [vmem:[#allocation7 + $0x1d0] sm:$0xff] }
 0x9a9   :  { %4281 = vmatpush1.bf16.msra.mxu1 %v7269_v14  ;;  %4209 = vmatprep.subr.bf16.mxu0 %v7276_v0  ;;  %v7324_v14 = vcombine.high %v3309_v6, %v3313_v11  ;;  %v3314_v0 = vld [vmem:[#allocation7 + $0x1f8] sm:$0xff]  ;;  %v3361_v49 = vld [vmem:[#allocation7 + $0x370] sm:$0xff] }
 0x9aa   :  { %4282 = vmatprep.subr.bf16.mxu1 %v7278_v58  ;;  %v7323_v58 = vcombine.low %v3309_v6, %v3313_v11  ;;  %v7326_v39 = vcombine.high %v3310_v44, %v3314_v0  ;;  %v7325_v29 = vcombine.low %v3310_v44, %v3314_v0  ;;  %v7371_v6 = vcombine.low %v3357_v20, %v3361_v49  ;;  %v3365_v44 = vld [vmem:[#allocation7 + $0x390] sm:$0xff]  ;;  %v3366_v0 = vld [vmem:[#allocation7 + $0x398] sm:$0xff] }
 0x9ac   :  { %4210 = vmatpush1.bf16.msra.mxu0 %v7275_v26  ;;  %v3318_v26 = vld [vmem:[#allocation7 + $0x218] sm:$0xff] }
 0x9ad   :  { %4283 = vmatpush1.bf16.msra.mxu1 %v7277_v52  ;;  %4211 = vmatprep.subr.bf16.mxu0 %v7284_v25  ;;  %v7332_v52 = vcombine.high %v3317_v18, %v3321_v1  ;;  %v3322_v25 = vld [vmem:[#allocation7 + $0x238] sm:$0xff] }
 0x9ae   :  { %4104 = vmatmul.mubr.bf16.gmra.mrb[100].mxu0 %v10130_v36  ;;  %4284 = vmatprep.subr.bf16.mxu1 %v7286_v43  ;;  %v7331_v43 = vcombine.low %v3317_v18, %v3321_v1  ;;  %v7334_v17 = vcombine.high %v3318_v26, %v3322_v25  ;;  %v7333_v45 = vcombine.low %v3318_v26, %v3322_v25  ;;  %v3373_v26 = vld [vmem:[#allocation7 + $0x3d0] sm:$0xff]  ;;  %v3374_v25 = vld [vmem:[#allocation7 + $0x3d8] sm:$0xff] }
 0x9af   :  { %4177 = vmatmul.mubr.bf16.gmra.mrb[100].mxu1 %v10130_v36  ;;  %4113 = vmatprep.mubr.bf16.mxu0 %v10134_v60 }
 0x9b0   :  { %4186 = vmatprep.mubr.bf16.mxu1 %v10134_v60  ;;  %4212 = vmatpush1.bf16.msra.mxu0 %v7283_v62  ;;  %v3330_v62 = vld [vmem:[#allocation7 + $0x278] sm:$0xff] }
 0x9b1   :  { %4285 = vmatpush1.bf16.msra.mxu1 %v7285_v61  ;;  %4213 = vmatprep.subr.bf16.mxu0 %v7292_v7  ;;  %v7342_v19 = vcombine.high %v3326_v30, %v3330_v62  ;;  %v7341_v61 = vcombine.low %v3326_v30, %v3330_v62  ;;  %v3333_v7 = vld [vmem:[#allocation7 + $0x290] sm:$0xff]  ;;  %v4422_v62 = vld [vmem:[#allocation9 + $0x28] sm:$0xff] }
 0x9b2   :  { %4286 = vmatprep.subr.bf16.mxu1 %v7294_v37  ;;  %v3337_v37 = vld [vmem:[#allocation7 + $0x2b0] sm:$0xff] }
 0x9b3   :  { %v7348_v4 = vcombine.high %v3333_v7, %v3337_v37  ;;  %v7347_v5 = vcombine.low %v3333_v7, %v3337_v37 }
 0x9b4   :  { %4214 = vmatpush1.bf16.msra.mxu0 %v7291_v28  ;;  %v7350_v28 = vcombine.high %v3334_v54, %v3338_v53 }
 0x9b5   :  { %4287 = vmatpush1.bf16.msra.mxu1 %v7293_v48  ;;  %4215 = vmatprep.subr.bf16.mxu0 %v7300_v9  ;;  %v7349_v48 = vcombine.low %v3334_v54, %v3338_v53  ;;  %v3341_v9 = vld [vmem:[#allocation7 + $0x2d0] sm:$0xff]  ;;  %v13286_v53 = vld [vmem:[#allocation167_spill] sm:$0xff] }
 0x9b6   :  { %4114 = vmatmul.mubr.bf16.gmra.mrb[104].mxu0 %v10142_v23  ;;  %4288 = vmatprep.subr.bf16.mxu1 %v7302_v40  ;;  %v3345_v40 = vld [vmem:[#allocation7 + $0x2f0] sm:$0xff] }
 0x9b7   :  { %4187 = vmatmul.mubr.bf16.gmra.mrb[104].mxu1 %v10142_v23  ;;  %v7356_v33 = vcombine.high %v3341_v9, %v3345_v40  ;;  %v7355_v57 = vcombine.low %v3341_v9, %v3345_v40 }
 0x9b8   :  { %4216 = vmatpush1.bf16.msra.mxu0 %v7299_v47  ;;  %v7358_v47 = vcombine.high %v3342_v32, %v3346_v50 }
 0x9b9   :  { %4289 = vmatpush1.bf16.msra.mxu1 %v7301_v55  ;;  %4217 = vmatprep.subr.bf16.mxu0 %v7308_v31  ;;  %v3350_v55 = vld [vmem:[#allocation7 + $0x318] sm:$0xff] }
 0x9ba   :  { %4290 = vmatprep.subr.bf16.mxu1 %v7310_v63  ;;  %v3354_v31 = vld [vmem:[#allocation7 + $0x338] sm:$0xff]  ;;  %v7357_v63 = vcombine.low %v3342_v32, %v3346_v50  ;;  %v13288_v32 = vld [vmem:[#allocation169_spill] sm:$0xff]  ;;  %v13289_v50 = vld [vmem:[#allocation170_spill] sm:$0xff] }
 0x9bc   :  { %4218 = vmatpush1.bf16.msra.mxu0 %v7307_v10  ;;  %v7364_v10 = vcombine.high %v3349_v34, %v3353_v56 }
 0x9bd   :  { %4291 = vmatpush1.bf16.msra.mxu1 %v7309_v41  ;;  %4219 = vmatprep.subr.bf16.mxu0 %v7316_v27  ;;  %v7366_v41 = vcombine.high %v3350_v55, %v3354_v31  ;;  %v3362_v27 = vld [vmem:[#allocation7 + $0x378] sm:$0xff] }
 0x9be   :  { %4292 = vmatprep.subr.bf16.mxu1 %v7318_v21  ;;  %v7372_v21 = vcombine.high %v3357_v20, %v3361_v49  ;;  %v7373_v11 = vcombine.low %v3358_v22, %v3362_v27 }
 0x9c0   :  { %4220 = vmatpush1.bf16.msra.mxu0 %v7315_v46  ;;  %v7365_v46 = vcombine.low %v3350_v55, %v3354_v31 }
 0x9c1   :  { %4293 = vmatpush1.bf16.msra.mxu1 %v7317_v3  ;;  %4221 = vmatprep.subr.bf16.mxu0 %v7324_v14  ;;  %v7374_v3 = vcombine.high %v3358_v22, %v3362_v27  ;;  %v3369_v14 = vld [vmem:[#allocation7 + $0x3b0] sm:$0xff] }
 0x9c2   :  { %4294 = vmatprep.subr.bf16.mxu1 %v7326_v39  ;;  %v3370_v39 = vld [vmem:[#allocation7 + $0x3b8] sm:$0xff] }
 0x9c3   :  { %v7382_v18 = vcombine.high %v3366_v0, %v3370_v39  ;;  %v7381_v1 = vcombine.low %v3366_v0, %v3370_v39  ;;  %v13291_v0 = vld [vmem:[#allocation196_spill] sm:$0xff] }
 0x9c4   :  { %4222 = vmatpush1.bf16.msra.mxu0 %v7323_v58  ;;  %v7380_v58 = vcombine.high %v3365_v44, %v3369_v14 }
 0x9c5   :  { %4295 = vmatpush1.bf16.msra.mxu1 %v7325_v29  ;;  %4223 = vmatprep.subr.bf16.mxu0 %v7332_v52  ;;  %v7379_v29 = vcombine.low %v3365_v44, %v3369_v14  ;;  %v3377_v52 = vld [vmem:[#allocation7 + $0x3f0] sm:$0xff]  ;;  %v13290_v44 = vld [vmem:[#allocation195_spill] sm:$0xff] }
 0x9c6   :  { %4296 = vmatprep.subr.bf16.mxu1 %v7334_v17  ;;  %v3378_v17 = vld [vmem:[#allocation7 + $0x3f8] sm:$0xff]  ;;  %v7387_v16 = vcombine.low %v3373_v26, %v3377_v52 }
 0x9c7   :  { %v7390_v30 = vcombine.high %v3374_v25, %v3378_v17 }
 0x9c8   :  { %4224 = vmatpush1.bf16.msra.mxu0 %v7331_v43  ;;  %v7388_v43 = vcombine.high %v3373_v26, %v3377_v52  ;;  %v13293_v26 = vld [vmem:[#allocation198_spill] sm:$0xff] }
 0x9c9   :  { %4297 = vmatpush1.bf16.msra.mxu1 %v7333_v45  ;;  %4225 = vmatprep.subr.bf16.mxu0 %v7340_v12  ;;  %v4417_v45 = vld [vmem:[#allocation9] sm:$0xff]  ;;  %v4418_v12 = vld [vmem:[#allocation9 + $0x8] sm:$0xff] }
 0x9ca   :  { %4298 = vmatprep.subr.bf16.mxu1 %v7342_v19  ;;  %v10146_v19 = vcombine.high %v4417_v45, %v4421_v38  ;;  %v10150_v7 = vcombine.low %v4417_v45, %v4421_v38  ;;  %v10153_v37 = vcombine.low %v4418_v12, %v4422_v62 }
 0x9cc   :  { %4226 = vmatpush1.bf16.msra.mxu0 %v7339_v59  ;;  %v7389_v59 = vcombine.low %v3374_v25, %v3378_v17  ;;  %13282 = vst [vmem:[#allocation90_spill] sm:$0xff] %v10146_v19  ;;  %13284 = vst [vmem:[#allocation92_spill] sm:$0xff] %v10150_v7 }
 0x9cd   :  { %4299 = vmatpush1.bf16.msra.mxu1 %v7341_v61  ;;  %4227 = vmatprep.subr.bf16.mxu0 %v7348_v4  ;;  %v10148_v61 = vcombine.high %v4418_v12, %v4422_v62  ;;  %13285 = vst [vmem:[#allocation93_spill] sm:$0xff] %v10153_v37 }
 0x9ce   :  { %4300 = vmatprep.subr.bf16.mxu1 %v7350_v28  ;;  %v13287_v28 = vld [vmem:[#allocation168_spill] sm:$0xff] }
 0x9cf   :  { %13283 = vst [vmem:[#allocation91_spill] sm:$0xff] %v10148_v61 }
 0x9d0   :  { %4228 = vmatpush1.bf16.msra.mxu0 %v7347_v5 }
 0x9d1   :  { %4301 = vmatpush1.bf16.msra.mxu1 %v7349_v48  ;;  %4229 = vmatprep.subr.bf16.mxu0 %v7356_v33 }
 0x9d2   :  { %4302 = vmatprep.subr.bf16.mxu1 %v7358_v47 }
 0x9d4   :  { %4230 = vmatpush1.bf16.msra.mxu0 %v7355_v57 }
 0x9d5   :  { %4303 = vmatpush1.bf16.msra.mxu1 %v7357_v63  ;;  %4231 = vmatprep.subr.bf16.mxu0 %v7364_v10 }
 0x9d6   :  { %4304 = vmatprep.subr.bf16.mxu1 %v7366_v41 }
 0x9d8   :  { %4232 = vmatpush1.bf16.msra.mxu0 %v7363_v51 }
 0x9d9   :  { %4305 = vmatpush1.bf16.msra.mxu1 %v7365_v46  ;;  %4233 = vmatprep.subr.bf16.mxu0 %v7372_v21 }
 0x9da   :  { %4306 = vmatprep.subr.bf16.mxu1 %v7374_v3 }
 0x9dc   :  { %4234 = vmatpush1.bf16.msra.mxu0 %v7371_v6 }
 0x9dd   :  { %4307 = vmatpush1.bf16.msra.mxu1 %v7373_v11  ;;  %4235 = vmatprep.subr.bf16.mxu0 %v7380_v58 }
 0x9de   :  { %4308 = vmatprep.subr.bf16.mxu1 %v7382_v18  ;;  %v13292_v18 = vld [vmem:[#allocation197_spill] sm:$0xff] }
 0x9e0   :  { %4236 = vmatpush1.bf16.msra.mxu0 %v7379_v29 }
 0x9e1   :  { %4309 = vmatpush1.bf16.msra.mxu1 %v7381_v1  ;;  %4237 = vmatprep.subr.bf16.mxu0 %v7388_v43 }
 0x9e2   :  { %4310 = vmatprep.subr.bf16.mxu1 %v7390_v30 }
 0x9e4   :  { %4238 = vmatpush1.bf16.msra.mxu0 %v7387_v16 }
 0x9e5   :  { %4311 = vmatpush1.bf16.msra.mxu1 %v7389_v59  ;;  %5193 = vmatprep.subr.bf16.mxu0 %v10146_v19 }
 0x9e6   :  { %5234 = vmatprep.subr.bf16.mxu1 %v10148_v61 }
 0x9f9   :  { %v3036_v54 = vpop.f32.mrb[88].mxu0  ;;  %v3077_v4 = vpop.f32.mrb[88].mxu1 }
 0x9fa   :  { %v3166_v5 = vadd.f32 %v3036_v54, %v13286_v53  ;;  %v3168_v48 = vadd.f32 %v3077_v4, %v13287_v28  ;;  %v3038_v9 = vpop.f32.mrb[89].mxu0  ;;  %v3079_v40 = vpop.f32.mrb[89].mxu1 }
 0x9fb   :  { %v3167_v33 = vadd.f32 %v3038_v9, %v13288_v32  ;;  %v3169_v34 = vadd.f32 %v3079_v40, %v13289_v50  ;;  %v3040_v56 = vpop.f32.mrb[90].mxu0  ;;  %v3081_v57 = vpop.f32.mrb[90].mxu1 }
 0x9fc   :  { %v3041_v47 = vpop.f32.mrb[91].mxu0  ;;  %v3082_v55 = vpop.f32.mrb[91].mxu1  ;;  %v7257_v31 = vmul.f32 -1.442695, %v3166_v5  ;;  %v7259_v63 = vmul.f32 -1.442695, %v3168_v48 }
 0x9fd   :  { %v7258_v10 = vmul.f32 -1.442695, %v3167_v33  ;;  %v7260_v41 = vmul.f32 -1.442695, %v3169_v34 }
 0x9fe   :  { %7810 = vpow2.f32 %v7257_v31 }
 0x9ff   :  { %7812 = vpow2.f32 %v7259_v63 }
 0xa00   :  { %7814 = vpow2.f32 %v7258_v10  ;;  %v4425_v10 = vld [vmem:[#allocation9 + $0x40] sm:$0xff] }
 0xa01   :  { %7816 = vpow2.f32 %v7260_v41  ;;  %v4429_v41 = vld [vmem:[#allocation9 + $0x60] sm:$0xff] }
 0xa08   :  { %v7811_v20 = vpop.eup %7810 }
 0xa09   :  { %v7813_v49 = vpop.eup %7812  ;;  %v3192_v51 = vadd.f32 1.0, %v7811_v20  ;;  %v4426_v20 = vld [vmem:[#allocation9 + $0x48] sm:$0xff] }
 0xa0a   :  { %v7815_v22 = vpop.eup %7814  ;;  %v3194_v46 = vadd.f32 1.0, %v7813_v49  ;;  %v4433_v49 = vld [vmem:[#allocation9 + $0x80] sm:$0xff] }
 0xa0b   :  { %v7817_v27 = vpop.eup %7816  ;;  %v3193_v21 = vadd.f32 1.0, %v7815_v22  ;;  %7818 = vrcp.f32 %v3192_v51  ;;  %v10178_v22 = vcombine.high %v4425_v10, %v4429_v41  ;;  %v4434_v51 = vld [vmem:[#allocation9 + $0x88] sm:$0xff] }
 0xa0c   :  { %v3195_v3 = vadd.f32 1.0, %v7817_v27  ;;  %7820 = vrcp.f32 %v3194_v46  ;;  %v4437_v27 = vld [vmem:[#allocation9 + $0xa0] sm:$0xff]  ;;  %v4438_v46 = vld [vmem:[#allocation9 + $0xa8] sm:$0xff] }
 0xa0d   :  { %7822 = vrcp.f32 %v3193_v21  ;;  %13294 = vst [vmem:[#allocation94_spill] sm:$0xff] %v10178_v22 }
 0xa0e   :  { %7824 = vrcp.f32 %v3195_v3  ;;  %v10192_v3 = vcombine.high %v4433_v49, %v4437_v27 }
 0xa10   :  { %13298 = vst [vmem:[#allocation117_spill] sm:$0xff] %v10192_v3 }
 0xa15   :  { %v7819_v30 = vpop.eup %7818 }
 0xa16   :  { %v7821_v12 = vpop.eup %7820 }
 0xa17   :  { %v7823_v62 = vpop.eup %7822  ;;  %v3212_v53 = vmul.f32 %v7821_v12, %v10028_v2 }
 0xa18   :  { %v7825_v59 = vpop.eup %7824 }
 0xa19   :  { %v3213_v48 = vmul.f32 %v7825_v59, %v10030_v13 }
 0xa39   :  { %v3118_v6 = vpop.f32.mrb[92].mxu0  ;;  %v3159_v11 = vpop.f32.mrb[92].mxu1 }
 0xa3a   :  { %v3170_v14 = vadd.f32 %v3118_v6, %v13290_v44  ;;  %v3172_v58 = vadd.f32 %v3159_v11, %v13291_v0  ;;  %v3120_v39 = vpop.f32.mrb[93].mxu0  ;;  %v3161_v29 = vpop.f32.mrb[93].mxu1  ;;  %v10194_v6 = vcombine.high %v4434_v51, %v4438_v46  ;;  %v4445_v11 = vld [vmem:[#allocation9 + $0xe0] sm:$0xff]  ;;  %v4442_v44 = vld [vmem:[#allocation9 + $0xc8] sm:$0xff]  ;;  %v10200_v0 = vcombine.low %v4433_v49, %v4437_v27 }
 0xa3b   :  { %v3171_v1 = vadd.f32 %v3120_v39, %v13292_v18  ;;  %v3173_v52 = vadd.f32 %v3161_v29, %v13293_v26  ;;  %v3122_v25 = vpop.f32.mrb[94].mxu0  ;;  %v3163_v43 = vpop.f32.mrb[94].mxu1  ;;  %v4453_v18 = vld [vmem:[#allocation9 + $0x120] sm:$0xff]  ;;  %v4454_v26 = vld [vmem:[#allocation9 + $0x128] sm:$0xff] }
 0xa3c   :  { %v7261_v17 = vmul.f32 -1.442695, %v3170_v14  ;;  %7826 = vtanh.f32 %v3172_v58  ;;  %v3123_v45 = vpop.f32.mrb[95].mxu0  ;;  %v3164_v38 = vpop.f32.mrb[95].mxu1  ;;  %13299 = vst [vmem:[#allocation118_spill] sm:$0xff] %v10194_v6  ;;  %v4446_v14 = vld [vmem:[#allocation9 + $0xe8] sm:$0xff]  ;;  %v10202_v58 = vcombine.low %v4434_v51, %v4438_v46 }
 0xa3d   :  { %v7262_v16 = vmul.f32 -1.442695, %v3171_v1  ;;  %7828 = vtanh.f32 %v3173_v52  ;;  %13300 = vst [vmem:[#allocation119_spill] sm:$0xff] %v10200_v0  ;;  %v10208_v29 = vcombine.high %v4442_v44, %v4446_v14  ;;  %v4450_v1 = vld [vmem:[#allocation9 + $0x108] sm:$0xff]  ;;  %v10216_v25 = vcombine.low %v4442_v44, %v4446_v14  ;;  %v4461_v45 = vld [vmem:[#allocation9 + $0x160] sm:$0xff] }
 0xa3e   :  { %7830 = vpow2.f32 %v7261_v17  ;;  %13301 = vst [vmem:[#allocation143_spill] sm:$0xff] %v10202_v58  ;;  %v10222_v17 = vcombine.high %v4450_v1, %v4454_v26  ;;  %v4458_v38 = vld [vmem:[#allocation9 + $0x148] sm:$0xff]  ;;  %v10230_v12 = vcombine.low %v4450_v1, %v4454_v26  ;;  %v4485_v49 = vld [vmem:[#allocation9 + $0x220] sm:$0xff]  ;;  %v13333_v26 = vmov 0  }
 0xa3f   :  { %7832 = vpow2.f32 %v7262_v16  ;;  %13303 = vst [vmem:[#allocation145_spill] sm:$0xff] %v10208_v29  ;;  %13305 = vst [vmem:[#allocation171_spill] sm:$0xff] %v10216_v25  ;;  %v4462_v16 = vld [vmem:[#allocation9 + $0x168] sm:$0xff]  ;;  %v4489_v14 = vld [vmem:[#allocation9 + $0x240] sm:$0xff] }
 0xa40   :  { %13307 = vst [vmem:[#allocation173_spill] sm:$0xff] %v10222_v17  ;;  %13309 = vst [vmem:[#allocation98_spill] sm:$0xff] %v10230_v12  ;;  %v10236_v59 = vcombine.high %v4458_v38, %v4462_v16  ;;  %v4482_v27 = vld [vmem:[#allocation9 + $0x208] sm:$0xff] }
 0xa41   :  { %v4486_v51 = vld [vmem:[#allocation9 + $0x228] sm:$0xff] }
 0xa42   :  { %13311 = vst [vmem:[#allocation100_spill] sm:$0xff] %v10236_v59  ;;  %v10294_v44 = vcombine.high %v4482_v27, %v4486_v51  ;;  %v4494_v1 = vld [vmem:[#allocation9 + $0x268] sm:$0xff] }
 0xa44   :  { %13331 = vst [vmem:[#allocation150_spill] sm:$0xff] %v10294_v44 }
 0xa46   :  { %v7827_v54 = vpop.eup %7826 }
 0xa47   :  { %v7829_v4 = vpop.eup %7828  ;;  %v3214_v5 = vmul.f32 %v7827_v54, %v7819_v30  ;;  %v4469_v54 = vld [vmem:[#allocation9 + $0x1a0] sm:$0xff] }
 0xa48   :  { %v7831_v28 = vpop.eup %7830  ;;  %v3215_v9 = vmul.f32 %v7829_v4, %v7823_v62  ;;  %v4466_v4 = vld [vmem:[#allocation9 + $0x188] sm:$0xff] }
 0xa49   :  { %v7833_v40 = vpop.eup %7832  ;;  %v3196_v32 = vadd.f32 1.0, %v7831_v28  ;;  %v3216_v33 = vadd.f32 %v3214_v5, %v3212_v53  ;;  %v4470_v53 = vld [vmem:[#allocation9 + $0x1a8] sm:$0xff]  ;;  %v10244_v28 = vcombine.low %v4458_v38, %v4462_v16 }
 0xa4a   :  { %v3197_v50 = vadd.f32 1.0, %v7833_v40  ;;  %v3217_v34 = vadd.f32 %v3215_v9, %v3213_v48  ;;  %v10250_v9 = vcombine.high %v4466_v4, %v4470_v53  ;;  %v4473_v40 = vld [vmem:[#allocation9 + $0x1c0] sm:$0xff] }
 0xa4b   :  { %7834 = vrcp.f32 %v3196_v32  ;;  %13313 = vst [vmem:[#allocation102_spill] sm:$0xff] %v10244_v28  ;;  %v4477_v32 = vld [vmem:[#allocation9 + $0x1e0] sm:$0xff] }
 0xa4c   :  { %7836 = vtanh.f32 %v3216_v33  ;;  %13315 = vst [vmem:[#allocation104_spill] sm:$0xff] %v10250_v9  ;;  %v4474_v33 = vld [vmem:[#allocation9 + $0x1c8] sm:$0xff]  ;;  %v10286_v46 = vcombine.low %v4473_v40, %v4477_v32 }
 0xa4d   :  { %7838 = vrcp.f32 %v3197_v50  ;;  %v4478_v50 = vld [vmem:[#allocation9 + $0x1e8] sm:$0xff] }
 0xa4e   :  { %7840 = vtanh.f32 %v3217_v34  ;;  %13328 = vst [vmem:[#allocation147_spill] sm:$0xff] %v10286_v46 }
 0xa55   :  { %v7835_v56 = vpop.eup %7834 }
 0xa56   :  { %v7837_v57 = vpop.eup %7836 }
 0xa57   :  { %v7839_v47 = vpop.eup %7838  ;;  %v3220_v55 = vmul.f32 %v7837_v57, %v7835_v56 }
 0xa58   :  { %v7841_v31 = vpop.eup %7840 }
 0xa59   :  { %v3221_v2 = vmul.f32 %v7841_v31, %v7839_v47  ;;  %v10170_v13 = vpack.c.bf16 %v3220_v55, %v10034_v35  ;;  %v10268_v31 = vcombine.low %v4466_v4, %v4470_v53 }
 0xa5b   :  { %v10167_v63 = vpack.c.bf16 %v3221_v2, %v10036_v8  ;;  %v4430_v8 = vld [vmem:[#allocation9 + $0x68] sm:$0xff]  ;;  %13322 = vst [vmem:[#allocation112_spill] sm:$0xff] %v10268_v31 }
 0xa5c   :  { %v10180_v35 = vcombine.high %v4426_v20, %v4430_v8  ;;  %v10188_v21 = vcombine.low %v4426_v20, %v4430_v8  ;;  %v4481_v20 = vld [vmem:[#allocation9 + $0x200] sm:$0xff] }
 0xa5d   :  { %4123 = vmatprep.mubr.bf16.mxu0 %v10167_v63  ;;  %4196 = vmatprep.mubr.bf16.mxu1 %v10167_v63 }
 0xa5e   :  { %4124 = vmatmul.mubr.bf16.gmra.mrb[108].mxu0 %v10170_v13  ;;  %4197 = vmatmul.mubr.bf16.gmra.mrb[108].mxu1 %v10170_v13  ;;  %13295 = vst [vmem:[#allocation95_spill] sm:$0xff] %v10180_v35  ;;  %13297 = vst [vmem:[#allocation97_spill] sm:$0xff] %v10188_v21 }
 0xa5f   :  { %4239 = vmatprep.mubr.bf16.mxu0 %v10110_v42  ;;  %4312 = vmatprep.mubr.bf16.mxu1 %v10110_v42  ;;  %v10186_v42 = vcombine.low %v4425_v10, %v4429_v41  ;;  %v10276_v10 = vcombine.high %v4473_v40, %v4477_v32  ;;  %v10278_v41 = vcombine.high %v4474_v33, %v4478_v50 }
 0xa61   :  { %13296 = vst [vmem:[#allocation96_spill] sm:$0xff] %v10186_v42  ;;  %13325 = vst [vmem:[#allocation115_spill] sm:$0xff] %v10276_v10 }
 0xa62   :  { %13326 = vst [vmem:[#allocation116_spill] sm:$0xff] %v10278_v41 }
 0xa66   :  { %4240 = vmatmul.mubr.bf16.vlgmr.msra.gmra.mrb[112].mxu0 %v10118_v24  ;;  %4313 = vmatmul.mubr.bf16.vlgmr.msra.gmra.mrb[112].mxu1 %v10118_v24  ;;  %v4441_v24 = vld [vmem:[#allocation9 + $0xc0] sm:$0xff] }
 0xa67   :  { %5194 = vmatpush1.bf16.msra.mxu0 %v10150_v7  ;;  %5235 = vmatpush1.bf16.msra.mxu1 %v10153_v37  ;;  %v10206_v39 = vcombine.high %v4441_v24, %v4445_v11  ;;  %v10214_v52 = vcombine.low %v4441_v24, %v4445_v11  ;;  %v10288_v24 = vcombine.low %v4474_v33, %v4478_v50  ;;  %v4497_v33 = vld [vmem:[#allocation9 + $0x280] sm:$0xff] }
 0xa68   :  { %4249 = vmatprep.mubr.bf16.mxu0 %v10122_v15  ;;  %4322 = vmatprep.mubr.bf16.mxu1 %v10122_v15  ;;  %v4449_v15 = vld [vmem:[#allocation9 + $0x100] sm:$0xff]  ;;  %v10292_v11 = vcombine.high %v4481_v20, %v4485_v49 }
 0xa69   :  { %5195 = vmatprep.subr.bf16.mxu0 %v10178_v22  ;;  %5236 = vmatprep.subr.bf16.mxu1 %v10180_v35  ;;  %13302 = vst [vmem:[#allocation144_spill] sm:$0xff] %v10206_v39  ;;  %13304 = vst [vmem:[#allocation146_spill] sm:$0xff] %v10214_v52  ;;  %v10220_v43 = vcombine.high %v4449_v15, %v4453_v18  ;;  %v10228_v30 = vcombine.low %v4449_v15, %v4453_v18  ;;  %v4490_v18 = vld [vmem:[#allocation9 + $0x248] sm:$0xff] }
 0xa6a   :  { %13329 = vst [vmem:[#allocation148_spill] sm:$0xff] %v10288_v24  ;;  %13330 = vst [vmem:[#allocation149_spill] sm:$0xff] %v10292_v11  ;;  %v10322_v32 = vcombine.high %v4490_v18, %v4494_v1 }
 0xa6b   :  { %5196 = vmatpush1.bf16.msra.mxu0 %v10186_v42  ;;  %5237 = vmatpush1.bf16.msra.mxu1 %v10188_v21  ;;  %13306 = vst [vmem:[#allocation172_spill] sm:$0xff] %v10220_v43  ;;  %13308 = vst [vmem:[#allocation174_spill] sm:$0xff] %v10228_v30 }
 0xa6c   :  { %5197 = vmatprep.subr.bf16.mxu0 %v10192_v3  ;;  %5238 = vmatprep.subr.bf16.mxu1 %v10194_v6  ;;  %13343 = vst [vmem:[#allocation180_spill] sm:$0xff] %v10322_v32 }
 0xa6e   :  { %4250 = vmatmul.mubr.bf16.gmra.mrb[116].mxu0 %v10130_v36  ;;  %4323 = vmatmul.mubr.bf16.gmra.mrb[116].mxu1 %v10130_v36  ;;  %v4457_v36 = vld [vmem:[#allocation9 + $0x140] sm:$0xff] }
 0xa6f   :  { %5198 = vmatpush1.bf16.msra.mxu0 %v10200_v0  ;;  %5239 = vmatpush1.bf16.msra.mxu1 %v10202_v58  ;;  %v10234_v62 = vcombine.high %v4457_v36, %v4461_v45  ;;  %v10242_v5 = vcombine.low %v4457_v36, %v4461_v45 }
 0xa70   :  { %4259 = vmatprep.mubr.bf16.mxu0 %v10134_v60  ;;  %4332 = vmatprep.mubr.bf16.mxu1 %v10134_v60  ;;  %v4465_v60 = vld [vmem:[#allocation9 + $0x180] sm:$0xff] }
 0xa71   :  { %5199 = vmatprep.subr.bf16.mxu0 %v10206_v39  ;;  %5240 = vmatprep.subr.bf16.mxu1 %v10208_v29  ;;  %13310 = vst [vmem:[#allocation99_spill] sm:$0xff] %v10234_v62  ;;  %13312 = vst [vmem:[#allocation101_spill] sm:$0xff] %v10242_v5  ;;  %v10248_v48 = vcombine.high %v4465_v60, %v4469_v54  ;;  %v10266_v55 = vcombine.low %v4465_v60, %v4469_v54 }
 0xa72   :  { %v10310_v60 = vcombine.low %v4481_v20, %v4485_v49  ;;  %v10312_v54 = vcombine.low %v4482_v27, %v4486_v51  ;;  %v4498_v20 = vld [vmem:[#allocation9 + $0x288] sm:$0xff]  ;;  %v10330_v51 = vcombine.low %v4490_v18, %v4494_v1 }
 0xa73   :  { %5200 = vmatpush1.bf16.msra.mxu0 %v10214_v52  ;;  %5241 = vmatpush1.bf16.msra.mxu1 %v10216_v25  ;;  %13314 = vst [vmem:[#allocation103_spill] sm:$0xff] %v10248_v48  ;;  %13321 = vst [vmem:[#allocation111_spill] sm:$0xff] %v10266_v55  ;;  %v4502_v49 = vld [vmem:[#allocation9 + $0x2a8] sm:$0xff] }
 0xa74   :  { %5201 = vmatprep.subr.bf16.mxu0 %v10220_v43  ;;  %5242 = vmatprep.subr.bf16.mxu1 %v10222_v17  ;;  %13338 = vst [vmem:[#allocation151_spill] sm:$0xff] %v10310_v60  ;;  %13339 = vst [vmem:[#allocation152_spill] sm:$0xff] %v10312_v54 }
 0xa75   :  { %13346 = vst [vmem:[#allocation155_spill] sm:$0xff] %v10330_v51 }
 0xa76   :  { %4260 = vmatmul.mubr.bf16.gmra.mrb[120].mxu0 %v10142_v23  ;;  %4333 = vmatmul.mubr.bf16.gmra.mrb[120].mxu1 %v10142_v23 }
 0xa77   :  { %5202 = vmatpush1.bf16.msra.mxu0 %v10228_v30  ;;  %5243 = vmatpush1.bf16.msra.mxu1 %v10230_v12 }
 0xa78   :  { %4269 = vmatprep.mubr.bf16.mxu0 %v10167_v63  ;;  %4342 = vmatprep.mubr.bf16.mxu1 %v10167_v63 }
 0xa79   :  { %5203 = vmatprep.subr.bf16.mxu0 %v10234_v62  ;;  %5244 = vmatprep.subr.bf16.mxu1 %v10236_v59  ;;  %v10254_v23 = vpop.f32.mrb[96].mxu0 }
 0xa7a   :  { %13316 = vst [vmem:[#allocation105_spill] sm:$0xff] %v10254_v23  ;;  %v10256_v34 = vpop.f32.mrb[96].mxu1  ;;  %v10258_v56 = vpop.f32.mrb[97].mxu0  ;;  %v4529_v23 = vld [vmem:[#allocation9 + $0x380] sm:$0xff] }
 0xa7b   :  { %13317 = vst [vmem:[#allocation106_spill] sm:$0xff] %v10256_v34  ;;  %13318 = vst [vmem:[#allocation107_spill] sm:$0xff] %v10258_v56  ;;  %5204 = vmatpush1.bf16.msra.mxu0 %v10242_v5  ;;  %5245 = vmatpush1.bf16.msra.mxu1 %v10244_v28  ;;  %v10262_v57 = vpop.f32.mrb[97].mxu1  ;;  %v10264_v47 = vpop.f32.mrb[98].mxu0  ;;  %v4522_v56 = vld [vmem:[#allocation9 + $0x348] sm:$0xff] }
 0xa7c   :  { %13319 = vst [vmem:[#allocation108_spill] sm:$0xff] %v10262_v57  ;;  %13320 = vst [vmem:[#allocation109_spill] sm:$0xff] %v10264_v47  ;;  %v10270_v2 = vpop.f32.mrb[98].mxu1  ;;  %5205 = vmatprep.subr.bf16.mxu0 %v10248_v48  ;;  %5246 = vmatprep.subr.bf16.mxu1 %v10250_v9  ;;  %v10274_v63 = vpop.f32.mrb[99].mxu0  ;;  %v4513_v47 = vld [vmem:[#allocation9 + $0x300] sm:$0xff]  ;;  %v4526_v34 = vld [vmem:[#allocation9 + $0x368] sm:$0xff] }
 0xa7d   :  { %13323 = vst [vmem:[#allocation113_spill] sm:$0xff] %v10270_v2  ;;  %13324 = vst [vmem:[#allocation114_spill] sm:$0xff] %v10274_v63  ;;  %v10280_v8 = vpop.f32.mrb[99].mxu1  ;;  %v10352_v63 = vcombine.low %v4498_v20, %v4502_v49  ;;  %v4525_v57 = vld [vmem:[#allocation9 + $0x360] sm:$0xff] }
 0xa7e   :  { %13327 = vst [vmem:[#allocation120_spill] sm:$0xff] %v10280_v8  ;;  %4270 = vmatmul.mubr.bf16.gmra.mrb[124].mxu0 %v10170_v13  ;;  %4343 = vmatmul.mubr.bf16.gmra.mrb[124].mxu1 %v10170_v13  ;;  %v4493_v13 = vld [vmem:[#allocation9 + $0x260] sm:$0xff] }
 0xa7f   :  { %5206 = vmatpush1.bf16.msra.mxu0 %v10266_v55  ;;  %5247 = vmatpush1.bf16.msra.mxu1 %v10268_v31  ;;  %v10320_v40 = vcombine.high %v4489_v14, %v4493_v13  ;;  %v10328_v27 = vcombine.low %v4489_v14, %v4493_v13  ;;  %13355 = vst [vmem:[#allocation160_spill] sm:$0xff] %v10352_v63 }
 0xa80   :  { %5207 = vmatprep.subr.bf16.mxu0 %v10276_v10  ;;  %5248 = vmatprep.subr.bf16.mxu1 %v10278_v41 }
 0xa81   :  { %v10296_v15 = vpop.f32.mrb[100].mxu0  ;;  %5225 = vmatprep.mubr.bf16.mxu0 %v13333_v26  ;;  %5266 = vmatprep.mubr.bf16.mxu1 %v13333_v26  ;;  %13342 = vst [vmem:[#allocation179_spill] sm:$0xff] %v10320_v40  ;;  %13345 = vst [vmem:[#allocation182_spill] sm:$0xff] %v10328_v27 }
 0xa82   :  { %13332 = vst [vmem:[#allocation175_spill] sm:$0xff] %v10296_v15  ;;  %v10300_v36 = vpop.f32.mrb[100].mxu1  ;;  %v10302_v45 = vpop.f32.mrb[101].mxu0  ;;  %v4510_v15 = vld [vmem:[#allocation9 + $0x2e8] sm:$0xff] }
 0xa83   :  { %13334 = vst [vmem:[#allocation176_spill] sm:$0xff] %v10300_v36  ;;  %13335 = vst [vmem:[#allocation177_spill] sm:$0xff] %v10302_v45  ;;  %5208 = vmatpush1.bf16.msra.mxu0 %v10286_v46  ;;  %5249 = vmatpush1.bf16.msra.mxu1 %v10288_v24  ;;  %v10306_v38 = vpop.f32.mrb[101].mxu1  ;;  %v10308_v16 = vpop.f32.mrb[102].mxu0  ;;  %v4509_v45 = vld [vmem:[#allocation9 + $0x2e0] sm:$0xff]  ;;  %v4506_v36 = vld [vmem:[#allocation9 + $0x2c8] sm:$0xff] }
 0xa84   :  { %13336 = vst [vmem:[#allocation178_spill] sm:$0xff] %v10306_v38  ;;  %13337 = vst [vmem:[#allocation110_spill] sm:$0xff] %v10308_v16  ;;  %v10314_v4 = vpop.f32.mrb[102].mxu1  ;;  %5209 = vmatprep.subr.bf16.mxu0 %v10292_v11  ;;  %5250 = vmatprep.subr.bf16.mxu1 %v10294_v44  ;;  %v10318_v53 = vpop.f32.mrb[103].mxu0  ;;  %v4501_v16 = vld [vmem:[#allocation9 + $0x2a0] sm:$0xff]  ;;  %v10362_v2 = vcombine.high %v4506_v36, %v4510_v15 }
 0xa85   :  { %13340 = vst [vmem:[#allocation153_spill] sm:$0xff] %v10314_v4  ;;  %13341 = vst [vmem:[#allocation154_spill] sm:$0xff] %v10318_v53  ;;  %v10324_v50 = vpop.f32.mrb[103].mxu1  ;;  %v10334_v53 = vcombine.high %v4497_v33, %v4501_v16  ;;  %v10336_v4 = vcombine.high %v4498_v20, %v4502_v49  ;;  %v10350_v1 = vcombine.low %v4497_v33, %v4501_v16  ;;  %v4514_v16 = vld [vmem:[#allocation9 + $0x308] sm:$0xff] }
 0xa86   :  { %13344 = vst [vmem:[#allocation181_spill] sm:$0xff] %v10324_v50  ;;  %v4505_v50 = vld [vmem:[#allocation9 + $0x2c0] sm:$0xff]  ;;  %13359 = vst [vmem:[#allocation188_spill] sm:$0xff] %v10362_v2  ;;  %v4518_v33 = vld [vmem:[#allocation9 + $0x328] sm:$0xff]  ;;  %v10370_v49 = vcombine.low %v4506_v36, %v4510_v15 }
 0xa87   :  { %5210 = vmatpush1.bf16.msra.mxu0 %v10310_v60  ;;  %5251 = vmatpush1.bf16.msra.mxu1 %v10312_v54  ;;  %13347 = vst [vmem:[#allocation156_spill] sm:$0xff] %v10334_v53  ;;  %13348 = vst [vmem:[#allocation157_spill] sm:$0xff] %v10336_v4  ;;  %v10368_v20 = vcombine.low %v4505_v50, %v4509_v45  ;;  %v10382_v15 = vcombine.low %v4514_v16, %v4518_v33 }
 0xa88   :  { %5211 = vmatprep.subr.bf16.mxu0 %v10320_v40  ;;  %5252 = vmatprep.subr.bf16.mxu1 %v10322_v32  ;;  %13354 = vst [vmem:[#allocation159_spill] sm:$0xff] %v10350_v1  ;;  %13362 = vst [vmem:[#allocation14_spill] sm:$0xff] %v10370_v49 }
 0xa89   :  { %v10338_v38 = vpop.f32.mrb[104].mxu0  ;;  %13361 = vst [vmem:[#allocation190_spill] sm:$0xff] %v10368_v20  ;;  %13366 = vst [vmem:[#allocation18_spill] sm:$0xff] %v10382_v15 }
 0xa8a   :  { %13349 = vst [vmem:[#allocation158_spill] sm:$0xff] %v10338_v38  ;;  %v10340_v8 = vpop.f32.mrb[104].mxu1  ;;  %v10342_v14 = vpop.f32.mrb[105].mxu0 }
 0xa8b   :  { %13350 = vst [vmem:[#allocation183_spill] sm:$0xff] %v10340_v8  ;;  %13351 = vst [vmem:[#allocation184_spill] sm:$0xff] %v10342_v14  ;;  %5212 = vmatpush1.bf16.msra.mxu0 %v10328_v27  ;;  %5253 = vmatpush1.bf16.msra.mxu1 %v10330_v51  ;;  %v10346_v13 = vpop.f32.mrb[105].mxu1  ;;  %v10348_v18 = vpop.f32.mrb[106].mxu0  ;;  %v10360_v14 = vcombine.high %v4505_v50, %v4509_v45  ;;  %v10388_v50 = vcombine.high %v4522_v56, %v4526_v34 }
 0xa8c   :  { %13352 = vst [vmem:[#allocation185_spill] sm:$0xff] %v10346_v13  ;;  %13353 = vst [vmem:[#allocation186_spill] sm:$0xff] %v10348_v18  ;;  %v10354_v38 = vpop.f32.mrb[106].mxu1  ;;  %5213 = vmatprep.subr.bf16.mxu0 %v10334_v53  ;;  %5254 = vmatprep.subr.bf16.mxu1 %v10336_v4  ;;  %v10358_v8 = vpop.f32.mrb[107].mxu0  ;;  %v4517_v18 = vld [vmem:[#allocation9 + $0x320] sm:$0xff] }
 0xa8d   :  { %13356 = vst [vmem:[#allocation161_spill] sm:$0xff] %v10354_v38  ;;  %13357 = vst [vmem:[#allocation162_spill] sm:$0xff] %v10358_v8  ;;  %v10364_v13 = vpop.f32.mrb[107].mxu1  ;;  %v10374_v8 = vcombine.high %v4513_v47, %v4517_v18  ;;  %v10376_v38 = vcombine.high %v4514_v16, %v4518_v33  ;;  %v10380_v45 = vcombine.low %v4513_v47, %v4517_v18 }
 0xa8e   :  { %13358 = vst [vmem:[#allocation187_spill] sm:$0xff] %v10360_v14  ;;  %13360 = vst [vmem:[#allocation189_spill] sm:$0xff] %v10364_v13  ;;  %v4521_v13 = vld [vmem:[#allocation9 + $0x340] sm:$0xff]  ;;  %v10394_v18 = vcombine.low %v4522_v56, %v4526_v34 }
 0xa8f   :  { %5214 = vmatpush1.bf16.msra.mxu0 %v10350_v1  ;;  %5255 = vmatpush1.bf16.msra.mxu1 %v10352_v63  ;;  %13363 = vst [vmem:[#allocation15_spill] sm:$0xff] %v10374_v8  ;;  %13364 = vst [vmem:[#allocation16_spill] sm:$0xff] %v10376_v38  ;;  %v10386_v36 = vcombine.high %v4521_v13, %v4525_v57  ;;  %v4534_v63 = vld [vmem:[#allocation9 + $0x3a8] sm:$0xff]  ;;  %v10392_v47 = vcombine.low %v4521_v13, %v4525_v57 }
 0xa90   :  { %5215 = vmatprep.subr.bf16.mxu0 %v10360_v14  ;;  %5256 = vmatprep.subr.bf16.mxu1 %v10362_v2  ;;  %13365 = vst [vmem:[#allocation17_spill] sm:$0xff] %v10380_v45  ;;  %13368 = vst [vmem:[#allocation20_spill] sm:$0xff] %v10388_v50  ;;  %v4533_v2 = vld [vmem:[#allocation9 + $0x3a0] sm:$0xff]  ;;  %v4530_v14 = vld [vmem:[#allocation9 + $0x388] sm:$0xff] }
 0xa91   :  { %13367 = vst [vmem:[#allocation19_spill] sm:$0xff] %v10386_v36  ;;  %13369 = vst [vmem:[#allocation21_spill] sm:$0xff] %v10392_v47  ;;  %v10398_v16 = vcombine.high %v4529_v23, %v4533_v2  ;;  %v10400_v33 = vcombine.high %v4530_v14, %v4534_v63  ;;  %v10404_v57 = vcombine.low %v4529_v23, %v4533_v2 }
 0xa92   :  { %13370 = vst [vmem:[#allocation22_spill] sm:$0xff] %v10394_v18  ;;  %v10406_v34 = vcombine.low %v4530_v14, %v4534_v63 }
 0xa93   :  { %5216 = vmatpush1.bf16.msra.mxu0 %v10368_v20  ;;  %5257 = vmatpush1.bf16.msra.mxu1 %v10370_v49  ;;  %13371 = vst [vmem:[#allocation23_spill] sm:$0xff] %v10398_v16  ;;  %13372 = vst [vmem:[#allocation24_spill] sm:$0xff] %v10400_v33  ;;  %v4538_v49 = vld [vmem:[#allocation9 + $0x3c8] sm:$0xff] }
 0xa94   :  { %5217 = vmatprep.subr.bf16.mxu0 %v10374_v8  ;;  %5258 = vmatprep.subr.bf16.mxu1 %v10376_v38  ;;  %v4537_v38 = vld [vmem:[#allocation9 + $0x3c0] sm:$0xff]  ;;  %v4542_v20 = vld [vmem:[#allocation9 + $0x3e8] sm:$0xff]  ;;  %13373 = vst [vmem:[#allocation25_spill] sm:$0xff] %v10404_v57  ;;  %13374 = vst [vmem:[#allocation26_spill] sm:$0xff] %v10406_v34 }
 0xa95   :  { %v4541_v8 = vld [vmem:[#allocation9 + $0x3e0] sm:$0xff]  ;;  %v10412_v13 = vcombine.high %v4538_v49, %v4542_v20  ;;  %v10418_v2 = vcombine.low %v4538_v49, %v4542_v20 }
 0xa96   :  { %v10410_v56 = vcombine.high %v4537_v38, %v4541_v8  ;;  %v10416_v23 = vcombine.low %v4537_v38, %v4541_v8 }
 0xa97   :  { %5218 = vmatpush1.bf16.msra.mxu0 %v10380_v45  ;;  %5259 = vmatpush1.bf16.msra.mxu1 %v10382_v15  ;;  %13376 = vst [vmem:[#allocation28_spill] sm:$0xff] %v10412_v13  ;;  %v4420_v15 = vld [vmem:[#allocation9 + $0x18] sm:$0xff]  ;;  %13378 = vst [vmem:[#allocation30_spill] sm:$0xff] %v10418_v2 }
 0xa98   :  { %5219 = vmatprep.subr.bf16.mxu0 %v10386_v36  ;;  %5260 = vmatprep.subr.bf16.mxu1 %v10388_v50  ;;  %13375 = vst [vmem:[#allocation27_spill] sm:$0xff] %v10410_v56  ;;  %v4419_v50 = vld [vmem:[#allocation9 + $0x10] sm:$0xff]  ;;  %v4424_v45 = vld [vmem:[#allocation9 + $0x38] sm:$0xff]  ;;  %13377 = vst [vmem:[#allocation29_spill] sm:$0xff] %v10416_v23 }
 0xa99   :  { %v4423_v36 = vld [vmem:[#allocation9 + $0x30] sm:$0xff]  ;;  %v10424_v14 = vcombine.high %v4420_v15, %v4424_v45  ;;  %v10430_v38 = vcombine.low %v4420_v15, %v4424_v45 }
 0xa9a   :  { %v10422_v63 = vcombine.high %v4419_v50, %v4423_v36  ;;  %v10428_v8 = vcombine.low %v4419_v50, %v4423_v36 }
 0xa9b   :  { %5220 = vmatpush1.bf16.msra.mxu0 %v10392_v47  ;;  %5261 = vmatpush1.bf16.msra.mxu1 %v10394_v18  ;;  %13380 = vst [vmem:[#allocation32_spill] sm:$0xff] %v10424_v14  ;;  %v4428_v18 = vld [vmem:[#allocation9 + $0x58] sm:$0xff]  ;;  %13382 = vst [vmem:[#allocation34_spill] sm:$0xff] %v10430_v38 }
 0xa9c   :  { %5221 = vmatprep.subr.bf16.mxu0 %v10398_v16  ;;  %5262 = vmatprep.subr.bf16.mxu1 %v10400_v33  ;;  %13379 = vst [vmem:[#allocation31_spill] sm:$0xff] %v10422_v63  ;;  %v4427_v33 = vld [vmem:[#allocation9 + $0x50] sm:$0xff]  ;;  %v4432_v47 = vld [vmem:[#allocation9 + $0x78] sm:$0xff]  ;;  %13381 = vst [vmem:[#allocation33_spill] sm:$0xff] %v10428_v8 }
 0xa9d   :  { %v4431_v16 = vld [vmem:[#allocation9 + $0x70] sm:$0xff]  ;;  %v10436_v49 = vcombine.high %v4428_v18, %v4432_v47  ;;  %v10444_v15 = vcombine.low %v4428_v18, %v4432_v47 }
 0xa9e   :  { %v10434_v20 = vcombine.high %v4427_v33, %v4431_v16  ;;  %v10442_v45 = vcombine.low %v4427_v33, %v4431_v16 }
 0xa9f   :  { %5222 = vmatpush1.bf16.msra.mxu0 %v10404_v57  ;;  %5263 = vmatpush1.bf16.msra.mxu1 %v10406_v34  ;;  %13384 = vst [vmem:[#allocation36_spill] sm:$0xff] %v10436_v49  ;;  %v4436_v34 = vld [vmem:[#allocation9 + $0x98] sm:$0xff]  ;;  %13386 = vst [vmem:[#allocation38_spill] sm:$0xff] %v10444_v15 }
 0xaa0   :  { %5223 = vmatprep.subr.bf16.mxu0 %v10410_v56  ;;  %5264 = vmatprep.subr.bf16.mxu1 %v10412_v13  ;;  %13383 = vst [vmem:[#allocation35_spill] sm:$0xff] %v10434_v20  ;;  %v4435_v13 = vld [vmem:[#allocation9 + $0x90] sm:$0xff]  ;;  %v4440_v57 = vld [vmem:[#allocation9 + $0xb8] sm:$0xff]  ;;  %13385 = vst [vmem:[#allocation37_spill] sm:$0xff] %v10442_v45 }
 0xaa1   :  { %v4439_v56 = vld [vmem:[#allocation9 + $0xb0] sm:$0xff]  ;;  %v10450_v50 = vcombine.high %v4436_v34, %v4440_v57  ;;  %v10458_v18 = vcombine.low %v4436_v34, %v4440_v57 }
 0xaa2   :  { %v10448_v36 = vcombine.high %v4435_v13, %v4439_v56  ;;  %v10456_v47 = vcombine.low %v4435_v13, %v4439_v56 }
 0xaa3   :  { %5224 = vmatpush1.bf16.msra.mxu0 %v10416_v23  ;;  %5265 = vmatpush1.bf16.msra.mxu1 %v10418_v2  ;;  %13388 = vst [vmem:[#allocation40_spill] sm:$0xff] %v10450_v50  ;;  %v4444_v2 = vld [vmem:[#allocation9 + $0xd8] sm:$0xff]  ;;  %13390 = vst [vmem:[#allocation42_spill] sm:$0xff] %v10458_v18 }
 0xaa4   :  { %5275 = vmatprep.subr.bf16.mxu0 %v10422_v63  ;;  %5316 = vmatprep.subr.bf16.mxu1 %v10424_v14  ;;  %13387 = vst [vmem:[#allocation39_spill] sm:$0xff] %v10448_v36  ;;  %v4443_v14 = vld [vmem:[#allocation9 + $0xd0] sm:$0xff]  ;;  %v4448_v23 = vld [vmem:[#allocation9 + $0xf8] sm:$0xff]  ;;  %13389 = vst [vmem:[#allocation41_spill] sm:$0xff] %v10456_v47 }
 0xaa5   :  { %v4447_v63 = vld [vmem:[#allocation9 + $0xf0] sm:$0xff]  ;;  %v10464_v33 = vcombine.high %v4444_v2, %v4448_v23  ;;  %v10470_v57 = vcombine.low %v4444_v2, %v4448_v23 }
 0xaa6   :  { %5226 = vmatmul.mubr.bf16.vlgmr.msra.gmra.mrb[128].mxu0 %v13333_v26  ;;  %5267 = vmatmul.mubr.bf16.vlgmr.msra.gmra.mrb[128].mxu1 %v13333_v26  ;;  %v10462_v16 = vcombine.high %v4443_v14, %v4447_v63  ;;  %v10468_v56 = vcombine.low %v4443_v14, %v4447_v63 }
 0xaa7   :  { %5276 = vmatpush1.bf16.msra.mxu0 %v10428_v8  ;;  %5317 = vmatpush1.bf16.msra.mxu1 %v10430_v38  ;;  %13392 = vst [vmem:[#allocation44_spill] sm:$0xff] %v10464_v33  ;;  %v4452_v38 = vld [vmem:[#allocation9 + $0x118] sm:$0xff]  ;;  %13394 = vst [vmem:[#allocation46_spill] sm:$0xff] %v10470_v57 }
 0xaa8   :  { %5277 = vmatprep.subr.bf16.mxu0 %v10434_v20  ;;  %5318 = vmatprep.subr.bf16.mxu1 %v10436_v49  ;;  %13391 = vst [vmem:[#allocation43_spill] sm:$0xff] %v10462_v16  ;;  %v4451_v49 = vld [vmem:[#allocation9 + $0x110] sm:$0xff]  ;;  %v4456_v8 = vld [vmem:[#allocation9 + $0x138] sm:$0xff]  ;;  %13393 = vst [vmem:[#allocation45_spill] sm:$0xff] %v10468_v56 }
 0xaa9   :  { %5307 = vmatprep.mubr.bf16.mxu0 %v13333_v26  ;;  %5348 = vmatprep.mubr.bf16.mxu1 %v13333_v26  ;;  %v4455_v20 = vld [vmem:[#allocation9 + $0x130] sm:$0xff]  ;;  %v10476_v13 = vcombine.high %v4452_v38, %v4456_v8  ;;  %v10482_v23 = vcombine.low %v4452_v38, %v4456_v8 }
 0xaaa   :  { %v10474_v34 = vcombine.high %v4451_v49, %v4455_v20  ;;  %v10480_v63 = vcombine.low %v4451_v49, %v4455_v20 }
 0xaab   :  { %5278 = vmatpush1.bf16.msra.mxu0 %v10442_v45  ;;  %5319 = vmatpush1.bf16.msra.mxu1 %v10444_v15  ;;  %13396 = vst [vmem:[#allocation48_spill] sm:$0xff] %v10476_v13  ;;  %v4460_v15 = vld [vmem:[#allocation9 + $0x158] sm:$0xff]  ;;  %13398 = vst [vmem:[#allocation50_spill] sm:$0xff] %v10482_v23 }
 0xaac   :  { %5279 = vmatprep.subr.bf16.mxu0 %v10448_v36  ;;  %5320 = vmatprep.subr.bf16.mxu1 %v10450_v50  ;;  %13395 = vst [vmem:[#allocation47_spill] sm:$0xff] %v10474_v34  ;;  %v4459_v50 = vld [vmem:[#allocation9 + $0x150] sm:$0xff]  ;;  %v4464_v45 = vld [vmem:[#allocation9 + $0x178] sm:$0xff]  ;;  %13397 = vst [vmem:[#allocation49_spill] sm:$0xff] %v10480_v63 }
 0xaad   :  { %v4463_v36 = vld [vmem:[#allocation9 + $0x170] sm:$0xff]  ;;  %v10488_v14 = vcombine.high %v4460_v15, %v4464_v45  ;;  %v10494_v8 = vcombine.low %v4460_v15, %v4464_v45 }
 0xaae   :  { %v10486_v2 = vcombine.high %v4459_v50, %v4463_v36  ;;  %v10492_v20 = vcombine.low %v4459_v50, %v4463_v36 }
 0xaaf   :  { %5280 = vmatpush1.bf16.msra.mxu0 %v10456_v47  ;;  %5321 = vmatpush1.bf16.msra.mxu1 %v10458_v18  ;;  %13400 = vst [vmem:[#allocation52_spill] sm:$0xff] %v10488_v14  ;;  %v4468_v18 = vld [vmem:[#allocation9 + $0x198] sm:$0xff]  ;;  %13402 = vst [vmem:[#allocation54_spill] sm:$0xff] %v10494_v8 }
 0xab0   :  { %5281 = vmatprep.subr.bf16.mxu0 %v10462_v16  ;;  %5322 = vmatprep.subr.bf16.mxu1 %v10464_v33  ;;  %13399 = vst [vmem:[#allocation51_spill] sm:$0xff] %v10486_v2  ;;  %v4467_v33 = vld [vmem:[#allocation9 + $0x190] sm:$0xff]  ;;  %v4472_v47 = vld [vmem:[#allocation9 + $0x1b8] sm:$0xff]  ;;  %13401 = vst [vmem:[#allocation53_spill] sm:$0xff] %v10492_v20 }
 0xab1   :  { %v4471_v16 = vld [vmem:[#allocation9 + $0x1b0] sm:$0xff]  ;;  %v10500_v49 = vcombine.high %v4468_v18, %v4472_v47  ;;  %v10506_v45 = vcombine.low %v4468_v18, %v4472_v47 }
 0xab2   :  { %v10498_v38 = vcombine.high %v4467_v33, %v4471_v16  ;;  %v10504_v36 = vcombine.low %v4467_v33, %v4471_v16 }
 0xab3   :  { %5282 = vmatpush1.bf16.msra.mxu0 %v10468_v56  ;;  %5323 = vmatpush1.bf16.msra.mxu1 %v10470_v57  ;;  %13404 = vst [vmem:[#allocation56_spill] sm:$0xff] %v10500_v49  ;;  %v4476_v57 = vld [vmem:[#allocation9 + $0x1d8] sm:$0xff]  ;;  %13406 = vst [vmem:[#allocation58_spill] sm:$0xff] %v10506_v45 }
 0xab4   :  { %5283 = vmatprep.subr.bf16.mxu0 %v10474_v34  ;;  %5324 = vmatprep.subr.bf16.mxu1 %v10476_v13  ;;  %13403 = vst [vmem:[#allocation55_spill] sm:$0xff] %v10498_v38  ;;  %v4475_v13 = vld [vmem:[#allocation9 + $0x1d0] sm:$0xff]  ;;  %v4480_v56 = vld [vmem:[#allocation9 + $0x1f8] sm:$0xff]  ;;  %13405 = vst [vmem:[#allocation57_spill] sm:$0xff] %v10504_v36 }
 0xab5   :  { %v4479_v34 = vld [vmem:[#allocation9 + $0x1f0] sm:$0xff]  ;;  %v10512_v50 = vcombine.high %v4476_v57, %v4480_v56  ;;  %v10518_v47 = vcombine.low %v4476_v57, %v4480_v56 }
 0xab6   :  { %v10510_v15 = vcombine.high %v4475_v13, %v4479_v34  ;;  %v10516_v16 = vcombine.low %v4475_v13, %v4479_v34 }
 0xab7   :  { %5284 = vmatpush1.bf16.msra.mxu0 %v10480_v63  ;;  %5325 = vmatpush1.bf16.msra.mxu1 %v10482_v23  ;;  %13408 = vst [vmem:[#allocation60_spill] sm:$0xff] %v10512_v50  ;;  %v4484_v23 = vld [vmem:[#allocation9 + $0x218] sm:$0xff]  ;;  %13410 = vst [vmem:[#allocation62_spill] sm:$0xff] %v10518_v47 }
 0xab8   :  { %5285 = vmatprep.subr.bf16.mxu0 %v10486_v2  ;;  %5326 = vmatprep.subr.bf16.mxu1 %v10488_v14  ;;  %13407 = vst [vmem:[#allocation59_spill] sm:$0xff] %v10510_v15  ;;  %v4483_v14 = vld [vmem:[#allocation9 + $0x210] sm:$0xff]  ;;  %v4488_v63 = vld [vmem:[#allocation9 + $0x238] sm:$0xff]  ;;  %13409 = vst [vmem:[#allocation61_spill] sm:$0xff] %v10516_v16 }
 0xab9   :  { %v4487_v2 = vld [vmem:[#allocation9 + $0x230] sm:$0xff]  ;;  %v10524_v33 = vcombine.high %v4484_v23, %v4488_v63  ;;  %v10530_v56 = vcombine.low %v4484_v23, %v4488_v63 }
 0xaba   :  { %v10522_v18 = vcombine.high %v4483_v14, %v4487_v2  ;;  %v10528_v34 = vcombine.low %v4483_v14, %v4487_v2 }
 0xabb   :  { %5286 = vmatpush1.bf16.msra.mxu0 %v10492_v20  ;;  %5327 = vmatpush1.bf16.msra.mxu1 %v10494_v8  ;;  %13412 = vst [vmem:[#allocation64_spill] sm:$0xff] %v10524_v33  ;;  %v4492_v8 = vld [vmem:[#allocation9 + $0x258] sm:$0xff]  ;;  %13414 = vst [vmem:[#allocation66_spill] sm:$0xff] %v10530_v56 }
 0xabc   :  { %5287 = vmatprep.subr.bf16.mxu0 %v10498_v38  ;;  %5328 = vmatprep.subr.bf16.mxu1 %v10500_v49  ;;  %13411 = vst [vmem:[#allocation63_spill] sm:$0xff] %v10522_v18  ;;  %v4491_v49 = vld [vmem:[#allocation9 + $0x250] sm:$0xff]  ;;  %v4496_v20 = vld [vmem:[#allocation9 + $0x278] sm:$0xff]  ;;  %13413 = vst [vmem:[#allocation65_spill] sm:$0xff] %v10528_v34 }
 0xabd   :  { %v4495_v38 = vld [vmem:[#allocation9 + $0x270] sm:$0xff]  ;;  %v10536_v13 = vcombine.high %v4492_v8, %v4496_v20  ;;  %v10542_v63 = vcombine.low %v4492_v8, %v4496_v20 }
 0xabe   :  { %v10534_v57 = vcombine.high %v4491_v49, %v4495_v38  ;;  %v10540_v2 = vcombine.low %v4491_v49, %v4495_v38 }
 0xabf   :  { %5288 = vmatpush1.bf16.msra.mxu0 %v10504_v36  ;;  %5329 = vmatpush1.bf16.msra.mxu1 %v10506_v45  ;;  %13416 = vst [vmem:[#allocation68_spill] sm:$0xff] %v10536_v13  ;;  %v4500_v45 = vld [vmem:[#allocation9 + $0x298] sm:$0xff]  ;;  %13418 = vst [vmem:[#allocation70_spill] sm:$0xff] %v10542_v63 }
 0xac0   :  { %5289 = vmatprep.subr.bf16.mxu0 %v10510_v15  ;;  %5330 = vmatprep.subr.bf16.mxu1 %v10512_v50  ;;  %13415 = vst [vmem:[#allocation67_spill] sm:$0xff] %v10534_v57  ;;  %v4499_v50 = vld [vmem:[#allocation9 + $0x290] sm:$0xff]  ;;  %v4504_v36 = vld [vmem:[#allocation9 + $0x2b8] sm:$0xff]  ;;  %13417 = vst [vmem:[#allocation69_spill] sm:$0xff] %v10540_v2 }
 0xac1   :  { %v4503_v15 = vld [vmem:[#allocation9 + $0x2b0] sm:$0xff]  ;;  %v10548_v14 = vcombine.high %v4500_v45, %v4504_v36  ;;  %v10554_v20 = vcombine.low %v4500_v45, %v4504_v36 }
 0xac2   :  { %v10546_v23 = vcombine.high %v4499_v50, %v4503_v15  ;;  %v10552_v38 = vcombine.low %v4499_v50, %v4503_v15 }
 0xac3   :  { %5290 = vmatpush1.bf16.msra.mxu0 %v10516_v16  ;;  %5331 = vmatpush1.bf16.msra.mxu1 %v10518_v47  ;;  %13420 = vst [vmem:[#allocation72_spill] sm:$0xff] %v10548_v14  ;;  %v4508_v47 = vld [vmem:[#allocation9 + $0x2d8] sm:$0xff]  ;;  %13422 = vst [vmem:[#allocation74_spill] sm:$0xff] %v10554_v20 }
 0xac4   :  { %5291 = vmatprep.subr.bf16.mxu0 %v10522_v18  ;;  %5332 = vmatprep.subr.bf16.mxu1 %v10524_v33  ;;  %13419 = vst [vmem:[#allocation71_spill] sm:$0xff] %v10546_v23  ;;  %v4507_v33 = vld [vmem:[#allocation9 + $0x2d0] sm:$0xff]  ;;  %v4512_v16 = vld [vmem:[#allocation9 + $0x2f8] sm:$0xff]  ;;  %13421 = vst [vmem:[#allocation73_spill] sm:$0xff] %v10552_v38 }
 0xac5   :  { %v4511_v18 = vld [vmem:[#allocation9 + $0x2f0] sm:$0xff]  ;;  %v10560_v49 = vcombine.high %v4508_v47, %v4512_v16  ;;  %v10566_v36 = vcombine.low %v4508_v47, %v4512_v16 }
 0xac6   :  { %v10558_v8 = vcombine.high %v4507_v33, %v4511_v18  ;;  %v10564_v15 = vcombine.low %v4507_v33, %v4511_v18 }
 0xac7   :  { %5292 = vmatpush1.bf16.msra.mxu0 %v10528_v34  ;;  %5333 = vmatpush1.bf16.msra.mxu1 %v10530_v56  ;;  %13424 = vst [vmem:[#allocation76_spill] sm:$0xff] %v10560_v49  ;;  %v4516_v56 = vld [vmem:[#allocation9 + $0x318] sm:$0xff]  ;;  %13426 = vst [vmem:[#allocation78_spill] sm:$0xff] %v10566_v36 }
 0xac8   :  { %5293 = vmatprep.subr.bf16.mxu0 %v10534_v57  ;;  %5334 = vmatprep.subr.bf16.mxu1 %v10536_v13  ;;  %13423 = vst [vmem:[#allocation75_spill] sm:$0xff] %v10558_v8  ;;  %v4515_v13 = vld [vmem:[#allocation9 + $0x310] sm:$0xff]  ;;  %v4520_v34 = vld [vmem:[#allocation9 + $0x338] sm:$0xff]  ;;  %13425 = vst [vmem:[#allocation77_spill] sm:$0xff] %v10564_v15 }
 0xac9   :  { %v4519_v57 = vld [vmem:[#allocation9 + $0x330] sm:$0xff]  ;;  %v10572_v50 = vcombine.high %v4516_v56, %v4520_v34  ;;  %v10578_v16 = vcombine.low %v4516_v56, %v4520_v34 }
 0xaca   :  { %v10570_v45 = vcombine.high %v4515_v13, %v4519_v57  ;;  %v10576_v18 = vcombine.low %v4515_v13, %v4519_v57 }
 0xacb   :  { %5294 = vmatpush1.bf16.msra.mxu0 %v10540_v2  ;;  %5335 = vmatpush1.bf16.msra.mxu1 %v10542_v63  ;;  %13428 = vst [vmem:[#allocation163_spill] sm:$0xff] %v10572_v50  ;;  %v4524_v63 = vld [vmem:[#allocation9 + $0x358] sm:$0xff]  ;;  %13430 = vst [vmem:[#allocation165_spill] sm:$0xff] %v10578_v16 }
 0xacc   :  { %5295 = vmatprep.subr.bf16.mxu0 %v10546_v23  ;;  %5336 = vmatprep.subr.bf16.mxu1 %v10548_v14  ;;  %13427 = vst [vmem:[#allocation79_spill] sm:$0xff] %v10570_v45  ;;  %v4523_v14 = vld [vmem:[#allocation9 + $0x350] sm:$0xff]  ;;  %v4528_v2 = vld [vmem:[#allocation9 + $0x378] sm:$0xff]  ;;  %13429 = vst [vmem:[#allocation164_spill] sm:$0xff] %v10576_v18 }
 0xacd   :  { %v4527_v23 = vld [vmem:[#allocation9 + $0x370] sm:$0xff]  ;;  %v10584_v33 = vcombine.high %v4524_v63, %v4528_v2  ;;  %v10590_v34 = vcombine.low %v4524_v63, %v4528_v2 }
 0xace   :  { %v10582_v47 = vcombine.high %v4523_v14, %v4527_v23  ;;  %v10588_v57 = vcombine.low %v4523_v14, %v4527_v23 }
 0xacf   :  { %5296 = vmatpush1.bf16.msra.mxu0 %v10552_v38  ;;  %5337 = vmatpush1.bf16.msra.mxu1 %v10554_v20  ;;  %13432 = vst [vmem:[#allocation191_spill] sm:$0xff] %v10584_v33  ;;  %v4532_v20 = vld [vmem:[#allocation9 + $0x398] sm:$0xff]  ;;  %13434 = vst [vmem:[#allocation193_spill] sm:$0xff] %v10590_v34 }
 0xad0   :  { %5297 = vmatprep.subr.bf16.mxu0 %v10558_v8  ;;  %5338 = vmatprep.subr.bf16.mxu1 %v10560_v49  ;;  %13431 = vst [vmem:[#allocation166_spill] sm:$0xff] %v10582_v47  ;;  %v4531_v49 = vld [vmem:[#allocation9 + $0x390] sm:$0xff]  ;;  %v4536_v38 = vld [vmem:[#allocation9 + $0x3b8] sm:$0xff]  ;;  %13433 = vst [vmem:[#allocation192_spill] sm:$0xff] %v10588_v57 }
 0xad1   :  { %v4535_v8 = vld [vmem:[#allocation9 + $0x3b0] sm:$0xff]  ;;  %v10596_v13 = vcombine.high %v4532_v20, %v4536_v38  ;;  %v10602_v2 = vcombine.low %v4532_v20, %v4536_v38  ;;  %v13444_v38 = vld [vmem:[#allocation187_spill] sm:$0xff]  ;;  %v13445_v20 = vld [vmem:[#allocation188_spill] sm:$0xff] }
 0xad2   :  { %v10594_v56 = vcombine.high %v4531_v49, %v4535_v8  ;;  %v10600_v23 = vcombine.low %v4531_v49, %v4535_v8  ;;  %v13446_v8 = vld [vmem:[#allocation190_spill] sm:$0xff] }
 0xad3   :  { %5298 = vmatpush1.bf16.msra.mxu0 %v10564_v15  ;;  %5339 = vmatpush1.bf16.msra.mxu1 %v10566_v36  ;;  %13436 = vst [vmem:[#allocation121_spill] sm:$0xff] %v10596_v13  ;;  %v4540_v36 = vld [vmem:[#allocation9 + $0x3d8] sm:$0xff]  ;;  %13438 = vst [vmem:[#allocation123_spill] sm:$0xff] %v10602_v2  ;;  %v13447_v49 = vld [vmem:[#allocation14_spill] sm:$0xff] }
 0xad4   :  { %5299 = vmatprep.subr.bf16.mxu0 %v10570_v45  ;;  %5340 = vmatprep.subr.bf16.mxu1 %v10572_v50  ;;  %13435 = vst [vmem:[#allocation194_spill] sm:$0xff] %v10594_v56  ;;  %v4539_v50 = vld [vmem:[#allocation9 + $0x3d0] sm:$0xff]  ;;  %v4544_v15 = vld [vmem:[#allocation9 + $0x3f8] sm:$0xff]  ;;  %13437 = vst [vmem:[#allocation122_spill] sm:$0xff] %v10600_v23 }
 0xad5   :  { %v4543_v45 = vld [vmem:[#allocation9 + $0x3f0] sm:$0xff]  ;;  %v10608_v14 = vcombine.high %v4540_v36, %v4544_v15 }
 0xad6   :  { %v10606_v63 = vcombine.high %v4539_v50, %v4543_v45 }
 0xad7   :  { %5300 = vmatpush1.bf16.msra.mxu0 %v10576_v18  ;;  %5341 = vmatpush1.bf16.msra.mxu1 %v10578_v16  ;;  %13440 = vst [vmem:[#allocation125_spill] sm:$0xff] %v10608_v14 }
 0xad8   :  { %5301 = vmatprep.subr.bf16.mxu0 %v10582_v47  ;;  %5342 = vmatprep.subr.bf16.mxu1 %v10584_v33  ;;  %13439 = vst [vmem:[#allocation124_spill] sm:$0xff] %v10606_v63  ;;  %v10612_v33 = vcombine.low %v4539_v50, %v4543_v45  ;;  %v13450_v45 = vld [vmem:[#allocation17_spill] sm:$0xff]  ;;  %v13451_v50 = vld [vmem:[#allocation18_spill] sm:$0xff] }
 0xada   :  { %13441 = vst [vmem:[#allocation126_spill] sm:$0xff] %v10612_v33 }
 0xadb   :  { %5302 = vmatpush1.bf16.msra.mxu0 %v10588_v57  ;;  %5343 = vmatpush1.bf16.msra.mxu1 %v10590_v34  ;;  %v10614_v57 = vcombine.low %v4540_v36, %v4544_v15  ;;  %v13448_v15 = vld [vmem:[#allocation15_spill] sm:$0xff]  ;;  %v13449_v36 = vld [vmem:[#allocation16_spill] sm:$0xff] }
 0xadc   :  { %5303 = vmatprep.subr.bf16.mxu0 %v10594_v56  ;;  %5344 = vmatprep.subr.bf16.mxu1 %v10596_v13 }
 0xadd   :  { %13442 = vst [vmem:[#allocation127_spill] sm:$0xff] %v10614_v57 }
 0xadf   :  { %5304 = vmatpush1.bf16.msra.mxu0 %v10600_v23  ;;  %5345 = vmatpush1.bf16.msra.mxu1 %v10602_v2 }
 0xae0   :  { %5305 = vmatprep.subr.bf16.mxu0 %v10606_v63  ;;  %5346 = vmatprep.subr.bf16.mxu1 %v10608_v14 }
 0xae3   :  { %5306 = vmatpush1.bf16.msra.mxu0 %v10612_v33  ;;  %5347 = vmatpush1.bf16.msra.mxu1 %v10614_v57 }
 0xae4   :  { %5423 = vmatprep.subr.bf16.mxu0 %v10146_v19  ;;  %5464 = vmatprep.subr.bf16.mxu1 %v10148_v61 }
 0xae6   :  { %5308 = vmatmul.mubr.bf16.vlgmr.msra.gmra.mrb[132].mxu0 %v13333_v26  ;;  %5349 = vmatmul.mubr.bf16.vlgmr.msra.gmra.mrb[132].mxu1 %v13333_v26  ;;  %v13443_v26 = vld [vmem:[#allocation160_spill] sm:$0xff] }
 0xae7   :  { %5424 = vmatpush1.bf16.msra.mxu0 %v10150_v7  ;;  %5465 = vmatpush1.bf16.msra.mxu1 %v10153_v37 }
 0xae8   :  { %5425 = vmatprep.subr.bf16.mxu0 %v10178_v22  ;;  %5466 = vmatprep.subr.bf16.mxu1 %v10180_v35 }
 0xaeb   :  { %5426 = vmatpush1.bf16.msra.mxu0 %v10186_v42  ;;  %5467 = vmatpush1.bf16.msra.mxu1 %v10188_v21 }
 0xaec   :  { %5427 = vmatprep.subr.bf16.mxu0 %v10192_v3  ;;  %5468 = vmatprep.subr.bf16.mxu1 %v10194_v6 }
 0xaef   :  { %5428 = vmatpush1.bf16.msra.mxu0 %v10200_v0  ;;  %5469 = vmatpush1.bf16.msra.mxu1 %v10202_v58 }
 0xaf0   :  { %5429 = vmatprep.subr.bf16.mxu0 %v10206_v39  ;;  %5470 = vmatprep.subr.bf16.mxu1 %v10208_v29 }
 0xaf3   :  { %5430 = vmatpush1.bf16.msra.mxu0 %v10214_v52  ;;  %5471 = vmatpush1.bf16.msra.mxu1 %v10216_v25 }
 0xaf4   :  { %5431 = vmatprep.subr.bf16.mxu0 %v10220_v43  ;;  %5472 = vmatprep.subr.bf16.mxu1 %v10222_v17 }
 0xaf7   :  { %5432 = vmatpush1.bf16.msra.mxu0 %v10228_v30  ;;  %5473 = vmatpush1.bf16.msra.mxu1 %v10230_v12 }
 0xaf8   :  { %5433 = vmatprep.subr.bf16.mxu0 %v10234_v62  ;;  %5474 = vmatprep.subr.bf16.mxu1 %v10236_v59 }
 0xafb   :  { %5434 = vmatpush1.bf16.msra.mxu0 %v10242_v5  ;;  %5475 = vmatpush1.bf16.msra.mxu1 %v10244_v28 }
 0xafc   :  { %5435 = vmatprep.subr.bf16.mxu0 %v10248_v48  ;;  %5476 = vmatprep.subr.bf16.mxu1 %v10250_v9 }
 0xaff   :  { %5436 = vmatpush1.bf16.msra.mxu0 %v10266_v55  ;;  %5477 = vmatpush1.bf16.msra.mxu1 %v10268_v31 }
 0xb00   :  { %5437 = vmatprep.subr.bf16.mxu0 %v10276_v10  ;;  %5478 = vmatprep.subr.bf16.mxu1 %v10278_v41  ;;  %v13516_v41 = vld [vmem:[#allocation108_spill] sm:$0xff] }
 0xb03   :  { %5438 = vmatpush1.bf16.msra.mxu0 %v10286_v46  ;;  %5479 = vmatpush1.bf16.msra.mxu1 %v10288_v24 }
 0xb04   :  { %5439 = vmatprep.subr.bf16.mxu0 %v10292_v11  ;;  %5480 = vmatprep.subr.bf16.mxu1 %v10294_v44 }
 0xb07   :  { %5440 = vmatpush1.bf16.msra.mxu0 %v10310_v60  ;;  %5481 = vmatpush1.bf16.msra.mxu1 %v10312_v54 }
 0xb08   :  { %5441 = vmatprep.subr.bf16.mxu0 %v10320_v40  ;;  %5482 = vmatprep.subr.bf16.mxu1 %v10322_v32 }
 0xb0b   :  { %5442 = vmatpush1.bf16.msra.mxu0 %v10328_v27  ;;  %5483 = vmatpush1.bf16.msra.mxu1 %v10330_v51 }
 0xb0c   :  { %5443 = vmatprep.subr.bf16.mxu0 %v10334_v53  ;;  %5484 = vmatprep.subr.bf16.mxu1 %v10336_v4  ;;  %v13452_v4 = vld [vmem:[#allocation19_spill] sm:$0xff] }
 0xb0f   :  { %5444 = vmatpush1.bf16.msra.mxu0 %v10350_v1  ;;  %5485 = vmatpush1.bf16.msra.mxu1 %v13443_v26  ;;  %v13453_v1 = vld [vmem:[#allocation20_spill] sm:$0xff]  ;;  %v13454_v26 = vld [vmem:[#allocation21_spill] sm:$0xff] }
 0xb10   :  { %5445 = vmatprep.subr.bf16.mxu0 %v13444_v38  ;;  %5486 = vmatprep.subr.bf16.mxu1 %v13445_v20  ;;  %v13455_v38 = vld [vmem:[#allocation22_spill] sm:$0xff]  ;;  %v13456_v20 = vld [vmem:[#allocation23_spill] sm:$0xff] }
 0xb13   :  { %5446 = vmatpush1.bf16.msra.mxu0 %v13446_v8  ;;  %5487 = vmatpush1.bf16.msra.mxu1 %v13447_v49  ;;  %v13457_v8 = vld [vmem:[#allocation24_spill] sm:$0xff]  ;;  %v13458_v49 = vld [vmem:[#allocation25_spill] sm:$0xff] }
 0xb14   :  { %5447 = vmatprep.subr.bf16.mxu0 %v13448_v15  ;;  %5488 = vmatprep.subr.bf16.mxu1 %v13449_v36  ;;  %v13459_v15 = vld [vmem:[#allocation26_spill] sm:$0xff]  ;;  %v13460_v36 = vld [vmem:[#allocation27_spill] sm:$0xff] }
 0xb17   :  { %5448 = vmatpush1.bf16.msra.mxu0 %v13450_v45  ;;  %5489 = vmatpush1.bf16.msra.mxu1 %v13451_v50  ;;  %v13461_v45 = vld [vmem:[#allocation28_spill] sm:$0xff]  ;;  %v13462_v50 = vld [vmem:[#allocation29_spill] sm:$0xff] }
 0xb18   :  { %5449 = vmatprep.subr.bf16.mxu0 %v13452_v4  ;;  %5490 = vmatprep.subr.bf16.mxu1 %v13453_v1  ;;  %v13463_v4 = vld [vmem:[#allocation30_spill] sm:$0xff]  ;;  %v13464_v1 = vld [vmem:[#allocation31_spill] sm:$0xff] }
 0xb1b   :  { %5450 = vmatpush1.bf16.msra.mxu0 %v13454_v26  ;;  %5491 = vmatpush1.bf16.msra.mxu1 %v13455_v38  ;;  %v13465_v26 = vld [vmem:[#allocation32_spill] sm:$0xff] }
 0xb1c   :  { %5451 = vmatprep.subr.bf16.mxu0 %v13456_v20  ;;  %5492 = vmatprep.subr.bf16.mxu1 %v13457_v8 }
 0xb1f   :  { %5452 = vmatpush1.bf16.msra.mxu0 %v13458_v49  ;;  %5493 = vmatpush1.bf16.msra.mxu1 %v13459_v15 }
 0xb20   :  { %5453 = vmatprep.subr.bf16.mxu0 %v13460_v36  ;;  %5494 = vmatprep.subr.bf16.mxu1 %v13461_v45 }
 0xb23   :  { %5454 = vmatpush1.bf16.msra.mxu0 %v13462_v50  ;;  %5495 = vmatpush1.bf16.msra.mxu1 %v13463_v4 }
 0xb24   :  { %5505 = vmatprep.subr.bf16.mxu0 %v13464_v1  ;;  %5546 = vmatprep.subr.bf16.mxu1 %v13465_v26  ;;  %v10707_v26 = vld [vmem:[%s11887_s6] sm:$0xff]  ;;  %s8198_s6 = smov [#allocation10]  }
 0xb25   :  { %s7031_s30 = sshll.u32 %s8198_s6, 4  ;;  %s7032_s30 = int_to_ptr.vmem [resolvable:$true] %s7031_s30 }
 0xb26   :  { %s8164_s8 = scalar_lea.vmem %s7032_s30, 256  ;;  %p8169_p11 = scmp.lt.s32.totalorder %s7032_s30, %s7032_s30 }
 0xb27   :  { %p8165_p10 = scmp.ne.s32.totalorder %s7032_s30, %s8164_s8  ;;  %p8170_p12 = scmp.lt.s32.totalorder %s8164_s8, %s8164_s8 }
 0xb29   :  { %p8171_p13 = por %p8170_p12, %p8169_p11 }
 0xb2b   :  { %p8172_p0 = pnand %p8171_p13, %p8165_p10 }
 0xb31   :  { %v10688_v38 = vpop.f32.mrb[108].mxu0  ;;  %v10690_v20 = vpop.f32.mrb[108].mxu1 }
 0xb32   :  { %13466 = vst [vmem:[#allocation128_spill] sm:$0xff] %v10688_v38  ;;  %13467 = vst [vmem:[#allocation129_spill] sm:$0xff] %v10690_v20  ;;  %v10692_v8 = vpop.f32.mrb[109].mxu0  ;;  %v10694_v49 = vpop.f32.mrb[109].mxu1 }
 0xb33   :  { %13468 = vst [vmem:[#allocation130_spill] sm:$0xff] %v10692_v8  ;;  %13469 = vst [vmem:[#allocation131_spill] sm:$0xff] %v10694_v49  ;;  %v10696_v15 = vpop.f32.mrb[110].mxu0  ;;  %v10698_v36 = vpop.f32.mrb[110].mxu1  ;;  %v13474_v8 = vld [vmem:[#allocation142_spill] sm:$0xff] }
 0xb34   :  { %13470 = vst [vmem:[#allocation132_spill] sm:$0xff] %v10696_v15  ;;  %13471 = vst [vmem:[#allocation133_spill] sm:$0xff] %v10698_v36  ;;  %v10700_v45 = vpop.f32.mrb[111].mxu0  ;;  %v10702_v50 = vpop.f32.mrb[111].mxu1  ;;  %v13475_v1 = vsub.s32 4, %v13474_v8  ;;  %v13476_v36 = vsub.s32 6, %v13474_v8 }
 0xb35   :  { %13472 = vst [vmem:[#allocation134_spill] sm:$0xff] %v10700_v45  ;;  %13473 = vst [vmem:[#allocation135_spill] sm:$0xff] %v10702_v50  ;;  %v13477_v4 = vsub.s32 5, %v13474_v8  ;;  %v13478_v51 = vsub.s32 7, %v13474_v8 }
 0xb36   :  { %v10716_v49 = vrot.slane %v10707_v26, %v13475_v1  ;;  %v10721_v45 = vrot.slane %v10707_v26, %v13476_v36 }
 0xb37   :  { %v10730_v53 = vrot.slane %v10707_v26, %v13477_v4  ;;  %v10735_v27 = vrot.slane %v10707_v26, %v13478_v51 }
 0xb39   :  { %v10709_v38 = vpop.f32.mrb[112].mxu0  ;;  %v10711_v20 = vpop.f32.mrb[112].mxu1 }
 0xb3a   :  { %v10723_v50 = vpop.f32.mrb[113].mxu0  ;;  %v10725_v15 = vpop.f32.mrb[113].mxu1 }
 0xb3b   :  { %v4245_v1 = vpop.f32.mrb[114].mxu0  ;;  %v4318_v32 = vpop.f32.mrb[114].mxu1 }
 0xb3c   :  { %v10738_v40 = vadd.f32 %v4245_v1, %v10716_v49  ;;  %v10741_v36 = vadd.f32 %v4318_v32, %v10721_v45  ;;  %v4247_v54 = vpop.f32.mrb[115].mxu0  ;;  %v4320_v60 = vpop.f32.mrb[115].mxu1 }
 0xb3d   :  { %v10744_v44 = vadd.f32 %v4247_v54, %v10730_v53  ;;  %v10747_v4 = vadd.f32 %v4320_v60, %v10735_v27 }
 0xb3e   :  { %13479 = vst [vmem:[#allocation136_spill] sm:$0xff] %v10738_v40  ;;  %13480 = vst [vmem:[#allocation137_spill] sm:$0xff] %v10741_v36 }
 0xb3f   :  { %13481 = vst [vmem:[#allocation138_spill] sm:$0xff] %v10744_v44  ;;  %13482 = vst [vmem:[#allocation139_spill] sm:$0xff] %v10747_v4 }
 0xb41   :  { %v4251_v11 = vpop.f32.mrb[116].mxu0  ;;  %v4324_v24 = vpop.f32.mrb[116].mxu1 }
 0xb42   :  { %v10750_v51 = vadd.f32 %v4251_v11, %v10716_v49  ;;  %v10753_v46 = vadd.f32 %v4324_v24, %v10721_v45  ;;  %v4253_v1 = vpop.f32.mrb[117].mxu0  ;;  %v4326_v40 = vpop.f32.mrb[117].mxu1 }
 0xb43   :  { %v10756_v32 = vadd.f32 %v4253_v1, %v10730_v53  ;;  %v10759_v36 = vadd.f32 %v4326_v40, %v10735_v27  ;;  %v4255_v54 = vpop.f32.mrb[118].mxu0  ;;  %v4328_v44 = vpop.f32.mrb[118].mxu1 }
 0xb44   :  { %13483 = vst [vmem:[#allocation140_spill] sm:$0xff] %v10750_v51  ;;  %13484 = vst [vmem:[#allocation141_spill] sm:$0xff] %v10753_v46  ;;  %v10762_v60 = vadd.f32 %v4255_v54, %v10716_v49  ;;  %v10765_v4 = vadd.f32 %v4328_v44, %v10721_v45  ;;  %v4257_v11 = vpop.f32.mrb[119].mxu0  ;;  %v4330_v51 = vpop.f32.mrb[119].mxu1 }
 0xb45   :  { %13485 = vst [vmem:[#allocation200_spill] sm:$0xff] %v10756_v32  ;;  %13486 = vst [vmem:[#allocation81_spill] sm:$0xff] %v10759_v36  ;;  %v10768_v24 = vadd.f32 %v4257_v11, %v10730_v53  ;;  %v10771_v46 = vadd.f32 %v4330_v51, %v10735_v27 }
 0xb46   :  { %13487 = vst [vmem:[#allocation199_spill] sm:$0xff] %v10762_v60  ;;  %13488 = vst [vmem:[#allocation80_spill] sm:$0xff] %v10765_v4 }
 0xb47   :  { %13489 = vst [vmem:[#allocation83_spill] sm:$0xff] %v10768_v24  ;;  %13490 = vst [vmem:[#allocation85_spill] sm:$0xff] %v10771_v46 }
 0xb49   :  { %v4261_v1 = vpop.f32.mrb[120].mxu0  ;;  %v4334_v32 = vpop.f32.mrb[120].mxu1 }
 0xb4a   :  { %v10774_v40 = vadd.f32 %v4261_v1, %v10716_v49  ;;  %v10777_v36 = vadd.f32 %v4334_v32, %v10721_v45  ;;  %v4263_v54 = vpop.f32.mrb[121].mxu0  ;;  %v4336_v60 = vpop.f32.mrb[121].mxu1 }
 0xb4b   :  { %v10780_v44 = vadd.f32 %v4263_v54, %v10730_v53  ;;  %v10783_v4 = vadd.f32 %v4336_v60, %v10735_v27  ;;  %v4265_v11 = vpop.f32.mrb[122].mxu0  ;;  %v4338_v24 = vpop.f32.mrb[122].mxu1 }
 0xb4c   :  { %13491 = vst [vmem:[#allocation82_spill] sm:$0xff] %v10774_v40  ;;  %13492 = vst [vmem:[#allocation84_spill] sm:$0xff] %v10777_v36  ;;  %v10786_v51 = vadd.f32 %v4265_v11, %v10716_v49  ;;  %v10789_v46 = vadd.f32 %v4338_v24, %v10721_v45  ;;  %v4267_v1 = vpop.f32.mrb[123].mxu0  ;;  %v4340_v40 = vpop.f32.mrb[123].mxu1 }
 0xb4d   :  { %13493 = vst [vmem:[#allocation87_spill] sm:$0xff] %v10780_v44  ;;  %13494 = vst [vmem:[#allocation89_spill] sm:$0xff] %v10783_v4  ;;  %v10792_v32 = vadd.f32 %v4267_v1, %v10730_v53  ;;  %v10795_v36 = vadd.f32 %v4340_v40, %v10735_v27 }
 0xb4e   :  { %13495 = vst [vmem:[#allocation86_spill] sm:$0xff] %v10786_v51  ;;  %13496 = vst [vmem:[#allocation88_spill] sm:$0xff] %v10789_v46 }
 0xb4f   :  { %13497 = vst [vmem:[#allocation167_spill] sm:$0xff] %v10792_v32  ;;  %13498 = vst [vmem:[#allocation168_spill] sm:$0xff] %v10795_v36 }
 0xb51   :  { %v4271_v54 = vpop.f32.mrb[124].mxu0  ;;  %v4344_v44 = vpop.f32.mrb[124].mxu1 }
 0xb52   :  { %v10798_v60 = vadd.f32 %v4271_v54, %v10716_v49  ;;  %v10801_v4 = vadd.f32 %v4344_v44, %v10721_v45  ;;  %v4273_v11 = vpop.f32.mrb[125].mxu0  ;;  %v4346_v51 = vpop.f32.mrb[125].mxu1 }
 0xb53   :  { %v10804_v24 = vadd.f32 %v4273_v11, %v10730_v53  ;;  %v10807_v46 = vadd.f32 %v4346_v51, %v10735_v27  ;;  %v4275_v1 = vpop.f32.mrb[126].mxu0  ;;  %v4348_v32 = vpop.f32.mrb[126].mxu1  ;;  %v13507_v11 = vsub.s32 0, %v13474_v8 }
 0xb54   :  { %13499 = vst [vmem:[#allocation169_spill] sm:$0xff] %v10798_v60  ;;  %13500 = vst [vmem:[#allocation170_spill] sm:$0xff] %v10801_v4  ;;  %v10810_v40 = vadd.f32 %v4275_v1, %v10716_v49  ;;  %v10813_v36 = vadd.f32 %v4348_v32, %v10721_v45  ;;  %v4277_v54 = vpop.f32.mrb[127].mxu0  ;;  %v4350_v60 = vpop.f32.mrb[127].mxu1  ;;  %v13511_v32 = vsub.s32 1, %v13474_v8 }
 0xb55   :  { %13501 = vst [vmem:[#allocation195_spill] sm:$0xff] %v10804_v24  ;;  %13502 = vst [vmem:[#allocation196_spill] sm:$0xff] %v10807_v46  ;;  %v10816_v44 = vadd.f32 %v4277_v54, %v10730_v53  ;;  %v10819_v4 = vadd.f32 %v4350_v60, %v10735_v27  ;;  %v10824_v51 = vrot.slane %v10707_v26, %v13507_v11  ;;  %v13509_v46 = vsub.s32 2, %v13474_v8  ;;  %v13514_v11 = vld [vmem:[#allocation106_spill] sm:$0xff]  ;;  %v13515_v24 = vld [vmem:[#allocation107_spill] sm:$0xff] }
 0xb56   :  { %13503 = vst [vmem:[#allocation197_spill] sm:$0xff] %v10810_v40  ;;  %13504 = vst [vmem:[#allocation198_spill] sm:$0xff] %v10813_v36  ;;  %v10834_v36 = vrot.slane %v10707_v26, %v13511_v32  ;;  %v13512_v54 = vsub.s32 3, %v13474_v8 }
 0xb57   :  { %13505 = vst [vmem:[#allocation142_spill] sm:$0xff] %v10816_v44  ;;  %13506 = vst [vmem:[#allocation201_spill] sm:$0xff] %v10819_v4  ;;  %v10829_v1 = vrot.slane %v10707_v26, %v13509_v46  ;;  %v13513_v4 = vld [vmem:[#allocation105_spill] sm:$0xff] }
 0xb58   :  { %13508 = vst [vmem:[#allocation202_spill] sm:$0xff] %v10824_v51  ;;  %v10839_v60 = vrot.slane %v10707_v26, %v13512_v54  ;;  %v4096_v44 = vadd.f32 %v13513_v4, %v10824_v51  ;;  %v4098_v46 = vadd.f32 %v13515_v24, %v10834_v36 }
 0xb59   :  { %13510 = vst [vmem:[#allocation203_spill] sm:$0xff] %v10829_v1  ;;  %v4169_v40 = vadd.f32 %v13514_v11, %v10829_v1 }
 0xb5a   :  { %v4171_v10 = vadd.f32 %v13516_v41, %v10839_v60 }
 0xb79   :  { %v5227_v31 = vpop.f32.mrb[128].mxu0  ;;  %v5268_v32 = vpop.f32.mrb[128].mxu1 }
 0xb7a   :  { %v5357_v55 = vadd.f32 %v5227_v31, %v4096_v44  ;;  %v5359_v9 = vadd.f32 %v5268_v32, %v4169_v40  ;;  %v5229_v8 = vpop.f32.mrb[129].mxu0  ;;  %v5270_v48 = vpop.f32.mrb[129].mxu1 }
 0xb7b   :  { %v5358_v26 = vadd.f32 %v5229_v8, %v4098_v46  ;;  %v5360_v54 = vadd.f32 %v5270_v48, %v4171_v10  ;;  %v5231_v28 = vpop.f32.mrb[130].mxu0  ;;  %v5272_v5 = vpop.f32.mrb[130].mxu1 }
 0xb7c   :  { %v5232_v4 = vpop.f32.mrb[131].mxu0  ;;  %v5273_v51 = vpop.f32.mrb[131].mxu1  ;;  %v7519_v59 = vmul.f32 -1.442695, %v5357_v55  ;;  %v7521_v11 = vmul.f32 -1.442695, %v5359_v9  ;;  %v4242_v5 = vadd.f32 %v10709_v38, %v10716_v49  ;;  %v4315_v28 = vadd.f32 %v10711_v20, %v10721_v45 }
 0xb7d   :  { %v7520_v1 = vmul.f32 -1.442695, %v5358_v26  ;;  %v7522_v62 = vmul.f32 -1.442695, %v5360_v54 }
 0xb7e   :  { %7842 = vpow2.f32 %v7519_v59  ;;  %v4244_v59 = vadd.f32 %v10723_v50, %v10730_v53 }
 0xb7f   :  { %7844 = vpow2.f32 %v7521_v11 }
 0xb80   :  { %7846 = vpow2.f32 %v7520_v1 }
 0xb81   :  { %7848 = vpow2.f32 %v7522_v62  ;;  %v4317_v62 = vadd.f32 %v10725_v15, %v10735_v27 }
 0xb88   :  { %v7843_v41 = vpop.eup %7842 }
 0xb89   :  { %v7845_v24 = vpop.eup %7844  ;;  %v5383_v44 = vadd.f32 1.0, %v7843_v41 }
 0xb8a   :  { %v7847_v31 = vpop.eup %7846  ;;  %v5385_v32 = vadd.f32 1.0, %v7845_v24 }
 0xb8b   :  { %v7849_v40 = vpop.eup %7848  ;;  %v5384_v46 = vadd.f32 1.0, %v7847_v31  ;;  %7850 = vrcp.f32 %v5383_v44 }
 0xb8c   :  { %v5386_v48 = vadd.f32 1.0, %v7849_v40  ;;  %7852 = vrcp.f32 %v5385_v32 }
 0xb8d   :  { %7854 = vrcp.f32 %v5384_v46 }
 0xb8e   :  { %7856 = vrcp.f32 %v5386_v48 }
 0xb95   :  { %v7851_v27 = vpop.eup %7850 }
 0xb96   :  { %v7853_v15 = vpop.eup %7852 }
 0xb97   :  { %v7855_v4 = vpop.eup %7854  ;;  %v5403_v31 = vmul.f32 0.0, %v7853_v15  ;;  %v13524_v15 = vld [vmem:[#allocation40_spill] sm:$0xff] }
 0xb98   :  { %v7857_v11 = vpop.eup %7856 }
 0xb99   :  { %v5404_v32 = vmul.f32 0.0, %v7857_v11  ;;  %v13526_v11 = vld [vmem:[#allocation42_spill] sm:$0xff] }
 0xbb9   :  { %v5309_v9 = vpop.f32.mrb[132].mxu0  ;;  %v5350_v55 = vpop.f32.mrb[132].mxu1 }
 0xbba   :  { %v5361_v10 = vadd.f32 %v5309_v9, %v4242_v5  ;;  %v5363_v51 = vadd.f32 %v5350_v55, %v4315_v28  ;;  %v5311_v1 = vpop.f32.mrb[133].mxu0  ;;  %v5352_v8 = vpop.f32.mrb[133].mxu1 }
 0xbbb   :  { %v5362_v38 = vadd.f32 %v5311_v1, %v4244_v59  ;;  %v5364_v49 = vadd.f32 %v5352_v8, %v4317_v62  ;;  %v5313_v26 = vpop.f32.mrb[134].mxu0  ;;  %v5354_v20 = vpop.f32.mrb[134].mxu1 }
 0xbbc   :  { %v7523_v45 = vmul.f32 -1.442695, %v5361_v10  ;;  %7858 = vtanh.f32 %v5363_v51  ;;  %v5314_v54 = vpop.f32.mrb[135].mxu0  ;;  %v5355_v53 = vpop.f32.mrb[135].mxu1  ;;  %v13517_v26 = vld [vmem:[#allocation33_spill] sm:$0xff]  ;;  %v13518_v20 = vld [vmem:[#allocation34_spill] sm:$0xff] }
 0xbbd   :  { %v7524_v50 = vmul.f32 -1.442695, %v5362_v38  ;;  %7860 = vtanh.f32 %v5364_v49  ;;  %v13520_v54 = vld [vmem:[#allocation36_spill] sm:$0xff]  ;;  %v13521_v53 = vld [vmem:[#allocation37_spill] sm:$0xff] }
 0xbbe   :  { %7862 = vpow2.f32 %v7523_v45  ;;  %v13519_v45 = vld [vmem:[#allocation35_spill] sm:$0xff] }
 0xbbf   :  { %7864 = vpow2.f32 %v7524_v50  ;;  %v13522_v50 = vld [vmem:[#allocation38_spill] sm:$0xff] }
 0xbc6   :  { %v7859_v41 = vpop.eup %7858 }
 0xbc7   :  { %v7861_v24 = vpop.eup %7860  ;;  %v5405_v40 = vmul.f32 %v7859_v41, %v7851_v27  ;;  %v13523_v27 = vld [vmem:[#allocation39_spill] sm:$0xff] }
 0xbc8   :  { %v7863_v44 = vpop.eup %7862  ;;  %v5406_v46 = vmul.f32 %v7861_v24, %v7855_v4  ;;  %v13525_v4 = vld [vmem:[#allocation41_spill] sm:$0xff]  ;;  %v13527_v41 = vld [vmem:[#allocation43_spill] sm:$0xff]  ;;  %v13528_v24 = vld [vmem:[#allocation44_spill] sm:$0xff] }
 0xbc9   :  { %v7865_v48 = vpop.eup %7864  ;;  %v5387_v5 = vadd.f32 1.0, %v7863_v44  ;;  %v10857_v28 = vadd.f32 %v5405_v40, %v5403_v31  ;;  %v13529_v31 = vld [vmem:[#allocation45_spill] sm:$0xff]  ;;  %v13530_v40 = vld [vmem:[#allocation46_spill] sm:$0xff]  ;;  %v13531_v44 = vld [vmem:[#allocation47_spill] sm:$0xff] }
 0xbca   :  { %v5388_v59 = vadd.f32 1.0, %v7865_v48  ;;  %v10859_v62 = vadd.f32 %v5406_v46, %v5404_v32  ;;  %v13532_v32 = vld [vmem:[#allocation48_spill] sm:$0xff]  ;;  %v13533_v46 = vld [vmem:[#allocation49_spill] sm:$0xff]  ;;  %v13534_v48 = vld [vmem:[#allocation50_spill] sm:$0xff] }
 0xbcb   :  { %7866 = vrcp.f32 %v5387_v5  ;;  %v13535_v5 = vld [vmem:[#allocation51_spill] sm:$0xff] }
 0xbcc   :  { %7868 = vtanh.f32 %v10857_v28 }
 0xbcd   :  { %7870 = vrcp.f32 %v5388_v59  ;;  %v13536_v59 = vld [vmem:[#allocation52_spill] sm:$0xff] }
 0xbce   :  { %7872 = vtanh.f32 %v10859_v62 }
 0xbd5   :  { %v7867_v9 = vpop.eup %7866 }
 0xbd6   :  { %v7869_v55 = vpop.eup %7868 }
 0xbd7   :  { %v7871_v10 = vpop.eup %7870  ;;  %v5411_v1 = vmul.f32 %v7869_v55, %v7867_v9  ;;  %v13537_v9 = vld [vmem:[#allocation53_spill] sm:$0xff]  ;;  %v13538_v55 = vld [vmem:[#allocation54_spill] sm:$0xff] }
 0xbd8   :  { %v7873_v51 = vpop.eup %7872 }
 0xbd9   :  { %v5412_v8 = vmul.f32 %v7873_v51, %v7871_v10  ;;  %v10863_v49 = vpack.c.bf16 %v5411_v1, %v5411_v1  ;;  %v13539_v10 = vld [vmem:[#allocation55_spill] sm:$0xff]  ;;  %v13540_v51 = vld [vmem:[#allocation56_spill] sm:$0xff]  ;;  %v13541_v1 = vld [vmem:[#allocation57_spill] sm:$0xff] }
 0xbdb   :  { %v5422_v38 = vpack.c.bf16 %v5412_v8, %v5412_v8  ;;  %v13542_v8 = vld [vmem:[#allocation58_spill] sm:$0xff] }
 0xbdd   :  { %5455 = vmatprep.mubr.bf16.mxu0 %v5422_v38  ;;  %5496 = vmatprep.mubr.bf16.mxu1 %v5422_v38 }
 0xbde   :  { %5456 = vmatmul.mubr.bf16.vlgmr.msra.gmra.mrb[136].mxu0 %v10863_v49  ;;  %5497 = vmatmul.mubr.bf16.vlgmr.msra.gmra.mrb[136].mxu1 %v10863_v49 }
 0xbdf   :  { %5506 = vmatpush1.bf16.msra.mxu0 %v13517_v26  ;;  %5547 = vmatpush1.bf16.msra.mxu1 %v13518_v20 }
 0xbe0   :  { %5537 = vmatprep.mubr.bf16.mxu0 %v5422_v38  ;;  %5578 = vmatprep.mubr.bf16.mxu1 %v5422_v38  ;;  %v13543_v38 = vld [vmem:[#allocation59_spill] sm:$0xff] }
 0xbe1   :  { %5507 = vmatprep.subr.bf16.mxu0 %v13519_v45  ;;  %5548 = vmatprep.subr.bf16.mxu1 %v13520_v54 }
 0xbe3   :  { %5508 = vmatpush1.bf16.msra.mxu0 %v13521_v53  ;;  %5549 = vmatpush1.bf16.msra.mxu1 %v13522_v50 }
 0xbe4   :  { %5509 = vmatprep.subr.bf16.mxu0 %v13523_v27  ;;  %5550 = vmatprep.subr.bf16.mxu1 %v13524_v15 }
 0xbe7   :  { %5510 = vmatpush1.bf16.msra.mxu0 %v13525_v4  ;;  %5551 = vmatpush1.bf16.msra.mxu1 %v13526_v11 }
 0xbe8   :  { %5511 = vmatprep.subr.bf16.mxu0 %v13527_v41  ;;  %5552 = vmatprep.subr.bf16.mxu1 %v13528_v24 }
 0xbeb   :  { %5512 = vmatpush1.bf16.msra.mxu0 %v13529_v31  ;;  %5553 = vmatpush1.bf16.msra.mxu1 %v13530_v40 }
 0xbec   :  { %5513 = vmatprep.subr.bf16.mxu0 %v13531_v44  ;;  %5554 = vmatprep.subr.bf16.mxu1 %v13532_v32 }
 0xbef   :  { %5514 = vmatpush1.bf16.msra.mxu0 %v13533_v46  ;;  %5555 = vmatpush1.bf16.msra.mxu1 %v13534_v48  ;;  %v13544_v46 = vld [vmem:[#allocation60_spill] sm:$0xff]  ;;  %v13545_v48 = vld [vmem:[#allocation61_spill] sm:$0xff] }
 0xbf0   :  { %5515 = vmatprep.subr.bf16.mxu0 %v13535_v5  ;;  %5556 = vmatprep.subr.bf16.mxu1 %v13536_v59  ;;  %v13546_v5 = vld [vmem:[#allocation62_spill] sm:$0xff]  ;;  %v13547_v59 = vld [vmem:[#allocation63_spill] sm:$0xff] }
 0xbf3   :  { %5516 = vmatpush1.bf16.msra.mxu0 %v13537_v9  ;;  %5557 = vmatpush1.bf16.msra.mxu1 %v13538_v55  ;;  %v13548_v9 = vld [vmem:[#allocation64_spill] sm:$0xff]  ;;  %v13549_v55 = vld [vmem:[#allocation65_spill] sm:$0xff] }
 0xbf4   :  { %5517 = vmatprep.subr.bf16.mxu0 %v13539_v10  ;;  %5558 = vmatprep.subr.bf16.mxu1 %v13540_v51  ;;  %v13550_v10 = vld [vmem:[#allocation66_spill] sm:$0xff]  ;;  %v13551_v51 = vld [vmem:[#allocation67_spill] sm:$0xff] }
 0xbf7   :  { %5518 = vmatpush1.bf16.msra.mxu0 %v13541_v1  ;;  %5559 = vmatpush1.bf16.msra.mxu1 %v13542_v8  ;;  %v13552_v1 = vld [vmem:[#allocation68_spill] sm:$0xff]  ;;  %v13553_v8 = vld [vmem:[#allocation69_spill] sm:$0xff] }
 0xbf8   :  { %5519 = vmatprep.subr.bf16.mxu0 %v13543_v38  ;;  %5560 = vmatprep.subr.bf16.mxu1 %v13544_v46  ;;  %v13554_v38 = vld [vmem:[#allocation70_spill] sm:$0xff]  ;;  %v13555_v46 = vld [vmem:[#allocation71_spill] sm:$0xff] }
 0xbfb   :  { %5520 = vmatpush1.bf16.msra.mxu0 %v13545_v48  ;;  %5561 = vmatpush1.bf16.msra.mxu1 %v13546_v5  ;;  %v13556_v48 = vld [vmem:[#allocation72_spill] sm:$0xff]  ;;  %v13557_v5 = vld [vmem:[#allocation73_spill] sm:$0xff] }
 0xbfc   :  { %5521 = vmatprep.subr.bf16.mxu0 %v13547_v59  ;;  %5562 = vmatprep.subr.bf16.mxu1 %v13548_v9  ;;  %v13558_v59 = vld [vmem:[#allocation74_spill] sm:$0xff]  ;;  %v13559_v9 = vld [vmem:[#allocation75_spill] sm:$0xff] }
 0xbff   :  { %5522 = vmatpush1.bf16.msra.mxu0 %v13549_v55  ;;  %5563 = vmatpush1.bf16.msra.mxu1 %v13550_v10  ;;  %v13560_v55 = vld [vmem:[#allocation76_spill] sm:$0xff]  ;;  %v13561_v10 = vld [vmem:[#allocation77_spill] sm:$0xff] }
 0xc00   :  { %5523 = vmatprep.subr.bf16.mxu0 %v13551_v51  ;;  %5564 = vmatprep.subr.bf16.mxu1 %v13552_v1  ;;  %v13562_v51 = vld [vmem:[#allocation78_spill] sm:$0xff]  ;;  %v13563_v1 = vld [vmem:[#allocation79_spill] sm:$0xff] }
 0xc03   :  { %5524 = vmatpush1.bf16.msra.mxu0 %v13553_v8  ;;  %5565 = vmatpush1.bf16.msra.mxu1 %v13554_v38  ;;  %v13564_v8 = vld [vmem:[#allocation163_spill] sm:$0xff] }
 0xc04   :  { %5525 = vmatprep.subr.bf16.mxu0 %v13555_v46  ;;  %5566 = vmatprep.subr.bf16.mxu1 %v13556_v48 }
 0xc07   :  { %5526 = vmatpush1.bf16.msra.mxu0 %v13557_v5  ;;  %5567 = vmatpush1.bf16.msra.mxu1 %v13558_v59  ;;  %v13565_v5 = vld [vmem:[#allocation191_spill] sm:$0xff]  ;;  %v13566_v59 = vld [vmem:[#allocation192_spill] sm:$0xff] }
 0xc08   :  { %5527 = vmatprep.subr.bf16.mxu0 %v13559_v9  ;;  %5568 = vmatprep.subr.bf16.mxu1 %v13560_v55 }
 0xc0b   :  { %5528 = vmatpush1.bf16.msra.mxu0 %v13561_v10  ;;  %5569 = vmatpush1.bf16.msra.mxu1 %v13562_v51 }
 0xc0c   :  { %5529 = vmatprep.subr.bf16.mxu0 %v13563_v1  ;;  %5570 = vmatprep.subr.bf16.mxu1 %v13564_v8 }
 0xc0f   :  { %5530 = vmatpush1.bf16.msra.mxu0 %v10576_v18  ;;  %5571 = vmatpush1.bf16.msra.mxu1 %v10578_v16 }
 0xc10   :  { %5531 = vmatprep.subr.bf16.mxu0 %v10582_v47  ;;  %5572 = vmatprep.subr.bf16.mxu1 %v13565_v5 }
 0xc13   :  { %5532 = vmatpush1.bf16.msra.mxu0 %v13566_v59  ;;  %5573 = vmatpush1.bf16.msra.mxu1 %v10590_v34 }
 0xc14   :  { %5533 = vmatprep.subr.bf16.mxu0 %v10594_v56  ;;  %5574 = vmatprep.subr.bf16.mxu1 %v10596_v13 }
 0xc17   :  { %5534 = vmatpush1.bf16.msra.mxu0 %v10600_v23  ;;  %5575 = vmatpush1.bf16.msra.mxu1 %v10602_v2 }
 0xc18   :  { %5535 = vmatprep.subr.bf16.mxu0 %v10606_v63  ;;  %5576 = vmatprep.subr.bf16.mxu1 %v10608_v14 }
 0xc1b   :  { %5536 = vmatpush1.bf16.msra.mxu0 %v10612_v33  ;;  %5577 = vmatpush1.bf16.msra.mxu1 %v10614_v57 }
 0xc1c   :  { %5653 = vmatprep.subr.bf16.mxu0 %v10146_v19  ;;  %5694 = vmatprep.subr.bf16.mxu1 %v10148_v61 }
 0xc1e   :  { %5538 = vmatmul.mubr.bf16.vlgmr.msra.gmra.mrb[140].mxu0 %v10863_v49  ;;  %5579 = vmatmul.mubr.bf16.vlgmr.msra.gmra.mrb[140].mxu1 %v10863_v49  ;;  %v13567_v49 = vld [vmem:[#allocation99_spill] sm:$0xff] }
 0xc1f   :  { %5654 = vmatpush1.bf16.msra.mxu0 %v10150_v7  ;;  %5695 = vmatpush1.bf16.msra.mxu1 %v10153_v37 }
 0xc20   :  { %5655 = vmatprep.subr.bf16.mxu0 %v10178_v22  ;;  %5696 = vmatprep.subr.bf16.mxu1 %v10180_v35 }
 0xc23   :  { %5656 = vmatpush1.bf16.msra.mxu0 %v10186_v42  ;;  %5697 = vmatpush1.bf16.msra.mxu1 %v10188_v21 }
 0xc24   :  { %5657 = vmatprep.subr.bf16.mxu0 %v10192_v3  ;;  %5698 = vmatprep.subr.bf16.mxu1 %v10194_v6  ;;  %v13616_v3 = vld [vmem:[#allocation113_spill] sm:$0xff] }
 0xc27   :  { %5658 = vmatpush1.bf16.msra.mxu0 %v10200_v0  ;;  %5699 = vmatpush1.bf16.msra.mxu1 %v10202_v58  ;;  %v13568_v0 = vld [vmem:[#allocation100_spill] sm:$0xff]  ;;  %v13569_v58 = vld [vmem:[#allocation101_spill] sm:$0xff] }
 0xc28   :  { %5659 = vmatprep.subr.bf16.mxu0 %v10206_v39  ;;  %5700 = vmatprep.subr.bf16.mxu1 %v10208_v29  ;;  %v13570_v39 = vld [vmem:[#allocation102_spill] sm:$0xff]  ;;  %v13571_v29 = vld [vmem:[#allocation103_spill] sm:$0xff] }
 0xc2b   :  { %5660 = vmatpush1.bf16.msra.mxu0 %v10214_v52  ;;  %5701 = vmatpush1.bf16.msra.mxu1 %v10216_v25  ;;  %v13572_v52 = vld [vmem:[#allocation104_spill] sm:$0xff]  ;;  %v13573_v25 = vld [vmem:[#allocation111_spill] sm:$0xff] }
 0xc2c   :  { %5661 = vmatprep.subr.bf16.mxu0 %v10220_v43  ;;  %5702 = vmatprep.subr.bf16.mxu1 %v10222_v17  ;;  %v13574_v43 = vld [vmem:[#allocation112_spill] sm:$0xff]  ;;  %v13575_v17 = vld [vmem:[#allocation115_spill] sm:$0xff] }
 0xc2f   :  { %5662 = vmatpush1.bf16.msra.mxu0 %v10228_v30  ;;  %5703 = vmatpush1.bf16.msra.mxu1 %v10230_v12  ;;  %v13576_v30 = vld [vmem:[#allocation116_spill] sm:$0xff]  ;;  %v13577_v12 = vld [vmem:[#allocation147_spill] sm:$0xff] }
 0xc30   :  { %5663 = vmatprep.subr.bf16.mxu0 %v13567_v49  ;;  %5704 = vmatprep.subr.bf16.mxu1 %v13568_v0  ;;  %v13578_v49 = vld [vmem:[#allocation148_spill] sm:$0xff]  ;;  %v13579_v0 = vld [vmem:[#allocation149_spill] sm:$0xff] }
 0xc33   :  { %5664 = vmatpush1.bf16.msra.mxu0 %v13569_v58  ;;  %5705 = vmatpush1.bf16.msra.mxu1 %v13570_v39  ;;  %v13580_v58 = vld [vmem:[#allocation150_spill] sm:$0xff]  ;;  %v13581_v39 = vld [vmem:[#allocation151_spill] sm:$0xff] }
 0xc34   :  { %5665 = vmatprep.subr.bf16.mxu0 %v13571_v29  ;;  %5706 = vmatprep.subr.bf16.mxu1 %v13572_v52  ;;  %v13582_v29 = vld [vmem:[#allocation152_spill] sm:$0xff]  ;;  %v13583_v52 = vld [vmem:[#allocation179_spill] sm:$0xff] }
 0xc37   :  { %5666 = vmatpush1.bf16.msra.mxu0 %v13573_v25  ;;  %5707 = vmatpush1.bf16.msra.mxu1 %v13574_v43  ;;  %v13584_v25 = vld [vmem:[#allocation180_spill] sm:$0xff]  ;;  %v13585_v43 = vld [vmem:[#allocation182_spill] sm:$0xff] }
 0xc38   :  { %5667 = vmatprep.subr.bf16.mxu0 %v13575_v17  ;;  %5708 = vmatprep.subr.bf16.mxu1 %v13576_v30  ;;  %v13586_v17 = vld [vmem:[#allocation155_spill] sm:$0xff]  ;;  %v13587_v30 = vld [vmem:[#allocation156_spill] sm:$0xff] }
 0xc3b   :  { %5668 = vmatpush1.bf16.msra.mxu0 %v13577_v12  ;;  %5709 = vmatpush1.bf16.msra.mxu1 %v13578_v49  ;;  %v13588_v12 = vld [vmem:[#allocation157_spill] sm:$0xff]  ;;  %v13589_v49 = vld [vmem:[#allocation159_spill] sm:$0xff] }
 0xc3c   :  { %5669 = vmatprep.subr.bf16.mxu0 %v13579_v0  ;;  %5710 = vmatprep.subr.bf16.mxu1 %v13580_v58  ;;  %v13590_v0 = vld [vmem:[#allocation160_spill] sm:$0xff]  ;;  %v13591_v58 = vld [vmem:[#allocation187_spill] sm:$0xff] }
 0xc3f   :  { %5670 = vmatpush1.bf16.msra.mxu0 %v13581_v39  ;;  %5711 = vmatpush1.bf16.msra.mxu1 %v13582_v29  ;;  %v13592_v39 = vld [vmem:[#allocation188_spill] sm:$0xff]  ;;  %v13593_v29 = vld [vmem:[#allocation190_spill] sm:$0xff] }
 0xc40   :  { %5671 = vmatprep.subr.bf16.mxu0 %v13583_v52  ;;  %5712 = vmatprep.subr.bf16.mxu1 %v13584_v25  ;;  %v13594_v52 = vld [vmem:[#allocation14_spill] sm:$0xff]  ;;  %v13595_v25 = vld [vmem:[#allocation15_spill] sm:$0xff] }
 0xc43   :  { %5672 = vmatpush1.bf16.msra.mxu0 %v13585_v43  ;;  %5713 = vmatpush1.bf16.msra.mxu1 %v13586_v17  ;;  %v13596_v43 = vld [vmem:[#allocation16_spill] sm:$0xff]  ;;  %v13597_v17 = vld [vmem:[#allocation17_spill] sm:$0xff] }
 0xc44   :  { %5673 = vmatprep.subr.bf16.mxu0 %v13587_v30  ;;  %5714 = vmatprep.subr.bf16.mxu1 %v13588_v12  ;;  %v13598_v30 = vld [vmem:[#allocation18_spill] sm:$0xff]  ;;  %v13599_v12 = vld [vmem:[#allocation19_spill] sm:$0xff] }
 0xc47   :  { %5674 = vmatpush1.bf16.msra.mxu0 %v13589_v49  ;;  %5715 = vmatpush1.bf16.msra.mxu1 %v13590_v0  ;;  %v13600_v49 = vld [vmem:[#allocation20_spill] sm:$0xff]  ;;  %v13601_v0 = vld [vmem:[#allocation21_spill] sm:$0xff] }
 0xc48   :  { %5675 = vmatprep.subr.bf16.mxu0 %v13591_v58  ;;  %5716 = vmatprep.subr.bf16.mxu1 %v13592_v39  ;;  %v13602_v58 = vld [vmem:[#allocation22_spill] sm:$0xff]  ;;  %v13603_v39 = vld [vmem:[#allocation23_spill] sm:$0xff] }
 0xc4b   :  { %5676 = vmatpush1.bf16.msra.mxu0 %v13593_v29  ;;  %5717 = vmatpush1.bf16.msra.mxu1 %v13594_v52  ;;  %v13604_v29 = vld [vmem:[#allocation24_spill] sm:$0xff]  ;;  %v13605_v52 = vld [vmem:[#allocation25_spill] sm:$0xff] }
 0xc4c   :  { %5677 = vmatprep.subr.bf16.mxu0 %v13595_v25  ;;  %5718 = vmatprep.subr.bf16.mxu1 %v13596_v43  ;;  %v13606_v25 = vld [vmem:[#allocation26_spill] sm:$0xff]  ;;  %v13607_v43 = vld [vmem:[#allocation27_spill] sm:$0xff] }
 0xc4f   :  { %5678 = vmatpush1.bf16.msra.mxu0 %v13597_v17  ;;  %5719 = vmatpush1.bf16.msra.mxu1 %v13598_v30  ;;  %v13608_v17 = vld [vmem:[#allocation28_spill] sm:$0xff]  ;;  %v13609_v30 = vld [vmem:[#allocation29_spill] sm:$0xff] }
 0xc50   :  { %5679 = vmatprep.subr.bf16.mxu0 %v13599_v12  ;;  %5720 = vmatprep.subr.bf16.mxu1 %v13600_v49  ;;  %v13610_v12 = vld [vmem:[#allocation30_spill] sm:$0xff]  ;;  %v13611_v49 = vld [vmem:[#allocation31_spill] sm:$0xff] }
 0xc53   :  { %5680 = vmatpush1.bf16.msra.mxu0 %v13601_v0  ;;  %5721 = vmatpush1.bf16.msra.mxu1 %v13602_v58  ;;  %v13612_v0 = vld [vmem:[#allocation32_spill] sm:$0xff]  ;;  %v13613_v58 = vld [vmem:[#allocation202_spill] sm:$0xff] }
 0xc54   :  { %5681 = vmatprep.subr.bf16.mxu0 %v13603_v39  ;;  %5722 = vmatprep.subr.bf16.mxu1 %v13604_v29  ;;  %v13614_v39 = vld [vmem:[#allocation109_spill] sm:$0xff]  ;;  %v13615_v29 = vld [vmem:[#allocation203_spill] sm:$0xff] }
 0xc55   :  { %v4100_v6 = vadd.f32 %v13614_v39, %v13613_v58 }
 0xc57   :  { %5682 = vmatpush1.bf16.msra.mxu0 %v13605_v52  ;;  %5723 = vmatpush1.bf16.msra.mxu1 %v13606_v25  ;;  %v4173_v52 = vadd.f32 %v13616_v3, %v13615_v29  ;;  %v13617_v25 = vld [vmem:[#allocation114_spill] sm:$0xff] }
 0xc58   :  { %5683 = vmatprep.subr.bf16.mxu0 %v13607_v43  ;;  %5724 = vmatprep.subr.bf16.mxu1 %v13608_v17  ;;  %v4102_v21 = vadd.f32 %v13617_v25, %v10834_v36  ;;  %v13618_v43 = vld [vmem:[#allocation120_spill] sm:$0xff] }
 0xc59   :  { %v4175_v17 = vadd.f32 %v13618_v43, %v10839_v60 }
 0xc5b   :  { %5684 = vmatpush1.bf16.msra.mxu0 %v13609_v30  ;;  %5725 = vmatpush1.bf16.msra.mxu1 %v13610_v12 }
 0xc5c   :  { %5735 = vmatprep.subr.bf16.mxu0 %v13611_v49  ;;  %5776 = vmatprep.subr.bf16.mxu1 %v13612_v0 }
 0xcb1   :  { %v5457_v42 = vpop.f32.mrb[136].mxu0  ;;  %v5498_v30 = vpop.f32.mrb[136].mxu1 }
 0xcb2   :  { %v5587_v35 = vadd.f32 %v5457_v42, %v4100_v6  ;;  %v5589_v12 = vadd.f32 %v5498_v30, %v4173_v52  ;;  %v5459_v22 = vpop.f32.mrb[137].mxu0  ;;  %v5500_v49 = vpop.f32.mrb[137].mxu1 }
 0xcb3   :  { %v5588_v37 = vadd.f32 %v5459_v22, %v4102_v21  ;;  %v5590_v0 = vadd.f32 %v5500_v49, %v4175_v17  ;;  %v5461_v7 = vpop.f32.mrb[138].mxu0  ;;  %v5502_v61 = vpop.f32.mrb[138].mxu1  ;;  %v13621_v17 = vld [vmem:[#allocation138_spill] sm:$0xff] }
 0xcb4   :  { %v5462_v39 = vpop.f32.mrb[139].mxu0  ;;  %v5503_v58 = vpop.f32.mrb[139].mxu1  ;;  %v7525_v19 = vmul.f32 -1.442695, %v5587_v35  ;;  %v7527_v3 = vmul.f32 -1.442695, %v5589_v12 }
 0xcb5   :  { %v7526_v29 = vmul.f32 -1.442695, %v5588_v37  ;;  %v7528_v57 = vmul.f32 -1.442695, %v5590_v0  ;;  %v13619_v35 = vld [vmem:[#allocation136_spill] sm:$0xff]  ;;  %v13620_v0 = vld [vmem:[#allocation137_spill] sm:$0xff] }
 0xcb6   :  { %7874 = vpow2.f32 %v7525_v19 }
 0xcb7   :  { %7876 = vpow2.f32 %v7527_v3 }
 0xcb8   :  { %7878 = vpow2.f32 %v7526_v29 }
 0xcb9   :  { %7880 = vpow2.f32 %v7528_v57  ;;  %v13622_v57 = vld [vmem:[#allocation139_spill] sm:$0xff] }
 0xcc0   :  { %v7875_v25 = vpop.eup %7874 }
 0xcc1   :  { %v7877_v43 = vpop.eup %7876  ;;  %v5613_v52 = vadd.f32 1.0, %v7875_v25 }
 0xcc2   :  { %v7879_v42 = vpop.eup %7878  ;;  %v5615_v30 = vadd.f32 1.0, %v7877_v43 }
 0xcc3   :  { %v7881_v6 = vpop.eup %7880  ;;  %v5614_v22 = vadd.f32 1.0, %v7879_v42  ;;  %7882 = vrcp.f32 %v5613_v52 }
 0xcc4   :  { %v5616_v21 = vadd.f32 1.0, %v7881_v6  ;;  %7884 = vrcp.f32 %v5615_v30 }
 0xcc5   :  { %7886 = vrcp.f32 %v5614_v22 }
 0xcc6   :  { %7888 = vrcp.f32 %v5616_v21 }
 0xccd   :  { %v7883_v52 = vpop.eup %7882 }
 0xcce   :  { %v7885_v30 = vpop.eup %7884 }
 0xccf   :  { %v7887_v22 = vpop.eup %7886 }
 0xcf1   :  { %v5539_v61 = vpop.f32.mrb[140].mxu0  ;;  %v5580_v7 = vpop.f32.mrb[140].mxu1 }
 0xcf2   :  { %v5591_v37 = vadd.f32 %v5539_v61, %v13619_v35  ;;  %v5593_v19 = vadd.f32 %v5580_v7, %v13620_v0  ;;  %v5541_v58 = vpop.f32.mrb[141].mxu0  ;;  %v5582_v29 = vpop.f32.mrb[141].mxu1  ;;  %v5633_v35 = vmul.f32 %v7885_v30, %v10857_v28  ;;  %v13624_v30 = vld [vmem:[#allocation50_spill] sm:$0xff] }
 0xcf3   :  { %v5592_v12 = vadd.f32 %v5541_v58, %v13621_v17  ;;  %v5594_v49 = vadd.f32 %v5582_v29, %v13622_v57  ;;  %v5543_v39 = vpop.f32.mrb[142].mxu0  ;;  %v5584_v3 = vpop.f32.mrb[142].mxu1 }
 0xcf4   :  { %v7529_v25 = vmul.f32 -1.442695, %v5591_v37  ;;  %7890 = vtanh.f32 %v5593_v19  ;;  %v5544_v43 = vpop.f32.mrb[143].mxu0  ;;  %v5585_v42 = vpop.f32.mrb[143].mxu1 }
 0xcf5   :  { %v7530_v6 = vmul.f32 -1.442695, %v5592_v12  ;;  %7892 = vtanh.f32 %v5594_v49  ;;  %v7889_v61 = vpop.eup %7888 }
 0xcf6   :  { %7894 = vpow2.f32 %v7529_v25  ;;  %v5634_v29 = vmul.f32 %v7889_v61, %v10859_v62  ;;  %v13626_v61 = vld [vmem:[#allocation52_spill] sm:$0xff] }
 0xcf7   :  { %7896 = vpow2.f32 %v7530_v6 }
 0xcfe   :  { %v7891_v7 = vpop.eup %7890 }
 0xcff   :  { %v7893_v21 = vpop.eup %7892  ;;  %v5635_v0 = vmul.f32 %v7891_v7, %v7883_v52  ;;  %v13623_v52 = vld [vmem:[#allocation49_spill] sm:$0xff] }
 0xd00   :  { %v7895_v58 = vpop.eup %7894  ;;  %v5636_v37 = vmul.f32 %v7893_v21, %v7887_v22  ;;  %v13625_v22 = vld [vmem:[#allocation51_spill] sm:$0xff]  ;;  %v13627_v7 = vld [vmem:[#allocation53_spill] sm:$0xff]  ;;  %v13628_v21 = vld [vmem:[#allocation54_spill] sm:$0xff] }
 0xd01   :  { %v7897_v19 = vpop.eup %7896  ;;  %v5617_v17 = vadd.f32 1.0, %v7895_v58  ;;  %v11011_v57 = vadd.f32 %v5635_v0, %v5633_v35  ;;  %v13629_v35 = vld [vmem:[#allocation55_spill] sm:$0xff]  ;;  %v13630_v0 = vld [vmem:[#allocation56_spill] sm:$0xff]  ;;  %v13631_v58 = vld [vmem:[#allocation57_spill] sm:$0xff] }
 0xd02   :  { %v5618_v12 = vadd.f32 1.0, %v7897_v19  ;;  %v11013_v49 = vadd.f32 %v5636_v37, %v5634_v29  ;;  %v13632_v29 = vld [vmem:[#allocation58_spill] sm:$0xff]  ;;  %v13633_v37 = vld [vmem:[#allocation59_spill] sm:$0xff]  ;;  %v13634_v19 = vld [vmem:[#allocation60_spill] sm:$0xff] }
 0xd03   :  { %7898 = vrcp.f32 %v5617_v17  ;;  %v13635_v17 = vld [vmem:[#allocation61_spill] sm:$0xff] }
 0xd04   :  { %7900 = vtanh.f32 %v11011_v57 }
 0xd05   :  { %7902 = vrcp.f32 %v5618_v12  ;;  %v13636_v12 = vld [vmem:[#allocation62_spill] sm:$0xff] }
 0xd06   :  { %7904 = vtanh.f32 %v11013_v49 }
 0xd0d   :  { %v7899_v39 = vpop.eup %7898 }
 0xd0e   :  { %v7901_v28 = vpop.eup %7900 }
 0xd0f   :  { %v7903_v3 = vpop.eup %7902  ;;  %v5641_v43 = vmul.f32 %v7901_v28, %v7899_v39  ;;  %v13637_v39 = vld [vmem:[#allocation63_spill] sm:$0xff]  ;;  %v13638_v28 = vld [vmem:[#allocation64_spill] sm:$0xff] }
 0xd10   :  { %v7905_v25 = vpop.eup %7904 }
 0xd11   :  { %v5642_v62 = vmul.f32 %v7905_v25, %v7903_v3  ;;  %v11017_v6 = vpack.c.bf16 %v5641_v43, %v5641_v43  ;;  %v13639_v3 = vld [vmem:[#allocation65_spill] sm:$0xff]  ;;  %v13640_v25 = vld [vmem:[#allocation66_spill] sm:$0xff]  ;;  %v13641_v43 = vld [vmem:[#allocation67_spill] sm:$0xff] }
 0xd13   :  { %v5652_v42 = vpack.c.bf16 %v5642_v62, %v5642_v62  ;;  %v13642_v62 = vld [vmem:[#allocation68_spill] sm:$0xff] }
 0xd15   :  { %5685 = vmatprep.mubr.bf16.mxu0 %v5652_v42  ;;  %5726 = vmatprep.mubr.bf16.mxu1 %v5652_v42 }
 0xd16   :  { %5686 = vmatmul.mubr.bf16.vlgmr.msra.gmra.mrb[144].mxu0 %v11017_v6  ;;  %5727 = vmatmul.mubr.bf16.vlgmr.msra.gmra.mrb[144].mxu1 %v11017_v6 }
 0xd17   :  { %5736 = vmatpush1.bf16.msra.mxu0 %v13517_v26  ;;  %5777 = vmatpush1.bf16.msra.mxu1 %v13518_v20 }
 0xd18   :  { %5767 = vmatprep.mubr.bf16.mxu0 %v5652_v42  ;;  %5808 = vmatprep.mubr.bf16.mxu1 %v5652_v42  ;;  %v13643_v42 = vld [vmem:[#allocation69_spill] sm:$0xff] }
 0xd19   :  { %5737 = vmatprep.subr.bf16.mxu0 %v13519_v45  ;;  %5778 = vmatprep.subr.bf16.mxu1 %v13520_v54 }
 0xd1b   :  { %5738 = vmatpush1.bf16.msra.mxu0 %v13521_v53  ;;  %5779 = vmatpush1.bf16.msra.mxu1 %v13522_v50 }
 0xd1c   :  { %5739 = vmatprep.subr.bf16.mxu0 %v13523_v27  ;;  %5780 = vmatprep.subr.bf16.mxu1 %v13524_v15 }
 0xd1f   :  { %5740 = vmatpush1.bf16.msra.mxu0 %v13525_v4  ;;  %5781 = vmatpush1.bf16.msra.mxu1 %v13526_v11 }
 0xd20   :  { %5741 = vmatprep.subr.bf16.mxu0 %v13527_v41  ;;  %5782 = vmatprep.subr.bf16.mxu1 %v13528_v24 }
 0xd23   :  { %5742 = vmatpush1.bf16.msra.mxu0 %v13529_v31  ;;  %5783 = vmatpush1.bf16.msra.mxu1 %v13530_v40 }
 0xd24   :  { %5743 = vmatprep.subr.bf16.mxu0 %v13531_v44  ;;  %5784 = vmatprep.subr.bf16.mxu1 %v13532_v32 }
 0xd27   :  { %5744 = vmatpush1.bf16.msra.mxu0 %v13623_v52  ;;  %5785 = vmatpush1.bf16.msra.mxu1 %v13624_v30 }
 0xd28   :  { %5745 = vmatprep.subr.bf16.mxu0 %v13625_v22  ;;  %5786 = vmatprep.subr.bf16.mxu1 %v13626_v61 }
 0xd2b   :  { %5746 = vmatpush1.bf16.msra.mxu0 %v13627_v7  ;;  %5787 = vmatpush1.bf16.msra.mxu1 %v13628_v21 }
 0xd2c   :  { %5747 = vmatprep.subr.bf16.mxu0 %v13629_v35  ;;  %5788 = vmatprep.subr.bf16.mxu1 %v13630_v0 }
 0xd2f   :  { %5748 = vmatpush1.bf16.msra.mxu0 %v13631_v58  ;;  %5789 = vmatpush1.bf16.msra.mxu1 %v13632_v29 }
 0xd30   :  { %5749 = vmatprep.subr.bf16.mxu0 %v13633_v37  ;;  %5790 = vmatprep.subr.bf16.mxu1 %v13634_v19 }
 0xd33   :  { %5750 = vmatpush1.bf16.msra.mxu0 %v13635_v17  ;;  %5791 = vmatpush1.bf16.msra.mxu1 %v13636_v12  ;;  %v13644_v12 = vld [vmem:[#allocation73_spill] sm:$0xff] }
 0xd34   :  { %5751 = vmatprep.subr.bf16.mxu0 %v13637_v39  ;;  %5792 = vmatprep.subr.bf16.mxu1 %v13638_v28  ;;  %v13645_v39 = vld [vmem:[#allocation74_spill] sm:$0xff] }
 0xd37   :  { %5752 = vmatpush1.bf16.msra.mxu0 %v13639_v3  ;;  %5793 = vmatpush1.bf16.msra.mxu1 %v13640_v25 }
 0xd38   :  { %5753 = vmatprep.subr.bf16.mxu0 %v13641_v43  ;;  %5794 = vmatprep.subr.bf16.mxu1 %v13642_v62 }
 0xd3b   :  { %5754 = vmatpush1.bf16.msra.mxu0 %v13643_v42  ;;  %5795 = vmatpush1.bf16.msra.mxu1 %v13554_v38 }
 0xd3c   :  { %5755 = vmatprep.subr.bf16.mxu0 %v13555_v46  ;;  %5796 = vmatprep.subr.bf16.mxu1 %v13556_v48 }
 0xd3f   :  { %5756 = vmatpush1.bf16.msra.mxu0 %v13644_v12  ;;  %5797 = vmatpush1.bf16.msra.mxu1 %v13645_v39 }
 0xd40   :  { %5757 = vmatprep.subr.bf16.mxu0 %v13559_v9  ;;  %5798 = vmatprep.subr.bf16.mxu1 %v13560_v55 }
 0xd43   :  { %5758 = vmatpush1.bf16.msra.mxu0 %v13561_v10  ;;  %5799 = vmatpush1.bf16.msra.mxu1 %v13562_v51 }
 0xd44   :  { %5759 = vmatprep.subr.bf16.mxu0 %v13563_v1  ;;  %5800 = vmatprep.subr.bf16.mxu1 %v13564_v8 }
 0xd47   :  { %5760 = vmatpush1.bf16.msra.mxu0 %v10576_v18  ;;  %5801 = vmatpush1.bf16.msra.mxu1 %v10578_v16  ;;  %v13716_v16 = vld [vmem:[#allocation176_spill] sm:$0xff] }
 0xd48   :  { %5761 = vmatprep.subr.bf16.mxu0 %v10582_v47  ;;  %5802 = vmatprep.subr.bf16.mxu1 %v13565_v5  ;;  %v13646_v47 = vld [vmem:[#allocation127_spill] sm:$0xff]  ;;  %v13647_v5 = vld [vmem:[#allocation90_spill] sm:$0xff] }
 0xd4b   :  { %5762 = vmatpush1.bf16.msra.mxu0 %v13566_v59  ;;  %5803 = vmatpush1.bf16.msra.mxu1 %v10590_v34  ;;  %v13648_v59 = vld [vmem:[#allocation91_spill] sm:$0xff] }
 0xd4c   :  { %5763 = vmatprep.subr.bf16.mxu0 %v10594_v56  ;;  %5804 = vmatprep.subr.bf16.mxu1 %v10596_v13  ;;  %v13649_v13 = vld [vmem:[#allocation92_spill] sm:$0xff]  ;;  %v13658_v56 = vld [vmem:[#allocation143_spill] sm:$0xff] }
 0xd4f   :  { %5764 = vmatpush1.bf16.msra.mxu0 %v10600_v23  ;;  %5805 = vmatpush1.bf16.msra.mxu1 %v10602_v2  ;;  %v13650_v23 = vld [vmem:[#allocation93_spill] sm:$0xff]  ;;  %v13651_v2 = vld [vmem:[#allocation94_spill] sm:$0xff] }
 0xd50   :  { %5765 = vmatprep.subr.bf16.mxu0 %v10606_v63  ;;  %5806 = vmatprep.subr.bf16.mxu1 %v10608_v14  ;;  %v13652_v63 = vld [vmem:[#allocation95_spill] sm:$0xff]  ;;  %v13653_v14 = vld [vmem:[#allocation96_spill] sm:$0xff] }
 0xd53   :  { %5766 = vmatpush1.bf16.msra.mxu0 %v10612_v33  ;;  %5807 = vmatpush1.bf16.msra.mxu1 %v13646_v47  ;;  %v13654_v33 = vld [vmem:[#allocation97_spill] sm:$0xff] }
 0xd54   :  { %5883 = vmatprep.subr.bf16.mxu0 %v13647_v5  ;;  %5924 = vmatprep.subr.bf16.mxu1 %v13648_v59  ;;  %v13655_v47 = vld [vmem:[#allocation117_spill] sm:$0xff]  ;;  %v13656_v5 = vld [vmem:[#allocation118_spill] sm:$0xff]  ;;  %v13657_v59 = vld [vmem:[#allocation119_spill] sm:$0xff] }
 0xd56   :  { %5768 = vmatmul.mubr.bf16.vlgmr.msra.gmra.mrb[148].mxu0 %v11017_v6  ;;  %5809 = vmatmul.mubr.bf16.vlgmr.msra.gmra.mrb[148].mxu1 %v11017_v6  ;;  %v13659_v6 = vld [vmem:[#allocation144_spill] sm:$0xff] }
 0xd57   :  { %5884 = vmatpush1.bf16.msra.mxu0 %v13649_v13  ;;  %5925 = vmatpush1.bf16.msra.mxu1 %v13650_v23  ;;  %v13660_v13 = vld [vmem:[#allocation145_spill] sm:$0xff]  ;;  %v13661_v23 = vld [vmem:[#allocation146_spill] sm:$0xff] }
 0xd58   :  { %5885 = vmatprep.subr.bf16.mxu0 %v13651_v2  ;;  %5926 = vmatprep.subr.bf16.mxu1 %v13652_v63  ;;  %v13662_v2 = vld [vmem:[#allocation171_spill] sm:$0xff]  ;;  %v13663_v63 = vld [vmem:[#allocation172_spill] sm:$0xff] }
 0xd5b   :  { %5886 = vmatpush1.bf16.msra.mxu0 %v13653_v14  ;;  %5927 = vmatpush1.bf16.msra.mxu1 %v13654_v33  ;;  %v13664_v14 = vld [vmem:[#allocation173_spill] sm:$0xff]  ;;  %v13665_v33 = vld [vmem:[#allocation174_spill] sm:$0xff] }
 0xd5c   :  { %5887 = vmatprep.subr.bf16.mxu0 %v13655_v47  ;;  %5928 = vmatprep.subr.bf16.mxu1 %v13656_v5  ;;  %v13666_v47 = vld [vmem:[#allocation98_spill] sm:$0xff]  ;;  %v13667_v5 = vld [vmem:[#allocation99_spill] sm:$0xff] }
 0xd5f   :  { %5888 = vmatpush1.bf16.msra.mxu0 %v13657_v59  ;;  %5929 = vmatpush1.bf16.msra.mxu1 %v13658_v56  ;;  %v13668_v59 = vld [vmem:[#allocation100_spill] sm:$0xff]  ;;  %v13669_v56 = vld [vmem:[#allocation101_spill] sm:$0xff] }
 0xd60   :  { %5889 = vmatprep.subr.bf16.mxu0 %v13659_v6  ;;  %5930 = vmatprep.subr.bf16.mxu1 %v13660_v13  ;;  %v13670_v6 = vld [vmem:[#allocation102_spill] sm:$0xff]  ;;  %v13671_v13 = vld [vmem:[#allocation103_spill] sm:$0xff] }
 0xd63   :  { %5890 = vmatpush1.bf16.msra.mxu0 %v13661_v23  ;;  %5931 = vmatpush1.bf16.msra.mxu1 %v13662_v2  ;;  %v13672_v23 = vld [vmem:[#allocation104_spill] sm:$0xff]  ;;  %v13673_v2 = vld [vmem:[#allocation111_spill] sm:$0xff] }
 0xd64   :  { %5891 = vmatprep.subr.bf16.mxu0 %v13663_v63  ;;  %5932 = vmatprep.subr.bf16.mxu1 %v13664_v14  ;;  %v13674_v63 = vld [vmem:[#allocation112_spill] sm:$0xff]  ;;  %v13675_v14 = vld [vmem:[#allocation115_spill] sm:$0xff] }
 0xd67   :  { %5892 = vmatpush1.bf16.msra.mxu0 %v13665_v33  ;;  %5933 = vmatpush1.bf16.msra.mxu1 %v13666_v47  ;;  %v13676_v33 = vld [vmem:[#allocation116_spill] sm:$0xff]  ;;  %v13677_v47 = vld [vmem:[#allocation147_spill] sm:$0xff] }
 0xd68   :  { %5893 = vmatprep.subr.bf16.mxu0 %v13667_v5  ;;  %5934 = vmatprep.subr.bf16.mxu1 %v13668_v59  ;;  %v13678_v5 = vld [vmem:[#allocation148_spill] sm:$0xff]  ;;  %v13679_v59 = vld [vmem:[#allocation149_spill] sm:$0xff] }
 0xd6b   :  { %5894 = vmatpush1.bf16.msra.mxu0 %v13669_v56  ;;  %5935 = vmatpush1.bf16.msra.mxu1 %v13670_v6  ;;  %v13680_v56 = vld [vmem:[#allocation150_spill] sm:$0xff]  ;;  %v13681_v6 = vld [vmem:[#allocation151_spill] sm:$0xff] }
 0xd6c   :  { %5895 = vmatprep.subr.bf16.mxu0 %v13671_v13  ;;  %5936 = vmatprep.subr.bf16.mxu1 %v13672_v23  ;;  %v13682_v13 = vld [vmem:[#allocation152_spill] sm:$0xff]  ;;  %v13683_v23 = vld [vmem:[#allocation179_spill] sm:$0xff] }
 0xd6f   :  { %5896 = vmatpush1.bf16.msra.mxu0 %v13673_v2  ;;  %5937 = vmatpush1.bf16.msra.mxu1 %v13674_v63  ;;  %v13684_v2 = vld [vmem:[#allocation180_spill] sm:$0xff]  ;;  %v13685_v63 = vld [vmem:[#allocation182_spill] sm:$0xff] }
 0xd70   :  { %5897 = vmatprep.subr.bf16.mxu0 %v13675_v14  ;;  %5938 = vmatprep.subr.bf16.mxu1 %v13676_v33  ;;  %v13686_v14 = vld [vmem:[#allocation155_spill] sm:$0xff]  ;;  %v13687_v33 = vld [vmem:[#allocation156_spill] sm:$0xff] }
 0xd73   :  { %5898 = vmatpush1.bf16.msra.mxu0 %v13677_v47  ;;  %5939 = vmatpush1.bf16.msra.mxu1 %v13678_v5  ;;  %v13688_v47 = vld [vmem:[#allocation157_spill] sm:$0xff]  ;;  %v13689_v5 = vld [vmem:[#allocation159_spill] sm:$0xff] }
 0xd74   :  { %5899 = vmatprep.subr.bf16.mxu0 %v13679_v59  ;;  %5940 = vmatprep.subr.bf16.mxu1 %v13680_v56  ;;  %v13690_v59 = vld [vmem:[#allocation160_spill] sm:$0xff]  ;;  %v13691_v56 = vld [vmem:[#allocation187_spill] sm:$0xff] }
 0xd77   :  { %5900 = vmatpush1.bf16.msra.mxu0 %v13681_v6  ;;  %5941 = vmatpush1.bf16.msra.mxu1 %v13682_v13  ;;  %v13692_v6 = vld [vmem:[#allocation188_spill] sm:$0xff]  ;;  %v13693_v13 = vld [vmem:[#allocation190_spill] sm:$0xff] }
 0xd78   :  { %5901 = vmatprep.subr.bf16.mxu0 %v13683_v23  ;;  %5942 = vmatprep.subr.bf16.mxu1 %v13684_v2  ;;  %v13694_v23 = vld [vmem:[#allocation14_spill] sm:$0xff]  ;;  %v13695_v2 = vld [vmem:[#allocation15_spill] sm:$0xff] }
 0xd7b   :  { %5902 = vmatpush1.bf16.msra.mxu0 %v13685_v63  ;;  %5943 = vmatpush1.bf16.msra.mxu1 %v13686_v14  ;;  %v13696_v63 = vld [vmem:[#allocation16_spill] sm:$0xff]  ;;  %v13697_v14 = vld [vmem:[#allocation17_spill] sm:$0xff] }
 0xd7c   :  { %5903 = vmatprep.subr.bf16.mxu0 %v13687_v33  ;;  %5944 = vmatprep.subr.bf16.mxu1 %v13688_v47  ;;  %v13698_v33 = vld [vmem:[#allocation18_spill] sm:$0xff]  ;;  %v13699_v47 = vld [vmem:[#allocation19_spill] sm:$0xff] }
 0xd7f   :  { %5904 = vmatpush1.bf16.msra.mxu0 %v13689_v5  ;;  %5945 = vmatpush1.bf16.msra.mxu1 %v13690_v59  ;;  %v13700_v5 = vld [vmem:[#allocation20_spill] sm:$0xff]  ;;  %v13701_v59 = vld [vmem:[#allocation21_spill] sm:$0xff] }
 0xd80   :  { %5905 = vmatprep.subr.bf16.mxu0 %v13691_v56  ;;  %5946 = vmatprep.subr.bf16.mxu1 %v13692_v6  ;;  %v13702_v56 = vld [vmem:[#allocation22_spill] sm:$0xff]  ;;  %v13703_v6 = vld [vmem:[#allocation23_spill] sm:$0xff] }
 0xd83   :  { %5906 = vmatpush1.bf16.msra.mxu0 %v13693_v13  ;;  %5947 = vmatpush1.bf16.msra.mxu1 %v13694_v23  ;;  %v13704_v13 = vld [vmem:[#allocation24_spill] sm:$0xff]  ;;  %v13705_v23 = vld [vmem:[#allocation25_spill] sm:$0xff] }
 0xd84   :  { %5907 = vmatprep.subr.bf16.mxu0 %v13695_v2  ;;  %5948 = vmatprep.subr.bf16.mxu1 %v13696_v63  ;;  %v13706_v2 = vld [vmem:[#allocation26_spill] sm:$0xff]  ;;  %v13707_v63 = vld [vmem:[#allocation27_spill] sm:$0xff] }
 0xd87   :  { %5908 = vmatpush1.bf16.msra.mxu0 %v13697_v14  ;;  %5949 = vmatpush1.bf16.msra.mxu1 %v13698_v33  ;;  %v13708_v14 = vld [vmem:[#allocation28_spill] sm:$0xff]  ;;  %v13709_v33 = vld [vmem:[#allocation29_spill] sm:$0xff] }
 0xd88   :  { %5909 = vmatprep.subr.bf16.mxu0 %v13699_v47  ;;  %5950 = vmatprep.subr.bf16.mxu1 %v13700_v5  ;;  %v13710_v47 = vld [vmem:[#allocation30_spill] sm:$0xff]  ;;  %v13711_v5 = vld [vmem:[#allocation31_spill] sm:$0xff] }
 0xd8b   :  { %5910 = vmatpush1.bf16.msra.mxu0 %v13701_v59  ;;  %5951 = vmatpush1.bf16.msra.mxu1 %v13702_v56  ;;  %v13712_v59 = vld [vmem:[#allocation32_spill] sm:$0xff]  ;;  %v13713_v56 = vld [vmem:[#allocation202_spill] sm:$0xff] }
 0xd8c   :  { %5911 = vmatprep.subr.bf16.mxu0 %v13703_v6  ;;  %5952 = vmatprep.subr.bf16.mxu1 %v13704_v13  ;;  %v13714_v6 = vld [vmem:[#allocation175_spill] sm:$0xff] }
 0xd8d   :  { %v4106_v34 = vadd.f32 %v13714_v6, %v13713_v56  ;;  %v13715_v13 = vld [vmem:[#allocation203_spill] sm:$0xff] }
 0xd8f   :  { %5912 = vmatpush1.bf16.msra.mxu0 %v13705_v23  ;;  %5953 = vmatpush1.bf16.msra.mxu1 %v13706_v2  ;;  %v4179_v23 = vadd.f32 %v13716_v16, %v13715_v13  ;;  %v13717_v2 = vld [vmem:[#allocation177_spill] sm:$0xff] }
 0xd90   :  { %5913 = vmatprep.subr.bf16.mxu0 %v13707_v63  ;;  %5954 = vmatprep.subr.bf16.mxu1 %v13708_v14  ;;  %v4108_v18 = vadd.f32 %v13717_v2, %v10834_v36  ;;  %v13718_v63 = vld [vmem:[#allocation178_spill] sm:$0xff] }
 0xd91   :  { %v4181_v14 = vadd.f32 %v13718_v63, %v10839_v60 }
 0xd93   :  { %5914 = vmatpush1.bf16.msra.mxu0 %v13709_v33  ;;  %5955 = vmatpush1.bf16.msra.mxu1 %v13710_v47 }
 0xd94   :  { %5965 = vmatprep.subr.bf16.mxu0 %v13711_v5  ;;  %6006 = vmatprep.subr.bf16.mxu1 %v13712_v59 }
 0xde9   :  { %v5687_v8 = vpop.f32.mrb[144].mxu0  ;;  %v5728_v33 = vpop.f32.mrb[144].mxu1 }
 0xdea   :  { %v5817_v1 = vadd.f32 %v5687_v8, %v4106_v34  ;;  %v5819_v47 = vadd.f32 %v5728_v33, %v4179_v23  ;;  %v5689_v51 = vpop.f32.mrb[145].mxu0  ;;  %v5730_v5 = vpop.f32.mrb[145].mxu1 }
 0xdeb   :  { %v5818_v10 = vadd.f32 %v5689_v51, %v4108_v18  ;;  %v5820_v59 = vadd.f32 %v5730_v5, %v4181_v14  ;;  %v5691_v55 = vpop.f32.mrb[146].mxu0  ;;  %v5732_v9 = vpop.f32.mrb[146].mxu1  ;;  %v13721_v51 = vld [vmem:[#allocation200_spill] sm:$0xff] }
 0xdec   :  { %v5692_v6 = vpop.f32.mrb[147].mxu0  ;;  %v5733_v56 = vpop.f32.mrb[147].mxu1  ;;  %v7531_v39 = vmul.f32 -1.442695, %v5817_v1  ;;  %v7533_v16 = vmul.f32 -1.442695, %v5819_v47 }
 0xded   :  { %v7532_v13 = vmul.f32 -1.442695, %v5818_v10  ;;  %v7534_v12 = vmul.f32 -1.442695, %v5820_v59  ;;  %v13719_v47 = vld [vmem:[#allocation140_spill] sm:$0xff]  ;;  %v13720_v59 = vld [vmem:[#allocation141_spill] sm:$0xff] }
 0xdee   :  { %7906 = vpow2.f32 %v7531_v39 }
 0xdef   :  { %7908 = vpow2.f32 %v7533_v16 }
 0xdf0   :  { %7910 = vpow2.f32 %v7532_v13 }
 0xdf1   :  { %7912 = vpow2.f32 %v7534_v12  ;;  %v13722_v12 = vld [vmem:[#allocation81_spill] sm:$0xff] }
 0xdf8   :  { %v7907_v2 = vpop.eup %7906 }
 0xdf9   :  { %v7909_v63 = vpop.eup %7908  ;;  %v5843_v23 = vadd.f32 1.0, %v7907_v2 }
 0xdfa   :  { %v7911_v34 = vpop.eup %7910  ;;  %v5845_v8 = vadd.f32 1.0, %v7909_v63 }
 0xdfb   :  { %v7913_v33 = vpop.eup %7912  ;;  %v5844_v18 = vadd.f32 1.0, %v7911_v34  ;;  %7914 = vrcp.f32 %v5843_v23 }
 0xdfc   :  { %v5846_v14 = vadd.f32 1.0, %v7913_v33  ;;  %7916 = vrcp.f32 %v5845_v8 }
 0xdfd   :  { %7918 = vrcp.f32 %v5844_v18 }
 0xdfe   :  { %7920 = vrcp.f32 %v5846_v14 }
 0xe05   :  { %v7915_v23 = vpop.eup %7914 }
 0xe06   :  { %v7917_v8 = vpop.eup %7916 }
 0xe07   :  { %v7919_v18 = vpop.eup %7918 }
 0xe29   :  { %v5769_v5 = vpop.f32.mrb[148].mxu0  ;;  %v5810_v56 = vpop.f32.mrb[148].mxu1 }
 0xe2a   :  { %v5821_v9 = vadd.f32 %v5769_v5, %v13719_v47  ;;  %v5823_v55 = vadd.f32 %v5810_v56, %v13720_v59  ;;  %v5771_v10 = vpop.f32.mrb[149].mxu0  ;;  %v5812_v13 = vpop.f32.mrb[149].mxu1  ;;  %v5863_v47 = vmul.f32 %v7917_v8, %v11011_v57  ;;  %v13724_v8 = vld [vmem:[#allocation63_spill] sm:$0xff] }
 0xe2b   :  { %v5822_v1 = vadd.f32 %v5771_v10, %v13721_v51  ;;  %v5824_v39 = vadd.f32 %v5812_v13, %v13722_v12  ;;  %v5773_v6 = vpop.f32.mrb[150].mxu0  ;;  %v5814_v16 = vpop.f32.mrb[150].mxu1 }
 0xe2c   :  { %v7535_v2 = vmul.f32 -1.442695, %v5821_v9  ;;  %7922 = vtanh.f32 %v5823_v55  ;;  %v5774_v63 = vpop.f32.mrb[151].mxu0  ;;  %v5815_v34 = vpop.f32.mrb[151].mxu1 }
 0xe2d   :  { %v7536_v33 = vmul.f32 -1.442695, %v5822_v1  ;;  %7924 = vtanh.f32 %v5824_v39  ;;  %v7921_v5 = vpop.eup %7920 }
 0xe2e   :  { %7926 = vpow2.f32 %v7535_v2  ;;  %v5864_v13 = vmul.f32 %v7921_v5, %v11013_v49  ;;  %v13726_v5 = vld [vmem:[#allocation74_spill] sm:$0xff] }
 0xe2f   :  { %7928 = vpow2.f32 %v7536_v33 }
 0xe36   :  { %v7923_v56 = vpop.eup %7922 }
 0xe37   :  { %v7925_v14 = vpop.eup %7924  ;;  %v5865_v59 = vmul.f32 %v7923_v56, %v7915_v23  ;;  %v13723_v23 = vld [vmem:[#allocation62_spill] sm:$0xff]  ;;  %v13727_v56 = vld [vmem:[#allocation75_spill] sm:$0xff] }
 0xe38   :  { %v7927_v10 = vpop.eup %7926  ;;  %v5866_v9 = vmul.f32 %v7925_v14, %v7919_v18  ;;  %v13725_v18 = vld [vmem:[#allocation73_spill] sm:$0xff]  ;;  %v13728_v14 = vld [vmem:[#allocation76_spill] sm:$0xff] }
 0xe39   :  { %v7929_v55 = vpop.eup %7928  ;;  %v5847_v51 = vadd.f32 1.0, %v7927_v10  ;;  %v11165_v12 = vadd.f32 %v5865_v59, %v5863_v47  ;;  %v13729_v47 = vld [vmem:[#allocation77_spill] sm:$0xff]  ;;  %v13730_v59 = vld [vmem:[#allocation78_spill] sm:$0xff]  ;;  %v13731_v10 = vld [vmem:[#allocation79_spill] sm:$0xff] }
 0xe3a   :  { %v5848_v1 = vadd.f32 1.0, %v7929_v55  ;;  %v11167_v39 = vadd.f32 %v5866_v9, %v5864_v13  ;;  %v13732_v13 = vld [vmem:[#allocation163_spill] sm:$0xff]  ;;  %v13733_v9 = vld [vmem:[#allocation164_spill] sm:$0xff]  ;;  %v13734_v55 = vld [vmem:[#allocation165_spill] sm:$0xff] }
 0xe3b   :  { %7930 = vrcp.f32 %v5847_v51  ;;  %v13735_v51 = vld [vmem:[#allocation166_spill] sm:$0xff] }
 0xe3c   :  { %7932 = vtanh.f32 %v11165_v12 }
 0xe3d   :  { %7934 = vrcp.f32 %v5848_v1  ;;  %v13736_v1 = vld [vmem:[#allocation191_spill] sm:$0xff] }
 0xe3e   :  { %7936 = vtanh.f32 %v11167_v39 }
 0xe45   :  { %v7931_v6 = vpop.eup %7930 }
 0xe46   :  { %v7933_v57 = vpop.eup %7932 }
 0xe47   :  { %v7935_v16 = vpop.eup %7934  ;;  %v5871_v63 = vmul.f32 %v7933_v57, %v7931_v6  ;;  %v13737_v6 = vld [vmem:[#allocation192_spill] sm:$0xff]  ;;  %v13738_v57 = vld [vmem:[#allocation193_spill] sm:$0xff] }
 0xe48   :  { %v7937_v2 = vpop.eup %7936 }
 0xe49   :  { %v5872_v49 = vmul.f32 %v7937_v2, %v7935_v16  ;;  %v11171_v33 = vpack.c.bf16 %v5871_v63, %v5871_v63  ;;  %v13739_v16 = vld [vmem:[#allocation194_spill] sm:$0xff]  ;;  %v13740_v2 = vld [vmem:[#allocation121_spill] sm:$0xff] }
 0xe4a   :  { %v13741_v63 = vld [vmem:[#allocation122_spill] sm:$0xff] }
 0xe4b   :  { %v5882_v34 = vpack.c.bf16 %v5872_v49, %v5872_v49  ;;  %v13742_v49 = vld [vmem:[#allocation123_spill] sm:$0xff] }
 0xe4d   :  { %5915 = vmatprep.mubr.bf16.mxu0 %v5882_v34  ;;  %5956 = vmatprep.mubr.bf16.mxu1 %v5882_v34 }
 0xe4e   :  { %5916 = vmatmul.mubr.bf16.vlgmr.msra.gmra.mrb[152].mxu0 %v11171_v33  ;;  %5957 = vmatmul.mubr.bf16.vlgmr.msra.gmra.mrb[152].mxu1 %v11171_v33 }
 0xe4f   :  { %5966 = vmatpush1.bf16.msra.mxu0 %v13517_v26  ;;  %6007 = vmatpush1.bf16.msra.mxu1 %v13518_v20 }
 0xe50   :  { %5997 = vmatprep.mubr.bf16.mxu0 %v5882_v34  ;;  %6038 = vmatprep.mubr.bf16.mxu1 %v5882_v34  ;;  %v13743_v34 = vld [vmem:[#allocation124_spill] sm:$0xff] }
 0xe51   :  { %5967 = vmatprep.subr.bf16.mxu0 %v13519_v45  ;;  %6008 = vmatprep.subr.bf16.mxu1 %v13520_v54 }
 0xe53   :  { %5968 = vmatpush1.bf16.msra.mxu0 %v13521_v53  ;;  %6009 = vmatpush1.bf16.msra.mxu1 %v13522_v50 }
 0xe54   :  { %5969 = vmatprep.subr.bf16.mxu0 %v13523_v27  ;;  %6010 = vmatprep.subr.bf16.mxu1 %v13524_v15 }
 0xe57   :  { %5970 = vmatpush1.bf16.msra.mxu0 %v13525_v4  ;;  %6011 = vmatpush1.bf16.msra.mxu1 %v13526_v11 }
 0xe58   :  { %5971 = vmatprep.subr.bf16.mxu0 %v13527_v41  ;;  %6012 = vmatprep.subr.bf16.mxu1 %v13528_v24 }
 0xe5b   :  { %5972 = vmatpush1.bf16.msra.mxu0 %v13529_v31  ;;  %6013 = vmatpush1.bf16.msra.mxu1 %v13530_v40 }
 0xe5c   :  { %5973 = vmatprep.subr.bf16.mxu0 %v13531_v44  ;;  %6014 = vmatprep.subr.bf16.mxu1 %v13532_v32 }
 0xe5f   :  { %5974 = vmatpush1.bf16.msra.mxu0 %v13623_v52  ;;  %6015 = vmatpush1.bf16.msra.mxu1 %v13624_v30 }
 0xe60   :  { %5975 = vmatprep.subr.bf16.mxu0 %v13625_v22  ;;  %6016 = vmatprep.subr.bf16.mxu1 %v13626_v61 }
 0xe63   :  { %5976 = vmatpush1.bf16.msra.mxu0 %v13627_v7  ;;  %6017 = vmatpush1.bf16.msra.mxu1 %v13628_v21 }
 0xe64   :  { %5977 = vmatprep.subr.bf16.mxu0 %v13629_v35  ;;  %6018 = vmatprep.subr.bf16.mxu1 %v13630_v0 }
 0xe67   :  { %5978 = vmatpush1.bf16.msra.mxu0 %v13631_v58  ;;  %6019 = vmatpush1.bf16.msra.mxu1 %v13632_v29 }
 0xe68   :  { %5979 = vmatprep.subr.bf16.mxu0 %v13633_v37  ;;  %6020 = vmatprep.subr.bf16.mxu1 %v13634_v19 }
 0xe6b   :  { %5980 = vmatpush1.bf16.msra.mxu0 %v13635_v17  ;;  %6021 = vmatpush1.bf16.msra.mxu1 %v13723_v23 }
 0xe6c   :  { %5981 = vmatprep.subr.bf16.mxu0 %v13724_v8  ;;  %6022 = vmatprep.subr.bf16.mxu1 %v13638_v28 }
 0xe6f   :  { %5982 = vmatpush1.bf16.msra.mxu0 %v13639_v3  ;;  %6023 = vmatpush1.bf16.msra.mxu1 %v13640_v25 }
 0xe70   :  { %5983 = vmatprep.subr.bf16.mxu0 %v13641_v43  ;;  %6024 = vmatprep.subr.bf16.mxu1 %v13642_v62 }
 0xe73   :  { %5984 = vmatpush1.bf16.msra.mxu0 %v13643_v42  ;;  %6025 = vmatpush1.bf16.msra.mxu1 %v13554_v38 }
 0xe74   :  { %5985 = vmatprep.subr.bf16.mxu0 %v13555_v46  ;;  %6026 = vmatprep.subr.bf16.mxu1 %v13556_v48 }
 0xe77   :  { %5986 = vmatpush1.bf16.msra.mxu0 %v13725_v18  ;;  %6027 = vmatpush1.bf16.msra.mxu1 %v13726_v5 }
 0xe78   :  { %5987 = vmatprep.subr.bf16.mxu0 %v13727_v56  ;;  %6028 = vmatprep.subr.bf16.mxu1 %v13728_v14 }
 0xe7b   :  { %5988 = vmatpush1.bf16.msra.mxu0 %v13729_v47  ;;  %6029 = vmatpush1.bf16.msra.mxu1 %v13730_v59 }
 0xe7c   :  { %5989 = vmatprep.subr.bf16.mxu0 %v13731_v10  ;;  %6030 = vmatprep.subr.bf16.mxu1 %v13732_v13  ;;  %v13816_v13 = vld [vmem:[#allocation153_spill] sm:$0xff] }
 0xe7f   :  { %5990 = vmatpush1.bf16.msra.mxu0 %v13733_v9  ;;  %6031 = vmatpush1.bf16.msra.mxu1 %v13734_v55  ;;  %v13744_v9 = vld [vmem:[#allocation125_spill] sm:$0xff]  ;;  %v13745_v55 = vld [vmem:[#allocation126_spill] sm:$0xff] }
 0xe80   :  { %5991 = vmatprep.subr.bf16.mxu0 %v13735_v51  ;;  %6032 = vmatprep.subr.bf16.mxu1 %v13736_v1  ;;  %v13746_v51 = vld [vmem:[#allocation127_spill] sm:$0xff]  ;;  %v13747_v1 = vld [vmem:[#allocation90_spill] sm:$0xff] }
 0xe83   :  { %5992 = vmatpush1.bf16.msra.mxu0 %v13737_v6  ;;  %6033 = vmatpush1.bf16.msra.mxu1 %v13738_v57  ;;  %v13748_v6 = vld [vmem:[#allocation91_spill] sm:$0xff] }
 0xe84   :  { %5993 = vmatprep.subr.bf16.mxu0 %v13739_v16  ;;  %6034 = vmatprep.subr.bf16.mxu1 %v13740_v2  ;;  %v13749_v2 = vld [vmem:[#allocation92_spill] sm:$0xff]  ;;  %v13758_v16 = vld [vmem:[#allocation143_spill] sm:$0xff] }
 0xe87   :  { %5994 = vmatpush1.bf16.msra.mxu0 %v13741_v63  ;;  %6035 = vmatpush1.bf16.msra.mxu1 %v13742_v49  ;;  %v13750_v63 = vld [vmem:[#allocation93_spill] sm:$0xff]  ;;  %v13751_v49 = vld [vmem:[#allocation94_spill] sm:$0xff] }
 0xe88   :  { %5995 = vmatprep.subr.bf16.mxu0 %v13743_v34  ;;  %6036 = vmatprep.subr.bf16.mxu1 %v13744_v9  ;;  %v13752_v34 = vld [vmem:[#allocation95_spill] sm:$0xff]  ;;  %v13753_v9 = vld [vmem:[#allocation96_spill] sm:$0xff] }
 0xe8b   :  { %5996 = vmatpush1.bf16.msra.mxu0 %v13745_v55  ;;  %6037 = vmatpush1.bf16.msra.mxu1 %v13746_v51  ;;  %v13754_v55 = vld [vmem:[#allocation97_spill] sm:$0xff] }
 0xe8c   :  { %6113 = vmatprep.subr.bf16.mxu0 %v13747_v1  ;;  %6154 = vmatprep.subr.bf16.mxu1 %v13748_v6  ;;  %v13755_v51 = vld [vmem:[#allocation117_spill] sm:$0xff]  ;;  %v13756_v1 = vld [vmem:[#allocation118_spill] sm:$0xff]  ;;  %v13757_v6 = vld [vmem:[#allocation119_spill] sm:$0xff] }
 0xe8e   :  { %5998 = vmatmul.mubr.bf16.vlgmr.msra.gmra.mrb[156].mxu0 %v11171_v33  ;;  %6039 = vmatmul.mubr.bf16.vlgmr.msra.gmra.mrb[156].mxu1 %v11171_v33  ;;  %v13759_v33 = vld [vmem:[#allocation144_spill] sm:$0xff] }
 0xe8f   :  { %6114 = vmatpush1.bf16.msra.mxu0 %v13749_v2  ;;  %6155 = vmatpush1.bf16.msra.mxu1 %v13750_v63  ;;  %v13760_v2 = vld [vmem:[#allocation145_spill] sm:$0xff]  ;;  %v13761_v63 = vld [vmem:[#allocation146_spill] sm:$0xff] }
 0xe90   :  { %6115 = vmatprep.subr.bf16.mxu0 %v13751_v49  ;;  %6156 = vmatprep.subr.bf16.mxu1 %v13752_v34  ;;  %v13762_v49 = vld [vmem:[#allocation171_spill] sm:$0xff]  ;;  %v13763_v34 = vld [vmem:[#allocation172_spill] sm:$0xff] }
 0xe93   :  { %6116 = vmatpush1.bf16.msra.mxu0 %v13753_v9  ;;  %6157 = vmatpush1.bf16.msra.mxu1 %v13754_v55  ;;  %v13764_v9 = vld [vmem:[#allocation173_spill] sm:$0xff]  ;;  %v13765_v55 = vld [vmem:[#allocation174_spill] sm:$0xff] }
 0xe94   :  { %6117 = vmatprep.subr.bf16.mxu0 %v13755_v51  ;;  %6158 = vmatprep.subr.bf16.mxu1 %v13756_v1  ;;  %v13766_v51 = vld [vmem:[#allocation98_spill] sm:$0xff]  ;;  %v13767_v1 = vld [vmem:[#allocation99_spill] sm:$0xff] }
 0xe97   :  { %6118 = vmatpush1.bf16.msra.mxu0 %v13757_v6  ;;  %6159 = vmatpush1.bf16.msra.mxu1 %v13758_v16  ;;  %v13768_v6 = vld [vmem:[#allocation100_spill] sm:$0xff]  ;;  %v13769_v16 = vld [vmem:[#allocation101_spill] sm:$0xff] }
 0xe98   :  { %6119 = vmatprep.subr.bf16.mxu0 %v13759_v33  ;;  %6160 = vmatprep.subr.bf16.mxu1 %v13760_v2  ;;  %v13770_v33 = vld [vmem:[#allocation102_spill] sm:$0xff]  ;;  %v13771_v2 = vld [vmem:[#allocation103_spill] sm:$0xff] }
 0xe9b   :  { %6120 = vmatpush1.bf16.msra.mxu0 %v13761_v63  ;;  %6161 = vmatpush1.bf16.msra.mxu1 %v13762_v49  ;;  %v13772_v63 = vld [vmem:[#allocation104_spill] sm:$0xff]  ;;  %v13773_v49 = vld [vmem:[#allocation111_spill] sm:$0xff] }
 0xe9c   :  { %6121 = vmatprep.subr.bf16.mxu0 %v13763_v34  ;;  %6162 = vmatprep.subr.bf16.mxu1 %v13764_v9  ;;  %v13774_v34 = vld [vmem:[#allocation112_spill] sm:$0xff]  ;;  %v13775_v9 = vld [vmem:[#allocation115_spill] sm:$0xff] }
 0xe9f   :  { %6122 = vmatpush1.bf16.msra.mxu0 %v13765_v55  ;;  %6163 = vmatpush1.bf16.msra.mxu1 %v13766_v51  ;;  %v13776_v55 = vld [vmem:[#allocation116_spill] sm:$0xff]  ;;  %v13777_v51 = vld [vmem:[#allocation147_spill] sm:$0xff] }
 0xea0   :  { %6123 = vmatprep.subr.bf16.mxu0 %v13767_v1  ;;  %6164 = vmatprep.subr.bf16.mxu1 %v13768_v6  ;;  %v13778_v1 = vld [vmem:[#allocation148_spill] sm:$0xff]  ;;  %v13779_v6 = vld [vmem:[#allocation149_spill] sm:$0xff] }
 0xea3   :  { %6124 = vmatpush1.bf16.msra.mxu0 %v13769_v16  ;;  %6165 = vmatpush1.bf16.msra.mxu1 %v13770_v33  ;;  %v13780_v16 = vld [vmem:[#allocation150_spill] sm:$0xff]  ;;  %v13781_v33 = vld [vmem:[#allocation151_spill] sm:$0xff] }
 0xea4   :  { %6125 = vmatprep.subr.bf16.mxu0 %v13771_v2  ;;  %6166 = vmatprep.subr.bf16.mxu1 %v13772_v63  ;;  %v13782_v2 = vld [vmem:[#allocation152_spill] sm:$0xff]  ;;  %v13783_v63 = vld [vmem:[#allocation179_spill] sm:$0xff] }
 0xea7   :  { %6126 = vmatpush1.bf16.msra.mxu0 %v13773_v49  ;;  %6167 = vmatpush1.bf16.msra.mxu1 %v13774_v34  ;;  %v13784_v49 = vld [vmem:[#allocation180_spill] sm:$0xff]  ;;  %v13785_v34 = vld [vmem:[#allocation182_spill] sm:$0xff] }
 0xea8   :  { %6127 = vmatprep.subr.bf16.mxu0 %v13775_v9  ;;  %6168 = vmatprep.subr.bf16.mxu1 %v13776_v55  ;;  %v13786_v9 = vld [vmem:[#allocation155_spill] sm:$0xff]  ;;  %v13787_v55 = vld [vmem:[#allocation156_spill] sm:$0xff] }
 0xeab   :  { %6128 = vmatpush1.bf16.msra.mxu0 %v13777_v51  ;;  %6169 = vmatpush1.bf16.msra.mxu1 %v13778_v1  ;;  %v13788_v51 = vld [vmem:[#allocation157_spill] sm:$0xff]  ;;  %v13789_v1 = vld [vmem:[#allocation159_spill] sm:$0xff] }
 0xeac   :  { %6129 = vmatprep.subr.bf16.mxu0 %v13779_v6  ;;  %6170 = vmatprep.subr.bf16.mxu1 %v13780_v16  ;;  %v13790_v6 = vld [vmem:[#allocation160_spill] sm:$0xff]  ;;  %v13791_v16 = vld [vmem:[#allocation187_spill] sm:$0xff] }
 0xeaf   :  { %6130 = vmatpush1.bf16.msra.mxu0 %v13781_v33  ;;  %6171 = vmatpush1.bf16.msra.mxu1 %v13782_v2  ;;  %v13792_v33 = vld [vmem:[#allocation188_spill] sm:$0xff]  ;;  %v13793_v2 = vld [vmem:[#allocation190_spill] sm:$0xff] }
 0xeb0   :  { %6131 = vmatprep.subr.bf16.mxu0 %v13783_v63  ;;  %6172 = vmatprep.subr.bf16.mxu1 %v13784_v49  ;;  %v13794_v63 = vld [vmem:[#allocation14_spill] sm:$0xff]  ;;  %v13795_v49 = vld [vmem:[#allocation15_spill] sm:$0xff] }
 0xeb3   :  { %6132 = vmatpush1.bf16.msra.mxu0 %v13785_v34  ;;  %6173 = vmatpush1.bf16.msra.mxu1 %v13786_v9  ;;  %v13796_v34 = vld [vmem:[#allocation16_spill] sm:$0xff]  ;;  %v13797_v9 = vld [vmem:[#allocation17_spill] sm:$0xff] }
 0xeb4   :  { %6133 = vmatprep.subr.bf16.mxu0 %v13787_v55  ;;  %6174 = vmatprep.subr.bf16.mxu1 %v13788_v51  ;;  %v13798_v55 = vld [vmem:[#allocation18_spill] sm:$0xff]  ;;  %v13799_v51 = vld [vmem:[#allocation19_spill] sm:$0xff] }
 0xeb7   :  { %6134 = vmatpush1.bf16.msra.mxu0 %v13789_v1  ;;  %6175 = vmatpush1.bf16.msra.mxu1 %v13790_v6  ;;  %v13800_v1 = vld [vmem:[#allocation20_spill] sm:$0xff]  ;;  %v13801_v6 = vld [vmem:[#allocation21_spill] sm:$0xff] }
 0xeb8   :  { %6135 = vmatprep.subr.bf16.mxu0 %v13791_v16  ;;  %6176 = vmatprep.subr.bf16.mxu1 %v13792_v33  ;;  %v13802_v16 = vld [vmem:[#allocation22_spill] sm:$0xff]  ;;  %v13803_v33 = vld [vmem:[#allocation23_spill] sm:$0xff] }
 0xebb   :  { %6136 = vmatpush1.bf16.msra.mxu0 %v13793_v2  ;;  %6177 = vmatpush1.bf16.msra.mxu1 %v13794_v63  ;;  %v13804_v2 = vld [vmem:[#allocation24_spill] sm:$0xff]  ;;  %v13805_v63 = vld [vmem:[#allocation25_spill] sm:$0xff] }
 0xebc   :  { %6137 = vmatprep.subr.bf16.mxu0 %v13795_v49  ;;  %6178 = vmatprep.subr.bf16.mxu1 %v13796_v34  ;;  %v13806_v49 = vld [vmem:[#allocation26_spill] sm:$0xff]  ;;  %v13807_v34 = vld [vmem:[#allocation27_spill] sm:$0xff] }
 0xebf   :  { %6138 = vmatpush1.bf16.msra.mxu0 %v13797_v9  ;;  %6179 = vmatpush1.bf16.msra.mxu1 %v13798_v55  ;;  %v13808_v9 = vld [vmem:[#allocation28_spill] sm:$0xff]  ;;  %v13809_v55 = vld [vmem:[#allocation29_spill] sm:$0xff] }
 0xec0   :  { %6139 = vmatprep.subr.bf16.mxu0 %v13799_v51  ;;  %6180 = vmatprep.subr.bf16.mxu1 %v13800_v1  ;;  %v13810_v51 = vld [vmem:[#allocation30_spill] sm:$0xff]  ;;  %v13811_v1 = vld [vmem:[#allocation31_spill] sm:$0xff] }
 0xec3   :  { %6140 = vmatpush1.bf16.msra.mxu0 %v13801_v6  ;;  %6181 = vmatpush1.bf16.msra.mxu1 %v13802_v16  ;;  %v13812_v6 = vld [vmem:[#allocation32_spill] sm:$0xff]  ;;  %v13813_v16 = vld [vmem:[#allocation202_spill] sm:$0xff] }
 0xec4   :  { %6141 = vmatprep.subr.bf16.mxu0 %v13803_v33  ;;  %6182 = vmatprep.subr.bf16.mxu1 %v13804_v2  ;;  %v13814_v33 = vld [vmem:[#allocation110_spill] sm:$0xff]  ;;  %v13815_v2 = vld [vmem:[#allocation203_spill] sm:$0xff] }
 0xec5   :  { %v4110_v57 = vadd.f32 %v13814_v33, %v13813_v16 }
 0xec7   :  { %6142 = vmatpush1.bf16.msra.mxu0 %v13805_v63  ;;  %6183 = vmatpush1.bf16.msra.mxu1 %v13806_v49  ;;  %v4183_v63 = vadd.f32 %v13816_v13, %v13815_v2  ;;  %v13817_v49 = vld [vmem:[#allocation154_spill] sm:$0xff] }
 0xec8   :  { %6143 = vmatprep.subr.bf16.mxu0 %v13807_v34  ;;  %6184 = vmatprep.subr.bf16.mxu1 %v13808_v9  ;;  %v4112_v10 = vadd.f32 %v13817_v49, %v10834_v36  ;;  %v13818_v34 = vld [vmem:[#allocation181_spill] sm:$0xff] }
 0xec9   :  { %v4185_v9 = vadd.f32 %v13818_v34, %v10839_v60 }
 0xecb   :  { %6144 = vmatpush1.bf16.msra.mxu0 %v13809_v55  ;;  %6185 = vmatpush1.bf16.msra.mxu1 %v13810_v51 }
 0xecc   :  { %6195 = vmatprep.subr.bf16.mxu0 %v13811_v1  ;;  %6236 = vmatprep.subr.bf16.mxu1 %v13812_v6 }
 0xf21   :  { %v5917_v59 = vpop.f32.mrb[152].mxu0  ;;  %v5958_v55 = vpop.f32.mrb[152].mxu1 }
 0xf22   :  { %v6047_v47 = vadd.f32 %v5917_v59, %v4110_v57  ;;  %v6049_v51 = vadd.f32 %v5958_v55, %v4183_v63  ;;  %v5919_v14 = vpop.f32.mrb[153].mxu0  ;;  %v5960_v1 = vpop.f32.mrb[153].mxu1 }
 0xf23   :  { %v6048_v56 = vadd.f32 %v5919_v14, %v4112_v10  ;;  %v6050_v6 = vadd.f32 %v5960_v1, %v4185_v9  ;;  %v5921_v5 = vpop.f32.mrb[154].mxu0  ;;  %v5962_v18 = vpop.f32.mrb[154].mxu1  ;;  %v13820_v9 = vld [vmem:[#allocation80_spill] sm:$0xff] }
 0xf24   :  { %v5922_v33 = vpop.f32.mrb[155].mxu0  ;;  %v5963_v16 = vpop.f32.mrb[155].mxu1  ;;  %v7537_v48 = vmul.f32 -1.442695, %v6047_v47  ;;  %v7539_v13 = vmul.f32 -1.442695, %v6049_v51 }
 0xf25   :  { %v7538_v2 = vmul.f32 -1.442695, %v6048_v56  ;;  %v7540_v46 = vmul.f32 -1.442695, %v6050_v6  ;;  %v13819_v47 = vld [vmem:[#allocation199_spill] sm:$0xff]  ;;  %v13822_v16 = vld [vmem:[#allocation85_spill] sm:$0xff] }
 0xf26   :  { %7938 = vpow2.f32 %v7537_v48 }
 0xf27   :  { %7940 = vpow2.f32 %v7539_v13 }
 0xf28   :  { %7942 = vpow2.f32 %v7538_v2 }
 0xf29   :  { %7944 = vpow2.f32 %v7540_v46  ;;  %v13821_v46 = vld [vmem:[#allocation83_spill] sm:$0xff] }
 0xf30   :  { %v7939_v49 = vpop.eup %7938 }
 0xf31   :  { %v7941_v34 = vpop.eup %7940  ;;  %v6073_v57 = vadd.f32 1.0, %v7939_v49 }
 0xf32   :  { %v7943_v59 = vpop.eup %7942  ;;  %v6075_v63 = vadd.f32 1.0, %v7941_v34 }
 0xf33   :  { %v7945_v55 = vpop.eup %7944  ;;  %v6074_v14 = vadd.f32 1.0, %v7943_v59  ;;  %7946 = vrcp.f32 %v6073_v57 }
 0xf34   :  { %v6076_v10 = vadd.f32 1.0, %v7945_v55  ;;  %7948 = vrcp.f32 %v6075_v63 }
 0xf35   :  { %7950 = vrcp.f32 %v6074_v14 }
 0xf36   :  { %7952 = vrcp.f32 %v6076_v10 }
 0xf3d   :  { %v7947_v57 = vpop.eup %7946 }
 0xf3e   :  { %v7949_v63 = vpop.eup %7948 }
 0xf3f   :  { %v7951_v14 = vpop.eup %7950 }
 0xf61   :  { %v5999_v18 = vpop.f32.mrb[156].mxu0  ;;  %v6040_v5 = vpop.f32.mrb[156].mxu1 }
 0xf62   :  { %v6051_v56 = vadd.f32 %v5999_v18, %v13819_v47  ;;  %v6053_v48 = vadd.f32 %v6040_v5, %v13820_v9  ;;  %v6001_v51 = vpop.f32.mrb[157].mxu0  ;;  %v6042_v1 = vpop.f32.mrb[157].mxu1  ;;  %v6093_v47 = vmul.f32 %v7949_v63, %v11165_v12  ;;  %v13824_v63 = vld [vmem:[#allocation72_spill] sm:$0xff] }
 0xf63   :  { %v6052_v6 = vadd.f32 %v6001_v51, %v13821_v46  ;;  %v6054_v2 = vadd.f32 %v6042_v1, %v13822_v16  ;;  %v6003_v33 = vpop.f32.mrb[158].mxu0  ;;  %v6044_v13 = vpop.f32.mrb[158].mxu1 }
 0xf64   :  { %v7541_v49 = vmul.f32 -1.442695, %v6051_v56  ;;  %7954 = vtanh.f32 %v6053_v48  ;;  %v6004_v34 = vpop.f32.mrb[159].mxu0  ;;  %v6045_v59 = vpop.f32.mrb[159].mxu1 }
 0xf65   :  { %v7542_v55 = vmul.f32 -1.442695, %v6052_v6  ;;  %7956 = vtanh.f32 %v6054_v2  ;;  %v7953_v18 = vpop.eup %7952 }
 0xf66   :  { %7958 = vpow2.f32 %v7541_v49  ;;  %v6094_v1 = vmul.f32 %v7953_v18, %v11167_v39  ;;  %v13826_v18 = vld [vmem:[#allocation74_spill] sm:$0xff] }
 0xf67   :  { %7960 = vpow2.f32 %v7542_v55 }
 0xf6e   :  { %v7955_v5 = vpop.eup %7954 }
 0xf6f   :  { %v7957_v10 = vpop.eup %7956  ;;  %v6095_v9 = vmul.f32 %v7955_v5, %v7947_v57  ;;  %v13823_v57 = vld [vmem:[#allocation71_spill] sm:$0xff] }
 0xf70   :  { %v7959_v51 = vpop.eup %7958  ;;  %v6096_v56 = vmul.f32 %v7957_v10, %v7951_v14  ;;  %v13825_v14 = vld [vmem:[#allocation73_spill] sm:$0xff]  ;;  %v13827_v5 = vld [vmem:[#allocation75_spill] sm:$0xff]  ;;  %v13828_v10 = vld [vmem:[#allocation76_spill] sm:$0xff] }
 0xf71   :  { %v7961_v48 = vpop.eup %7960  ;;  %v6077_v46 = vadd.f32 1.0, %v7959_v51  ;;  %v11319_v16 = vadd.f32 %v6095_v9, %v6093_v47  ;;  %v13829_v47 = vld [vmem:[#allocation77_spill] sm:$0xff]  ;;  %v13830_v9 = vld [vmem:[#allocation78_spill] sm:$0xff]  ;;  %v13831_v51 = vld [vmem:[#allocation79_spill] sm:$0xff] }
 0xf72   :  { %v6078_v6 = vadd.f32 1.0, %v7961_v48  ;;  %v11321_v2 = vadd.f32 %v6096_v56, %v6094_v1  ;;  %v13832_v1 = vld [vmem:[#allocation163_spill] sm:$0xff]  ;;  %v13833_v56 = vld [vmem:[#allocation164_spill] sm:$0xff]  ;;  %v13834_v48 = vld [vmem:[#allocation165_spill] sm:$0xff] }
 0xf73   :  { %7962 = vrcp.f32 %v6077_v46  ;;  %v13835_v46 = vld [vmem:[#allocation166_spill] sm:$0xff] }
 0xf74   :  { %7964 = vtanh.f32 %v11319_v16 }
 0xf75   :  { %7966 = vrcp.f32 %v6078_v6  ;;  %v13836_v6 = vld [vmem:[#allocation191_spill] sm:$0xff] }
 0xf76   :  { %7968 = vtanh.f32 %v11321_v2 }
 0xf7d   :  { %v7963_v33 = vpop.eup %7962 }
 0xf7e   :  { %v7965_v12 = vpop.eup %7964 }
 0xf7f   :  { %v7967_v13 = vpop.eup %7966  ;;  %v6101_v34 = vmul.f32 %v7965_v12, %v7963_v33  ;;  %v13837_v33 = vld [vmem:[#allocation192_spill] sm:$0xff]  ;;  %v13838_v12 = vld [vmem:[#allocation193_spill] sm:$0xff] }
 0xf80   :  { %v7969_v49 = vpop.eup %7968 }
 0xf81   :  { %v6102_v39 = vmul.f32 %v7969_v49, %v7967_v13  ;;  %v11325_v55 = vpack.c.bf16 %v6101_v34, %v6101_v34  ;;  %v13839_v13 = vld [vmem:[#allocation194_spill] sm:$0xff]  ;;  %v13840_v49 = vld [vmem:[#allocation121_spill] sm:$0xff] }
 0xf82   :  { %v13841_v34 = vld [vmem:[#allocation122_spill] sm:$0xff] }
 0xf83   :  { %v6112_v59 = vpack.c.bf16 %v6102_v39, %v6102_v39  ;;  %v13842_v39 = vld [vmem:[#allocation123_spill] sm:$0xff] }
 0xf85   :  { %6145 = vmatprep.mubr.bf16.mxu0 %v6112_v59  ;;  %6186 = vmatprep.mubr.bf16.mxu1 %v6112_v59 }
 0xf86   :  { %6146 = vmatmul.mubr.bf16.vlgmr.msra.gmra.mrb[160].mxu0 %v11325_v55  ;;  %6187 = vmatmul.mubr.bf16.vlgmr.msra.gmra.mrb[160].mxu1 %v11325_v55 }
 0xf87   :  { %6196 = vmatpush1.bf16.msra.mxu0 %v13517_v26  ;;  %6237 = vmatpush1.bf16.msra.mxu1 %v13518_v20 }
 0xf88   :  { %6227 = vmatprep.mubr.bf16.mxu0 %v6112_v59  ;;  %6268 = vmatprep.mubr.bf16.mxu1 %v6112_v59  ;;  %v13843_v59 = vld [vmem:[#allocation124_spill] sm:$0xff] }
 0xf89   :  { %6197 = vmatprep.subr.bf16.mxu0 %v13519_v45  ;;  %6238 = vmatprep.subr.bf16.mxu1 %v13520_v54 }
 0xf8b   :  { %6198 = vmatpush1.bf16.msra.mxu0 %v13521_v53  ;;  %6239 = vmatpush1.bf16.msra.mxu1 %v13522_v50 }
 0xf8c   :  { %6199 = vmatprep.subr.bf16.mxu0 %v13523_v27  ;;  %6240 = vmatprep.subr.bf16.mxu1 %v13524_v15 }
 0xf8f   :  { %6200 = vmatpush1.bf16.msra.mxu0 %v13525_v4  ;;  %6241 = vmatpush1.bf16.msra.mxu1 %v13526_v11 }
 0xf90   :  { %6201 = vmatprep.subr.bf16.mxu0 %v13527_v41  ;;  %6242 = vmatprep.subr.bf16.mxu1 %v13528_v24 }
 0xf93   :  { %6202 = vmatpush1.bf16.msra.mxu0 %v13529_v31  ;;  %6243 = vmatpush1.bf16.msra.mxu1 %v13530_v40 }
 0xf94   :  { %6203 = vmatprep.subr.bf16.mxu0 %v13531_v44  ;;  %6244 = vmatprep.subr.bf16.mxu1 %v13532_v32 }
 0xf97   :  { %6204 = vmatpush1.bf16.msra.mxu0 %v13623_v52  ;;  %6245 = vmatpush1.bf16.msra.mxu1 %v13624_v30 }
 0xf98   :  { %6205 = vmatprep.subr.bf16.mxu0 %v13625_v22  ;;  %6246 = vmatprep.subr.bf16.mxu1 %v13626_v61 }
 0xf9b   :  { %6206 = vmatpush1.bf16.msra.mxu0 %v13627_v7  ;;  %6247 = vmatpush1.bf16.msra.mxu1 %v13628_v21 }
 0xf9c   :  { %6207 = vmatprep.subr.bf16.mxu0 %v13629_v35  ;;  %6248 = vmatprep.subr.bf16.mxu1 %v13630_v0 }
 0xf9f   :  { %6208 = vmatpush1.bf16.msra.mxu0 %v13631_v58  ;;  %6249 = vmatpush1.bf16.msra.mxu1 %v13632_v29 }
 0xfa0   :  { %6209 = vmatprep.subr.bf16.mxu0 %v13633_v37  ;;  %6250 = vmatprep.subr.bf16.mxu1 %v13634_v19 }
 0xfa3   :  { %6210 = vmatpush1.bf16.msra.mxu0 %v13635_v17  ;;  %6251 = vmatpush1.bf16.msra.mxu1 %v13723_v23 }
 0xfa4   :  { %6211 = vmatprep.subr.bf16.mxu0 %v13724_v8  ;;  %6252 = vmatprep.subr.bf16.mxu1 %v13638_v28 }
 0xfa7   :  { %6212 = vmatpush1.bf16.msra.mxu0 %v13639_v3  ;;  %6253 = vmatpush1.bf16.msra.mxu1 %v13640_v25 }
 0xfa8   :  { %6213 = vmatprep.subr.bf16.mxu0 %v13641_v43  ;;  %6254 = vmatprep.subr.bf16.mxu1 %v13642_v62 }
 0xfab   :  { %6214 = vmatpush1.bf16.msra.mxu0 %v13643_v42  ;;  %6255 = vmatpush1.bf16.msra.mxu1 %v13554_v38 }
 0xfac   :  { %6215 = vmatprep.subr.bf16.mxu0 %v13823_v57  ;;  %6256 = vmatprep.subr.bf16.mxu1 %v13824_v63 }
 0xfaf   :  { %6216 = vmatpush1.bf16.msra.mxu0 %v13825_v14  ;;  %6257 = vmatpush1.bf16.msra.mxu1 %v13826_v18 }
 0xfb0   :  { %6217 = vmatprep.subr.bf16.mxu0 %v13827_v5  ;;  %6258 = vmatprep.subr.bf16.mxu1 %v13828_v10 }
 0xfb3   :  { %6218 = vmatpush1.bf16.msra.mxu0 %v13829_v47  ;;  %6259 = vmatpush1.bf16.msra.mxu1 %v13830_v9 }
 0xfb4   :  { %6219 = vmatprep.subr.bf16.mxu0 %v13831_v51  ;;  %6260 = vmatprep.subr.bf16.mxu1 %v13832_v1  ;;  %v13916_v1 = vld [vmem:[#allocation183_spill] sm:$0xff] }
 0xfb7   :  { %6220 = vmatpush1.bf16.msra.mxu0 %v13833_v56  ;;  %6261 = vmatpush1.bf16.msra.mxu1 %v13834_v48  ;;  %v13844_v56 = vld [vmem:[#allocation125_spill] sm:$0xff]  ;;  %v13845_v48 = vld [vmem:[#allocation126_spill] sm:$0xff] }
 0xfb8   :  { %6221 = vmatprep.subr.bf16.mxu0 %v13835_v46  ;;  %6262 = vmatprep.subr.bf16.mxu1 %v13836_v6  ;;  %v13846_v46 = vld [vmem:[#allocation127_spill] sm:$0xff]  ;;  %v13847_v6 = vld [vmem:[#allocation90_spill] sm:$0xff] }
 0xfbb   :  { %6222 = vmatpush1.bf16.msra.mxu0 %v13837_v33  ;;  %6263 = vmatpush1.bf16.msra.mxu1 %v13838_v12  ;;  %v13848_v33 = vld [vmem:[#allocation91_spill] sm:$0xff] }
 0xfbc   :  { %6223 = vmatprep.subr.bf16.mxu0 %v13839_v13  ;;  %6264 = vmatprep.subr.bf16.mxu1 %v13840_v49  ;;  %v13849_v49 = vld [vmem:[#allocation92_spill] sm:$0xff]  ;;  %v13858_v13 = vld [vmem:[#allocation143_spill] sm:$0xff] }
 0xfbf   :  { %6224 = vmatpush1.bf16.msra.mxu0 %v13841_v34  ;;  %6265 = vmatpush1.bf16.msra.mxu1 %v13842_v39  ;;  %v13850_v34 = vld [vmem:[#allocation93_spill] sm:$0xff]  ;;  %v13851_v39 = vld [vmem:[#allocation94_spill] sm:$0xff] }
 0xfc0   :  { %6225 = vmatprep.subr.bf16.mxu0 %v13843_v59  ;;  %6266 = vmatprep.subr.bf16.mxu1 %v13844_v56  ;;  %v13852_v59 = vld [vmem:[#allocation95_spill] sm:$0xff]  ;;  %v13853_v56 = vld [vmem:[#allocation96_spill] sm:$0xff] }
 0xfc3   :  { %6226 = vmatpush1.bf16.msra.mxu0 %v13845_v48  ;;  %6267 = vmatpush1.bf16.msra.mxu1 %v13846_v46  ;;  %v13854_v48 = vld [vmem:[#allocation97_spill] sm:$0xff] }
 0xfc4   :  { %6343 = vmatprep.subr.bf16.mxu0 %v13847_v6  ;;  %6384 = vmatprep.subr.bf16.mxu1 %v13848_v33  ;;  %v13855_v46 = vld [vmem:[#allocation117_spill] sm:$0xff]  ;;  %v13856_v6 = vld [vmem:[#allocation118_spill] sm:$0xff]  ;;  %v13857_v33 = vld [vmem:[#allocation119_spill] sm:$0xff] }
 0xfc6   :  { %6228 = vmatmul.mubr.bf16.vlgmr.msra.gmra.mrb[164].mxu0 %v11325_v55  ;;  %6269 = vmatmul.mubr.bf16.vlgmr.msra.gmra.mrb[164].mxu1 %v11325_v55  ;;  %v13859_v55 = vld [vmem:[#allocation144_spill] sm:$0xff] }
 0xfc7   :  { %6344 = vmatpush1.bf16.msra.mxu0 %v13849_v49  ;;  %6385 = vmatpush1.bf16.msra.mxu1 %v13850_v34  ;;  %v13860_v49 = vld [vmem:[#allocation145_spill] sm:$0xff]  ;;  %v13861_v34 = vld [vmem:[#allocation146_spill] sm:$0xff] }
 0xfc8   :  { %6345 = vmatprep.subr.bf16.mxu0 %v13851_v39  ;;  %6386 = vmatprep.subr.bf16.mxu1 %v13852_v59  ;;  %v13862_v39 = vld [vmem:[#allocation171_spill] sm:$0xff]  ;;  %v13863_v59 = vld [vmem:[#allocation172_spill] sm:$0xff] }
 0xfcb   :  { %6346 = vmatpush1.bf16.msra.mxu0 %v13853_v56  ;;  %6387 = vmatpush1.bf16.msra.mxu1 %v13854_v48  ;;  %v13864_v56 = vld [vmem:[#allocation173_spill] sm:$0xff]  ;;  %v13865_v48 = vld [vmem:[#allocation174_spill] sm:$0xff] }
 0xfcc   :  { %6347 = vmatprep.subr.bf16.mxu0 %v13855_v46  ;;  %6388 = vmatprep.subr.bf16.mxu1 %v13856_v6  ;;  %v13866_v46 = vld [vmem:[#allocation98_spill] sm:$0xff]  ;;  %v13867_v6 = vld [vmem:[#allocation99_spill] sm:$0xff] }
 0xfcf   :  { %6348 = vmatpush1.bf16.msra.mxu0 %v13857_v33  ;;  %6389 = vmatpush1.bf16.msra.mxu1 %v13858_v13  ;;  %v13868_v33 = vld [vmem:[#allocation100_spill] sm:$0xff]  ;;  %v13869_v13 = vld [vmem:[#allocation101_spill] sm:$0xff] }
 0xfd0   :  { %6349 = vmatprep.subr.bf16.mxu0 %v13859_v55  ;;  %6390 = vmatprep.subr.bf16.mxu1 %v13860_v49  ;;  %v13870_v55 = vld [vmem:[#allocation102_spill] sm:$0xff]  ;;  %v13871_v49 = vld [vmem:[#allocation103_spill] sm:$0xff] }
 0xfd3   :  { %6350 = vmatpush1.bf16.msra.mxu0 %v13861_v34  ;;  %6391 = vmatpush1.bf16.msra.mxu1 %v13862_v39  ;;  %v13872_v34 = vld [vmem:[#allocation104_spill] sm:$0xff]  ;;  %v13873_v39 = vld [vmem:[#allocation111_spill] sm:$0xff] }
 0xfd4   :  { %6351 = vmatprep.subr.bf16.mxu0 %v13863_v59  ;;  %6392 = vmatprep.subr.bf16.mxu1 %v13864_v56  ;;  %v13874_v59 = vld [vmem:[#allocation112_spill] sm:$0xff]  ;;  %v13875_v56 = vld [vmem:[#allocation115_spill] sm:$0xff] }
 0xfd7   :  { %6352 = vmatpush1.bf16.msra.mxu0 %v13865_v48  ;;  %6393 = vmatpush1.bf16.msra.mxu1 %v13866_v46  ;;  %v13876_v48 = vld [vmem:[#allocation116_spill] sm:$0xff]  ;;  %v13877_v46 = vld [vmem:[#allocation147_spill] sm:$0xff] }
 0xfd8   :  { %6353 = vmatprep.subr.bf16.mxu0 %v13867_v6  ;;  %6394 = vmatprep.subr.bf16.mxu1 %v13868_v33  ;;  %v13878_v6 = vld [vmem:[#allocation148_spill] sm:$0xff]  ;;  %v13879_v33 = vld [vmem:[#allocation149_spill] sm:$0xff] }
 0xfdb   :  { %6354 = vmatpush1.bf16.msra.mxu0 %v13869_v13  ;;  %6395 = vmatpush1.bf16.msra.mxu1 %v13870_v55  ;;  %v13880_v13 = vld [vmem:[#allocation150_spill] sm:$0xff]  ;;  %v13881_v55 = vld [vmem:[#allocation151_spill] sm:$0xff] }
 0xfdc   :  { %6355 = vmatprep.subr.bf16.mxu0 %v13871_v49  ;;  %6396 = vmatprep.subr.bf16.mxu1 %v13872_v34  ;;  %v13882_v49 = vld [vmem:[#allocation152_spill] sm:$0xff]  ;;  %v13883_v34 = vld [vmem:[#allocation179_spill] sm:$0xff] }
 0xfdf   :  { %6356 = vmatpush1.bf16.msra.mxu0 %v13873_v39  ;;  %6397 = vmatpush1.bf16.msra.mxu1 %v13874_v59  ;;  %v13884_v39 = vld [vmem:[#allocation180_spill] sm:$0xff]  ;;  %v13885_v59 = vld [vmem:[#allocation182_spill] sm:$0xff] }
 0xfe0   :  { %6357 = vmatprep.subr.bf16.mxu0 %v13875_v56  ;;  %6398 = vmatprep.subr.bf16.mxu1 %v13876_v48  ;;  %v13886_v56 = vld [vmem:[#allocation155_spill] sm:$0xff]  ;;  %v13887_v48 = vld [vmem:[#allocation156_spill] sm:$0xff] }
 0xfe3   :  { %6358 = vmatpush1.bf16.msra.mxu0 %v13877_v46  ;;  %6399 = vmatpush1.bf16.msra.mxu1 %v13878_v6  ;;  %v13888_v46 = vld [vmem:[#allocation157_spill] sm:$0xff]  ;;  %v13889_v6 = vld [vmem:[#allocation159_spill] sm:$0xff] }
 0xfe4   :  { %6359 = vmatprep.subr.bf16.mxu0 %v13879_v33  ;;  %6400 = vmatprep.subr.bf16.mxu1 %v13880_v13  ;;  %v13890_v33 = vld [vmem:[#allocation160_spill] sm:$0xff]  ;;  %v13891_v13 = vld [vmem:[#allocation187_spill] sm:$0xff] }
 0xfe7   :  { %6360 = vmatpush1.bf16.msra.mxu0 %v13881_v55  ;;  %6401 = vmatpush1.bf16.msra.mxu1 %v13882_v49  ;;  %v13892_v55 = vld [vmem:[#allocation188_spill] sm:$0xff]  ;;  %v13893_v49 = vld [vmem:[#allocation190_spill] sm:$0xff] }
 0xfe8   :  { %6361 = vmatprep.subr.bf16.mxu0 %v13883_v34  ;;  %6402 = vmatprep.subr.bf16.mxu1 %v13884_v39  ;;  %v13894_v34 = vld [vmem:[#allocation14_spill] sm:$0xff]  ;;  %v13895_v39 = vld [vmem:[#allocation15_spill] sm:$0xff] }
 0xfeb   :  { %6362 = vmatpush1.bf16.msra.mxu0 %v13885_v59  ;;  %6403 = vmatpush1.bf16.msra.mxu1 %v13886_v56  ;;  %v13896_v59 = vld [vmem:[#allocation16_spill] sm:$0xff]  ;;  %v13897_v56 = vld [vmem:[#allocation17_spill] sm:$0xff] }
 0xfec   :  { %6363 = vmatprep.subr.bf16.mxu0 %v13887_v48  ;;  %6404 = vmatprep.subr.bf16.mxu1 %v13888_v46  ;;  %v13898_v48 = vld [vmem:[#allocation18_spill] sm:$0xff]  ;;  %v13899_v46 = vld [vmem:[#allocation19_spill] sm:$0xff] }
 0xfef   :  { %6364 = vmatpush1.bf16.msra.mxu0 %v13889_v6  ;;  %6405 = vmatpush1.bf16.msra.mxu1 %v13890_v33  ;;  %v13900_v6 = vld [vmem:[#allocation20_spill] sm:$0xff]  ;;  %v13901_v33 = vld [vmem:[#allocation21_spill] sm:$0xff] }
 0xff0   :  { %6365 = vmatprep.subr.bf16.mxu0 %v13891_v13  ;;  %6406 = vmatprep.subr.bf16.mxu1 %v13892_v55  ;;  %v13902_v13 = vld [vmem:[#allocation22_spill] sm:$0xff]  ;;  %v13903_v55 = vld [vmem:[#allocation23_spill] sm:$0xff] }
 0xff3   :  { %6366 = vmatpush1.bf16.msra.mxu0 %v13893_v49  ;;  %6407 = vmatpush1.bf16.msra.mxu1 %v13894_v34  ;;  %v13904_v49 = vld [vmem:[#allocation24_spill] sm:$0xff]  ;;  %v13905_v34 = vld [vmem:[#allocation25_spill] sm:$0xff] }
 0xff4   :  { %6367 = vmatprep.subr.bf16.mxu0 %v13895_v39  ;;  %6408 = vmatprep.subr.bf16.mxu1 %v13896_v59  ;;  %v13906_v39 = vld [vmem:[#allocation26_spill] sm:$0xff]  ;;  %v13907_v59 = vld [vmem:[#allocation27_spill] sm:$0xff] }
 0xff7   :  { %6368 = vmatpush1.bf16.msra.mxu0 %v13897_v56  ;;  %6409 = vmatpush1.bf16.msra.mxu1 %v13898_v48  ;;  %v13908_v56 = vld [vmem:[#allocation28_spill] sm:$0xff]  ;;  %v13909_v48 = vld [vmem:[#allocation29_spill] sm:$0xff] }
 0xff8   :  { %6369 = vmatprep.subr.bf16.mxu0 %v13899_v46  ;;  %6410 = vmatprep.subr.bf16.mxu1 %v13900_v6  ;;  %v13910_v46 = vld [vmem:[#allocation30_spill] sm:$0xff]  ;;  %v13911_v6 = vld [vmem:[#allocation31_spill] sm:$0xff] }
 0xffb   :  { %6370 = vmatpush1.bf16.msra.mxu0 %v13901_v33  ;;  %6411 = vmatpush1.bf16.msra.mxu1 %v13902_v13  ;;  %v13912_v33 = vld [vmem:[#allocation32_spill] sm:$0xff]  ;;  %v13913_v13 = vld [vmem:[#allocation202_spill] sm:$0xff] }
 0xffc   :  { %6371 = vmatprep.subr.bf16.mxu0 %v13903_v55  ;;  %6412 = vmatprep.subr.bf16.mxu1 %v13904_v49  ;;  %v13914_v55 = vld [vmem:[#allocation158_spill] sm:$0xff]  ;;  %v13915_v49 = vld [vmem:[#allocation203_spill] sm:$0xff] }
 0xffd   :  { %v4116_v12 = vadd.f32 %v13914_v55, %v13913_v13 }
 0xfff   :  { %6372 = vmatpush1.bf16.msra.mxu0 %v13905_v34  ;;  %6413 = vmatpush1.bf16.msra.mxu1 %v13906_v39  ;;  %v4189_v34 = vadd.f32 %v13916_v1, %v13915_v49  ;;  %v13917_v39 = vld [vmem:[#allocation184_spill] sm:$0xff] }
0x1000   :  { %6373 = vmatprep.subr.bf16.mxu0 %v13907_v59  ;;  %6414 = vmatprep.subr.bf16.mxu1 %v13908_v56  ;;  %v4118_v51 = vadd.f32 %v13917_v39, %v10834_v36  ;;  %v13918_v59 = vld [vmem:[#allocation185_spill] sm:$0xff] }
0x1001   :  { %v4191_v56 = vadd.f32 %v13918_v59, %v10839_v60 }
0x1003   :  { %6374 = vmatpush1.bf16.msra.mxu0 %v13909_v48  ;;  %6415 = vmatpush1.bf16.msra.mxu1 %v13910_v46 }
0x1004   :  { %6425 = vmatprep.subr.bf16.mxu0 %v13911_v6  ;;  %6466 = vmatprep.subr.bf16.mxu1 %v13912_v33 }
0x1059   :  { %v6147_v9 = vpop.f32.mrb[160].mxu0  ;;  %v6188_v48 = vpop.f32.mrb[160].mxu1 }
0x105a   :  { %v6277_v47 = vadd.f32 %v6147_v9, %v4116_v12  ;;  %v6279_v46 = vadd.f32 %v6188_v48, %v4189_v34  ;;  %v6149_v10 = vpop.f32.mrb[161].mxu0  ;;  %v6190_v6 = vpop.f32.mrb[161].mxu1 }
0x105b   :  { %v6278_v5 = vadd.f32 %v6149_v10, %v4118_v51  ;;  %v6280_v33 = vadd.f32 %v6190_v6, %v4191_v56  ;;  %v6151_v18 = vpop.f32.mrb[162].mxu0  ;;  %v6192_v14 = vpop.f32.mrb[162].mxu1  ;;  %v13920_v56 = vld [vmem:[#allocation84_spill] sm:$0xff] }
0x105c   :  { %v6152_v55 = vpop.f32.mrb[163].mxu0  ;;  %v6193_v13 = vpop.f32.mrb[163].mxu1  ;;  %v7543_v63 = vmul.f32 -1.442695, %v6277_v47  ;;  %v7545_v1 = vmul.f32 -1.442695, %v6279_v46 }
0x105d   :  { %v7544_v49 = vmul.f32 -1.442695, %v6278_v5  ;;  %v7546_v57 = vmul.f32 -1.442695, %v6280_v33  ;;  %v13919_v47 = vld [vmem:[#allocation82_spill] sm:$0xff]  ;;  %v13922_v13 = vld [vmem:[#allocation89_spill] sm:$0xff] }
0x105e   :  { %7970 = vpow2.f32 %v7543_v63 }
0x105f   :  { %7972 = vpow2.f32 %v7545_v1 }
0x1060   :  { %7974 = vpow2.f32 %v7544_v49 }
0x1061   :  { %7976 = vpow2.f32 %v7546_v57  ;;  %v13921_v57 = vld [vmem:[#allocation87_spill] sm:$0xff] }
0x1068   :  { %v7971_v39 = vpop.eup %7970 }
0x1069   :  { %v7973_v59 = vpop.eup %7972  ;;  %v6303_v12 = vadd.f32 1.0, %v7971_v39 }
0x106a   :  { %v7975_v9 = vpop.eup %7974  ;;  %v6305_v34 = vadd.f32 1.0, %v7973_v59 }
0x106b   :  { %v7977_v48 = vpop.eup %7976  ;;  %v6304_v10 = vadd.f32 1.0, %v7975_v9  ;;  %7978 = vrcp.f32 %v6303_v12 }
0x106c   :  { %v6306_v51 = vadd.f32 1.0, %v7977_v48  ;;  %7980 = vrcp.f32 %v6305_v34 }
0x106d   :  { %7982 = vrcp.f32 %v6304_v10 }
0x106e   :  { %7984 = vrcp.f32 %v6306_v51 }
0x1075   :  { %v7979_v12 = vpop.eup %7978 }
0x1076   :  { %v7981_v34 = vpop.eup %7980 }
0x1077   :  { %v7983_v10 = vpop.eup %7982 }
0x1099   :  { %v6229_v14 = vpop.f32.mrb[164].mxu0  ;;  %v6270_v18 = vpop.f32.mrb[164].mxu1 }
0x109a   :  { %v6281_v5 = vadd.f32 %v6229_v14, %v13919_v47  ;;  %v6283_v63 = vadd.f32 %v6270_v18, %v13920_v56  ;;  %v6231_v46 = vpop.f32.mrb[165].mxu0  ;;  %v6272_v6 = vpop.f32.mrb[165].mxu1  ;;  %v6323_v47 = vmul.f32 %v7981_v34, %v11319_v16  ;;  %v13924_v34 = vld [vmem:[#allocation72_spill] sm:$0xff] }
0x109b   :  { %v6282_v33 = vadd.f32 %v6231_v46, %v13921_v57  ;;  %v6284_v49 = vadd.f32 %v6272_v6, %v13922_v13  ;;  %v6233_v55 = vpop.f32.mrb[166].mxu0  ;;  %v6274_v1 = vpop.f32.mrb[166].mxu1 }
0x109c   :  { %v7547_v39 = vmul.f32 -1.442695, %v6281_v5  ;;  %7986 = vtanh.f32 %v6283_v63  ;;  %v6234_v59 = vpop.f32.mrb[167].mxu0  ;;  %v6275_v9 = vpop.f32.mrb[167].mxu1 }
0x109d   :  { %v7548_v48 = vmul.f32 -1.442695, %v6282_v33  ;;  %7988 = vtanh.f32 %v6284_v49  ;;  %v7985_v14 = vpop.eup %7984 }
0x109e   :  { %7990 = vpow2.f32 %v7547_v39  ;;  %v6324_v6 = vmul.f32 %v7985_v14, %v11321_v2  ;;  %v13926_v14 = vld [vmem:[#allocation74_spill] sm:$0xff] }
0x109f   :  { %7992 = vpow2.f32 %v7548_v48 }
0x10a6   :  { %v7987_v18 = vpop.eup %7986 }
0x10a7   :  { %v7989_v51 = vpop.eup %7988  ;;  %v6325_v56 = vmul.f32 %v7987_v18, %v7979_v12  ;;  %v13923_v12 = vld [vmem:[#allocation71_spill] sm:$0xff] }
0x10a8   :  { %v7991_v46 = vpop.eup %7990  ;;  %v6326_v5 = vmul.f32 %v7989_v51, %v7983_v10  ;;  %v13925_v10 = vld [vmem:[#allocation73_spill] sm:$0xff]  ;;  %v13927_v18 = vld [vmem:[#allocation75_spill] sm:$0xff]  ;;  %v13928_v51 = vld [vmem:[#allocation76_spill] sm:$0xff] }
0x10a9   :  { %v7993_v63 = vpop.eup %7992  ;;  %v6307_v57 = vadd.f32 1.0, %v7991_v46  ;;  %v11473_v13 = vadd.f32 %v6325_v56, %v6323_v47  ;;  %v13929_v47 = vld [vmem:[#allocation77_spill] sm:$0xff]  ;;  %v13930_v56 = vld [vmem:[#allocation78_spill] sm:$0xff]  ;;  %v13931_v46 = vld [vmem:[#allocation79_spill] sm:$0xff] }
0x10aa   :  { %v6308_v33 = vadd.f32 1.0, %v7993_v63  ;;  %v11475_v49 = vadd.f32 %v6326_v5, %v6324_v6  ;;  %v13932_v6 = vld [vmem:[#allocation163_spill] sm:$0xff]  ;;  %v13933_v5 = vld [vmem:[#allocation164_spill] sm:$0xff]  ;;  %v13934_v63 = vld [vmem:[#allocation165_spill] sm:$0xff] }
0x10ab   :  { %7994 = vrcp.f32 %v6307_v57  ;;  %v13935_v57 = vld [vmem:[#allocation166_spill] sm:$0xff] }
0x10ac   :  { %7996 = vtanh.f32 %v11473_v13 }
0x10ad   :  { %7998 = vrcp.f32 %v6308_v33  ;;  %v13936_v33 = vld [vmem:[#allocation191_spill] sm:$0xff] }
0x10ae   :  { %8000 = vtanh.f32 %v11475_v49 }
0x10b5   :  { %v7995_v55 = vpop.eup %7994 }
0x10b6   :  { %v7997_v16 = vpop.eup %7996 }
0x10b7   :  { %v7999_v1 = vpop.eup %7998  ;;  %v6331_v59 = vmul.f32 %v7997_v16, %v7995_v55  ;;  %v13937_v55 = vld [vmem:[#allocation192_spill] sm:$0xff]  ;;  %v13938_v16 = vld [vmem:[#allocation193_spill] sm:$0xff] }
0x10b8   :  { %v8001_v39 = vpop.eup %8000 }
0x10b9   :  { %v6332_v2 = vmul.f32 %v8001_v39, %v7999_v1  ;;  %v11479_v48 = vpack.c.bf16 %v6331_v59, %v6331_v59  ;;  %v13939_v1 = vld [vmem:[#allocation194_spill] sm:$0xff]  ;;  %v13940_v39 = vld [vmem:[#allocation121_spill] sm:$0xff] }
0x10ba   :  { %v13941_v59 = vld [vmem:[#allocation122_spill] sm:$0xff] }
0x10bb   :  { %v6342_v9 = vpack.c.bf16 %v6332_v2, %v6332_v2  ;;  %v13942_v2 = vld [vmem:[#allocation123_spill] sm:$0xff] }
0x10bd   :  { %6375 = vmatprep.mubr.bf16.mxu0 %v6342_v9  ;;  %6416 = vmatprep.mubr.bf16.mxu1 %v6342_v9 }
0x10be   :  { %6376 = vmatmul.mubr.bf16.vlgmr.msra.gmra.mrb[168].mxu0 %v11479_v48  ;;  %6417 = vmatmul.mubr.bf16.vlgmr.msra.gmra.mrb[168].mxu1 %v11479_v48 }
0x10bf   :  { %6426 = vmatpush1.bf16.msra.mxu0 %v13517_v26  ;;  %6467 = vmatpush1.bf16.msra.mxu1 %v13518_v20 }
0x10c0   :  { %6457 = vmatprep.mubr.bf16.mxu0 %v6342_v9  ;;  %6498 = vmatprep.mubr.bf16.mxu1 %v6342_v9  ;;  %v13943_v9 = vld [vmem:[#allocation124_spill] sm:$0xff] }
0x10c1   :  { %6427 = vmatprep.subr.bf16.mxu0 %v13519_v45  ;;  %6468 = vmatprep.subr.bf16.mxu1 %v13520_v54 }
0x10c3   :  { %6428 = vmatpush1.bf16.msra.mxu0 %v13521_v53  ;;  %6469 = vmatpush1.bf16.msra.mxu1 %v13522_v50 }
0x10c4   :  { %6429 = vmatprep.subr.bf16.mxu0 %v13523_v27  ;;  %6470 = vmatprep.subr.bf16.mxu1 %v13524_v15 }
0x10c7   :  { %6430 = vmatpush1.bf16.msra.mxu0 %v13525_v4  ;;  %6471 = vmatpush1.bf16.msra.mxu1 %v13526_v11 }
0x10c8   :  { %6431 = vmatprep.subr.bf16.mxu0 %v13527_v41  ;;  %6472 = vmatprep.subr.bf16.mxu1 %v13528_v24 }
0x10cb   :  { %6432 = vmatpush1.bf16.msra.mxu0 %v13529_v31  ;;  %6473 = vmatpush1.bf16.msra.mxu1 %v13530_v40 }
0x10cc   :  { %6433 = vmatprep.subr.bf16.mxu0 %v13531_v44  ;;  %6474 = vmatprep.subr.bf16.mxu1 %v13532_v32 }
0x10cf   :  { %6434 = vmatpush1.bf16.msra.mxu0 %v13623_v52  ;;  %6475 = vmatpush1.bf16.msra.mxu1 %v13624_v30 }
0x10d0   :  { %6435 = vmatprep.subr.bf16.mxu0 %v13625_v22  ;;  %6476 = vmatprep.subr.bf16.mxu1 %v13626_v61 }
0x10d3   :  { %6436 = vmatpush1.bf16.msra.mxu0 %v13627_v7  ;;  %6477 = vmatpush1.bf16.msra.mxu1 %v13628_v21 }
0x10d4   :  { %6437 = vmatprep.subr.bf16.mxu0 %v13629_v35  ;;  %6478 = vmatprep.subr.bf16.mxu1 %v13630_v0 }
0x10d7   :  { %6438 = vmatpush1.bf16.msra.mxu0 %v13631_v58  ;;  %6479 = vmatpush1.bf16.msra.mxu1 %v13632_v29 }
0x10d8   :  { %6439 = vmatprep.subr.bf16.mxu0 %v13633_v37  ;;  %6480 = vmatprep.subr.bf16.mxu1 %v13634_v19 }
0x10db   :  { %6440 = vmatpush1.bf16.msra.mxu0 %v13635_v17  ;;  %6481 = vmatpush1.bf16.msra.mxu1 %v13723_v23 }
0x10dc   :  { %6441 = vmatprep.subr.bf16.mxu0 %v13724_v8  ;;  %6482 = vmatprep.subr.bf16.mxu1 %v13638_v28 }
0x10df   :  { %6442 = vmatpush1.bf16.msra.mxu0 %v13639_v3  ;;  %6483 = vmatpush1.bf16.msra.mxu1 %v13640_v25 }
0x10e0   :  { %6443 = vmatprep.subr.bf16.mxu0 %v13641_v43  ;;  %6484 = vmatprep.subr.bf16.mxu1 %v13642_v62 }
0x10e3   :  { %6444 = vmatpush1.bf16.msra.mxu0 %v13643_v42  ;;  %6485 = vmatpush1.bf16.msra.mxu1 %v13554_v38 }
0x10e4   :  { %6445 = vmatprep.subr.bf16.mxu0 %v13923_v12  ;;  %6486 = vmatprep.subr.bf16.mxu1 %v13924_v34 }
0x10e7   :  { %6446 = vmatpush1.bf16.msra.mxu0 %v13925_v10  ;;  %6487 = vmatpush1.bf16.msra.mxu1 %v13926_v14 }
0x10e8   :  { %6447 = vmatprep.subr.bf16.mxu0 %v13927_v18  ;;  %6488 = vmatprep.subr.bf16.mxu1 %v13928_v51 }
0x10eb   :  { %6448 = vmatpush1.bf16.msra.mxu0 %v13929_v47  ;;  %6489 = vmatpush1.bf16.msra.mxu1 %v13930_v56 }
0x10ec   :  { %6449 = vmatprep.subr.bf16.mxu0 %v13931_v46  ;;  %6490 = vmatprep.subr.bf16.mxu1 %v13932_v6  ;;  %v14016_v6 = vld [vmem:[#allocation161_spill] sm:$0xff] }
0x10ef   :  { %6450 = vmatpush1.bf16.msra.mxu0 %v13933_v5  ;;  %6491 = vmatpush1.bf16.msra.mxu1 %v13934_v63  ;;  %v13944_v5 = vld [vmem:[#allocation125_spill] sm:$0xff]  ;;  %v13945_v63 = vld [vmem:[#allocation126_spill] sm:$0xff] }
0x10f0   :  { %6451 = vmatprep.subr.bf16.mxu0 %v13935_v57  ;;  %6492 = vmatprep.subr.bf16.mxu1 %v13936_v33  ;;  %v13946_v57 = vld [vmem:[#allocation127_spill] sm:$0xff]  ;;  %v13947_v33 = vld [vmem:[#allocation90_spill] sm:$0xff] }
0x10f3   :  { %6452 = vmatpush1.bf16.msra.mxu0 %v13937_v55  ;;  %6493 = vmatpush1.bf16.msra.mxu1 %v13938_v16  ;;  %v13948_v55 = vld [vmem:[#allocation91_spill] sm:$0xff] }
0x10f4   :  { %6453 = vmatprep.subr.bf16.mxu0 %v13939_v1  ;;  %6494 = vmatprep.subr.bf16.mxu1 %v13940_v39  ;;  %v13949_v39 = vld [vmem:[#allocation92_spill] sm:$0xff]  ;;  %v13958_v1 = vld [vmem:[#allocation143_spill] sm:$0xff] }
0x10f7   :  { %6454 = vmatpush1.bf16.msra.mxu0 %v13941_v59  ;;  %6495 = vmatpush1.bf16.msra.mxu1 %v13942_v2  ;;  %v13950_v59 = vld [vmem:[#allocation93_spill] sm:$0xff]  ;;  %v13951_v2 = vld [vmem:[#allocation94_spill] sm:$0xff] }
0x10f8   :  { %6455 = vmatprep.subr.bf16.mxu0 %v13943_v9  ;;  %6496 = vmatprep.subr.bf16.mxu1 %v13944_v5  ;;  %v13952_v9 = vld [vmem:[#allocation95_spill] sm:$0xff]  ;;  %v13953_v5 = vld [vmem:[#allocation96_spill] sm:$0xff] }
0x10fb   :  { %6456 = vmatpush1.bf16.msra.mxu0 %v13945_v63  ;;  %6497 = vmatpush1.bf16.msra.mxu1 %v13946_v57  ;;  %v13954_v63 = vld [vmem:[#allocation97_spill] sm:$0xff] }
0x10fc   :  { %6573 = vmatprep.subr.bf16.mxu0 %v13947_v33  ;;  %6614 = vmatprep.subr.bf16.mxu1 %v13948_v55  ;;  %v13955_v57 = vld [vmem:[#allocation117_spill] sm:$0xff]  ;;  %v13956_v33 = vld [vmem:[#allocation118_spill] sm:$0xff]  ;;  %v13957_v55 = vld [vmem:[#allocation119_spill] sm:$0xff] }
0x10fe   :  { %6458 = vmatmul.mubr.bf16.vlgmr.msra.gmra.mrb[172].mxu0 %v11479_v48  ;;  %6499 = vmatmul.mubr.bf16.vlgmr.msra.gmra.mrb[172].mxu1 %v11479_v48  ;;  %v13959_v48 = vld [vmem:[#allocation144_spill] sm:$0xff] }
0x10ff   :  { %6574 = vmatpush1.bf16.msra.mxu0 %v13949_v39  ;;  %6615 = vmatpush1.bf16.msra.mxu1 %v13950_v59  ;;  %v13960_v39 = vld [vmem:[#allocation145_spill] sm:$0xff]  ;;  %v13961_v59 = vld [vmem:[#allocation146_spill] sm:$0xff] }
0x1100   :  { %6575 = vmatprep.subr.bf16.mxu0 %v13951_v2  ;;  %6616 = vmatprep.subr.bf16.mxu1 %v13952_v9  ;;  %v13962_v2 = vld [vmem:[#allocation171_spill] sm:$0xff]  ;;  %v13963_v9 = vld [vmem:[#allocation172_spill] sm:$0xff] }
0x1103   :  { %6576 = vmatpush1.bf16.msra.mxu0 %v13953_v5  ;;  %6617 = vmatpush1.bf16.msra.mxu1 %v13954_v63  ;;  %v13964_v5 = vld [vmem:[#allocation173_spill] sm:$0xff]  ;;  %v13965_v63 = vld [vmem:[#allocation174_spill] sm:$0xff] }
0x1104   :  { %6577 = vmatprep.subr.bf16.mxu0 %v13955_v57  ;;  %6618 = vmatprep.subr.bf16.mxu1 %v13956_v33  ;;  %v13966_v57 = vld [vmem:[#allocation98_spill] sm:$0xff]  ;;  %v13967_v33 = vld [vmem:[#allocation99_spill] sm:$0xff] }
0x1107   :  { %6578 = vmatpush1.bf16.msra.mxu0 %v13957_v55  ;;  %6619 = vmatpush1.bf16.msra.mxu1 %v13958_v1  ;;  %v13968_v55 = vld [vmem:[#allocation100_spill] sm:$0xff]  ;;  %v13969_v1 = vld [vmem:[#allocation101_spill] sm:$0xff] }
0x1108   :  { %6579 = vmatprep.subr.bf16.mxu0 %v13959_v48  ;;  %6620 = vmatprep.subr.bf16.mxu1 %v13960_v39  ;;  %v13970_v48 = vld [vmem:[#allocation102_spill] sm:$0xff]  ;;  %v13971_v39 = vld [vmem:[#allocation103_spill] sm:$0xff] }
0x110b   :  { %6580 = vmatpush1.bf16.msra.mxu0 %v13961_v59  ;;  %6621 = vmatpush1.bf16.msra.mxu1 %v13962_v2  ;;  %v13972_v59 = vld [vmem:[#allocation104_spill] sm:$0xff]  ;;  %v13973_v2 = vld [vmem:[#allocation111_spill] sm:$0xff] }
0x110c   :  { %6581 = vmatprep.subr.bf16.mxu0 %v13963_v9  ;;  %6622 = vmatprep.subr.bf16.mxu1 %v13964_v5  ;;  %v13974_v9 = vld [vmem:[#allocation112_spill] sm:$0xff]  ;;  %v13975_v5 = vld [vmem:[#allocation115_spill] sm:$0xff] }
0x110f   :  { %6582 = vmatpush1.bf16.msra.mxu0 %v13965_v63  ;;  %6623 = vmatpush1.bf16.msra.mxu1 %v13966_v57  ;;  %v13976_v63 = vld [vmem:[#allocation116_spill] sm:$0xff]  ;;  %v13977_v57 = vld [vmem:[#allocation147_spill] sm:$0xff] }
0x1110   :  { %6583 = vmatprep.subr.bf16.mxu0 %v13967_v33  ;;  %6624 = vmatprep.subr.bf16.mxu1 %v13968_v55  ;;  %v13978_v33 = vld [vmem:[#allocation148_spill] sm:$0xff]  ;;  %v13979_v55 = vld [vmem:[#allocation149_spill] sm:$0xff] }
0x1113   :  { %6584 = vmatpush1.bf16.msra.mxu0 %v13969_v1  ;;  %6625 = vmatpush1.bf16.msra.mxu1 %v13970_v48  ;;  %v13980_v1 = vld [vmem:[#allocation150_spill] sm:$0xff]  ;;  %v13981_v48 = vld [vmem:[#allocation151_spill] sm:$0xff] }
0x1114   :  { %6585 = vmatprep.subr.bf16.mxu0 %v13971_v39  ;;  %6626 = vmatprep.subr.bf16.mxu1 %v13972_v59  ;;  %v13982_v39 = vld [vmem:[#allocation152_spill] sm:$0xff]  ;;  %v13983_v59 = vld [vmem:[#allocation179_spill] sm:$0xff] }
0x1117   :  { %6586 = vmatpush1.bf16.msra.mxu0 %v13973_v2  ;;  %6627 = vmatpush1.bf16.msra.mxu1 %v13974_v9  ;;  %v13984_v2 = vld [vmem:[#allocation180_spill] sm:$0xff]  ;;  %v13985_v9 = vld [vmem:[#allocation182_spill] sm:$0xff] }
0x1118   :  { %6587 = vmatprep.subr.bf16.mxu0 %v13975_v5  ;;  %6628 = vmatprep.subr.bf16.mxu1 %v13976_v63  ;;  %v13986_v5 = vld [vmem:[#allocation155_spill] sm:$0xff]  ;;  %v13987_v63 = vld [vmem:[#allocation156_spill] sm:$0xff] }
0x111b   :  { %6588 = vmatpush1.bf16.msra.mxu0 %v13977_v57  ;;  %6629 = vmatpush1.bf16.msra.mxu1 %v13978_v33  ;;  %v13988_v57 = vld [vmem:[#allocation157_spill] sm:$0xff]  ;;  %v13989_v33 = vld [vmem:[#allocation159_spill] sm:$0xff] }
0x111c   :  { %6589 = vmatprep.subr.bf16.mxu0 %v13979_v55  ;;  %6630 = vmatprep.subr.bf16.mxu1 %v13980_v1  ;;  %v13990_v55 = vld [vmem:[#allocation160_spill] sm:$0xff]  ;;  %v13991_v1 = vld [vmem:[#allocation187_spill] sm:$0xff] }
0x111f   :  { %6590 = vmatpush1.bf16.msra.mxu0 %v13981_v48  ;;  %6631 = vmatpush1.bf16.msra.mxu1 %v13982_v39  ;;  %v13992_v48 = vld [vmem:[#allocation188_spill] sm:$0xff]  ;;  %v13993_v39 = vld [vmem:[#allocation190_spill] sm:$0xff] }
0x1120   :  { %6591 = vmatprep.subr.bf16.mxu0 %v13983_v59  ;;  %6632 = vmatprep.subr.bf16.mxu1 %v13984_v2  ;;  %v13994_v59 = vld [vmem:[#allocation14_spill] sm:$0xff]  ;;  %v13995_v2 = vld [vmem:[#allocation15_spill] sm:$0xff] }
0x1123   :  { %6592 = vmatpush1.bf16.msra.mxu0 %v13985_v9  ;;  %6633 = vmatpush1.bf16.msra.mxu1 %v13986_v5  ;;  %v13996_v9 = vld [vmem:[#allocation16_spill] sm:$0xff]  ;;  %v13997_v5 = vld [vmem:[#allocation17_spill] sm:$0xff] }
0x1124   :  { %6593 = vmatprep.subr.bf16.mxu0 %v13987_v63  ;;  %6634 = vmatprep.subr.bf16.mxu1 %v13988_v57  ;;  %v13998_v63 = vld [vmem:[#allocation18_spill] sm:$0xff]  ;;  %v13999_v57 = vld [vmem:[#allocation19_spill] sm:$0xff] }
0x1127   :  { %6594 = vmatpush1.bf16.msra.mxu0 %v13989_v33  ;;  %6635 = vmatpush1.bf16.msra.mxu1 %v13990_v55  ;;  %v14000_v33 = vld [vmem:[#allocation20_spill] sm:$0xff]  ;;  %v14001_v55 = vld [vmem:[#allocation21_spill] sm:$0xff] }
0x1128   :  { %6595 = vmatprep.subr.bf16.mxu0 %v13991_v1  ;;  %6636 = vmatprep.subr.bf16.mxu1 %v13992_v48  ;;  %v14002_v1 = vld [vmem:[#allocation22_spill] sm:$0xff]  ;;  %v14003_v48 = vld [vmem:[#allocation23_spill] sm:$0xff] }
0x112b   :  { %6596 = vmatpush1.bf16.msra.mxu0 %v13993_v39  ;;  %6637 = vmatpush1.bf16.msra.mxu1 %v13994_v59  ;;  %v14004_v39 = vld [vmem:[#allocation24_spill] sm:$0xff]  ;;  %v14005_v59 = vld [vmem:[#allocation25_spill] sm:$0xff] }
0x112c   :  { %6597 = vmatprep.subr.bf16.mxu0 %v13995_v2  ;;  %6638 = vmatprep.subr.bf16.mxu1 %v13996_v9  ;;  %v14006_v2 = vld [vmem:[#allocation26_spill] sm:$0xff]  ;;  %v14007_v9 = vld [vmem:[#allocation27_spill] sm:$0xff] }
0x112f   :  { %6598 = vmatpush1.bf16.msra.mxu0 %v13997_v5  ;;  %6639 = vmatpush1.bf16.msra.mxu1 %v13998_v63  ;;  %v14008_v5 = vld [vmem:[#allocation28_spill] sm:$0xff]  ;;  %v14009_v63 = vld [vmem:[#allocation29_spill] sm:$0xff] }
0x1130   :  { %6599 = vmatprep.subr.bf16.mxu0 %v13999_v57  ;;  %6640 = vmatprep.subr.bf16.mxu1 %v14000_v33  ;;  %v14010_v57 = vld [vmem:[#allocation30_spill] sm:$0xff]  ;;  %v14011_v33 = vld [vmem:[#allocation31_spill] sm:$0xff] }
0x1133   :  { %6600 = vmatpush1.bf16.msra.mxu0 %v14001_v55  ;;  %6641 = vmatpush1.bf16.msra.mxu1 %v14002_v1  ;;  %v14012_v55 = vld [vmem:[#allocation32_spill] sm:$0xff]  ;;  %v14013_v1 = vld [vmem:[#allocation202_spill] sm:$0xff] }
0x1134   :  { %6601 = vmatprep.subr.bf16.mxu0 %v14003_v48  ;;  %6642 = vmatprep.subr.bf16.mxu1 %v14004_v39  ;;  %v14014_v48 = vld [vmem:[#allocation186_spill] sm:$0xff]  ;;  %v14015_v39 = vld [vmem:[#allocation203_spill] sm:$0xff] }
0x1135   :  { %v4120_v16 = vadd.f32 %v14014_v48, %v14013_v1 }
0x1137   :  { %6602 = vmatpush1.bf16.msra.mxu0 %v14005_v59  ;;  %6643 = vmatpush1.bf16.msra.mxu1 %v14006_v2  ;;  %v4193_v59 = vadd.f32 %v14016_v6, %v14015_v39  ;;  %v14017_v2 = vld [vmem:[#allocation162_spill] sm:$0xff] }
0x1138   :  { %6603 = vmatprep.subr.bf16.mxu0 %v14007_v9  ;;  %6644 = vmatprep.subr.bf16.mxu1 %v14008_v5  ;;  %v4122_v46 = vadd.f32 %v14017_v2, %v10834_v36  ;;  %v14018_v9 = vld [vmem:[#allocation189_spill] sm:$0xff] }
0x1139   :  { %v4195_v5 = vadd.f32 %v14018_v9, %v10839_v60 }
0x113b   :  { %6604 = vmatpush1.bf16.msra.mxu0 %v14009_v63  ;;  %6645 = vmatpush1.bf16.msra.mxu1 %v14010_v57 }
0x113c   :  { %6655 = vmatprep.subr.bf16.mxu0 %v14011_v33  ;;  %6696 = vmatprep.subr.bf16.mxu1 %v14012_v55 }
0x1191   :  { %v6377_v56 = vpop.f32.mrb[168].mxu0  ;;  %v6418_v63 = vpop.f32.mrb[168].mxu1 }
0x1192   :  { %v6507_v47 = vadd.f32 %v6377_v56, %v4120_v16  ;;  %v6509_v57 = vadd.f32 %v6418_v63, %v4193_v59  ;;  %v6379_v51 = vpop.f32.mrb[169].mxu0  ;;  %v6420_v33 = vpop.f32.mrb[169].mxu1 }
0x1193   :  { %v6508_v18 = vadd.f32 %v6379_v51, %v4122_v46  ;;  %v6510_v55 = vadd.f32 %v6420_v33, %v4195_v5  ;;  %v6381_v14 = vpop.f32.mrb[170].mxu0  ;;  %v6422_v10 = vpop.f32.mrb[170].mxu1  ;;  %v14020_v5 = vld [vmem:[#allocation88_spill] sm:$0xff] }
0x1194   :  { %v6382_v48 = vpop.f32.mrb[171].mxu0  ;;  %v6423_v1 = vpop.f32.mrb[171].mxu1  ;;  %v7549_v34 = vmul.f32 -1.442695, %v6507_v47  ;;  %v7551_v6 = vmul.f32 -1.442695, %v6509_v57 }
0x1195   :  { %v7550_v39 = vmul.f32 -1.442695, %v6508_v18  ;;  %v7552_v12 = vmul.f32 -1.442695, %v6510_v55  ;;  %v14019_v47 = vld [vmem:[#allocation86_spill] sm:$0xff]  ;;  %v14022_v1 = vld [vmem:[#allocation168_spill] sm:$0xff] }
0x1196   :  { %8002 = vpow2.f32 %v7549_v34 }
0x1197   :  { %8004 = vpow2.f32 %v7551_v6 }
0x1198   :  { %8006 = vpow2.f32 %v7550_v39 }
0x1199   :  { %8008 = vpow2.f32 %v7552_v12  ;;  %v14021_v12 = vld [vmem:[#allocation167_spill] sm:$0xff] }
0x11a0   :  { %v8003_v2 = vpop.eup %8002 }
0x11a1   :  { %v8005_v9 = vpop.eup %8004  ;;  %v6533_v16 = vadd.f32 1.0, %v8003_v2 }
0x11a2   :  { %v8007_v56 = vpop.eup %8006  ;;  %v6535_v59 = vadd.f32 1.0, %v8005_v9 }
0x11a3   :  { %v8009_v63 = vpop.eup %8008  ;;  %v6534_v51 = vadd.f32 1.0, %v8007_v56  ;;  %8010 = vrcp.f32 %v6533_v16 }
0x11a4   :  { %v6536_v46 = vadd.f32 1.0, %v8009_v63  ;;  %8012 = vrcp.f32 %v6535_v59 }
0x11a5   :  { %8014 = vrcp.f32 %v6534_v51 }
0x11a6   :  { %8016 = vrcp.f32 %v6536_v46 }
0x11ad   :  { %v8011_v16 = vpop.eup %8010 }
0x11ae   :  { %v8013_v59 = vpop.eup %8012 }
0x11af   :  { %v8015_v51 = vpop.eup %8014 }
0x11d1   :  { %v6459_v10 = vpop.f32.mrb[172].mxu0  ;;  %v6500_v14 = vpop.f32.mrb[172].mxu1 }
0x11d2   :  { %v6511_v18 = vadd.f32 %v6459_v10, %v14019_v47  ;;  %v6513_v34 = vadd.f32 %v6500_v14, %v14020_v5  ;;  %v6461_v57 = vpop.f32.mrb[173].mxu0  ;;  %v6502_v33 = vpop.f32.mrb[173].mxu1  ;;  %v6553_v47 = vmul.f32 %v8013_v59, %v11473_v13  ;;  %v14024_v59 = vld [vmem:[#allocation72_spill] sm:$0xff] }
0x11d3   :  { %v6512_v55 = vadd.f32 %v6461_v57, %v14021_v12  ;;  %v6514_v39 = vadd.f32 %v6502_v33, %v14022_v1  ;;  %v6463_v48 = vpop.f32.mrb[174].mxu0  ;;  %v6504_v6 = vpop.f32.mrb[174].mxu1 }
0x11d4   :  { %v7553_v2 = vmul.f32 -1.442695, %v6511_v18  ;;  %8018 = vtanh.f32 %v6513_v34  ;;  %v6464_v9 = vpop.f32.mrb[175].mxu0  ;;  %v6505_v56 = vpop.f32.mrb[175].mxu1 }
0x11d5   :  { %v7554_v63 = vmul.f32 -1.442695, %v6512_v55  ;;  %8020 = vtanh.f32 %v6514_v39  ;;  %v8017_v10 = vpop.eup %8016 }
0x11d6   :  { %8022 = vpow2.f32 %v7553_v2  ;;  %v6554_v33 = vmul.f32 %v8017_v10, %v11475_v49  ;;  %v14026_v10 = vld [vmem:[#allocation74_spill] sm:$0xff] }
0x11d7   :  { %8024 = vpow2.f32 %v7554_v63 }
0x11de   :  { %v8019_v14 = vpop.eup %8018 }
0x11df   :  { %v8021_v46 = vpop.eup %8020  ;;  %v6555_v5 = vmul.f32 %v8019_v14, %v8011_v16  ;;  %v14023_v16 = vld [vmem:[#allocation71_spill] sm:$0xff] }
0x11e0   :  { %v8023_v57 = vpop.eup %8022  ;;  %v6556_v18 = vmul.f32 %v8021_v46, %v8015_v51  ;;  %v14025_v51 = vld [vmem:[#allocation73_spill] sm:$0xff]  ;;  %v14027_v14 = vld [vmem:[#allocation75_spill] sm:$0xff]  ;;  %v14028_v46 = vld [vmem:[#allocation76_spill] sm:$0xff] }
0x11e1   :  { %v8025_v34 = vpop.eup %8024  ;;  %v6537_v12 = vadd.f32 1.0, %v8023_v57  ;;  %v11627_v1 = vadd.f32 %v6555_v5, %v6553_v47  ;;  %v14029_v47 = vld [vmem:[#allocation77_spill] sm:$0xff]  ;;  %v14030_v5 = vld [vmem:[#allocation78_spill] sm:$0xff]  ;;  %v14031_v57 = vld [vmem:[#allocation79_spill] sm:$0xff] }
0x11e2   :  { %v6538_v55 = vadd.f32 1.0, %v8025_v34  ;;  %v11629_v39 = vadd.f32 %v6556_v18, %v6554_v33  ;;  %v14032_v33 = vld [vmem:[#allocation163_spill] sm:$0xff]  ;;  %v14033_v18 = vld [vmem:[#allocation164_spill] sm:$0xff]  ;;  %v14034_v34 = vld [vmem:[#allocation165_spill] sm:$0xff] }
0x11e3   :  { %8026 = vrcp.f32 %v6537_v12  ;;  %v14035_v12 = vld [vmem:[#allocation166_spill] sm:$0xff] }
0x11e4   :  { %8028 = vtanh.f32 %v11627_v1 }
0x11e5   :  { %8030 = vrcp.f32 %v6538_v55  ;;  %v14036_v55 = vld [vmem:[#allocation191_spill] sm:$0xff] }
0x11e6   :  { %8032 = vtanh.f32 %v11629_v39 }
0x11ed   :  { %v8027_v48 = vpop.eup %8026 }
0x11ee   :  { %v8029_v13 = vpop.eup %8028 }
0x11ef   :  { %v8031_v6 = vpop.eup %8030  ;;  %v6561_v9 = vmul.f32 %v8029_v13, %v8027_v48  ;;  %v14037_v48 = vld [vmem:[#allocation192_spill] sm:$0xff]  ;;  %v14038_v13 = vld [vmem:[#allocation193_spill] sm:$0xff] }
0x11f0   :  { %v8033_v2 = vpop.eup %8032 }
0x11f1   :  { %v6562_v49 = vmul.f32 %v8033_v2, %v8031_v6  ;;  %v11633_v63 = vpack.c.bf16 %v6561_v9, %v6561_v9  ;;  %v14039_v6 = vld [vmem:[#allocation194_spill] sm:$0xff]  ;;  %v14040_v2 = vld [vmem:[#allocation121_spill] sm:$0xff] }
0x11f2   :  { %v14041_v9 = vld [vmem:[#allocation122_spill] sm:$0xff] }
0x11f3   :  { %v6572_v56 = vpack.c.bf16 %v6562_v49, %v6562_v49  ;;  %v14042_v49 = vld [vmem:[#allocation123_spill] sm:$0xff] }
0x11f5   :  { %6605 = vmatprep.mubr.bf16.mxu0 %v6572_v56  ;;  %6646 = vmatprep.mubr.bf16.mxu1 %v6572_v56 }
0x11f6   :  { %6606 = vmatmul.mubr.bf16.vlgmr.msra.gmra.mrb[176].mxu0 %v11633_v63  ;;  %6647 = vmatmul.mubr.bf16.vlgmr.msra.gmra.mrb[176].mxu1 %v11633_v63 }
0x11f7   :  { %6656 = vmatpush1.bf16.msra.mxu0 %v13517_v26  ;;  %6697 = vmatpush1.bf16.msra.mxu1 %v13518_v20 }
0x11f8   :  { %6687 = vmatprep.mubr.bf16.mxu0 %v6572_v56  ;;  %6728 = vmatprep.mubr.bf16.mxu1 %v6572_v56  ;;  %v14043_v56 = vld [vmem:[#allocation124_spill] sm:$0xff] }
0x11f9   :  { %6657 = vmatprep.subr.bf16.mxu0 %v13519_v45  ;;  %6698 = vmatprep.subr.bf16.mxu1 %v13520_v54 }
0x11fb   :  { %6658 = vmatpush1.bf16.msra.mxu0 %v13521_v53  ;;  %6699 = vmatpush1.bf16.msra.mxu1 %v13522_v50 }
0x11fc   :  { %6659 = vmatprep.subr.bf16.mxu0 %v13523_v27  ;;  %6700 = vmatprep.subr.bf16.mxu1 %v13524_v15 }
0x11ff   :  { %6660 = vmatpush1.bf16.msra.mxu0 %v13525_v4  ;;  %6701 = vmatpush1.bf16.msra.mxu1 %v13526_v11 }
0x1200   :  { %6661 = vmatprep.subr.bf16.mxu0 %v13527_v41  ;;  %6702 = vmatprep.subr.bf16.mxu1 %v13528_v24 }
0x1203   :  { %6662 = vmatpush1.bf16.msra.mxu0 %v13529_v31  ;;  %6703 = vmatpush1.bf16.msra.mxu1 %v13530_v40 }
0x1204   :  { %6663 = vmatprep.subr.bf16.mxu0 %v13531_v44  ;;  %6704 = vmatprep.subr.bf16.mxu1 %v13532_v32 }
0x1207   :  { %6664 = vmatpush1.bf16.msra.mxu0 %v13623_v52  ;;  %6705 = vmatpush1.bf16.msra.mxu1 %v13624_v30 }
0x1208   :  { %6665 = vmatprep.subr.bf16.mxu0 %v13625_v22  ;;  %6706 = vmatprep.subr.bf16.mxu1 %v13626_v61 }
0x120b   :  { %6666 = vmatpush1.bf16.msra.mxu0 %v13627_v7  ;;  %6707 = vmatpush1.bf16.msra.mxu1 %v13628_v21 }
0x120c   :  { %6667 = vmatprep.subr.bf16.mxu0 %v13629_v35  ;;  %6708 = vmatprep.subr.bf16.mxu1 %v13630_v0 }
0x120f   :  { %6668 = vmatpush1.bf16.msra.mxu0 %v13631_v58  ;;  %6709 = vmatpush1.bf16.msra.mxu1 %v13632_v29 }
0x1210   :  { %6669 = vmatprep.subr.bf16.mxu0 %v13633_v37  ;;  %6710 = vmatprep.subr.bf16.mxu1 %v13634_v19 }
0x1213   :  { %6670 = vmatpush1.bf16.msra.mxu0 %v13635_v17  ;;  %6711 = vmatpush1.bf16.msra.mxu1 %v13723_v23 }
0x1214   :  { %6671 = vmatprep.subr.bf16.mxu0 %v13724_v8  ;;  %6712 = vmatprep.subr.bf16.mxu1 %v13638_v28 }
0x1217   :  { %6672 = vmatpush1.bf16.msra.mxu0 %v13639_v3  ;;  %6713 = vmatpush1.bf16.msra.mxu1 %v13640_v25 }
0x1218   :  { %6673 = vmatprep.subr.bf16.mxu0 %v13641_v43  ;;  %6714 = vmatprep.subr.bf16.mxu1 %v13642_v62 }
0x121b   :  { %6674 = vmatpush1.bf16.msra.mxu0 %v13643_v42  ;;  %6715 = vmatpush1.bf16.msra.mxu1 %v13554_v38 }
0x121c   :  { %6675 = vmatprep.subr.bf16.mxu0 %v14023_v16  ;;  %6716 = vmatprep.subr.bf16.mxu1 %v14024_v59 }
0x121f   :  { %6676 = vmatpush1.bf16.msra.mxu0 %v14025_v51  ;;  %6717 = vmatpush1.bf16.msra.mxu1 %v14026_v10 }
0x1220   :  { %6677 = vmatprep.subr.bf16.mxu0 %v14027_v14  ;;  %6718 = vmatprep.subr.bf16.mxu1 %v14028_v46 }
0x1223   :  { %6678 = vmatpush1.bf16.msra.mxu0 %v14029_v47  ;;  %6719 = vmatpush1.bf16.msra.mxu1 %v14030_v5 }
0x1224   :  { %6679 = vmatprep.subr.bf16.mxu0 %v14031_v57  ;;  %6720 = vmatprep.subr.bf16.mxu1 %v14032_v33  ;;  %v14116_v33 = vld [vmem:[#allocation129_spill] sm:$0xff] }
0x1227   :  { %6680 = vmatpush1.bf16.msra.mxu0 %v14033_v18  ;;  %6721 = vmatpush1.bf16.msra.mxu1 %v14034_v34  ;;  %v14044_v18 = vld [vmem:[#allocation125_spill] sm:$0xff]  ;;  %v14045_v34 = vld [vmem:[#allocation126_spill] sm:$0xff] }
0x1228   :  { %6681 = vmatprep.subr.bf16.mxu0 %v14035_v12  ;;  %6722 = vmatprep.subr.bf16.mxu1 %v14036_v55  ;;  %v14046_v12 = vld [vmem:[#allocation127_spill] sm:$0xff]  ;;  %v14047_v55 = vld [vmem:[#allocation90_spill] sm:$0xff] }
0x122b   :  { %6682 = vmatpush1.bf16.msra.mxu0 %v14037_v48  ;;  %6723 = vmatpush1.bf16.msra.mxu1 %v14038_v13  ;;  %v14048_v48 = vld [vmem:[#allocation91_spill] sm:$0xff] }
0x122c   :  { %6683 = vmatprep.subr.bf16.mxu0 %v14039_v6  ;;  %6724 = vmatprep.subr.bf16.mxu1 %v14040_v2  ;;  %v14049_v2 = vld [vmem:[#allocation92_spill] sm:$0xff]  ;;  %v14058_v6 = vld [vmem:[#allocation143_spill] sm:$0xff] }
0x122f   :  { %6684 = vmatpush1.bf16.msra.mxu0 %v14041_v9  ;;  %6725 = vmatpush1.bf16.msra.mxu1 %v14042_v49  ;;  %v14050_v9 = vld [vmem:[#allocation93_spill] sm:$0xff]  ;;  %v14051_v49 = vld [vmem:[#allocation94_spill] sm:$0xff] }
0x1230   :  { %6685 = vmatprep.subr.bf16.mxu0 %v14043_v56  ;;  %6726 = vmatprep.subr.bf16.mxu1 %v14044_v18  ;;  %v14052_v56 = vld [vmem:[#allocation95_spill] sm:$0xff]  ;;  %v14053_v18 = vld [vmem:[#allocation96_spill] sm:$0xff] }
0x1233   :  { %6686 = vmatpush1.bf16.msra.mxu0 %v14045_v34  ;;  %6727 = vmatpush1.bf16.msra.mxu1 %v14046_v12  ;;  %v14054_v34 = vld [vmem:[#allocation97_spill] sm:$0xff] }
0x1234   :  { %6803 = vmatprep.subr.bf16.mxu0 %v14047_v55  ;;  %6844 = vmatprep.subr.bf16.mxu1 %v14048_v48  ;;  %v14055_v12 = vld [vmem:[#allocation117_spill] sm:$0xff]  ;;  %v14056_v55 = vld [vmem:[#allocation118_spill] sm:$0xff]  ;;  %v14057_v48 = vld [vmem:[#allocation119_spill] sm:$0xff] }
0x1236   :  { %6688 = vmatmul.mubr.bf16.vlgmr.msra.gmra.mrb[180].mxu0 %v11633_v63  ;;  %6729 = vmatmul.mubr.bf16.vlgmr.msra.gmra.mrb[180].mxu1 %v11633_v63  ;;  %v14059_v63 = vld [vmem:[#allocation144_spill] sm:$0xff] }
0x1237   :  { %6804 = vmatpush1.bf16.msra.mxu0 %v14049_v2  ;;  %6845 = vmatpush1.bf16.msra.mxu1 %v14050_v9  ;;  %v14060_v2 = vld [vmem:[#allocation145_spill] sm:$0xff]  ;;  %v14061_v9 = vld [vmem:[#allocation146_spill] sm:$0xff] }
0x1238   :  { %6805 = vmatprep.subr.bf16.mxu0 %v14051_v49  ;;  %6846 = vmatprep.subr.bf16.mxu1 %v14052_v56  ;;  %v14062_v49 = vld [vmem:[#allocation171_spill] sm:$0xff]  ;;  %v14063_v56 = vld [vmem:[#allocation172_spill] sm:$0xff] }
0x123b   :  { %6806 = vmatpush1.bf16.msra.mxu0 %v14053_v18  ;;  %6847 = vmatpush1.bf16.msra.mxu1 %v14054_v34  ;;  %v14064_v18 = vld [vmem:[#allocation173_spill] sm:$0xff]  ;;  %v14065_v34 = vld [vmem:[#allocation174_spill] sm:$0xff] }
0x123c   :  { %6807 = vmatprep.subr.bf16.mxu0 %v14055_v12  ;;  %6848 = vmatprep.subr.bf16.mxu1 %v14056_v55  ;;  %v14066_v12 = vld [vmem:[#allocation98_spill] sm:$0xff]  ;;  %v14067_v55 = vld [vmem:[#allocation99_spill] sm:$0xff] }
0x123f   :  { %6808 = vmatpush1.bf16.msra.mxu0 %v14057_v48  ;;  %6849 = vmatpush1.bf16.msra.mxu1 %v14058_v6  ;;  %v14068_v48 = vld [vmem:[#allocation100_spill] sm:$0xff]  ;;  %v14069_v6 = vld [vmem:[#allocation101_spill] sm:$0xff] }
0x1240   :  { %6809 = vmatprep.subr.bf16.mxu0 %v14059_v63  ;;  %6850 = vmatprep.subr.bf16.mxu1 %v14060_v2  ;;  %v14070_v63 = vld [vmem:[#allocation102_spill] sm:$0xff]  ;;  %v14071_v2 = vld [vmem:[#allocation103_spill] sm:$0xff] }
0x1243   :  { %6810 = vmatpush1.bf16.msra.mxu0 %v14061_v9  ;;  %6851 = vmatpush1.bf16.msra.mxu1 %v14062_v49  ;;  %v14072_v9 = vld [vmem:[#allocation104_spill] sm:$0xff]  ;;  %v14073_v49 = vld [vmem:[#allocation111_spill] sm:$0xff] }
0x1244   :  { %6811 = vmatprep.subr.bf16.mxu0 %v14063_v56  ;;  %6852 = vmatprep.subr.bf16.mxu1 %v14064_v18  ;;  %v14074_v56 = vld [vmem:[#allocation112_spill] sm:$0xff]  ;;  %v14075_v18 = vld [vmem:[#allocation115_spill] sm:$0xff] }
0x1247   :  { %6812 = vmatpush1.bf16.msra.mxu0 %v14065_v34  ;;  %6853 = vmatpush1.bf16.msra.mxu1 %v14066_v12  ;;  %v14076_v34 = vld [vmem:[#allocation116_spill] sm:$0xff]  ;;  %v14077_v12 = vld [vmem:[#allocation147_spill] sm:$0xff] }
0x1248   :  { %6813 = vmatprep.subr.bf16.mxu0 %v14067_v55  ;;  %6854 = vmatprep.subr.bf16.mxu1 %v14068_v48  ;;  %v14078_v55 = vld [vmem:[#allocation148_spill] sm:$0xff]  ;;  %v14079_v48 = vld [vmem:[#allocation149_spill] sm:$0xff] }
0x124b   :  { %6814 = vmatpush1.bf16.msra.mxu0 %v14069_v6  ;;  %6855 = vmatpush1.bf16.msra.mxu1 %v14070_v63  ;;  %v14080_v6 = vld [vmem:[#allocation150_spill] sm:$0xff]  ;;  %v14081_v63 = vld [vmem:[#allocation151_spill] sm:$0xff] }
0x124c   :  { %6815 = vmatprep.subr.bf16.mxu0 %v14071_v2  ;;  %6856 = vmatprep.subr.bf16.mxu1 %v14072_v9  ;;  %v14082_v2 = vld [vmem:[#allocation152_spill] sm:$0xff]  ;;  %v14083_v9 = vld [vmem:[#allocation179_spill] sm:$0xff] }
0x124f   :  { %6816 = vmatpush1.bf16.msra.mxu0 %v14073_v49  ;;  %6857 = vmatpush1.bf16.msra.mxu1 %v14074_v56  ;;  %v14084_v49 = vld [vmem:[#allocation180_spill] sm:$0xff]  ;;  %v14085_v56 = vld [vmem:[#allocation182_spill] sm:$0xff] }
0x1250   :  { %6817 = vmatprep.subr.bf16.mxu0 %v14075_v18  ;;  %6858 = vmatprep.subr.bf16.mxu1 %v14076_v34  ;;  %v14086_v18 = vld [vmem:[#allocation155_spill] sm:$0xff]  ;;  %v14087_v34 = vld [vmem:[#allocation156_spill] sm:$0xff] }
0x1253   :  { %6818 = vmatpush1.bf16.msra.mxu0 %v14077_v12  ;;  %6859 = vmatpush1.bf16.msra.mxu1 %v14078_v55  ;;  %v14088_v12 = vld [vmem:[#allocation157_spill] sm:$0xff]  ;;  %v14089_v55 = vld [vmem:[#allocation159_spill] sm:$0xff] }
0x1254   :  { %6819 = vmatprep.subr.bf16.mxu0 %v14079_v48  ;;  %6860 = vmatprep.subr.bf16.mxu1 %v14080_v6  ;;  %v14090_v48 = vld [vmem:[#allocation160_spill] sm:$0xff]  ;;  %v14091_v6 = vld [vmem:[#allocation187_spill] sm:$0xff] }
0x1257   :  { %6820 = vmatpush1.bf16.msra.mxu0 %v14081_v63  ;;  %6861 = vmatpush1.bf16.msra.mxu1 %v14082_v2  ;;  %v14092_v63 = vld [vmem:[#allocation188_spill] sm:$0xff]  ;;  %v14093_v2 = vld [vmem:[#allocation190_spill] sm:$0xff] }
0x1258   :  { %6821 = vmatprep.subr.bf16.mxu0 %v14083_v9  ;;  %6862 = vmatprep.subr.bf16.mxu1 %v14084_v49  ;;  %v14094_v9 = vld [vmem:[#allocation14_spill] sm:$0xff]  ;;  %v14095_v49 = vld [vmem:[#allocation15_spill] sm:$0xff] }
0x125b   :  { %6822 = vmatpush1.bf16.msra.mxu0 %v14085_v56  ;;  %6863 = vmatpush1.bf16.msra.mxu1 %v14086_v18  ;;  %v14096_v56 = vld [vmem:[#allocation16_spill] sm:$0xff]  ;;  %v14097_v18 = vld [vmem:[#allocation17_spill] sm:$0xff] }
0x125c   :  { %6823 = vmatprep.subr.bf16.mxu0 %v14087_v34  ;;  %6864 = vmatprep.subr.bf16.mxu1 %v14088_v12  ;;  %v14098_v34 = vld [vmem:[#allocation18_spill] sm:$0xff]  ;;  %v14099_v12 = vld [vmem:[#allocation19_spill] sm:$0xff] }
0x125f   :  { %6824 = vmatpush1.bf16.msra.mxu0 %v14089_v55  ;;  %6865 = vmatpush1.bf16.msra.mxu1 %v14090_v48  ;;  %v14100_v55 = vld [vmem:[#allocation20_spill] sm:$0xff]  ;;  %v14101_v48 = vld [vmem:[#allocation21_spill] sm:$0xff] }
0x1260   :  { %6825 = vmatprep.subr.bf16.mxu0 %v14091_v6  ;;  %6866 = vmatprep.subr.bf16.mxu1 %v14092_v63  ;;  %v14102_v6 = vld [vmem:[#allocation22_spill] sm:$0xff]  ;;  %v14103_v63 = vld [vmem:[#allocation23_spill] sm:$0xff] }
0x1263   :  { %6826 = vmatpush1.bf16.msra.mxu0 %v14093_v2  ;;  %6867 = vmatpush1.bf16.msra.mxu1 %v14094_v9  ;;  %v14104_v2 = vld [vmem:[#allocation24_spill] sm:$0xff]  ;;  %v14105_v9 = vld [vmem:[#allocation25_spill] sm:$0xff] }
0x1264   :  { %6827 = vmatprep.subr.bf16.mxu0 %v14095_v49  ;;  %6868 = vmatprep.subr.bf16.mxu1 %v14096_v56  ;;  %v14106_v49 = vld [vmem:[#allocation26_spill] sm:$0xff]  ;;  %v14107_v56 = vld [vmem:[#allocation27_spill] sm:$0xff] }
0x1267   :  { %6828 = vmatpush1.bf16.msra.mxu0 %v14097_v18  ;;  %6869 = vmatpush1.bf16.msra.mxu1 %v14098_v34  ;;  %v14108_v18 = vld [vmem:[#allocation28_spill] sm:$0xff]  ;;  %v14109_v34 = vld [vmem:[#allocation29_spill] sm:$0xff] }
0x1268   :  { %6829 = vmatprep.subr.bf16.mxu0 %v14099_v12  ;;  %6870 = vmatprep.subr.bf16.mxu1 %v14100_v55  ;;  %v14110_v12 = vld [vmem:[#allocation30_spill] sm:$0xff]  ;;  %v14111_v55 = vld [vmem:[#allocation31_spill] sm:$0xff] }
0x126b   :  { %6830 = vmatpush1.bf16.msra.mxu0 %v14101_v48  ;;  %6871 = vmatpush1.bf16.msra.mxu1 %v14102_v6  ;;  %v14112_v48 = vld [vmem:[#allocation32_spill] sm:$0xff]  ;;  %v14113_v6 = vld [vmem:[#allocation202_spill] sm:$0xff] }
0x126c   :  { %6831 = vmatprep.subr.bf16.mxu0 %v14103_v63  ;;  %6872 = vmatprep.subr.bf16.mxu1 %v14104_v2  ;;  %v14114_v63 = vld [vmem:[#allocation128_spill] sm:$0xff]  ;;  %v14115_v2 = vld [vmem:[#allocation203_spill] sm:$0xff] }
0x126d   :  { %v4126_v13 = vadd.f32 %v14114_v63, %v14113_v6 }
0x126f   :  { %6832 = vmatpush1.bf16.msra.mxu0 %v14105_v9  ;;  %6873 = vmatpush1.bf16.msra.mxu1 %v14106_v49  ;;  %v4199_v9 = vadd.f32 %v14116_v33, %v14115_v2  ;;  %v14117_v49 = vld [vmem:[#allocation130_spill] sm:$0xff] }
0x1270   :  { %6833 = vmatprep.subr.bf16.mxu0 %v14107_v56  ;;  %6874 = vmatprep.subr.bf16.mxu1 %v14108_v18  ;;  %v4128_v57 = vadd.f32 %v14117_v49, %v10834_v36  ;;  %v14118_v56 = vld [vmem:[#allocation131_spill] sm:$0xff] }
0x1271   :  { %v4201_v18 = vadd.f32 %v14118_v56, %v10839_v60 }
0x1273   :  { %6834 = vmatpush1.bf16.msra.mxu0 %v14109_v34  ;;  %6875 = vmatpush1.bf16.msra.mxu1 %v14110_v12 }
0x1274   :  { %6885 = vmatprep.subr.bf16.mxu0 %v14111_v55  ;;  %6926 = vmatprep.subr.bf16.mxu1 %v14112_v48 }
0x12c9   :  { %v6607_v5 = vpop.f32.mrb[176].mxu0  ;;  %v6648_v34 = vpop.f32.mrb[176].mxu1 }
0x12ca   :  { %v6737_v47 = vadd.f32 %v6607_v5, %v4126_v13  ;;  %v6739_v12 = vadd.f32 %v6648_v34, %v4199_v9  ;;  %v6609_v46 = vpop.f32.mrb[177].mxu0  ;;  %v6650_v55 = vpop.f32.mrb[177].mxu1 }
0x12cb   :  { %v6738_v14 = vadd.f32 %v6609_v46, %v4128_v57  ;;  %v6740_v48 = vadd.f32 %v6650_v55, %v4201_v18  ;;  %v6611_v10 = vpop.f32.mrb[178].mxu0  ;;  %v6652_v51 = vpop.f32.mrb[178].mxu1  ;;  %v14122_v55 = vld [vmem:[#allocation196_spill] sm:$0xff] }
0x12cc   :  { %v6612_v63 = vpop.f32.mrb[179].mxu0  ;;  %v6653_v6 = vpop.f32.mrb[179].mxu1  ;;  %v7555_v59 = vmul.f32 -1.442695, %v6737_v47  ;;  %v7557_v33 = vmul.f32 -1.442695, %v6739_v12 }
0x12cd   :  { %v7556_v2 = vmul.f32 -1.442695, %v6738_v14  ;;  %v7558_v16 = vmul.f32 -1.442695, %v6740_v48  ;;  %v14119_v47 = vld [vmem:[#allocation169_spill] sm:$0xff]  ;;  %v14120_v6 = vld [vmem:[#allocation170_spill] sm:$0xff] }
0x12ce   :  { %8034 = vpow2.f32 %v7555_v59 }
0x12cf   :  { %8036 = vpow2.f32 %v7557_v33 }
0x12d0   :  { %8038 = vpow2.f32 %v7556_v2 }
0x12d1   :  { %8040 = vpow2.f32 %v7558_v16  ;;  %v14121_v16 = vld [vmem:[#allocation195_spill] sm:$0xff] }
0x12d8   :  { %v8035_v49 = vpop.eup %8034 }
0x12d9   :  { %v8037_v56 = vpop.eup %8036  ;;  %v6763_v9 = vadd.f32 1.0, %v8035_v49 }
0x12da   :  { %v8039_v5 = vpop.eup %8038  ;;  %v6765_v34 = vadd.f32 1.0, %v8037_v56 }
0x12db   :  { %v8041_v13 = vpop.eup %8040  ;;  %v6764_v46 = vadd.f32 1.0, %v8039_v5  ;;  %8042 = vrcp.f32 %v6763_v9 }
0x12dc   :  { %v6766_v57 = vadd.f32 1.0, %v8041_v13  ;;  %8044 = vrcp.f32 %v6765_v34 }
0x12dd   :  { %8046 = vrcp.f32 %v6764_v46 }
0x12de   :  { %8048 = vrcp.f32 %v6766_v57 }
0x12e5   :  { %v8043_v9 = vpop.eup %8042 }
0x12e6   :  { %v8045_v34 = vpop.eup %8044 }
0x12e7   :  { %v8047_v46 = vpop.eup %8046 }
0x1309   :  { %v6689_v51 = vpop.f32.mrb[180].mxu0  ;;  %v6730_v10 = vpop.f32.mrb[180].mxu1 }
0x130a   :  { %v6741_v14 = vadd.f32 %v6689_v51, %v14119_v47  ;;  %v6743_v59 = vadd.f32 %v6730_v10, %v14120_v6  ;;  %v6691_v18 = vpop.f32.mrb[181].mxu0  ;;  %v6732_v2 = vpop.f32.mrb[181].mxu1  ;;  %v6783_v47 = vmul.f32 %v8045_v34, %v11627_v1 }
0x130b   :  { %v6742_v12 = vadd.f32 %v6691_v18, %v14121_v16  ;;  %v6744_v48 = vadd.f32 %v6732_v2, %v14122_v55  ;;  %v6693_v63 = vpop.f32.mrb[182].mxu0  ;;  %v6734_v33 = vpop.f32.mrb[182].mxu1 }
0x130c   :  { %v7559_v49 = vmul.f32 -1.442695, %v6741_v14  ;;  %8050 = vtanh.f32 %v6743_v59  ;;  %v6694_v56 = vpop.f32.mrb[183].mxu0  ;;  %v6735_v5 = vpop.f32.mrb[183].mxu1 }
0x130d   :  { %v7560_v13 = vmul.f32 -1.442695, %v6742_v12  ;;  %8052 = vtanh.f32 %v6744_v48  ;;  %v8049_v51 = vpop.eup %8048 }
0x130e   :  { %8054 = vpow2.f32 %v7559_v49  ;;  %v6784_v2 = vmul.f32 %v8049_v51, %v11629_v39 }
0x130f   :  { %8056 = vpow2.f32 %v7560_v13 }
0x1316   :  { %v8051_v10 = vpop.eup %8050 }
0x1317   :  { %v8053_v57 = vpop.eup %8052  ;;  %v6785_v6 = vmul.f32 %v8051_v10, %v8043_v9 }
0x1318   :  { %v8055_v18 = vpop.eup %8054  ;;  %v6786_v14 = vmul.f32 %v8053_v57, %v8047_v46 }
0x1319   :  { %v8057_v59 = vpop.eup %8056  ;;  %v6767_v16 = vadd.f32 1.0, %v8055_v18  ;;  %v11781_v55 = vadd.f32 %v6785_v6, %v6783_v47 }
0x131a   :  { %v6768_v12 = vadd.f32 1.0, %v8057_v59  ;;  %v11783_v48 = vadd.f32 %v6786_v14, %v6784_v2 }
0x131b   :  { %8058 = vrcp.f32 %v6767_v16 }
0x131c   :  { %8060 = vtanh.f32 %v11781_v55 }
0x131d   :  { %8062 = vrcp.f32 %v6768_v12 }
0x131e   :  { %8064 = vtanh.f32 %v11783_v48 }
0x1325   :  { %v8059_v63 = vpop.eup %8058 }
0x1326   :  { %v8061_v1 = vpop.eup %8060 }
0x1327   :  { %v8063_v33 = vpop.eup %8062  ;;  %v6791_v56 = vmul.f32 %v8061_v1, %v8059_v63 }
0x1328   :  { %v8065_v49 = vpop.eup %8064 }
0x1329   :  { %v6792_v39 = vmul.f32 %v8065_v49, %v8063_v33  ;;  %v11787_v13 = vpack.c.bf16 %v6791_v56, %v6791_v56 }
0x132b   :  { %v6802_v5 = vpack.c.bf16 %v6792_v39, %v6792_v39 }
0x132d   :  { %6835 = vmatprep.mubr.bf16.mxu0 %v6802_v5  ;;  %6876 = vmatprep.mubr.bf16.mxu1 %v6802_v5 }
0x132e   :  { %6836 = vmatmul.mubr.bf16.vlgmr.msra.gmra.mrb[184].mxu0 %v11787_v13  ;;  %6877 = vmatmul.mubr.bf16.vlgmr.msra.gmra.mrb[184].mxu1 %v11787_v13 }
0x132f   :  { %6886 = vmatpush1.bf16.msra.mxu0 %v13517_v26  ;;  %6927 = vmatpush1.bf16.msra.mxu1 %v13518_v20  ;;  %v14123_v26 = vld [vmem:[#allocation71_spill] sm:$0xff]  ;;  %v14124_v20 = vld [vmem:[#allocation72_spill] sm:$0xff] }
0x1330   :  { %6917 = vmatprep.mubr.bf16.mxu0 %v6802_v5  ;;  %6958 = vmatprep.mubr.bf16.mxu1 %v6802_v5  ;;  %v14153_v5 = vld [vmem:[#allocation197_spill] sm:$0xff] }
0x1331   :  { %6887 = vmatprep.subr.bf16.mxu0 %v13519_v45  ;;  %6928 = vmatprep.subr.bf16.mxu1 %v13520_v54  ;;  %v14125_v45 = vld [vmem:[#allocation73_spill] sm:$0xff]  ;;  %v14126_v54 = vld [vmem:[#allocation74_spill] sm:$0xff] }
0x1333   :  { %6888 = vmatpush1.bf16.msra.mxu0 %v13521_v53  ;;  %6929 = vmatpush1.bf16.msra.mxu1 %v13522_v50  ;;  %v14127_v53 = vld [vmem:[#allocation75_spill] sm:$0xff]  ;;  %v14128_v50 = vld [vmem:[#allocation76_spill] sm:$0xff] }
0x1334   :  { %6889 = vmatprep.subr.bf16.mxu0 %v13523_v27  ;;  %6930 = vmatprep.subr.bf16.mxu1 %v13524_v15  ;;  %v14129_v27 = vld [vmem:[#allocation77_spill] sm:$0xff]  ;;  %v14130_v15 = vld [vmem:[#allocation78_spill] sm:$0xff] }
0x1337   :  { %6890 = vmatpush1.bf16.msra.mxu0 %v13525_v4  ;;  %6931 = vmatpush1.bf16.msra.mxu1 %v13526_v11  ;;  %v14131_v4 = vld [vmem:[#allocation79_spill] sm:$0xff] }
0x1338   :  { %6891 = vmatprep.subr.bf16.mxu0 %v13527_v41  ;;  %6932 = vmatprep.subr.bf16.mxu1 %v13528_v24  ;;  %v14132_v11 = vld [vmem:[#allocation163_spill] sm:$0xff]  ;;  %v14133_v41 = vld [vmem:[#allocation164_spill] sm:$0xff]  ;;  %v14134_v24 = vld [vmem:[#allocation165_spill] sm:$0xff] }
0x133b   :  { %6892 = vmatpush1.bf16.msra.mxu0 %v13529_v31  ;;  %6933 = vmatpush1.bf16.msra.mxu1 %v13530_v40  ;;  %v14135_v31 = vld [vmem:[#allocation166_spill] sm:$0xff]  ;;  %v14136_v40 = vld [vmem:[#allocation191_spill] sm:$0xff] }
0x133c   :  { %6893 = vmatprep.subr.bf16.mxu0 %v13531_v44  ;;  %6934 = vmatprep.subr.bf16.mxu1 %v13532_v32  ;;  %v14137_v44 = vld [vmem:[#allocation192_spill] sm:$0xff]  ;;  %v14138_v32 = vld [vmem:[#allocation193_spill] sm:$0xff] }
0x133f   :  { %6894 = vmatpush1.bf16.msra.mxu0 %v13623_v52  ;;  %6935 = vmatpush1.bf16.msra.mxu1 %v13624_v30  ;;  %v14140_v52 = vld [vmem:[#allocation121_spill] sm:$0xff]  ;;  %v14141_v30 = vld [vmem:[#allocation122_spill] sm:$0xff] }
0x1340   :  { %6895 = vmatprep.subr.bf16.mxu0 %v13625_v22  ;;  %6936 = vmatprep.subr.bf16.mxu1 %v13626_v61  ;;  %v14142_v22 = vld [vmem:[#allocation123_spill] sm:$0xff]  ;;  %v14143_v61 = vld [vmem:[#allocation124_spill] sm:$0xff] }
0x1343   :  { %6896 = vmatpush1.bf16.msra.mxu0 %v13627_v7  ;;  %6937 = vmatpush1.bf16.msra.mxu1 %v13628_v21  ;;  %v14144_v7 = vld [vmem:[#allocation125_spill] sm:$0xff]  ;;  %v14145_v21 = vld [vmem:[#allocation126_spill] sm:$0xff] }
0x1344   :  { %6897 = vmatprep.subr.bf16.mxu0 %v13629_v35  ;;  %6938 = vmatprep.subr.bf16.mxu1 %v13630_v0  ;;  %v14146_v35 = vld [vmem:[#allocation127_spill] sm:$0xff]  ;;  %v14147_v0 = vld [vmem:[#allocation202_spill] sm:$0xff] }
0x1347   :  { %6898 = vmatpush1.bf16.msra.mxu0 %v13631_v58  ;;  %6939 = vmatpush1.bf16.msra.mxu1 %v13632_v29  ;;  %v14148_v58 = vld [vmem:[#allocation132_spill] sm:$0xff] }
0x1348   :  { %6899 = vmatprep.subr.bf16.mxu0 %v13633_v37  ;;  %6940 = vmatprep.subr.bf16.mxu1 %v13634_v19  ;;  %v4130_v29 = vadd.f32 %v14148_v58, %v14147_v0  ;;  %v14149_v37 = vld [vmem:[#allocation203_spill] sm:$0xff]  ;;  %v14150_v19 = vld [vmem:[#allocation133_spill] sm:$0xff] }
0x134b   :  { %6900 = vmatpush1.bf16.msra.mxu0 %v13635_v17  ;;  %6941 = vmatpush1.bf16.msra.mxu1 %v13723_v23  ;;  %v4203_v17 = vadd.f32 %v14150_v19, %v14149_v37 }
0x134c   :  { %6901 = vmatprep.subr.bf16.mxu0 %v13724_v8  ;;  %6942 = vmatprep.subr.bf16.mxu1 %v13638_v28  ;;  %v14151_v28 = vld [vmem:[#allocation134_spill] sm:$0xff] }
0x134f   :  { %6902 = vmatpush1.bf16.msra.mxu0 %v13639_v3  ;;  %6943 = vmatpush1.bf16.msra.mxu1 %v13640_v25  ;;  %v4132_v3 = vadd.f32 %v14151_v28, %v10834_v36  ;;  %v14152_v25 = vld [vmem:[#allocation135_spill] sm:$0xff] }
0x1350   :  { %6903 = vmatprep.subr.bf16.mxu0 %v13641_v43  ;;  %6944 = vmatprep.subr.bf16.mxu1 %v13642_v62  ;;  %v4205_v43 = vadd.f32 %v14152_v25, %v10839_v60 }
0x1353   :  { %6904 = vmatpush1.bf16.msra.mxu0 %v13643_v42  ;;  %6945 = vmatpush1.bf16.msra.mxu1 %v13554_v38  ;;  %v14139_v38 = vld [vmem:[#allocation194_spill] sm:$0xff] }
0x1354   :  { %6905 = vmatprep.subr.bf16.mxu0 %v14123_v26  ;;  %6946 = vmatprep.subr.bf16.mxu1 %v14124_v20  ;;  %v14154_v26 = vld [vmem:[#allocation198_spill] sm:$0xff] }
0x1357   :  { %6906 = vmatpush1.bf16.msra.mxu0 %v14125_v45  ;;  %6947 = vmatpush1.bf16.msra.mxu1 %v14126_v54 }
0x1358   :  { %6907 = vmatprep.subr.bf16.mxu0 %v14127_v53  ;;  %6948 = vmatprep.subr.bf16.mxu1 %v14128_v50  ;;  %v14155_v53 = vld [vmem:[#allocation142_spill] sm:$0xff] }
0x135b   :  { %6908 = vmatpush1.bf16.msra.mxu0 %v14129_v27  ;;  %6949 = vmatpush1.bf16.msra.mxu1 %v14130_v15  ;;  %v14156_v27 = vld [vmem:[#allocation201_spill] sm:$0xff] }
0x135c   :  { %6909 = vmatprep.subr.bf16.mxu0 %v14131_v4  ;;  %6950 = vmatprep.subr.bf16.mxu1 %v14132_v11 }
0x135f   :  { %6910 = vmatpush1.bf16.msra.mxu0 %v14133_v41  ;;  %6951 = vmatpush1.bf16.msra.mxu1 %v14134_v24 }
0x1360   :  { %6911 = vmatprep.subr.bf16.mxu0 %v14135_v31  ;;  %6952 = vmatprep.subr.bf16.mxu1 %v14136_v40 }
0x1363   :  { %6912 = vmatpush1.bf16.msra.mxu0 %v14137_v44  ;;  %6953 = vmatpush1.bf16.msra.mxu1 %v14138_v32 }
0x1364   :  { %6913 = vmatprep.subr.bf16.mxu0 %v14139_v38  ;;  %6954 = vmatprep.subr.bf16.mxu1 %v14140_v52 }
0x1367   :  { %6914 = vmatpush1.bf16.msra.mxu0 %v14141_v30  ;;  %6955 = vmatpush1.bf16.msra.mxu1 %v14142_v22 }
0x1368   :  { %6915 = vmatprep.subr.bf16.mxu0 %v14143_v61  ;;  %6956 = vmatprep.subr.bf16.mxu1 %v14144_v7 }
0x136b   :  { %6916 = vmatpush1.bf16.msra.mxu0 %v14145_v21  ;;  %6957 = vmatpush1.bf16.msra.mxu1 %v14146_v35 }
0x136e   :  { %6918 = vmatmul.mubr.bf16.vlgmr.msra.gmra.mrb[188].mxu0 %v11787_v13  ;;  %6959 = vmatmul.mubr.bf16.vlgmr.msra.gmra.mrb[188].mxu1 %v11787_v13 }
0x1401   :  { %v6837_v62 = vpop.f32.mrb[184].mxu0  ;;  %v6878_v42 = vpop.f32.mrb[184].mxu1 }
0x1402   :  { %v6967_v23 = vadd.f32 %v6837_v62, %v4130_v29  ;;  %v6969_v8 = vadd.f32 %v6878_v42, %v4203_v17  ;;  %v6839_v9 = vpop.f32.mrb[185].mxu0  ;;  %v6880_v34 = vpop.f32.mrb[185].mxu1 }
0x1403   :  { %v6968_v46 = vadd.f32 %v6839_v9, %v4132_v3  ;;  %v6970_v51 = vadd.f32 %v6880_v34, %v4205_v43  ;;  %v6841_v10 = vpop.f32.mrb[186].mxu0  ;;  %v6882_v57 = vpop.f32.mrb[186].mxu1 }
0x1404   :  { %v6842_v47 = vpop.f32.mrb[187].mxu0  ;;  %v6883_v6 = vpop.f32.mrb[187].mxu1  ;;  %v7561_v18 = vmul.f32 -1.442695, %v6967_v23  ;;  %v7563_v2 = vmul.f32 -1.442695, %v6969_v8 }
0x1405   :  { %v7562_v14 = vmul.f32 -1.442695, %v6968_v46  ;;  %v7564_v59 = vmul.f32 -1.442695, %v6970_v51 }
0x1406   :  { %8066 = vpow2.f32 %v7561_v18 }
0x1407   :  { %8068 = vpow2.f32 %v7563_v2 }
0x1408   :  { %8070 = vpow2.f32 %v7562_v14 }
0x1409   :  { %8072 = vpow2.f32 %v7564_v59 }
0x1410   :  { %v8067_v36 = vpop.eup %8066 }
0x1411   :  { %v8069_v60 = vpop.eup %8068  ;;  %v6993_v63 = vadd.f32 1.0, %v8067_v36 }
0x1412   :  { %v8071_v16 = vpop.eup %8070  ;;  %v6995_v1 = vadd.f32 1.0, %v8069_v60 }
0x1413   :  { %v8073_v12 = vpop.eup %8072  ;;  %v6994_v33 = vadd.f32 1.0, %v8071_v16  ;;  %8074 = vrcp.f32 %v6993_v63 }
0x1414   :  { %v6996_v49 = vadd.f32 1.0, %v8073_v12  ;;  %8076 = vrcp.f32 %v6995_v1 }
0x1415   :  { %8078 = vrcp.f32 %v6994_v33 }
0x1416   :  { %8080 = vrcp.f32 %v6996_v49 }
0x141d   :  { %v8075_v44 = vpop.eup %8074 }
0x141e   :  { %v8077_v32 = vpop.eup %8076 }
0x141f   :  { %v8079_v38 = vpop.eup %8078  ;;  %v7013_v61 = vmul.f32 %v8077_v32, %v11781_v55 }
0x1420   :  { %v8081_v52 = vpop.eup %8080 }
0x1421   :  { %v7014_v35 = vmul.f32 %v8081_v52, %v11783_v48 }
0x1441   :  { %v6919_v56 = vpop.f32.mrb[188].mxu0  ;;  %v6960_v39 = vpop.f32.mrb[188].mxu1 }
0x1442   :  { %v6971_v13 = vadd.f32 %v6919_v56, %v14153_v5  ;;  %v6973_v20 = vadd.f32 %v6960_v39, %v14154_v26  ;;  %v6921_v45 = vpop.f32.mrb[189].mxu0  ;;  %v6962_v54 = vpop.f32.mrb[189].mxu1 }
0x1443   :  { %v6972_v50 = vadd.f32 %v6921_v45, %v14155_v53  ;;  %v6974_v15 = vadd.f32 %v6962_v54, %v14156_v27  ;;  %v6923_v4 = vpop.f32.mrb[190].mxu0  ;;  %v6964_v11 = vpop.f32.mrb[190].mxu1 }
0x1444   :  { %v7565_v41 = vmul.f32 -1.442695, %v6971_v13  ;;  %8082 = vtanh.f32 %v6973_v20  ;;  %v6924_v24 = vpop.f32.mrb[191].mxu0  ;;  %v6965_v31 = vpop.f32.mrb[191].mxu1 }
0x1445   :  { %v7566_v40 = vmul.f32 -1.442695, %v6972_v50  ;;  %8084 = vtanh.f32 %v6974_v15 }
0x1446   :  { %8086 = vpow2.f32 %v7565_v41 }
0x1447   :  { %8088 = vpow2.f32 %v7566_v40 }
0x144e   :  { %v8083_v30 = vpop.eup %8082 }
0x144f   :  { %v8085_v22 = vpop.eup %8084  ;;  %v7015_v7 = vmul.f32 %v8083_v30, %v8075_v44 }
0x1450   :  { %v8087_v21 = vpop.eup %8086  ;;  %v7016_v0 = vmul.f32 %v8085_v22, %v8079_v38 }
0x1451   :  { %v8089_v58 = vpop.eup %8088  ;;  %v6997_v29 = vadd.f32 1.0, %v8087_v21  ;;  %v7017_v37 = vadd.f32 %v7015_v7, %v7013_v61 }
0x1452   :  { %v6998_v19 = vadd.f32 1.0, %v8089_v58  ;;  %v7018_v17 = vadd.f32 %v7016_v0, %v7014_v35 }
0x1453   :  { %8090 = vrcp.f32 %v6997_v29 }
0x1454   :  { %8092 = vtanh.f32 %v7017_v37 }
0x1455   :  { %8094 = vrcp.f32 %v6998_v19 }
0x1456   :  { %8096 = vtanh.f32 %v7018_v17 }
0x145d   :  { %v8091_v28 = vpop.eup %8090 }
0x145e   :  { %v8093_v3 = vpop.eup %8092 }
0x145f   :  { %v8095_v25 = vpop.eup %8094  ;;  %v7021_v55 = vmul.f32 %v8093_v3, %v8091_v28 }
0x1460   :  { %v8097_v43 = vpop.eup %8096 }
0x1461   :  { %v7022_v62 = vmul.f32 %v8097_v43, %v8095_v25  ;;  %7023 = vst [vmem:[#allocation10] sm:$0xff] %v7021_v55 }
0x1463   :  { %7024 = vst [vmem:[#allocation10 + $0x8] sm:$0xff] %v7022_v62 }
0x1464   :  { %8175 = shalt.err (!%p8172_p0)
}
0x1465   :  { %s8176_s11 = scalar_lea.hbm %s11888_s7, 256 }
0x1466   :  { %p8177_p1 = scmp.ne.s32.totalorder %s11888_s7, %s8176_s11  ;;  %p8180_p2 = scmp.lt.u32.totalorder %s8176_s11, %s11888_s7 }
0x1468   :  { %p8182_p3 = pnand %p8180_p2, %p8177_p1 }
0x146a   :  { %8185 = shalt.err (!%p8182_p3)
}
0x146b   :  { %7034 = dma.vmem_to_hbm [thread:$0]  %s7032_s30, 256, %s11888_s7, [#allocation6]  }
0x146c   :  { %8190 = dma.done.wait [#allocation6], 256  }
0x146d   :  { %8191 = vsyncadd [#allocation6], 4294967040 }
0x146e   :  { %7038 = vsyncpa [#allocation5], 1 }
0x146f   :  { %7039 = vsyncpa [#allocation8], 1 }
0x1470   :  { %7040 = vsyncpa [#allocation6], 1 }

</bundles_post_ra>
